<compile_context>
chip_gen: v6e
topology: v6e:2x2x1
jax: 0.10.0
libtpu: 0.0.40
codegen_flags: <defaults>
</compile_context>

<pallas_src>
import functools

import jax
import jax.numpy as jnp
import numpy as np
from jax.experimental import pallas as pl
from jax.experimental.pallas import tpu as pltpu

F_PAD = 8     # per-branch landmark feature dim (3 / 4) padded to 8 with zeros (no-op math)
N_PAD = 32    # per-branch landmark count (16 / 21 / 24) padded to 32 (sublane aligned)
NC_PAD = 128  # classifier logits padded to a full 128-lane group (lane-dense store)


# ----------------------------- Pallas kernels -----------------------------

def _cnn_mean_kernel(x_ref, w1_ref, b1_ref, w2_ref, b2_ref, lmask_ref, o_ref):
    """All-branch, all-frame 1x1 Conv(+folded BN)+ReLU -> Conv+ReLU -> masked landmark mean.

    x     : (T*B*N_PAD, 4*F_PAD)  block-diagonal branch layout along features
    w1    : (4*F_PAD, 4*64) block-diag     b1: (1, 4*64)
    w2    : (4*64, 4*C)     block-diag     b2: (1, 4*C)
    lmask : (N_PAD, 4*C)    = (n < N_branch) / N_branch   (row mask and 1/N folded together)
    o     : (T*B, 4*C)      per-frame pooled features, time-major rows (t*B + b)
    """
    h1 = jnp.dot(x_ref[...], w1_ref[...], preferred_element_type=jnp.float32) + b1_ref[...]
    h1 = jnp.maximum(h1, 0.0)
    # TODO(synk): nn.Dropout between the convs is identity in eval mode; not emitted.
    h2 = jnp.dot(h1, w2_ref[...], preferred_element_type=jnp.float32) + b2_ref[...]
    h2 = jnp.maximum(h2, 0.0)
    tb = o_ref.shape[0]
    npad, c4 = lmask_ref.shape
    h2 = h2.reshape(tb, npad, c4) * lmask_ref[...][None]
    o_ref[...] = jnp.sum(h2, axis=1)


def _bilstm_cls_kernel(x_ref, mask_ref,
                       wih_f_ref, whh_f_ref, b_f_ref,
                       wih_b_ref, whh_b_ref, b_b_ref,
                       w1f_ref, w1b_ref, b1_ref, w2_ref, b2_ref,
                       o_ref, *, T, B):
    """Fused 4-branch BiLSTM + masked mean pooling + classifier.

    x, mask : (T*B, 4H)   frame features / per-branch masks broadcast to 4H columns
    wih/whh : (4H, 16H)   block-diagonal over branches, gate-major column layout [i|f|g|o]
    b       : (1, 16H)
    w1f/w1b : (4H, 256)   classifier Linear split into fwd/bwd halves, b1: (1, 256)
    w2      : (256, NC_PAD), b2: (1, NC_PAD)
    o       : (B, NC_PAD) padded logits
    """
    h4 = x_ref.shape[-1]                         # 4 branches * H  (= 128)
    mask = mask_ref[...]
    xm = x_ref[...] * mask                       # x * mask before the LSTM

    # Input projection hoisted out of the recurrence: one matmul per direction.
    gx_f = jnp.dot(xm, wih_f_ref[...], preferred_element_type=jnp.float32) + b_f_ref[...]
    gx_b = jnp.dot(xm, wih_b_ref[...], preferred_element_type=jnp.float32) + b_b_ref[...]

    # Weights loaded once, reused across all timesteps.
    whh_f = whh_f_ref[...]
    whh_b = whh_b_ref[...]

    def upd(g, c):
        # gate-major layout: each gate occupies a full 128-lane block
        i = jax.nn.sigmoid(g[:, 0 * h4:1 * h4])
        f = jax.nn.sigmoid(g[:, 1 * h4:2 * h4])
        gg = jnp.tanh(g[:, 2 * h4:3 * h4])
        o = jax.nn.sigmoid(g[:, 3 * h4:4 * h4])
        c = f * c + i * gg
        return o * jnp.tanh(c), c

    z = jnp.zeros((B, h4), jnp.float32)
    h_f = c_f = acc_f = z
    h_b = c_b = acc_b = z
    msum = z

    # Fully unrolled; forward and backward recurrences interleaved in one loop.
    for s in range(T):
        tb = T - 1 - s
        m_f = mask[s * B:(s + 1) * B]
        m_b = mask[tb * B:(tb + 1) * B]
        g_f = gx_f[s * B:(s + 1) * B] + jnp.dot(h_f, whh_f, preferred_element_type=jnp.float32)
        g_b = gx_b[tb * B:(tb + 1) * B] + jnp.dot(h_b, whh_b, preferred_element_type=jnp.float32)
        h_f, c_f = upd(g_f, c_f)
        h_b, c_b = upd(g_b, c_b)
        acc_f = acc_f + h_f * m_f                # output * mask, summed over T
        acc_b = acc_b + h_b * m_b
        msum = msum + m_f

    inv = 1.0 / jnp.maximum(msum, 1.0)           # clamp(min=1)
    ff = acc_f * inv
    fb = acc_b * inv

    # TODO(synk): classifier nn.Dropout is identity in eval mode; not emitted.
    hc = (jnp.dot(ff, w1f_ref[...], preferred_element_type=jnp.float32)
          + jnp.dot(fb, w1b_ref[...], preferred_element_type=jnp.float32)
          + b1_ref[...])
    hc = jnp.maximum(hc, 0.0)
    o_ref[...] = jnp.dot(hc, w2_ref[...], preferred_element_type=jnp.float32) + b2_ref[...]


# ----------------------------- pallas_call wrappers -----------------------------

def _vmem_specs(n):
    return [pl.BlockSpec(memory_space=pltpu.MemorySpace.VMEM) for _ in range(n)]


def cnn_mean(x, kp, tb):
    c4 = kp["cnn_w2"].shape[1]
    return pl.pallas_call(
        _cnn_mean_kernel,
        out_shape=jax.ShapeDtypeStruct((tb, c4), jnp.float32),
        in_specs=_vmem_specs(6),
        out_specs=pl.BlockSpec(memory_space=pltpu.MemorySpace.VMEM),
    )(x, kp["cnn_w1"], kp["cnn_b1"], kp["cnn_w2"], kp["cnn_b2"], kp["lmask"])


def bilstm_classifier(frame, mask, kp, T, B):
    nc_pad = kp["cls_w2"].shape[1]
    kern = functools.partial(_bilstm_cls_kernel, T=T, B=B)
    return pl.pallas_call(
        kern,
        out_shape=jax.ShapeDtypeStruct((B, nc_pad), jnp.float32),
        in_specs=_vmem_specs(13),
        out_specs=pl.BlockSpec(memory_space=pltpu.MemorySpace.VMEM),
    )(frame, mask,
      kp["wih_f"], kp["whh_f"], kp["b_f"],
      kp["wih_b"], kp["whh_b"], kp["b_b"],
      kp["cls_w1f"], kp["cls_w1b"], kp["cls_b1"], kp["cls_w2"], kp["cls_b2"])


# ----------------------------- forward pass (glue + kernels) -----------------------------

def model_forward(kp, pose, face, lhand, rhand, pm, fm, lm, rm, *, num_classes):
    B, T = pm.shape
    c4 = kp["cnn_w2"].shape[1]
    nb = 4
    h = c4 // nb

    def prep(x):
        _, _, n, f = x.shape
        xp = jnp.pad(x, ((0, 0), (0, 0), (0, N_PAD - n), (0, F_PAD - f)))
        return jnp.transpose(xp, (1, 0, 2, 3))                     # (T, B, N_PAD, F_PAD)

    x_all = jnp.concatenate([prep(pose), prep(face), prep(lhand), prep(rhand)], axis=-1)
    x_all = x_all.reshape(T * B * N_PAD, nb * F_PAD)               # time-major rows

    m = jnp.stack([pm, fm, lm, rm], axis=-1).astype(jnp.float32)   # (B, T, 4)
    m = jnp.transpose(m, (1, 0, 2))                                # (T, B, 4)
    mask_all = jnp.repeat(m, h, axis=-1).reshape(T * B, c4)        # (T*B, 4H) branch-major

    frame = cnn_mean(x_all, kp, T * B)                             # (T*B, 4C), lane-dense
    logits_pad = bilstm_classifier(frame, mask_all, kp, T, B)      # (B, NC_PAD)
    return logits_pad[:, :num_classes]


# ----------------------------- parameter setup (glue) -----------------------------

def _normal(key, shape, scale=0.1):
    return scale * jax.random.normal(key, shape, dtype=jnp.float32)


def init_branch_params(key, in_dim, cnn_out, hidden):
    """Deterministic synthetic params; BN (eval mode) folded into the 1x1 convs."""
    ks = jax.random.split(key, 14)
    eps = 1e-5

    # Conv1d(in_dim -> 64, k=1) + BatchNorm1d(64)
    w1 = _normal(ks[0], (64, in_dim))
    bc1 = _normal(ks[1], (64,))
    g1 = 1.0 + _normal(ks[2], (64,), 0.05)
    be1 = _normal(ks[3], (64,), 0.05)
    mu1 = _normal(ks[4], (64,), 0.05)
    var1 = 1.0 + 0.1 * jax.nn.sigmoid(_normal(ks[5], (64,)))
    s1 = g1 / jnp.sqrt(var1 + eps)
    w1f = w1 * s1[:, None]
    b1f = (bc1 - mu1) * s1 + be1

    # Conv1d(64 -> cnn_out, k=1) + BatchNorm1d(cnn_out)
    w2 = _normal(ks[6], (cnn_out, 64))
    bc2 = _normal(ks[7], (cnn_out,))
    g2 = 1.0 + _normal(ks[8], (cnn_out,), 0.05)
    be2 = _normal(ks[9], (cnn_out,), 0.05)
    mu2 = _normal(ks[10], (cnn_out,), 0.05)
    var2 = 1.0 + 0.1 * jax.nn.sigmoid(_normal(ks[11], (cnn_out,)))
    s2 = g2 / jnp.sqrt(var2 + eps)
    w2f = w2 * s2[:, None]
    b2f = (bc2 - mu2) * s2 + be2

    # channels-last layouts; pad conv1 input rows with zeros to F_PAD
    w1_k = jnp.zeros((F_PAD, 64), jnp.float32).at[:in_dim].set(w1f.T)
    params = {
        "w1": w1_k, "b1": b1f.reshape(1, 64),
        "w2": w2f.T, "b2": b2f.reshape(1, cnn_out),
    }

    # Bidirectional LSTM (gate order i, f, g, o like PyTorch)
    def lstm_dir(k):
        kk = jax.random.split(k, 4)
        wih = _normal(kk[0], (4 * hidden, cnn_out))
        whh = _normal(kk[1], (4 * hidden, hidden))
        bih = _normal(kk[2], (4 * hidden,))
        bhh = _normal(kk[3], (4 * hidden,))
        return wih.T, whh.T, (bih + bhh).reshape(1, 4 * hidden)

    params["wih_f"], params["whh_f"], params["b_f"] = lstm_dir(ks[12])
    params["wih_b"], params["whh_b"], params["b_b"] = lstm_dir(ks[13])
    return params


def build_kernel_params(params, branch_names, n_landmarks, num_classes):
    """Fuse 4 branches into block-diagonal, gate-major kernel-layout weights (host-side)."""
    nb = len(branch_names)
    p0 = params[branch_names[0]]
    C = p0["w2"].shape[1]
    H = p0["whh_f"].shape[0]
    assert C == H, "fused layout assumes cnn_out == lstm_hidden"
    c4 = nb * C
    h4 = nb * H

    w1 = np.zeros((nb * F_PAD, nb * 64), np.float32)
    b1 = np.zeros((1, nb * 64), np.float32)
    w2 = np.zeros((nb * 64, c4), np.float32)
    b2 = np.zeros((1, c4), np.float32)
    lmask = np.zeros((N_PAD, c4), np.float32)
    for b, name in enumerate(branch_names):
        p = params[name]
        w1[b * F_PAD:(b + 1) * F_PAD, b * 64:(b + 1) * 64] = np.asarray(p["w1"])
        b1[0, b * 64:(b + 1) * 64] = np.asarray(p["b1"][0])
        w2[b * 64:(b + 1) * 64, b * C:(b + 1) * C] = np.asarray(p["w2"])
        b2[0, b * C:(b + 1) * C] = np.asarray(p["b2"][0])
        n = n_landmarks[name]
        lmask[:n, b * C:(b + 1) * C] = 1.0 / n

    def fuse_dir(sfx):
        wih = np.zeros((c4, 4 * h4), np.float32)
        whh = np.zeros((h4, 4 * h4), np.float32)
        bg = np.zeros((1, 4 * h4), np.float32)
        for b, name in enumerate(branch_names):
            p = params[name]
            wi = np.asarray(p["wih_" + sfx])      # (C, 4H), PyTorch gate order (i,f,g,o)
            wh = np.asarray(p["whh_" + sfx])      # (H, 4H)
            bb = np.asarray(p["b_" + sfx][0])     # (4H,)
            for g in range(4):
                cs = g * h4 + b * H               # gate-major columns, branch-major within
                wih[b * C:(b + 1) * C, cs:cs + H] = wi[:, g * H:(g + 1) * H]
                whh[b * H:(b + 1) * H, cs:cs + H] = wh[:, g * H:(g + 1) * H]
                bg[0, cs:cs + H] = bb[g * H:(g + 1) * H]
        return wih, whh, bg

    wih_f, whh_f, b_f = fuse_dir("f")
    wih_b, whh_b, b_b = fuse_dir("b")

    # Classifier: permute rows from PyTorch order [b0f b0b b1f b1b ...] to kernel order
    # [fwd(b0..b3) | bwd(b0..b3)], split into fwd/bwd halves, and pad logits to NC_PAD lanes.
    perm = np.zeros(2 * h4, dtype=np.int64)
    for b in range(nb):
        for j in range(H):
            perm[b * H + j] = b * 2 * H + j
            perm[h4 + b * H + j] = b * 2 * H + H + j
    w1c = np.asarray(params["cls"]["w1"])[perm, :]
    w2c = np.asarray(params["cls"]["w2"])
    w2p = np.zeros((w2c.shape[0], NC_PAD), np.float32)
    w2p[:, :num_classes] = w2c
    b2p = np.zeros((1, NC_PAD), np.float32)
    b2p[0, :num_classes] = np.asarray(params["cls"]["b2"][0])

    kp = {
        "cnn_w1": w1, "cnn_b1": b1, "cnn_w2": w2, "cnn_b2": b2, "lmask": lmask,
        "wih_f": wih_f, "whh_f": whh_f, "b_f": b_f,
        "wih_b": wih_b, "whh_b": whh_b, "b_b": b_b,
        "cls_w1f": w1c[:h4], "cls_w1b": w1c[h4:],
        "cls_b1": np.asarray(params["cls"]["b1"]),
        "cls_w2": w2p, "cls_b2": b2p,
    }
    return {k: jnp.asarray(v) for k, v in kp.items()}


# ----------------------------- pure-JAX reference (for sanity check) -----------------------------

def _ref_branch(p, x, mask):
    B, T, N, F = x.shape
    w1 = p["w1"][:F]
    h1 = jnp.maximum(jnp.einsum("btnf,fk->btnk", x, w1) + p["b1"][0], 0.0)
    h2 = jnp.maximum(jnp.einsum("btnk,kc->btnc", h1, p["w2"]) + p["b2"][0], 0.0)
    feat = jnp.mean(h2, axis=2)                                      # (B, T, C)
    m = mask[:, :, None].astype(jnp.float32)
    xm = feat * m
    H = p["whh_f"].shape[0]

    def run_dir(wih, whh, b, reverse):
        seq = xm[:, ::-1, :] if reverse else xm

        def step(carry, xt):
            h, c = carry
            gates = xt @ wih + h @ whh + b
            i = jax.nn.sigmoid(gates[:, :H])
            f = jax.nn.sigmoid(gates[:, H:2 * H])
            g = jnp.tanh(gates[:, 2 * H:3 * H])
            o = jax.nn.sigmoid(gates[:, 3 * H:])
            c = f * c + i * g
            h = o * jnp.tanh(c)
            return (h, c), h

        z = jnp.zeros((B, H), jnp.float32)
        _, hs = jax.lax.scan(step, (z, z), jnp.transpose(seq, (1, 0, 2)))
        hs = jnp.transpose(hs, (1, 0, 2))
        return hs[:, ::-1, :] if reverse else hs

    out = jnp.concatenate([run_dir(p["wih_f"], p["whh_f"], p["b_f"], False),
                           run_dir(p["wih_b"], p["whh_b"], p["b_b"], True)], axis=-1)
    out = out * m
    sm = jnp.maximum(jnp.sum(m, axis=1), 1.0)
    return jnp.sum(out, axis=1) / sm


def _ref_model(params, pose, face, lhand, rhand, pm, fm, lm, rm):
    feats = [
        _ref_branch(params["pose"], pose, pm),
        _ref_branch(params["face"], face, fm),
        _ref_branch(params["lhand"], lhand, lm),
        _ref_branch(params["rhand"], rhand, rm),
    ]
    combined = jnp.concatenate(feats, axis=1)
    c = params["cls"]
    h = jnp.maximum(combined @ c["w1"] + c["b1"], 0.0)
    return h @ c["w2"] + c["b2"]


# ----------------------------- main -----------------------------

if __name__ == "__main__":
    key = jax.random.PRNGKey(0)
    B, T = 2, 8
    pose_dim, face_dim, hand_dim = 4, 3, 3
    n_pose, n_face, n_hand = 16, 24, 21
    cnn_out, lstm_hidden, num_classes = 32, 32, 20

    k_par, k_in = jax.random.split(key)
    kb = jax.random.split(k_par, 5)
    params = {
        "pose": init_branch_params(kb[0], pose_dim, cnn_out, lstm_hidden),
        "face": init_branch_params(kb[1], face_dim, cnn_out, lstm_hidden),
        "lhand": init_branch_params(kb[2], hand_dim, cnn_out, lstm_hidden),
        "rhand": init_branch_params(kb[3], hand_dim, cnn_out, lstm_hidden),
    }
    combined_dim = 2 * lstm_hidden * 4
    kc = jax.random.split(kb[4], 4)
    params["cls"] = {
        "w1": _normal(kc[0], (combined_dim, 256)),
        "b1": _normal(kc[1], (256,)).reshape(1, 256),
        "w2": _normal(kc[2], (256, num_classes)),
        "b2": _normal(kc[3], (num_classes,)).reshape(1, num_classes),
    }

    n_landmarks = {"pose": n_pose, "face": n_face, "lhand": n_hand, "rhand": n_hand}
    kparams = build_kernel_params(params, ("pose", "face", "lhand", "rhand"),
                                  n_landmarks, num_classes)

    ki = jax.random.split(k_in, 8)
    pose = jax.random.normal(ki[0], (B, T, n_pose, pose_dim), jnp.float32)
    face = jax.random.normal(ki[1], (B, T, n_face, face_dim), jnp.float32)
    lhand = jax.random.normal(ki[2], (B, T, n_hand, hand_dim), jnp.float32)
    rhand = jax.random.normal(ki[3], (B, T, n_hand, hand_dim), jnp.float32)

    def mk_mask(k):
        m = (jax.random.uniform(k, (B, T)) > 0.3).astype(jnp.float32)
        return m.at[:, 0].set(1.0)

    pm, fm, lm, rm = (mk_mask(k) for k in ki[4:8])

    fwd = jax.jit(model_forward, static_argnames=("num_classes",))
    logits = fwd(kparams, pose, face, lhand, rhand, pm, fm, lm, rm, num_classes=num_classes)
    logits = jax.block_until_ready(logits)
    assert logits.shape == (B, num_classes)

    ref = _ref_model(params, pose, face, lhand, rhand, pm, fm, lm, rm)
    np.testing.assert_allclose(np.asarray(logits), np.asarray(ref), atol=5e-2, rtol=5e-2)

    print("KERNEL_OK")
</pallas_src>

<mosaic_0001>
module attributes {stable_mosaic.version = 11 : i64} {
  func.func @_cnn_mean_kernel(%arg0: memref<512x32xf32, #tpu.memory_space<vmem>>, %arg1: memref<32x256xf32, #tpu.memory_space<vmem>>, %arg2: memref<1x256xf32, #tpu.memory_space<vmem>>, %arg3: memref<256x128xf32, #tpu.memory_space<vmem>>, %arg4: memref<1x128xf32, #tpu.memory_space<vmem>>, %arg5: memref<32x128xf32, #tpu.memory_space<vmem>>, %arg6: memref<16x128xf32, #tpu.memory_space<vmem>>) attributes {dimension_semantics = [], scalar_prefetch = 0 : i64, scratch_operands = 0 : i64, tpu.core_type = #tpu.core_type<tc>} {
    %c0 = arith.constant 0 : index
    %c0_0 = arith.constant 0 : index
    %0 = vector.load %arg0[%c0, %c0_0] : memref<512x32xf32, #tpu.memory_space<vmem>>, vector<512x32xf32>
    %c0_1 = arith.constant 0 : index
    %c0_2 = arith.constant 0 : index
    %1 = vector.load %arg1[%c0_1, %c0_2] : memref<32x256xf32, #tpu.memory_space<vmem>>, vector<32x256xf32>
    %cst = arith.constant dense<0.000000e+00> : vector<512x256xf32>
    %2 = tpu.matmul %0, %1, %cst {dimension_numbers = #tpu.dot_dimension_numbers<[1], [0], [0], [1], [0, 0, 1, 1], [], []>} : vector<512x32xf32>, vector<32x256xf32>, vector<512x256xf32> -> vector<512x256xf32>
    %c0_3 = arith.constant 0 : index
    %c0_4 = arith.constant 0 : index
    %3 = vector.load %arg2[%c0_3, %c0_4] : memref<1x256xf32, #tpu.memory_space<vmem>>, vector<1x256xf32>
    %4 = vector.broadcast %3 : vector<1x256xf32> to vector<512x256xf32>
    %5 = arith.addf %2, %4 : vector<512x256xf32>
    %cst_5 = arith.constant 0.000000e+00 : f32
    %6 = vector.broadcast %cst_5 : f32 to vector<512x256xf32>
    %7 = arith.maximumf %5, %6 : vector<512x256xf32>
    %c0_6 = arith.constant 0 : index
    %c0_7 = arith.constant 0 : index
    %8 = vector.load %arg3[%c0_6, %c0_7] : memref<256x128xf32, #tpu.memory_space<vmem>>, vector<256x128xf32>
    %cst_8 = arith.constant dense<0.000000e+00> : vector<512x128xf32>
    %9 = tpu.matmul %7, %8, %cst_8 {dimension_numbers = #tpu.dot_dimension_numbers<[1], [0], [0], [1], [0, 0, 1, 1], [], []>} : vector<512x256xf32>, vector<256x128xf32>, vector<512x128xf32> -> vector<512x128xf32>
    %c0_9 = arith.constant 0 : index
    %c0_10 = arith.constant 0 : index
    %10 = vector.load %arg4[%c0_9, %c0_10] : memref<1x128xf32, #tpu.memory_space<vmem>>, vector<1x128xf32>
    %11 = vector.broadcast %10 : vector<1x128xf32> to vector<512x128xf32>
    %12 = arith.addf %9, %11 : vector<512x128xf32>
    %cst_11 = arith.constant 0.000000e+00 : f32
    %13 = vector.broadcast %cst_11 : f32 to vector<512x128xf32>
    %14 = arith.maximumf %12, %13 : vector<512x128xf32>
    %15 = vector.shape_cast %14 : vector<512x128xf32> to vector<16x32x128xf32>
    %c0_12 = arith.constant 0 : index
    %c0_13 = arith.constant 0 : index
    %16 = vector.load %arg5[%c0_12, %c0_13] : memref<32x128xf32, #tpu.memory_space<vmem>>, vector<32x128xf32>
    %17 = vector.shape_cast %16 : vector<32x128xf32> to vector<1x32x128xf32>
    %18 = vector.broadcast %17 : vector<1x32x128xf32> to vector<16x32x128xf32>
    %19 = arith.mulf %15, %18 : vector<16x32x128xf32>
    %cst_14 = arith.constant dense<0.000000e+00> : vector<16x128xf32>
    %20 = vector.multi_reduction <add>, %19, %cst_14 [1] : vector<16x32x128xf32> to vector<16x128xf32>
    %c0_15 = arith.constant 0 : index
    %c0_16 = arith.constant 0 : index
    %21 = vector.load %arg6[%c0_15, %c0_16] : memref<16x128xf32, #tpu.memory_space<vmem>>, vector<16x128xf32>
    tpu.vector_store %arg6[%c0_15, %c0_16], %20 {strides = array<i32>} : memref<16x128xf32, #tpu.memory_space<vmem>>, vector<16x128xf32>,
    return
  }
}

module attributes {stable_mosaic.version = 11 : i64} {
  func.func @_bilstm_cls_kernel(%arg0: memref<16x128xf32, #tpu.memory_space<vmem>>, %arg1: memref<16x128xf32, #tpu.memory_space<vmem>>, %arg2: memref<128x512xf32, #tpu.memory_space<vmem>>, %arg3: memref<128x512xf32, #tpu.memory_space<vmem>>, %arg4: memref<1x512xf32, #tpu.memory_space<vmem>>, %arg5: memref<128x512xf32, #tpu.memory_space<vmem>>, %arg6: memref<128x512xf32, #tpu.memory_space<vmem>>, %arg7: memref<1x512xf32, #tpu.memory_space<vmem>>, %arg8: memref<128x256xf32, #tpu.memory_space<vmem>>, %arg9: memref<128x256xf32, #tpu.memory_space<vmem>>, %arg10: memref<1x256xf32, #tpu.memory_space<vmem>>, %arg11: memref<256x128xf32, #tpu.memory_space<vmem>>, %arg12: memref<1x128xf32, #tpu.memory_space<vmem>>, %arg13: memref<2x128xf32, #tpu.memory_space<vmem>>) attributes {dimension_semantics = [], scalar_prefetch = 0 : i64, scratch_operands = 0 : i64, tpu.core_type = #tpu.core_type<tc>} {
    %c0 = arith.constant 0 : index
    %c0_0 = arith.constant 0 : index
    %0 = vector.load %arg1[%c0, %c0_0] : memref<16x128xf32, #tpu.memory_space<vmem>>, vector<16x128xf32>
    %c0_1 = arith.constant 0 : index
    %c0_2 = arith.constant 0 : index
    %1 = vector.load %arg0[%c0_1, %c0_2] : memref<16x128xf32, #tpu.memory_space<vmem>>, vector<16x128xf32>
    %2 = arith.mulf %1, %0 : vector<16x128xf32>
    %c0_3 = arith.constant 0 : index
    %c0_4 = arith.constant 0 : index
    %3 = vector.load %arg2[%c0_3, %c0_4] : memref<128x512xf32, #tpu.memory_space<vmem>>, vector<128x512xf32>
    %cst = arith.constant dense<0.000000e+00> : vector<16x512xf32>
    %4 = tpu.matmul %2, %3, %cst {dimension_numbers = #tpu.dot_dimension_numbers<[1], [0], [0], [1], [0, 0, 1, 1], [], []>} : vector<16x128xf32>, vector<128x512xf32>, vector<16x512xf32> -> vector<16x512xf32>
    %c0_5 = arith.constant 0 : index
    %c0_6 = arith.constant 0 : index
    %5 = vector.load %arg4[%c0_5, %c0_6] : memref<1x512xf32, #tpu.memory_space<vmem>>, vector<1x512xf32>
    %6 = vector.broadcast %5 : vector<1x512xf32> to vector<16x512xf32>
    %7 = arith.addf %4, %6 : vector<16x512xf32>
    %c0_7 = arith.constant 0 : index
    %c0_8 = arith.constant 0 : index
    %8 = vector.load %arg5[%c0_7, %c0_8] : memref<128x512xf32, #tpu.memory_space<vmem>>, vector<128x512xf32>
    %cst_9 = arith.constant dense<0.000000e+00> : vector<16x512xf32>
    %9 = tpu.matmul %2, %8, %cst_9 {dimension_numbers = #tpu.dot_dimension_numbers<[1], [0], [0], [1], [0, 0, 1, 1], [], []>} : vector<16x128xf32>, vector<128x512xf32>, vector<16x512xf32> -> vector<16x512xf32>
    %c0_10 = arith.constant 0 : index
    %c0_11 = arith.constant 0 : index
    %10 = vector.load %arg7[%c0_10, %c0_11] : memref<1x512xf32, #tpu.memory_space<vmem>>, vector<1x512xf32>
    %11 = vector.broadcast %10 : vector<1x512xf32> to vector<16x512xf32>
    %12 = arith.addf %9, %11 : vector<16x512xf32>
    %c0_12 = arith.constant 0 : index
    %c0_13 = arith.constant 0 : index
    %13 = vector.load %arg3[%c0_12, %c0_13] : memref<128x512xf32, #tpu.memory_space<vmem>>, vector<128x512xf32>
    %c0_14 = arith.constant 0 : index
    %c0_15 = arith.constant 0 : index
    %14 = vector.load %arg6[%c0_14, %c0_15] : memref<128x512xf32, #tpu.memory_space<vmem>>, vector<128x512xf32>
    %cst_16 = arith.constant 0.000000e+00 : f32
    %15 = vector.broadcast %cst_16 : f32 to vector<2x128xf32>
    %16 = vector.extract_strided_slice %0 {offsets = [0, 0], sizes = [2, 128], strides = [1, 1]} : vector<16x128xf32> to vector<2x128xf32>
    %17 = vector.extract_strided_slice %0 {offsets = [14, 0], sizes = [2, 128], strides = [1, 1]} : vector<16x128xf32> to vector<2x128xf32>
    %18 = vector.extract_strided_slice %7 {offsets = [0, 0], sizes = [2, 512], strides = [1, 1]} : vector<16x512xf32> to vector<2x512xf32>
    %cst_17 = arith.constant dense<0.000000e+00> : vector<2x512xf32>
    %19 = tpu.matmul %15, %13, %cst_17 {dimension_numbers = #tpu.dot_dimension_numbers<[1], [0], [0], [1], [0, 0, 1, 1], [], []>} : vector<2x128xf32>, vector<128x512xf32>, vector<2x512xf32> -> vector<2x512xf32>
    %20 = arith.addf %18, %19 : vector<2x512xf32>
    %21 = vector.extract_strided_slice %12 {offsets = [14, 0], sizes = [2, 512], strides = [1, 1]} : vector<16x512xf32> to vector<2x512xf32>
    %cst_18 = arith.constant dense<0.000000e+00> : vector<2x512xf32>
    %22 = tpu.matmul %15, %14, %cst_18 {dimension_numbers = #tpu.dot_dimension_numbers<[1], [0], [0], [1], [0, 0, 1, 1], [], []>} : vector<2x128xf32>, vector<128x512xf32>, vector<2x512xf32> -> vector<2x512xf32>
    %23 = arith.addf %21, %22 : vector<2x512xf32>
    %24 = vector.extract_strided_slice %20 {offsets = [0, 0], sizes = [2, 128], strides = [1, 1]} : vector<2x512xf32> to vector<2x128xf32>
    %25 = arith.negf %24 : vector<2x128xf32>
    %26 = math.exp %25 : vector<2x128xf32>
    %cst_19 = arith.constant 1.000000e+00 : f32
    %27 = vector.broadcast %cst_19 : f32 to vector<2x128xf32>
    %28 = arith.addf %27, %26 : vector<2x128xf32>
    %29 = arith.divf %27, %28 : vector<2x128xf32>
    %30 = vector.extract_strided_slice %20 {offsets = [0, 128], sizes = [2, 128], strides = [1, 1]} : vector<2x512xf32> to vector<2x128xf32>
    %31 = arith.negf %30 : vector<2x128xf32>
    %32 = math.exp %31 : vector<2x128xf32>
    %cst_20 = arith.constant 1.000000e+00 : f32
    %33 = vector.broadcast %cst_20 : f32 to vector<2x128xf32>
    %34 = arith.addf %33, %32 : vector<2x128xf32>
    %35 = arith.divf %33, %34 : vector<2x128xf32>
    %36 = vector.extract_strided_slice %20 {offsets = [0, 256], sizes = [2, 128], strides = [1, 1]} : vector<2x512xf32> to vector<2x128xf32>
    %37 = math.tanh %36 : vector<2x128xf32>
    %38 = vector.extract_strided_slice %20 {offsets = [0, 384], sizes = [2, 128], strides = [1, 1]} : vector<2x512xf32> to vector<2x128xf32>
    %39 = arith.negf %38 : vector<2x128xf32>
    %40 = math.exp %39 : vector<2x128xf32>
    %cst_21 = arith.constant 1.000000e+00 : f32
    %41 = vector.broadcast %cst_21 : f32 to vector<2x128xf32>
    %42 = arith.addf %41, %40 : vector<2x128xf32>
    %43 = arith.divf %41, %42 : vector<2x128xf32>
    %44 = arith.mulf %35, %15 : vector<2x128xf32>
    %45 = arith.mulf %29, %37 : vector<2x128xf32>
    %46 = arith.addf %44, %45 : vector<2x128xf32>
    %47 = math.tanh %46 : vector<2x128xf32>
    %48 = arith.mulf %43, %47 : vector<2x128xf32>
    %49 = vector.extract_strided_slice %23 {offsets = [0, 0], sizes = [2, 128], strides = [1, 1]} : vector<2x512xf32> to vector<2x128xf32>
    %50 = arith.negf %49 : vector<2x128xf32>
    %51 = math.exp %50 : vector<2x128xf32>
    %cst_22 = arith.constant 1.000000e+00 : f32
    %52 = vector.broadcast %cst_22 : f32 to vector<2x128xf32>
    %53 = arith.addf %52, %51 : vector<2x128xf32>
    %54 = arith.divf %52, %53 : vector<2x128xf32>
    %55 = vector.extract_strided_slice %23 {offsets = [0, 128], sizes = [2, 128], strides = [1, 1]} : vector<2x512xf32> to vector<2x128xf32>
    %56 = arith.negf %55 : vector<2x128xf32>
    %57 = math.exp %56 : vector<2x128xf32>
    %cst_23 = arith.constant 1.000000e+00 : f32
    %58 = vector.broadcast %cst_23 : f32 to vector<2x128xf32>
    %59 = arith.addf %58, %57 : vector<2x128xf32>
    %60 = arith.divf %58, %59 : vector<2x128xf32>
    %61 = vector.extract_strided_slice %23 {offsets = [0, 256], sizes = [2, 128], strides = [1, 1]} : vector<2x512xf32> to vector<2x128xf32>
    %62 = math.tanh %61 : vector<2x128xf32>
    %63 = vector.extract_strided_slice %23 {offsets = [0, 384], sizes = [2, 128], strides = [1, 1]} : vector<2x512xf32> to vector<2x128xf32>
    %64 = arith.negf %63 : vector<2x128xf32>
    %65 = math.exp %64 : vector<2x128xf32>
    %cst_24 = arith.constant 1.000000e+00 : f32
    %66 = vector.broadcast %cst_24 : f32 to vector<2x128xf32>
    %67 = arith.addf %66, %65 : vector<2x128xf32>
    %68 = arith.divf %66, %67 : vector<2x128xf32>
    %69 = arith.mulf %60, %15 : vector<2x128xf32>
    %70 = arith.mulf %54, %62 : vector<2x128xf32>
    %71 = arith.addf %69, %70 : vector<2x128xf32>
    %72 = math.tanh %71 : vector<2x128xf32>
    %73 = arith.mulf %68, %72 : vector<2x128xf32>
    %74 = arith.mulf %48, %16 : vector<2x128xf32>
    %75 = arith.addf %15, %74 : vector<2x128xf32>
    %76 = arith.mulf %73, %17 : vector<2x128xf32>
    %77 = arith.addf %15, %76 : vector<2x128xf32>
    %78 = arith.addf %15, %16 : vector<2x128xf32>
    %79 = vector.extract_strided_slice %0 {offsets = [2, 0], sizes = [2, 128], strides = [1, 1]} : vector<16x128xf32> to vector<2x128xf32>
    %80 = vector.extract_strided_slice %0 {offsets = [12, 0], sizes = [2, 128], strides = [1, 1]} : vector<16x128xf32> to vector<2x128xf32>
    %81 = vector.extract_strided_slice %7 {offsets = [2, 0], sizes = [2, 512], strides = [1, 1]} : vector<16x512xf32> to vector<2x512xf32>
    %cst_25 = arith.constant dense<0.000000e+00> : vector<2x512xf32>
    %82 = tpu.matmul %48, %13, %cst_25 {dimension_numbers = #tpu.dot_dimension_numbers<[1], [0], [0], [1], [0, 0, 1, 1], [], []>} : vector<2x128xf32>, vector<128x512xf32>, vector<2x512xf32> -> vector<2x512xf32>
    %83 = arith.addf %81, %82 : vector<2x512xf32>
    %84 = vector.extract_strided_slice %12 {offsets = [12, 0], sizes = [2, 512], strides = [1, 1]} : vector<16x512xf32> to vector<2x512xf32>
    %cst_26 = arith.constant dense<0.000000e+00> : vector<2x512xf32>
    %85 = tpu.matmul %73, %14, %cst_26 {dimension_numbers = #tpu.dot_dimension_numbers<[1], [0], [0], [1], [0, 0, 1, 1], [], []>} : vector<2x128xf32>, vector<128x512xf32>, vector<2x512xf32> -> vector<2x512xf32>
    %86 = arith.addf %84, %85 : vector<2x512xf32>
    %87 = vector.extract_strided_slice %83 {offsets = [0, 0], sizes = [2, 128], strides = [1, 1]} : vector<2x512xf32> to vector<2x128xf32>
    %88 = arith.negf %87 : vector<2x128xf32>
    %89 = math.exp %88 : vector<2x128xf32>
    %cst_27 = arith.constant 1.000000e+00 : f32
    %90 = vector.broadcast %cst_27 : f32 to vector<2x128xf32>
    %91 = arith.addf %90, %89 : vector<2x128xf32>
    %92 = arith.divf %90, %91 : vector<2x128xf32>
    %93 = vector.extract_strided_slice %83 {offsets = [0, 128], sizes = [2, 128], strides = [1, 1]} : vector<2x512xf32> to vector<2x128xf32>
    %94 = arith.negf %93 : vector<2x128xf32>
    %95 = math.exp %94 : vector<2x128xf32>
    %cst_28 = arith.constant 1.000000e+00 : f32
    %96 = vector.broadcast %cst_28 : f32 to vector<2x128xf32>
    %97 = arith.addf %96, %95 : vector<2x128xf32>
    %98 = arith.divf %96, %97 : vector<2x128xf32>
    %99 = vector.extract_strided_slice %83 {offsets = [0, 256], sizes = [2, 128], strides = [1, 1]} : vector<2x512xf32> to vector<2x128xf32>
    %100 = math.tanh %99 : vector<2x128xf32>
    %101 = vector.extract_strided_slice %83 {offsets = [0, 384], sizes = [2, 128], strides = [1, 1]} : vector<2x512xf32> to vector<2x128xf32>
    %102 = arith.negf %101 : vector<2x128xf32>
    %103 = math.exp %102 : vector<2x128xf32>
    %cst_29 = arith.constant 1.000000e+00 : f32
    %104 = vector.broadcast %cst_29 : f32 to vector<2x128xf32>
    %105 = arith.addf %104, %103 : vector<2x128xf32>
    %106 = arith.divf %104, %105 : vector<2x128xf32>
    %107 = arith.mulf %98, %46 : vector<2x128xf32>
    %108 = arith.mulf %92, %100 : vector<2x128xf32>
    %109 = arith.addf %107, %108 : vector<2x128xf32>
    %110 = math.tanh %109 : vector<2x128xf32>
    %111 = arith.mulf %106, %110 : vector<2x128xf32>
    %112 = vector.extract_strided_slice %86 {offsets = [0, 0], sizes = [2, 128], strides = [1, 1]} : vector<2x512xf32> to vector<2x128xf32>
    %113 = arith.negf %112 : vector<2x128xf32>
    %114 = math.exp %113 : vector<2x128xf32>
    %cst_30 = arith.constant 1.000000e+00 : f32
    %115 = vector.broadcast %cst_30 : f32 to vector<2x128xf32>
    %116 = arith.addf %115, %114 : vector<2x128xf32>
    %117 = arith.divf %115, %116 : vector<2x128xf32>
    %118 = vector.extract_strided_slice %86 {offsets = [0, 128], sizes = [2, 128], strides = [1, 1]} : vector<2x512xf32> to vector<2x128xf32>
    %119 = arith.negf %118 : vector<2x128xf32>
    %120 = math.exp %119 : vector<2x128xf32>
    %cst_31 = arith.constant 1.000000e+00 : f32
    %121 = vector.broadcast %cst_31 : f32 to vector<2x128xf32>
    %122 = arith.addf %121, %120 : vector<2x128xf32>
    %123 = arith.divf %121, %122 : vector<2x128xf32>
    %124 = vector.extract_strided_slice %86 {offsets = [0, 256], sizes = [2, 128], strides = [1, 1]} : vector<2x512xf32> to vector<2x128xf32>
    %125 = math.tanh %124 : vector<2x128xf32>
    %126 = vector.extract_strided_slice %86 {offsets = [0, 384], sizes = [2, 128], strides = [1, 1]} : vector<2x512xf32> to vector<2x128xf32>
    %127 = arith.negf %126 : vector<2x128xf32>
    %128 = math.exp %127 : vector<2x128xf32>
    %cst_32 = arith.constant 1.000000e+00 : f32
    %129 = vector.broadcast %cst_32 : f32 to vector<2x128xf32>
    %130 = arith.addf %129, %128 : vector<2x128xf32>
    %131 = arith.divf %129, %130 : vector<2x128xf32>
    %132 = arith.mulf %123, %71 : vector<2x128xf32>
    %133 = arith.mulf %117, %125 : vector<2x128xf32>
    %134 = arith.addf %132, %133 : vector<2x128xf32>
    %135 = math.tanh %134 : vector<2x128xf32>
    %136 = arith.mulf %131, %135 : vector<2x128xf32>
    %137 = arith.mulf %111, %79 : vector<2x128xf32>
    %138 = arith.addf %75, %137 : vector<2x128xf32>
    %139 = arith.mulf %136, %80 : vector<2x128xf32>
    %140 = arith.addf %77, %139 : vector<2x128xf32>
    %141 = arith.addf %78, %79 : vector<2x128xf32>
    %142 = vector.extract_strided_slice %0 {offsets = [4, 0], sizes = [2, 128], strides = [1, 1]} : vector<16x128xf32> to vector<2x128xf32>
    %143 = vector.extract_strided_slice %0 {offsets = [10, 0], sizes = [2, 128], strides = [1, 1]} : vector<16x128xf32> to vector<2x128xf32>
    %144 = vector.extract_strided_slice %7 {offsets = [4, 0], sizes = [2, 512], strides = [1, 1]} : vector<16x512xf32> to vector<2x512xf32>
    %cst_33 = arith.constant dense<0.000000e+00> : vector<2x512xf32>
    %145 = tpu.matmul %111, %13, %cst_33 {dimension_numbers = #tpu.dot_dimension_numbers<[1], [0], [0], [1], [0, 0, 1, 1], [], []>} : vector<2x128xf32>, vector<128x512xf32>, vector<2x512xf32> -> vector<2x512xf32>
    %146 = arith.addf %144, %145 : vector<2x512xf32>
    %147 = vector.extract_strided_slice %12 {offsets = [10, 0], sizes = [2, 512], strides = [1, 1]} : vector<16x512xf32> to vector<2x512xf32>
    %cst_34 = arith.constant dense<0.000000e+00> : vector<2x512xf32>
    %148 = tpu.matmul %136, %14, %cst_34 {dimension_numbers = #tpu.dot_dimension_numbers<[1], [0], [0], [1], [0, 0, 1, 1], [], []>} : vector<2x128xf32>, vector<128x512xf32>, vector<2x512xf32> -> vector<2x512xf32>
    %149 = arith.addf %147, %148 : vector<2x512xf32>
    %150 = vector.extract_strided_slice %146 {offsets = [0, 0], sizes = [2, 128], strides = [1, 1]} : vector<2x512xf32> to vector<2x128xf32>
    %151 = arith.negf %150 : vector<2x128xf32>
    %152 = math.exp %151 : vector<2x128xf32>
    %cst_35 = arith.constant 1.000000e+00 : f32
    %153 = vector.broadcast %cst_35 : f32 to vector<2x128xf32>
    %154 = arith.addf %153, %152 : vector<2x128xf32>
    %155 = arith.divf %153, %154 : vector<2x128xf32>
    %156 = vector.extract_strided_slice %146 {offsets = [0, 128], sizes = [2, 128], strides = [1, 1]} : vector<2x512xf32> to vector<2x128xf32>
    %157 = arith.negf %156 : vector<2x128xf32>
    %158 = math.exp %157 : vector<2x128xf32>
    %cst_36 = arith.constant 1.000000e+00 : f32
    %159 = vector.broadcast %cst_36 : f32 to vector<2x128xf32>
    %160 = arith.addf %159, %158 : vector<2x128xf32>
    %161 = arith.divf %159, %160 : vector<2x128xf32>
    %162 = vector.extract_strided_slice %146 {offsets = [0, 256], sizes = [2, 128], strides = [1, 1]} : vector<2x512xf32> to vector<2x128xf32>
    %163 = math.tanh %162 : vector<2x128xf32>
    %164 = vector.extract_strided_slice %146 {offsets = [0, 384], sizes = [2, 128], strides = [1, 1]} : vector<2x512xf32> to vector<2x128xf32>
    %165 = arith.negf %164 : vector<2x128xf32>
    %166 = math.exp %165 : vector<2x128xf32>
    %cst_37 = arith.constant 1.000000e+00 : f32
    %167 = vector.broadcast %cst_37 : f32 to vector<2x128xf32>
    %168 = arith.addf %167, %166 : vector<2x128xf32>
    %169 = arith.divf %167, %168 : vector<2x128xf32>
    %170 = arith.mulf %161, %109 : vector<2x128xf32>
    %171 = arith.mulf %155, %163 : vector<2x128xf32>
    %172 = arith.addf %170, %171 : vector<2x128xf32>
    %173 = math.tanh %172 : vector<2x128xf32>
    %174 = arith.mulf %169, %173 : vector<2x128xf32>
    %175 = vector.extract_strided_slice %149 {offsets = [0, 0], sizes = [2, 128], strides = [1, 1]} : vector<2x512xf32> to vector<2x128xf32>
    %176 = arith.negf %175 : vector<2x128xf32>
    %177 = math.exp %176 : vector<2x128xf32>
    %cst_38 = arith.constant 1.000000e+00 : f32
    %178 = vector.broadcast %cst_38 : f32 to vector<2x128xf32>
    %179 = arith.addf %178, %177 : vector<2x128xf32>
    %180 = arith.divf %178, %179 : vector<2x128xf32>
    %181 = vector.extract_strided_slice %149 {offsets = [0, 128], sizes = [2, 128], strides = [1, 1]} : vector<2x512xf32> to vector<2x128xf32>
    %182 = arith.negf %181 : vector<2x128xf32>
    %183 = math.exp %182 : vector<2x128xf32>
    %cst_39 = arith.constant 1.000000e+00 : f32
    %184 = vector.broadcast %cst_39 : f32 to vector<2x128xf32>
    %185 = arith.addf %184, %183 : vector<2x128xf32>
    %186 = arith.divf %184, %185 : vector<2x128xf32>
    %187 = vector.extract_strided_slice %149 {offsets = [0, 256], sizes = [2, 128], strides = [1, 1]} : vector<2x512xf32> to vector<2x128xf32>
    %188 = math.tanh %187 : vector<2x128xf32>
    %189 = vector.extract_strided_slice %149 {offsets = [0, 384], sizes = [2, 128], strides = [1, 1]} : vector<2x512xf32> to vector<2x128xf32>
    %190 = arith.negf %189 : vector<2x128xf32>
    %191 = math.exp %190 : vector<2x128xf32>
    %cst_40 = arith.constant 1.000000e+00 : f32
    %192 = vector.broadcast %cst_40 : f32 to vector<2x128xf32>
    %193 = arith.addf %192, %191 : vector<2x128xf32>
    %194 = arith.divf %192, %193 : vector<2x128xf32>
    %195 = arith.mulf %186, %134 : vector<2x128xf32>
    %196 = arith.mulf %180, %188 : vector<2x128xf32>
    %197 = arith.addf %195, %196 : vector<2x128xf32>
    %198 = math.tanh %197 : vector<2x128xf32>
    %199 = arith.mulf %194, %198 : vector<2x128xf32>
    %200 = arith.mulf %174, %142 : vector<2x128xf32>
    %201 = arith.addf %138, %200 : vector<2x128xf32>
    %202 = arith.mulf %199, %143 : vector<2x128xf32>
    %203 = arith.addf %140, %202 : vector<2x128xf32>
    %204 = arith.addf %141, %142 : vector<2x128xf32>
    %205 = vector.extract_strided_slice %0 {offsets = [6, 0], sizes = [2, 128], strides = [1, 1]} : vector<16x128xf32> to vector<2x128xf32>
    %206 = vector.extract_strided_slice %0 {offsets = [8, 0], sizes = [2, 128], strides = [1, 1]} : vector<16x128xf32> to vector<2x128xf32>
    %207 = vector.extract_strided_slice %7 {offsets = [6, 0], sizes = [2, 512], strides = [1, 1]} : vector<16x512xf32> to vector<2x512xf32>
    %cst_41 = arith.constant dense<0.000000e+00> : vector<2x512xf32>
    %208 = tpu.matmul %174, %13, %cst_41 {dimension_numbers = #tpu.dot_dimension_numbers<[1], [0], [0], [1], [0, 0, 1, 1], [], []>} : vector<2x128xf32>, vector<128x512xf32>, vector<2x512xf32> -> vector<2x512xf32>
    %209 = arith.addf %207, %208 : vector<2x512xf32>
    %210 = vector.extract_strided_slice %12 {offsets = [8, 0], sizes = [2, 512], strides = [1, 1]} : vector<16x512xf32> to vector<2x512xf32>
    %cst_42 = arith.constant dense<0.000000e+00> : vector<2x512xf32>
    %211 = tpu.matmul %199, %14, %cst_42 {dimension_numbers = #tpu.dot_dimension_numbers<[1], [0], [0], [1], [0, 0, 1, 1], [], []>} : vector<2x128xf32>, vector<128x512xf32>, vector<2x512xf32> -> vector<2x512xf32>
    %212 = arith.addf %210, %211 : vector<2x512xf32>
    %213 = vector.extract_strided_slice %209 {offsets = [0, 0], sizes = [2, 128], strides = [1, 1]} : vector<2x512xf32> to vector<2x128xf32>
    %214 = arith.negf %213 : vector<2x128xf32>
    %215 = math.exp %214 : vector<2x128xf32>
    %cst_43 = arith.constant 1.000000e+00 : f32
    %216 = vector.broadcast %cst_43 : f32 to vector<2x128xf32>
    %217 = arith.addf %216, %215 : vector<2x128xf32>
    %218 = arith.divf %216, %217 : vector<2x128xf32>
    %219 = vector.extract_strided_slice %209 {offsets = [0, 128], sizes = [2, 128], strides = [1, 1]} : vector<2x512xf32> to vector<2x128xf32>
    %220 = arith.negf %219 : vector<2x128xf32>
    %221 = math.exp %220 : vector<2x128xf32>
    %cst_44 = arith.constant 1.000000e+00 : f32
    %222 = vector.broadcast %cst_44 : f32 to vector<2x128xf32>
    %223 = arith.addf %222, %221 : vector<2x128xf32>
    %224 = arith.divf %222, %223 : vector<2x128xf32>
    %225 = vector.extract_strided_slice %209 {offsets = [0, 256], sizes = [2, 128], strides = [1, 1]} : vector<2x512xf32> to vector<2x128xf32>
    %226 = math.tanh %225 : vector<2x128xf32>
    %227 = vector.extract_strided_slice %209 {offsets = [0, 384], sizes = [2, 128], strides = [1, 1]} : vector<2x512xf32> to vector<2x128xf32>
    %228 = arith.negf %227 : vector<2x128xf32>
    %229 = math.exp %228 : vector<2x128xf32>
    %cst_45 = arith.constant 1.000000e+00 : f32
    %230 = vector.broadcast %cst_45 : f32 to vector<2x128xf32>
    %231 = arith.addf %230, %229 : vector<2x128xf32>
    %232 = arith.divf %230, %231 : vector<2x128xf32>
    %233 = arith.mulf %224, %172 : vector<2x128xf32>
    %234 = arith.mulf %218, %226 : vector<2x128xf32>
    %235 = arith.addf %233, %234 : vector<2x128xf32>
    %236 = math.tanh %235 : vector<2x128xf32>
    %237 = arith.mulf %232, %236 : vector<2x128xf32>
    %238 = vector.extract_strided_slice %212 {offsets = [0, 0], sizes = [2, 128], strides = [1, 1]} : vector<2x512xf32> to vector<2x128xf32>
    %239 = arith.negf %238 : vector<2x128xf32>
    %240 = math.exp %239 : vector<2x128xf32>
    %cst_46 = arith.constant 1.000000e+00 : f32
    %241 = vector.broadcast %cst_46 : f32 to vector<2x128xf32>
    %242 = arith.addf %241, %240 : vector<2x128xf32>
    %243 = arith.divf %241, %242 : vector<2x128xf32>
    %244 = vector.extract_strided_slice %212 {offsets = [0, 128], sizes = [2, 128], strides = [1, 1]} : vector<2x512xf32> to vector<2x128xf32>
    %245 = arith.negf %244 : vector<2x128xf32>
    %246 = math.exp %245 : vector<2x128xf32>
    %cst_47 = arith.constant 1.000000e+00 : f32
    %247 = vector.broadcast %cst_47 : f32 to vector<2x128xf32>
    %248 = arith.addf %247, %246 : vector<2x128xf32>
    %249 = arith.divf %247, %248 : vector<2x128xf32>
    %250 = vector.extract_strided_slice %212 {offsets = [0, 256], sizes = [2, 128], strides = [1, 1]} : vector<2x512xf32> to vector<2x128xf32>
    %251 = math.tanh %250 : vector<2x128xf32>
    %252 = vector.extract_strided_slice %212 {offsets = [0, 384], sizes = [2, 128], strides = [1, 1]} : vector<2x512xf32> to vector<2x128xf32>
    %253 = arith.negf %252 : vector<2x128xf32>
    %254 = math.exp %253 : vector<2x128xf32>
    %cst_48 = arith.constant 1.000000e+00 : f32
    %255 = vector.broadcast %cst_48 : f32 to vector<2x128xf32>
    %256 = arith.addf %255, %254 : vector<2x128xf32>
    %257 = arith.divf %255, %256 : vector<2x128xf32>
    %258 = arith.mulf %249, %197 : vector<2x128xf32>
    %259 = arith.mulf %243, %251 : vector<2x128xf32>
    %260 = arith.addf %258, %259 : vector<2x128xf32>
    %261 = math.tanh %260 : vector<2x128xf32>
    %262 = arith.mulf %257, %261 : vector<2x128xf32>
    %263 = arith.mulf %237, %205 : vector<2x128xf32>
    %264 = arith.addf %201, %263 : vector<2x128xf32>
    %265 = arith.mulf %262, %206 : vector<2x128xf32>
    %266 = arith.addf %203, %265 : vector<2x128xf32>
    %267 = arith.addf %204, %205 : vector<2x128xf32>
    %268 = vector.extract_strided_slice %0 {offsets = [8, 0], sizes = [2, 128], strides = [1, 1]} : vector<16x128xf32> to vector<2x128xf32>
    %269 = vector.extract_strided_slice %0 {offsets = [6, 0], sizes = [2, 128], strides = [1, 1]} : vector<16x128xf32> to vector<2x128xf32>
    %270 = vector.extract_strided_slice %7 {offsets = [8, 0], sizes = [2, 512], strides = [1, 1]} : vector<16x512xf32> to vector<2x512xf32>
    %cst_49 = arith.constant dense<0.000000e+00> : vector<2x512xf32>
    %271 = tpu.matmul %237, %13, %cst_49 {dimension_numbers = #tpu.dot_dimension_numbers<[1], [0], [0], [1], [0, 0, 1, 1], [], []>} : vector<2x128xf32>, vector<128x512xf32>, vector<2x512xf32> -> vector<2x512xf32>
    %272 = arith.addf %270, %271 : vector<2x512xf32>
    %273 = vector.extract_strided_slice %12 {offsets = [6, 0], sizes = [2, 512], strides = [1, 1]} : vector<16x512xf32> to vector<2x512xf32>
    %cst_50 = arith.constant dense<0.000000e+00> : vector<2x512xf32>
    %274 = tpu.matmul %262, %14, %cst_50 {dimension_numbers = #tpu.dot_dimension_numbers<[1], [0], [0], [1], [0, 0, 1, 1], [], []>} : vector<2x128xf32>, vector<128x512xf32>, vector<2x512xf32> -> vector<2x512xf32>
    %275 = arith.addf %273, %274 : vector<2x512xf32>
    %276 = vector.extract_strided_slice %272 {offsets = [0, 0], sizes = [2, 128], strides = [1, 1]} : vector<2x512xf32> to vector<2x128xf32>
    %277 = arith.negf %276 : vector<2x128xf32>
    %278 = math.exp %277 : vector<2x128xf32>
    %cst_51 = arith.constant 1.000000e+00 : f32
    %279 = vector.broadcast %cst_51 : f32 to vector<2x128xf32>
    %280 = arith.addf %279, %278 : vector<2x128xf32>
    %281 = arith.divf %279, %280 : vector<2x128xf32>
    %282 = vector.extract_strided_slice %272 {offsets = [0, 128], sizes = [2, 128], strides = [1, 1]} : vector<2x512xf32> to vector<2x128xf32>
    %283 = arith.negf %282 : vector<2x128xf32>
    %284 = math.exp %283 : vector<2x128xf32>
    %cst_52 = arith.constant 1.000000e+00 : f32
    %285 = vector.broadcast %cst_52 : f32 to vector<2x128xf32>
    %286 = arith.addf %285, %284 : vector<2x128xf32>
    %287 = arith.divf %285, %286 : vector<2x128xf32>
    %288 = vector.extract_strided_slice %272 {offsets = [0, 256], sizes = [2, 128], strides = [1, 1]} : vector<2x512xf32> to vector<2x128xf32>
    %289 = math.tanh %288 : vector<2x128xf32>
    %290 = vector.extract_strided_slice %272 {offsets = [0, 384], sizes = [2, 128], strides = [1, 1]} : vector<2x512xf32> to vector<2x128xf32>
    %291 = arith.negf %290 : vector<2x128xf32>
    %292 = math.exp %291 : vector<2x128xf32>
    %cst_53 = arith.constant 1.000000e+00 : f32
    %293 = vector.broadcast %cst_53 : f32 to vector<2x128xf32>
    %294 = arith.addf %293, %292 : vector<2x128xf32>
    %295 = arith.divf %293, %294 : vector<2x128xf32>
    %296 = arith.mulf %287, %235 : vector<2x128xf32>
    %297 = arith.mulf %281, %289 : vector<2x128xf32>
    %298 = arith.addf %296, %297 : vector<2x128xf32>
    %299 = math.tanh %298 : vector<2x128xf32>
    %300 = arith.mulf %295, %299 : vector<2x128xf32>
    %301 = vector.extract_strided_slice %275 {offsets = [0, 0], sizes = [2, 128], strides = [1, 1]} : vector<2x512xf32> to vector<2x128xf32>
    %302 = arith.negf %301 : vector<2x128xf32>
    %303 = math.exp %302 : vector<2x128xf32>
    %cst_54 = arith.constant 1.000000e+00 : f32
    %304 = vector.broadcast %cst_54 : f32 to vector<2x128xf32>
    %305 = arith.addf %304, %303 : vector<2x128xf32>
    %306 = arith.divf %304, %305 : vector<2x128xf32>
    %307 = vector.extract_strided_slice %275 {offsets = [0, 128], sizes = [2, 128], strides = [1, 1]} : vector<2x512xf32> to vector<2x128xf32>
    %308 = arith.negf %307 : vector<2x128xf32>
    %309 = math.exp %308 : vector<2x128xf32>
    %cst_55 = arith.constant 1.000000e+00 : f32
    %310 = vector.broadcast %cst_55 : f32 to vector<2x128xf32>
    %311 = arith.addf %310, %309 : vector<2x128xf32>
    %312 = arith.divf %310, %311 : vector<2x128xf32>
    %313 = vector.extract_strided_slice %275 {offsets = [0, 256], sizes = [2, 128], strides = [1, 1]} : vector<2x512xf32> to vector<2x128xf32>
    %314 = math.tanh %313 : vector<2x128xf32>
    %315 = vector.extract_strided_slice %275 {offsets = [0, 384], sizes = [2, 128], strides = [1, 1]} : vector<2x512xf32> to vector<2x128xf32>
    %316 = arith.negf %315 : vector<2x128xf32>
    %317 = math.exp %316 : vector<2x128xf32>
    %cst_56 = arith.constant 1.000000e+00 : f32
    %318 = vector.broadcast %cst_56 : f32 to vector<2x128xf32>
    %319 = arith.addf %318, %317 : vector<2x128xf32>
    %320 = arith.divf %318, %319 : vector<2x128xf32>
    %321 = arith.mulf %312, %260 : vector<2x128xf32>
    %322 = arith.mulf %306, %314 : vector<2x128xf32>
    %323 = arith.addf %321, %322 : vector<2x128xf32>
    %324 = math.tanh %323 : vector<2x128xf32>
    %325 = arith.mulf %320, %324 : vector<2x128xf32>
    %326 = arith.mulf %300, %268 : vector<2x128xf32>
    %327 = arith.addf %264, %326 : vector<2x128xf32>
    %328 = arith.mulf %325, %269 : vector<2x128xf32>
    %329 = arith.addf %266, %328 : vector<2x128xf32>
    %330 = arith.addf %267, %268 : vector<2x128xf32>
    %331 = vector.extract_strided_slice %0 {offsets = [10, 0], sizes = [2, 128], strides = [1, 1]} : vector<16x128xf32> to vector<2x128xf32>
    %332 = vector.extract_strided_slice %0 {offsets = [4, 0], sizes = [2, 128], strides = [1, 1]} : vector<16x128xf32> to vector<2x128xf32>
    %333 = vector.extract_strided_slice %7 {offsets = [10, 0], sizes = [2, 512], strides = [1, 1]} : vector<16x512xf32> to vector<2x512xf32>
    %cst_57 = arith.constant dense<0.000000e+00> : vector<2x512xf32>
    %334 = tpu.matmul %300, %13, %cst_57 {dimension_numbers = #tpu.dot_dimension_numbers<[1], [0], [0], [1], [0, 0, 1, 1], [], []>} : vector<2x128xf32>, vector<128x512xf32>, vector<2x512xf32> -> vector<2x512xf32>
    %335 = arith.addf %333, %334 : vector<2x512xf32>
    %336 = vector.extract_strided_slice %12 {offsets = [4, 0], sizes = [2, 512], strides = [1, 1]} : vector<16x512xf32> to vector<2x512xf32>
    %cst_58 = arith.constant dense<0.000000e+00> : vector<2x512xf32>
    %337 = tpu.matmul %325, %14, %cst_58 {dimension_numbers = #tpu.dot_dimension_numbers<[1], [0], [0], [1], [0, 0, 1, 1], [], []>} : vector<2x128xf32>, vector<128x512xf32>, vector<2x512xf32> -> vector<2x512xf32>
    %338 = arith.addf %336, %337 : vector<2x512xf32>
    %339 = vector.extract_strided_slice %335 {offsets = [0, 0], sizes = [2, 128], strides = [1, 1]} : vector<2x512xf32> to vector<2x128xf32>
    %340 = arith.negf %339 : vector<2x128xf32>
    %341 = math.exp %340 : vector<2x128xf32>
    %cst_59 = arith.constant 1.000000e+00 : f32
    %342 = vector.broadcast %cst_59 : f32 to vector<2x128xf32>
    %343 = arith.addf %342, %341 : vector<2x128xf32>
    %344 = arith.divf %342, %343 : vector<2x128xf32>
    %345 = vector.extract_strided_slice %335 {offsets = [0, 128], sizes = [2, 128], strides = [1, 1]} : vector<2x512xf32> to vector<2x128xf32>
    %346 = arith.negf %345 : vector<2x128xf32>
    %347 = math.exp %346 : vector<2x128xf32>
    %cst_60 = arith.constant 1.000000e+00 : f32
    %348 = vector.broadcast %cst_60 : f32 to vector<2x128xf32>
    %349 = arith.addf %348, %347 : vector<2x128xf32>
    %350 = arith.divf %348, %349 : vector<2x128xf32>
    %351 = vector.extract_strided_slice %335 {offsets = [0, 256], sizes = [2, 128], strides = [1, 1]} : vector<2x512xf32> to vector<2x128xf32>
    %352 = math.tanh %351 : vector<2x128xf32>
    %353 = vector.extract_strided_slice %335 {offsets = [0, 384], sizes = [2, 128], strides = [1, 1]} : vector<2x512xf32> to vector<2x128xf32>
    %354 = arith.negf %353 : vector<2x128xf32>
    %355 = math.exp %354 : vector<2x128xf32>
    %cst_61 = arith.constant 1.000000e+00 : f32
    %356 = vector.broadcast %cst_61 : f32 to vector<2x128xf32>
    %357 = arith.addf %356, %355 : vector<2x128xf32>
    %358 = arith.divf %356, %357 : vector<2x128xf32>
    %359 = arith.mulf %350, %298 : vector<2x128xf32>
    %360 = arith.mulf %344, %352 : vector<2x128xf32>
    %361 = arith.addf %359, %360 : vector<2x128xf32>
    %362 = math.tanh %361 : vector<2x128xf32>
    %363 = arith.mulf %358, %362 : vector<2x128xf32>
    %364 = vector.extract_strided_slice %338 {offsets = [0, 0], sizes = [2, 128], strides = [1, 1]} : vector<2x512xf32> to vector<2x128xf32>
    %365 = arith.negf %364 : vector<2x128xf32>
    %366 = math.exp %365 : vector<2x128xf32>
    %cst_62 = arith.constant 1.000000e+00 : f32
    %367 = vector.broadcast %cst_62 : f32 to vector<2x128xf32>
    %368 = arith.addf %367, %366 : vector<2x128xf32>
    %369 = arith.divf %367, %368 : vector<2x128xf32>
    %370 = vector.extract_strided_slice %338 {offsets = [0, 128], sizes = [2, 128], strides = [1, 1]} : vector<2x512xf32> to vector<2x128xf32>
    %371 = arith.negf %370 : vector<2x128xf32>
    %372 = math.exp %371 : vector<2x128xf32>
    %cst_63 = arith.constant 1.000000e+00 : f32
    %373 = vector.broadcast %cst_63 : f32 to vector<2x128xf32>
    %374 = arith.addf %373, %372 : vector<2x128xf32>
    %375 = arith.divf %373, %374 : vector<2x128xf32>
    %376 = vector.extract_strided_slice %338 {offsets = [0, 256], sizes = [2, 128], strides = [1, 1]} : vector<2x512xf32> to vector<2x128xf32>
    %377 = math.tanh %376 : vector<2x128xf32>
    %378 = vector.extract_strided_slice %338 {offsets = [0, 384], sizes = [2, 128], strides = [1, 1]} : vector<2x512xf32> to vector<2x128xf32>
    %379 = arith.negf %378 : vector<2x128xf32>
    %380 = math.exp %379 : vector<2x128xf32>
    %cst_64 = arith.constant 1.000000e+00 : f32
    %381 = vector.broadcast %cst_64 : f32 to vector<2x128xf32>
    %382 = arith.addf %381, %380 : vector<2x128xf32>
    %383 = arith.divf %381, %382 : vector<2x128xf32>
    %384 = arith.mulf %375, %323 : vector<2x128xf32>
    %385 = arith.mulf %369, %377 : vector<2x128xf32>
    %386 = arith.addf %384, %385 : vector<2x128xf32>
    %387 = math.tanh %386 : vector<2x128xf32>
    %388 = arith.mulf %383, %387 : vector<2x128xf32>
    %389 = arith.mulf %363, %331 : vector<2x128xf32>
    %390 = arith.addf %327, %389 : vector<2x128xf32>
    %391 = arith.mulf %388, %332 : vector<2x128xf32>
    %392 = arith.addf %329, %391 : vector<2x128xf32>
    %393 = arith.addf %330, %331 : vector<2x128xf32>
    %394 = vector.extract_strided_slice %0 {offsets = [12, 0], sizes = [2, 128], strides = [1, 1]} : vector<16x128xf32> to vector<2x128xf32>
    %395 = vector.extract_strided_slice %0 {offsets = [2, 0], sizes = [2, 128], strides = [1, 1]} : vector<16x128xf32> to vector<2x128xf32>
    %396 = vector.extract_strided_slice %7 {offsets = [12, 0], sizes = [2, 512], strides = [1, 1]} : vector<16x512xf32> to vector<2x512xf32>
    %cst_65 = arith.constant dense<0.000000e+00> : vector<2x512xf32>
    %397 = tpu.matmul %363, %13, %cst_65 {dimension_numbers = #tpu.dot_dimension_numbers<[1], [0], [0], [1], [0, 0, 1, 1], [], []>} : vector<2x128xf32>, vector<128x512xf32>, vector<2x512xf32> -> vector<2x512xf32>
    %398 = arith.addf %396, %397 : vector<2x512xf32>
    %399 = vector.extract_strided_slice %12 {offsets = [2, 0], sizes = [2, 512], strides = [1, 1]} : vector<16x512xf32> to vector<2x512xf32>
    %cst_66 = arith.constant dense<0.000000e+00> : vector<2x512xf32>
    %400 = tpu.matmul %388, %14, %cst_66 {dimension_numbers = #tpu.dot_dimension_numbers<[1], [0], [0], [1], [0, 0, 1, 1], [], []>} : vector<2x128xf32>, vector<128x512xf32>, vector<2x512xf32> -> vector<2x512xf32>
    %401 = arith.addf %399, %400 : vector<2x512xf32>
    %402 = vector.extract_strided_slice %398 {offsets = [0, 0], sizes = [2, 128], strides = [1, 1]} : vector<2x512xf32> to vector<2x128xf32>
    %403 = arith.negf %402 : vector<2x128xf32>
    %404 = math.exp %403 : vector<2x128xf32>
    %cst_67 = arith.constant 1.000000e+00 : f32
    %405 = vector.broadcast %cst_67 : f32 to vector<2x128xf32>
    %406 = arith.addf %405, %404 : vector<2x128xf32>
    %407 = arith.divf %405, %406 : vector<2x128xf32>
    %408 = vector.extract_strided_slice %398 {offsets = [0, 128], sizes = [2, 128], strides = [1, 1]} : vector<2x512xf32> to vector<2x128xf32>
    %409 = arith.negf %408 : vector<2x128xf32>
    %410 = math.exp %409 : vector<2x128xf32>
    %cst_68 = arith.constant 1.000000e+00 : f32
    %411 = vector.broadcast %cst_68 : f32 to vector<2x128xf32>
    %412 = arith.addf %411, %410 : vector<2x128xf32>
    %413 = arith.divf %411, %412 : vector<2x128xf32>
    %414 = vector.extract_strided_slice %398 {offsets = [0, 256], sizes = [2, 128], strides = [1, 1]} : vector<2x512xf32> to vector<2x128xf32>
    %415 = math.tanh %414 : vector<2x128xf32>
    %416 = vector.extract_strided_slice %398 {offsets = [0, 384], sizes = [2, 128], strides = [1, 1]} : vector<2x512xf32> to vector<2x128xf32>
    %417 = arith.negf %416 : vector<2x128xf32>
    %418 = math.exp %417 : vector<2x128xf32>
    %cst_69 = arith.constant 1.000000e+00 : f32
    %419 = vector.broadcast %cst_69 : f32 to vector<2x128xf32>
    %420 = arith.addf %419, %418 : vector<2x128xf32>
    %421 = arith.divf %419, %420 : vector<2x128xf32>
    %422 = arith.mulf %413, %361 : vector<2x128xf32>
    %423 = arith.mulf %407, %415 : vector<2x128xf32>
    %424 = arith.addf %422, %423 : vector<2x128xf32>
    %425 = math.tanh %424 : vector<2x128xf32>
    %426 = arith.mulf %421, %425 : vector<2x128xf32>
    %427 = vector.extract_strided_slice %401 {offsets = [0, 0], sizes = [2, 128], strides = [1, 1]} : vector<2x512xf32> to vector<2x128xf32>
    %428 = arith.negf %427 : vector<2x128xf32>
    %429 = math.exp %428 : vector<2x128xf32>
    %cst_70 = arith.constant 1.000000e+00 : f32
    %430 = vector.broadcast %cst_70 : f32 to vector<2x128xf32>
    %431 = arith.addf %430, %429 : vector<2x128xf32>
    %432 = arith.divf %430, %431 : vector<2x128xf32>
    %433 = vector.extract_strided_slice %401 {offsets = [0, 128], sizes = [2, 128], strides = [1, 1]} : vector<2x512xf32> to vector<2x128xf32>
    %434 = arith.negf %433 : vector<2x128xf32>
    %435 = math.exp %434 : vector<2x128xf32>
    %cst_71 = arith.constant 1.000000e+00 : f32
    %436 = vector.broadcast %cst_71 : f32 to vector<2x128xf32>
    %437 = arith.addf %436, %435 : vector<2x128xf32>
    %438 = arith.divf %436, %437 : vector<2x128xf32>
    %439 = vector.extract_strided_slice %401 {offsets = [0, 256], sizes = [2, 128], strides = [1, 1]} : vector<2x512xf32> to vector<2x128xf32>
    %440 = math.tanh %439 : vector<2x128xf32>
    %441 = vector.extract_strided_slice %401 {offsets = [0, 384], sizes = [2, 128], strides = [1, 1]} : vector<2x512xf32> to vector<2x128xf32>
    %442 = arith.negf %441 : vector<2x128xf32>
    %443 = math.exp %442 : vector<2x128xf32>
    %cst_72 = arith.constant 1.000000e+00 : f32
    %444 = vector.broadcast %cst_72 : f32 to vector<2x128xf32>
    %445 = arith.addf %444, %443 : vector<2x128xf32>
    %446 = arith.divf %444, %445 : vector<2x128xf32>
    %447 = arith.mulf %438, %386 : vector<2x128xf32>
    %448 = arith.mulf %432, %440 : vector<2x128xf32>
    %449 = arith.addf %447, %448 : vector<2x128xf32>
    %450 = math.tanh %449 : vector<2x128xf32>
    %451 = arith.mulf %446, %450 : vector<2x128xf32>
    %452 = arith.mulf %426, %394 : vector<2x128xf32>
    %453 = arith.addf %390, %452 : vector<2x128xf32>
    %454 = arith.mulf %451, %395 : vector<2x128xf32>
    %455 = arith.addf %392, %454 : vector<2x128xf32>
    %456 = arith.addf %393, %394 : vector<2x128xf32>
    %457 = vector.extract_strided_slice %0 {offsets = [14, 0], sizes = [2, 128], strides = [1, 1]} : vector<16x128xf32> to vector<2x128xf32>
    %458 = vector.extract_strided_slice %0 {offsets = [0, 0], sizes = [2, 128], strides = [1, 1]} : vector<16x128xf32> to vector<2x128xf32>
    %459 = vector.extract_strided_slice %7 {offsets = [14, 0], sizes = [2, 512], strides = [1, 1]} : vector<16x512xf32> to vector<2x512xf32>
    %cst_73 = arith.constant dense<0.000000e+00> : vector<2x512xf32>
    %460 = tpu.matmul %426, %13, %cst_73 {dimension_numbers = #tpu.dot_dimension_numbers<[1], [0], [0], [1], [0, 0, 1, 1], [], []>} : vector<2x128xf32>, vector<128x512xf32>, vector<2x512xf32> -> vector<2x512xf32>
    %461 = arith.addf %459, %460 : vector<2x512xf32>
    %462 = vector.extract_strided_slice %12 {offsets = [0, 0], sizes = [2, 512], strides = [1, 1]} : vector<16x512xf32> to vector<2x512xf32>
    %cst_74 = arith.constant dense<0.000000e+00> : vector<2x512xf32>
    %463 = tpu.matmul %451, %14, %cst_74 {dimension_numbers = #tpu.dot_dimension_numbers<[1], [0], [0], [1], [0, 0, 1, 1], [], []>} : vector<2x128xf32>, vector<128x512xf32>, vector<2x512xf32> -> vector<2x512xf32>
    %464 = arith.addf %462, %463 : vector<2x512xf32>
    %465 = vector.extract_strided_slice %461 {offsets = [0, 0], sizes = [2, 128], strides = [1, 1]} : vector<2x512xf32> to vector<2x128xf32>
    %466 = arith.negf %465 : vector<2x128xf32>
    %467 = math.exp %466 : vector<2x128xf32>
    %cst_75 = arith.constant 1.000000e+00 : f32
    %468 = vector.broadcast %cst_75 : f32 to vector<2x128xf32>
    %469 = arith.addf %468, %467 : vector<2x128xf32>
    %470 = arith.divf %468, %469 : vector<2x128xf32>
    %471 = vector.extract_strided_slice %461 {offsets = [0, 128], sizes = [2, 128], strides = [1, 1]} : vector<2x512xf32> to vector<2x128xf32>
    %472 = arith.negf %471 : vector<2x128xf32>
    %473 = math.exp %472 : vector<2x128xf32>
    %cst_76 = arith.constant 1.000000e+00 : f32
    %474 = vector.broadcast %cst_76 : f32 to vector<2x128xf32>
    %475 = arith.addf %474, %473 : vector<2x128xf32>
    %476 = arith.divf %474, %475 : vector<2x128xf32>
    %477 = vector.extract_strided_slice %461 {offsets = [0, 256], sizes = [2, 128], strides = [1, 1]} : vector<2x512xf32> to vector<2x128xf32>
    %478 = math.tanh %477 : vector<2x128xf32>
    %479 = vector.extract_strided_slice %461 {offsets = [0, 384], sizes = [2, 128], strides = [1, 1]} : vector<2x512xf32> to vector<2x128xf32>
    %480 = arith.negf %479 : vector<2x128xf32>
    %481 = math.exp %480 : vector<2x128xf32>
    %cst_77 = arith.constant 1.000000e+00 : f32
    %482 = vector.broadcast %cst_77 : f32 to vector<2x128xf32>
    %483 = arith.addf %482, %481 : vector<2x128xf32>
    %484 = arith.divf %482, %483 : vector<2x128xf32>
    %485 = arith.mulf %476, %424 : vector<2x128xf32>
    %486 = arith.mulf %470, %478 : vector<2x128xf32>
    %487 = arith.addf %485, %486 : vector<2x128xf32>
    %488 = math.tanh %487 : vector<2x128xf32>
    %489 = arith.mulf %484, %488 : vector<2x128xf32>
    %490 = vector.extract_strided_slice %464 {offsets = [0, 0], sizes = [2, 128], strides = [1, 1]} : vector<2x512xf32> to vector<2x128xf32>
    %491 = arith.negf %490 : vector<2x128xf32>
    %492 = math.exp %491 : vector<2x128xf32>
    %cst_78 = arith.constant 1.000000e+00 : f32
    %493 = vector.broadcast %cst_78 : f32 to vector<2x128xf32>
    %494 = arith.addf %493, %492 : vector<2x128xf32>
    %495 = arith.divf %493, %494 : vector<2x128xf32>
    %496 = vector.extract_strided_slice %464 {offsets = [0, 128], sizes = [2, 128], strides = [1, 1]} : vector<2x512xf32> to vector<2x128xf32>
    %497 = arith.negf %496 : vector<2x128xf32>
    %498 = math.exp %497 : vector<2x128xf32>
    %cst_79 = arith.constant 1.000000e+00 : f32
    %499 = vector.broadcast %cst_79 : f32 to vector<2x128xf32>
    %500 = arith.addf %499, %498 : vector<2x128xf32>
    %501 = arith.divf %499, %500 : vector<2x128xf32>
    %502 = vector.extract_strided_slice %464 {offsets = [0, 256], sizes = [2, 128], strides = [1, 1]} : vector<2x512xf32> to vector<2x128xf32>
    %503 = math.tanh %502 : vector<2x128xf32>
    %504 = vector.extract_strided_slice %464 {offsets = [0, 384], sizes = [2, 128], strides = [1, 1]} : vector<2x512xf32> to vector<2x128xf32>
    %505 = arith.negf %504 : vector<2x128xf32>
    %506 = math.exp %505 : vector<2x128xf32>
    %cst_80 = arith.constant 1.000000e+00 : f32
    %507 = vector.broadcast %cst_80 : f32 to vector<2x128xf32>
    %508 = arith.addf %507, %506 : vector<2x128xf32>
    %509 = arith.divf %507, %508 : vector<2x128xf32>
    %510 = arith.mulf %501, %449 : vector<2x128xf32>
    %511 = arith.mulf %495, %503 : vector<2x128xf32>
    %512 = arith.addf %510, %511 : vector<2x128xf32>
    %513 = math.tanh %512 : vector<2x128xf32>
    %514 = arith.mulf %509, %513 : vector<2x128xf32>
    %515 = arith.mulf %489, %457 : vector<2x128xf32>
    %516 = arith.addf %453, %515 : vector<2x128xf32>
    %517 = arith.mulf %514, %458 : vector<2x128xf32>
    %518 = arith.addf %455, %517 : vector<2x128xf32>
    %519 = arith.addf %456, %457 : vector<2x128xf32>
    %cst_81 = arith.constant 1.000000e+00 : f32
    %520 = vector.broadcast %cst_81 : f32 to vector<2x128xf32>
    %521 = arith.maximumf %519, %520 : vector<2x128xf32>
    %cst_82 = arith.constant 1.000000e+00 : f32
    %522 = vector.broadcast %cst_82 : f32 to vector<2x128xf32>
    %523 = arith.divf %522, %521 : vector<2x128xf32>
    %524 = arith.mulf %516, %523 : vector<2x128xf32>
    %525 = arith.mulf %518, %523 : vector<2x128xf32>
    %c0_83 = arith.constant 0 : index
    %c0_84 = arith.constant 0 : index
    %526 = vector.load %arg8[%c0_83, %c0_84] : memref<128x256xf32, #tpu.memory_space<vmem>>, vector<128x256xf32>
    %cst_85 = arith.constant dense<0.000000e+00> : vector<2x256xf32>
    %527 = tpu.matmul %524, %526, %cst_85 {dimension_numbers = #tpu.dot_dimension_numbers<[1], [0], [0], [1], [0, 0, 1, 1], [], []>} : vector<2x128xf32>, vector<128x256xf32>, vector<2x256xf32> -> vector<2x256xf32>
    %c0_86 = arith.constant 0 : index
    %c0_87 = arith.constant 0 : index
    %528 = vector.load %arg9[%c0_86, %c0_87] : memref<128x256xf32, #tpu.memory_space<vmem>>, vector<128x256xf32>
    %cst_88 = arith.constant dense<0.000000e+00> : vector<2x256xf32>
    %529 = tpu.matmul %525, %528, %cst_88 {dimension_numbers = #tpu.dot_dimension_numbers<[1], [0], [0], [1], [0, 0, 1, 1], [], []>} : vector<2x128xf32>, vector<128x256xf32>, vector<2x256xf32> -> vector<2x256xf32>
    %530 = arith.addf %527, %529 : vector<2x256xf32>
    %c0_89 = arith.constant 0 : index
    %c0_90 = arith.constant 0 : index
    %531 = vector.load %arg10[%c0_89, %c0_90] : memref<1x256xf32, #tpu.memory_space<vmem>>, vector<1x256xf32>
    %532 = vector.broadcast %531 : vector<1x256xf32> to vector<2x256xf32>
    %533 = arith.addf %530, %532 : vector<2x256xf32>
    %cst_91 = arith.constant 0.000000e+00 : f32
    %534 = vector.broadcast %cst_91 : f32 to vector<2x256xf32>
    %535 = arith.maximumf %533, %534 : vector<2x256xf32>
    %c0_92 = arith.constant 0 : index
    %c0_93 = arith.constant 0 : index
    %536 = vector.load %arg11[%c0_92, %c0_93] : memref<256x128xf32, #tpu.memory_space<vmem>>, vector<256x128xf32>
    %cst_94 = arith.constant dense<0.000000e+00> : vector<2x128xf32>
    %537 = tpu.matmul %535, %536, %cst_94 {dimension_numbers = #tpu.dot_dimension_numbers<[1], [0], [0], [1], [0, 0, 1, 1], [], []>} : vector<2x256xf32>, vector<256x128xf32>, vector<2x128xf32> -> vector<2x128xf32>
    %c0_95 = arith.constant 0 : index
    %c0_96 = arith.constant 0 : index
    %538 = vector.load %arg12[%c0_95, %c0_96] : memref<1x128xf32, #tpu.memory_space<vmem>>, vector<1x128xf32>
    %539 = vector.broadcast %538 : vector<1x128xf32> to vector<2x128xf32>
    %540 = arith.addf %537, %539 : vector<2x128xf32>
    %c0_97 = arith.constant 0 : index
    %c0_98 = arith.constant 0 : index
    %541 = vector.load %arg13[%c0_97, %c0_98] : memref<2x128xf32, #tpu.memory_space<vmem>>, vector<2x128xf32>
    tpu.vector_store %arg13[%c0_97, %c0_98], %540 {strides = array<i32>} : memref<2x128xf32, #tpu.memory_space<vmem>>, vector<2x128xf32>,
    return
  }
}

</mosaic_0001>

<bundles_post_ra>
// kernel: model_forward.2
= control target key start
LH: loop header
LB: loop body
LE: loop exit
PB: predicated region body
PF: predicated region fallthrough
CT: control target
= control target key end

     0   :  { %v1753_v3 = vmov 0.0   ;;  %vm107_vm0 = vcmask 261120   ;;  %vm1593_vm1 = vcmask 1041409   ;;  %vm1595_vm2 = vcmask 1042434   ;;  %s2730_s1 = inlined_call_operand.vmem [shape: f32[32,256], index: 1, kind: input, shape index: {}]   ;;  %s2731_s0 = inlined_call_operand.vmem [shape: f32[512,32], index: 0, kind: input, shape index: {}]   ;;  %s2732_s3 = inlined_call_operand.vmem [shape: f32[256,128], index: 3, kind: input, shape index: {}]   ;;  %s2733_s2 = inlined_call_operand.vmem [shape: f32[1,256], index: 2, kind: input, shape index: {}]   ;;  %s2734_s4 = inlined_call_operand.vmem [shape: f32[1,128], index: 4, kind: input, shape index: {}]   ;;  %s2735_s5 = inlined_call_operand.vmem [shape: f32[32,128], index: 5, kind: input, shape index: {}]   ;;  %s2736_s6 = inlined_call_operand.vmem [shape: f32[16,128], index: 6, kind: output, shape index: {}]  }
   0x1   :  { %v94_v0 = vld [vmem:[%s2730_s1 + $0x38] sm:$0xff]  ;;  %v93_v1 = vld [vmem:[%s2730_s1 + $0x30] sm:$0xff]  ;;  %v92_v2 = vld [vmem:[%s2730_s1 + $0x28] sm:$0xff]  ;;  %364 = vmatprep.mubr.f32.mxu0 %v1753_v3  ;;  %1687 = vmatprep.subr.mxu1 %v1753_v3  ;;  %vm1597_vm3 = vcmask 1043459   ;;  %vm1599_vm4 = vcmask 1044484   ;;  %vm1601_vm5 = vcmask 1045509  }
   0x2   :  { %324 = vmatprep.subr.mxu0 %v94_v0  ;;  %v91_v4 = vld [vmem:[%s2730_s1 + $0x20] sm:$0xff]  ;;  %v90_v5 = vld [vmem:[%s2730_s1 + $0x18] sm:$0xff]  ;;  %v89_v6 = vld [vmem:[%s2730_s1 + $0x10] sm:$0xff]  ;;  %vm1603_vm6 = vcmask 1046534   ;;  %vm1605_vm7 = vcmask 1047559  }
   0x3   :  { %325 = vmatpush1.msra.mxu0 %v93_v1  ;;  %v88_v7 = vld [vmem:[%s2730_s1 + $0x8] sm:$0xff]  ;;  %v87_v8 = vld [vmem:[%s2730_s1] sm:$0xff]  ;;  %v25_v11 = vld [vmem:[%s2731_s0 + $0x10] sm:$0xff] }
   0x4   :  { %326 = vmatprep.subr.mxu0 %v92_v2  ;;  %v23_v9 = vld [vmem:[%s2731_s0] sm:$0xff]  ;;  %v24_v10 = vld [vmem:[%s2731_s0 + $0x8] sm:$0xff]  ;;  %v26_v12 = vld [vmem:[%s2731_s0 + $0x18] sm:$0xff] }
   0x5   :  { %327 = vmatpush1.msra.mxu0 %v91_v4  ;;  %v27_v13 = vld [vmem:[%s2731_s0 + $0x20] sm:$0xff]  ;;  %v28_v14 = vld [vmem:[%s2731_s0 + $0x28] sm:$0xff]  ;;  %v29_v15 = vld [vmem:[%s2731_s0 + $0x30] sm:$0xff] }
   0x6   :  { %328 = vmatprep.subr.mxu0 %v90_v5  ;;  %v30_v16 = vld [vmem:[%s2731_s0 + $0x38] sm:$0xff]  ;;  %v31_v17 = vld [vmem:[%s2731_s0 + $0x40] sm:$0xff]  ;;  %v32_v18 = vld [vmem:[%s2731_s0 + $0x48] sm:$0xff] }
   0x7   :  { %329 = vmatpush1.msra.mxu0 %v89_v6  ;;  %v892_v19 = vld [vmem:[%s2732_s3 + $0x78] sm:$0xff]  ;;  %v33_v20 = vld [vmem:[%s2731_s0 + $0x50] sm:$0xff]  ;;  %v890_v22 = vld [vmem:[%s2732_s3 + $0x68] sm:$0xff] }
   0x8   :  { %330 = vmatprep.subr.mxu0 %v88_v7  ;;  %v891_v21 = vld [vmem:[%s2732_s3 + $0x70] sm:$0xff]  ;;  %1719 = vmatpush1.msra.mxu1 %v892_v19  ;;  %v34_v23 = vld [vmem:[%s2731_s0 + $0x58] sm:$0xff]  ;;  %v889_v24 = vld [vmem:[%s2732_s3 + $0x60] sm:$0xff] }
   0x9   :  { %331 = vmatpush1.msra.mxu0 %v87_v8  ;;  %1688 = vmatprep.subr.mxu1 %v1753_v3  ;;  %v888_v25 = vld [vmem:[%s2732_s3 + $0x58] sm:$0xff]  ;;  %v35_v26 = vld [vmem:[%s2731_s0 + $0x60] sm:$0xff]  ;;  %v887_v27 = vld [vmem:[%s2732_s3 + $0x50] sm:$0xff] }
   0xa   :  { %1622 = vmatmul.mubr.msk.f32.vlgmr.msra.gmra.mxu0 %vm107_vm0, %v23_v9  ;;  %916 = vmatprep.subr.mxu0 %v1753_v3  ;;  %v886_v28 = vld [vmem:[%s2732_s3 + $0x48] sm:$0xff]  ;;  %v885_v30 = vld [vmem:[%s2732_s3 + $0x40] sm:$0xff]  ;;  %v884_v31 = vld [vmem:[%s2732_s3 + $0x38] sm:$0xff] }
   0xb   :  { %370 = vmatprep.mubr.f32.mxu0 %v1753_v3  ;;  %917 = vmatpush1.msra.mxu0 %v892_v19  ;;  %v36_v29 = vld [vmem:[%s2731_s0 + $0x68] sm:$0xff]  ;;  %v37_v32 = vld [vmem:[%s2731_s0 + $0x70] sm:$0xff]  ;;  %v38_v35 = vld [vmem:[%s2731_s0 + $0x78] sm:$0xff] }
   0xc   :  { %918 = vmatprep.subr.mxu0 %v1753_v3  ;;  %1720 = vmatpush1.msra.mxu1 %v891_v21  ;;  %v883_v33 = vld [vmem:[%s2732_s3 + $0x30] sm:$0xff]  ;;  %v882_v34 = vld [vmem:[%s2732_s3 + $0x28] sm:$0xff]  ;;  %v881_v36 = vld [vmem:[%s2732_s3 + $0x20] sm:$0xff] }
   0xd   :  { %919 = vmatpush1.msra.mxu0 %v891_v21  ;;  %1689 = vmatprep.subr.mxu1 %v1753_v3  ;;  %v880_v37 = vld [vmem:[%s2732_s3 + $0x18] sm:$0xff]  ;;  %v39_v38 = vld [vmem:[%s2731_s0 + $0x80] sm:$0xff]  ;;  %v1959_v39 = vld [vmem:[%s2732_s3 + $0x10] sm:$0xff] }
   0xe   :  { %1623 = vmatmul.mubr.msk.f32.gmra.mxu0 %vm107_vm0, %v24_v10  ;;  %1721 = vmatpush1.msra.mxu1 %v890_v22  ;;  %v1968_v40 = vld [vmem:[%s2732_s3 + $0x8] sm:$0xff]  ;;  %v1979_v42 = vld [vmem:[%s2732_s3] sm:$0xff]  ;;  %v1988_v43 = vld [vmem:[%s2732_s3 + $0xf8] sm:$0xff] }
   0xf   :  { %376 = vmatprep.mubr.f32.mxu0 %v1753_v3  ;;  %920 = vmatprep.subr.mxu0 %v1753_v3  ;;  %v40_v41 = vld [vmem:[%s2731_s0 + $0x88] sm:$0xff]  ;;  %v41_v44 = vld [vmem:[%s2731_s0 + $0x90] sm:$0xff]  ;;  %v42_v47 = vld [vmem:[%s2731_s0 + $0x98] sm:$0xff] }
  0x10   :  { %1690 = vmatprep.subr.mxu1 %v1753_v3  ;;  %921 = vmatpush1.msra.mxu0 %v890_v22  ;;  %v1999_v45 = vld [vmem:[%s2732_s3 + $0xf0] sm:$0xff]  ;;  %v2008_v46 = vld [vmem:[%s2732_s3 + $0xe8] sm:$0xff]  ;;  %v2019_v48 = vld [vmem:[%s2732_s3 + $0xe0] sm:$0xff] }
  0x11   :  { %1722 = vmatpush1.msra.mxu1 %v889_v24  ;;  %922 = vmatprep.subr.mxu0 %v1753_v3  ;;  %v2028_v49 = vld [vmem:[%s2732_s3 + $0xd8] sm:$0xff]  ;;  %v43_v50 = vld [vmem:[%s2731_s0 + $0xa0] sm:$0xff]  ;;  %v2039_v51 = vld [vmem:[%s2732_s3 + $0xd0] sm:$0xff] }
  0x12   :  { %1624 = vmatmul.mubr.msk.f32.gmra.mxu0 %vm107_vm0, %v25_v11  ;;  %1691 = vmatprep.subr.mxu1 %v1753_v3  ;;  %v2048_v52 = vld [vmem:[%s2732_s3 + $0xc8] sm:$0xff]  ;;  %v2059_v54 = vld [vmem:[%s2732_s3 + $0xc0] sm:$0xff]  ;;  %v2068_v55 = vld [vmem:[%s2732_s3 + $0xb8] sm:$0xff] }
  0x13   :  { %382 = vmatprep.mubr.f32.mxu0 %v1753_v3  ;;  %1723 = vmatpush1.msra.mxu1 %v888_v25  ;;  %v44_v53 = vld [vmem:[%s2731_s0 + $0xa8] sm:$0xff]  ;;  %v45_v56 = vld [vmem:[%s2731_s0 + $0xb0] sm:$0xff]  ;;  %v46_v59 = vld [vmem:[%s2731_s0 + $0xb8] sm:$0xff] }
  0x14   :  { %1692 = vmatprep.subr.mxu1 %v1753_v3  ;;  %923 = vmatpush1.msra.mxu0 %v889_v24  ;;  %v2079_v57 = vld [vmem:[%s2732_s3 + $0xb0] sm:$0xff]  ;;  %v2089_v58 = vld [vmem:[%s2732_s3 + $0xa8] sm:$0xff]  ;;  %v2100_v60 = vld [vmem:[%s2732_s3 + $0xa0] sm:$0xff] }
  0x15   :  { %1724 = vmatpush1.msra.mxu1 %v887_v27  ;;  %924 = vmatprep.subr.mxu0 %v1753_v3  ;;  %v896_v61 = vld [vmem:[%s2732_s3 + $0x98] sm:$0xff]  ;;  %v47_v62 = vld [vmem:[%s2731_s0 + $0xc0] sm:$0xff]  ;;  %v895_v63 = vld [vmem:[%s2732_s3 + $0x90] sm:$0xff] }
  0x16   :  { %1625 = vmatmul.mubr.msk.f32.gmra.mxu0 %vm107_vm0, %v26_v12  ;;  %1693 = vmatprep.subr.mxu1 %v1753_v3  ;;  %v894_v0 = vld [vmem:[%s2732_s3 + $0x88] sm:$0xff]  ;;  %v893_v2 = vld [vmem:[%s2732_s3 + $0x80] sm:$0xff]  ;;  %v49_v4 = vld [vmem:[%s2731_s0 + $0xd0] sm:$0xff] }
  0x17   :  { %388 = vmatprep.mubr.f32.mxu0 %v1753_v3  ;;  %1725 = vmatpush1.msra.mxu1 %v886_v28  ;;  %v48_v1 = vld [vmem:[%s2731_s0 + $0xc8] sm:$0xff]  ;;  %v50_v5 = vld [vmem:[%s2731_s0 + $0xd8] sm:$0xff]  ;;  %v51_v6 = vld [vmem:[%s2731_s0 + $0xe0] sm:$0xff] }
  0x18   :  { %1694 = vmatprep.subr.mxu1 %v1753_v3  ;;  %925 = vmatpush1.msra.mxu0 %v888_v25  ;;  %v52_v7 = vld [vmem:[%s2731_s0 + $0xe8] sm:$0xff]  ;;  %v53_v8 = vld [vmem:[%s2731_s0 + $0xf0] sm:$0xff]  ;;  %v54_v9 = vld [vmem:[%s2731_s0 + $0xf8] sm:$0xff] }
  0x19   :  { %1726 = vmatpush1.msra.mxu1 %v885_v30  ;;  %926 = vmatprep.subr.mxu0 %v1753_v3  ;;  %v55_v10 = vld [vmem:[%s2731_s0 + $0x100] sm:$0xff]  ;;  %v56_v11 = vld [vmem:[%s2731_s0 + $0x108] sm:$0xff]  ;;  %v57_v12 = vld [vmem:[%s2731_s0 + $0x110] sm:$0xff] }
  0x1a   :  { %1626 = vmatmul.mubr.msk.f32.gmra.mxu0 %vm107_vm0, %v27_v13  ;;  %1695 = vmatprep.subr.mxu1 %v1753_v3  ;;  %v58_v13 = vld [vmem:[%s2731_s0 + $0x118] sm:$0xff]  ;;  %v64_v19 = vld [vmem:[%s2731_s0 + $0x148] sm:$0xff]  ;;  %v67_v22 = vld [vmem:[%s2731_s0 + $0x160] sm:$0xff] }
  0x1b   :  { %394 = vmatprep.mubr.f32.mxu0 %v1753_v3  ;;  %1727 = vmatpush1.msra.mxu1 %v884_v31  ;;  %v66_v21 = vld [vmem:[%s2731_s0 + $0x158] sm:$0xff]  ;;  %v69_v24 = vld [vmem:[%s2731_s0 + $0x170] sm:$0xff] }
  0x1c   :  { %1696 = vmatprep.subr.mxu1 %v1753_v3  ;;  %927 = vmatpush1.msra.mxu0 %v887_v27  ;;  %v70_v25 = vld [vmem:[%s2731_s0 + $0x178] sm:$0xff] }
  0x1d   :  { %1728 = vmatpush1.msra.mxu1 %v883_v33  ;;  %928 = vmatprep.subr.mxu0 %v1753_v3 }
  0x1e   :  { %1627 = vmatmul.mubr.msk.f32.gmra.mxu0 %vm107_vm0, %v28_v14  ;;  %1697 = vmatprep.subr.mxu1 %v1753_v3  ;;  %v59_v14 = vld [vmem:[%s2731_s0 + $0x120] sm:$0xff] }
  0x1f   :  { %400 = vmatprep.mubr.f32.mxu0 %v1753_v3  ;;  %1729 = vmatpush1.msra.mxu1 %v882_v34 }
  0x20   :  { %1698 = vmatprep.subr.mxu1 %v1753_v3  ;;  %929 = vmatpush1.msra.mxu0 %v886_v28  ;;  %v72_v28 = vld [vmem:[%s2731_s0 + $0x188] sm:$0xff] }
  0x21   :  { %1730 = vmatpush1.msra.mxu1 %v881_v36  ;;  %930 = vmatprep.subr.mxu0 %v1753_v3 }
  0x22   :  { %1628 = vmatmul.mubr.msk.f32.gmra.mxu0 %vm107_vm0, %v29_v15  ;;  %1699 = vmatprep.subr.mxu1 %v1753_v3  ;;  %v60_v15 = vld [vmem:[%s2731_s0 + $0x128] sm:$0xff] }
  0x23   :  { %406 = vmatprep.mubr.f32.mxu0 %v1753_v3  ;;  %1731 = vmatpush1.msra.mxu1 %v880_v37 }
  0x24   :  { %1700 = vmatprep.subr.mxu1 %v1753_v3  ;;  %931 = vmatpush1.msra.mxu0 %v885_v30 }
  0x25   :  { %1732 = vmatpush1.msra.mxu1 %v1959_v39  ;;  %932 = vmatprep.subr.mxu0 %v1753_v3 }
  0x26   :  { %1629 = vmatmul.mubr.msk.f32.gmra.mxu0 %vm107_vm0, %v30_v16  ;;  %1701 = vmatprep.subr.mxu1 %v1753_v3  ;;  %v61_v16 = vld [vmem:[%s2731_s0 + $0x130] sm:$0xff] }
  0x27   :  { %412 = vmatprep.mubr.f32.mxu0 %v1753_v3  ;;  %1733 = vmatpush1.msra.mxu1 %v1968_v40 }
  0x28   :  { %1702 = vmatprep.subr.mxu1 %v1753_v3  ;;  %933 = vmatpush1.msra.mxu0 %v884_v31  ;;  %v73_v31 = vld [vmem:[%s2731_s0 + $0x190] sm:$0xff] }
  0x29   :  { %1734 = vmatpush1.msra.mxu1 %v1979_v42  ;;  %934 = vmatprep.subr.mxu0 %v1753_v3 }
  0x2a   :  { %1630 = vmatmul.mubr.msk.f32.gmra.mxu0 %vm107_vm0, %v31_v17  ;;  %1703 = vmatprep.subr.mxu1 %v1753_v3  ;;  %v62_v17 = vld [vmem:[%s2731_s0 + $0x138] sm:$0xff] }
  0x2b   :  { %418 = vmatprep.mubr.f32.mxu0 %v1753_v3  ;;  %1735 = vmatpush2.msra.mxu1 %v1988_v43 }
  0x2c   :  { %1704 = vmatprep.subr.mxu1 %v1753_v3  ;;  %935 = vmatpush1.msra.mxu0 %v883_v33 }
  0x2d   :  { %1736 = vmatpush2.msra.mxu1 %v1999_v45  ;;  %936 = vmatprep.subr.mxu0 %v1753_v3 }
  0x2e   :  { %1631 = vmatmul.mubr.msk.f32.gmra.mxu0 %vm107_vm0, %v32_v18  ;;  %1705 = vmatprep.subr.mxu1 %v1753_v3  ;;  %v63_v18 = vld [vmem:[%s2731_s0 + $0x140] sm:$0xff] }
  0x2f   :  { %424 = vmatprep.mubr.f32.mxu0 %v1753_v3  ;;  %1737 = vmatpush2.msra.mxu1 %v2008_v46 }
  0x30   :  { %1706 = vmatprep.subr.mxu1 %v1753_v3  ;;  %937 = vmatpush1.msra.mxu0 %v882_v34  ;;  %v74_v34 = vld [vmem:[%s2731_s0 + $0x198] sm:$0xff] }
  0x31   :  { %1738 = vmatpush2.msra.mxu1 %v2019_v48  ;;  %938 = vmatprep.subr.mxu0 %v1753_v3 }
  0x32   :  { %1632 = vmatmul.mubr.msk.f32.gmra.mxu0 %vm107_vm0, %v33_v20  ;;  %1707 = vmatprep.subr.mxu1 %v1753_v3  ;;  %v65_v20 = vld [vmem:[%s2731_s0 + $0x150] sm:$0xff] }
  0x33   :  { %430 = vmatprep.mubr.f32.mxu0 %v1753_v3  ;;  %1739 = vmatpush2.msra.mxu1 %v2028_v49 }
  0x34   :  { %1708 = vmatprep.subr.mxu1 %v1753_v3  ;;  %939 = vmatpush1.msra.mxu0 %v881_v36 }
  0x35   :  { %1740 = vmatpush2.msra.mxu1 %v2039_v51  ;;  %940 = vmatprep.subr.mxu0 %v1753_v3 }
  0x36   :  { %1633 = vmatmul.mubr.msk.f32.gmra.mxu0 %vm107_vm0, %v34_v23  ;;  %1709 = vmatprep.subr.mxu1 %v1753_v3  ;;  %v68_v23 = vld [vmem:[%s2731_s0 + $0x168] sm:$0xff] }
  0x37   :  { %436 = vmatprep.mubr.f32.mxu0 %v1753_v3  ;;  %1741 = vmatpush2.msra.mxu1 %v2048_v52 }
  0x38   :  { %1710 = vmatprep.subr.mxu1 %v1753_v3  ;;  %941 = vmatpush1.msra.mxu0 %v880_v37  ;;  %v75_v37 = vld [vmem:[%s2731_s0 + $0x1a0] sm:$0xff] }
  0x39   :  { %1742 = vmatpush2.msra.mxu1 %v2059_v54  ;;  %942 = vmatprep.subr.mxu0 %v1753_v3 }
  0x3a   :  { %1634 = vmatmul.mubr.msk.f32.gmra.mxu0 %vm107_vm0, %v35_v26  ;;  %1711 = vmatprep.subr.mxu1 %v1753_v3  ;;  %v71_v26 = vld [vmem:[%s2731_s0 + $0x180] sm:$0xff] }
  0x3b   :  { %442 = vmatprep.mubr.f32.mxu0 %v1753_v3  ;;  %1743 = vmatpush2.msra.mxu1 %v2068_v55 }
  0x3c   :  { %1712 = vmatprep.subr.mxu1 %v1753_v3  ;;  %943 = vmatpush1.msra.mxu0 %v1959_v39  ;;  %v97_v39 = vlaneseq }
  0x3d   :  { %1744 = vmatpush2.msra.mxu1 %v2079_v57  ;;  %944 = vmatprep.subr.mxu0 %v1753_v3 }
  0x3e   :  { %1635 = vmatmul.mubr.msk.f32.gmra.mxu0 %vm107_vm0, %v36_v29  ;;  %1713 = vmatprep.subr.mxu1 %v1753_v3 }
  0x3f   :  { %448 = vmatprep.mubr.f32.mxu0 %v1753_v3  ;;  %1745 = vmatpush2.msra.mxu1 %v2089_v58 }
  0x40   :  { %1714 = vmatprep.subr.mxu1 %v1753_v3  ;;  %945 = vmatpush1.msra.mxu0 %v1968_v40 }
  0x41   :  { %1746 = vmatpush2.msra.mxu1 %v2100_v60  ;;  %946 = vmatprep.subr.mxu0 %v1753_v3 }
  0x42   :  { %1636 = vmatmul.mubr.msk.f32.gmra.mxu0 %vm107_vm0, %v37_v32  ;;  %1715 = vmatprep.subr.mxu1 %v1753_v3 }
  0x43   :  { %454 = vmatprep.mubr.f32.mxu0 %v1753_v3  ;;  %1747 = vmatpush2.msra.mxu1 %v896_v61 }
  0x44   :  { %1716 = vmatprep.subr.mxu1 %v1753_v3  ;;  %947 = vmatpush1.msra.mxu0 %v1979_v42 }
  0x45   :  { %1748 = vmatpush2.msra.mxu1 %v895_v63  ;;  %948 = vmatprep.subr.mxu0 %v1753_v3 }
  0x46   :  { %1637 = vmatmul.mubr.msk.f32.gmra.mxu0 %vm107_vm0, %v38_v35  ;;  %1717 = vmatprep.subr.mxu1 %v1753_v3 }
  0x47   :  { %460 = vmatprep.mubr.f32.mxu0 %v1753_v3  ;;  %949 = vmatpush2.msra.mxu0 %v1988_v43  ;;  %v98_v43 = vshrl.u32 %v97_v39, 7 }
  0x48   :  { %1749 = vmatpush2.msra.mxu1 %v894_v0  ;;  %950 = vmatprep.subr.mxu0 %v1753_v3 }
  0x49   :  { %1718 = vmatprep.subr.mxu1 %v1753_v3  ;;  %951 = vmatpush2.msra.mxu0 %v1999_v45  ;;  %v77_v45 = vld [vmem:[%s2731_s0 + $0x1b0] sm:$0xff] }
  0x4a   :  { %1638 = vmatmul.mubr.msk.f32.gmra.mxu0 %vm107_vm0, %v39_v38  ;;  %1750 = vmatpush2.msra.mxu1 %v893_v2 }
  0x4b   :  { %466 = vmatprep.mubr.f32.mxu0 %v1753_v3  ;;  %952 = vmatprep.subr.mxu0 %v1753_v3 }
  0x4c   :  { %953 = vmatpush2.msra.mxu0 %v2008_v46 }
  0x4d   :  { %954 = vmatprep.subr.mxu0 %v1753_v3 }
  0x4e   :  { %1639 = vmatmul.mubr.msk.f32.gmra.mxu0 %vm107_vm0, %v40_v41  ;;  %v76_v41 = vld [vmem:[%s2731_s0 + $0x1a8] sm:$0xff] }
  0x4f   :  { %472 = vmatprep.mubr.f32.mxu0 %v1753_v3  ;;  %955 = vmatpush2.msra.mxu0 %v2019_v48 }
  0x50   :  { %956 = vmatprep.subr.mxu0 %v1753_v3 }
  0x51   :  { %957 = vmatpush2.msra.mxu0 %v2028_v49  ;;  %v95_v49 = vld [vmem:[%s2733_s2] sm:$0x3] }
  0x52   :  { %1640 = vmatmul.mubr.msk.f32.gmra.mxu0 %vm107_vm0, %v41_v44  ;;  %958 = vmatprep.subr.mxu0 %v1753_v3 }
  0x53   :  { %478 = vmatprep.mubr.f32.mxu0 %v1753_v3  ;;  %959 = vmatpush2.msra.mxu0 %v2039_v51  ;;  %v78_v51 = vld [vmem:[%s2731_s0 + $0x1b8] sm:$0xff] }
  0x54   :  { %960 = vmatprep.subr.mxu0 %v1753_v3 }
  0x55   :  { %961 = vmatpush2.msra.mxu0 %v2048_v52 }
  0x56   :  { %1641 = vmatmul.mubr.msk.f32.gmra.mxu0 %vm107_vm0, %v42_v47  ;;  %962 = vmatprep.subr.mxu0 %v1753_v3  ;;  %v99_v47 = vsub.s32 0, %v98_v43 }
  0x57   :  { %484 = vmatprep.mubr.f32.mxu0 %v1753_v3  ;;  %963 = vmatpush2.msra.mxu0 %v2059_v54 }
  0x58   :  { %964 = vmatprep.subr.mxu0 %v1753_v3 }
  0x59   :  { %965 = vmatpush2.msra.mxu0 %v2068_v55 }
  0x5a   :  { %1642 = vmatmul.mubr.msk.f32.gmra.mxu0 %vm107_vm0, %v43_v50  ;;  %966 = vmatprep.subr.mxu0 %v1753_v3  ;;  %v103_v50 = vsub.s32 1, %v98_v43 }
  0x5b   :  { %490 = vmatprep.mubr.f32.mxu0 %v1753_v3  ;;  %967 = vmatpush2.msra.mxu0 %v2079_v57 }
  0x5c   :  { %968 = vmatprep.subr.mxu0 %v1753_v3  ;;  %v2346_v55 = vrot.slane %v95_v49, %v103_v50 }
  0x5d   :  { %969 = vmatpush2.msra.mxu0 %v2089_v58 }
  0x5e   :  { %1643 = vmatmul.mubr.msk.f32.gmra.mxu0 %vm107_vm0, %v44_v53  ;;  %970 = vmatprep.subr.mxu0 %v1753_v3  ;;  %v2343_v53 = vrot.slane %v95_v49, %v99_v47 }
  0x5f   :  { %496 = vmatprep.mubr.f32.mxu0 %v1753_v3  ;;  %971 = vmatpush2.msra.mxu0 %v2100_v60 }
  0x60   :  { %972 = vmatprep.subr.mxu0 %v1753_v3 }
  0x61   :  { %973 = vmatpush2.msra.mxu0 %v896_v61 }
  0x62   :  { %1644 = vmatmul.mubr.msk.f32.gmra.mxu0 %vm107_vm0, %v45_v56  ;;  %974 = vmatprep.subr.mxu0 %v1753_v3  ;;  %v79_v56 = vld [vmem:[%s2731_s0 + $0x1c0] sm:$0xff] }
  0x63   :  { %502 = vmatprep.mubr.f32.mxu0 %v1753_v3  ;;  %975 = vmatpush2.msra.mxu0 %v895_v63 }
  0x64   :  { %976 = vmatprep.subr.mxu0 %v1753_v3 }
  0x65   :  { %977 = vmatpush2.msra.mxu0 %v894_v0 }
  0x66   :  { %1645 = vmatmul.mubr.msk.f32.gmra.mxu0 %vm107_vm0, %v46_v59  ;;  %978 = vmatprep.subr.mxu0 %v1753_v3 }
  0x67   :  { %508 = vmatprep.mubr.f32.mxu0 %v1753_v3  ;;  %979 = vmatpush2.msra.mxu0 %v893_v2 }
  0x6a   :  { %1646 = vmatmul.mubr.msk.f32.gmra.mxu0 %vm107_vm0, %v47_v62  ;;  %v80_v62 = vld [vmem:[%s2731_s0 + $0x1c8] sm:$0xff] }
  0x6b   :  { %514 = vmatprep.mubr.f32.mxu0 %v1753_v3 }
  0x6e   :  { %1647 = vmatmul.mubr.msk.f32.gmra.mxu0 %vm107_vm0, %v48_v1 }
  0x6f   :  { %520 = vmatprep.mubr.f32.mxu0 %v1753_v3 }
  0x72   :  { %1648 = vmatmul.mubr.msk.f32.gmra.mxu0 %vm107_vm0, %v49_v4 }
  0x73   :  { %526 = vmatprep.mubr.f32.mxu0 %v1753_v3 }
  0x76   :  { %1649 = vmatmul.mubr.msk.f32.gmra.mxu0 %vm107_vm0, %v50_v5 }
  0x77   :  { %532 = vmatprep.mubr.f32.mxu0 %v1753_v3 }
  0x7a   :  { %1650 = vmatmul.mubr.msk.f32.gmra.mxu0 %vm107_vm0, %v51_v6  ;;  %v81_v6 = vld [vmem:[%s2731_s0 + $0x1d0] sm:$0xff] }
  0x7b   :  { %538 = vmatprep.mubr.f32.mxu0 %v1753_v3 }
  0x7e   :  { %1651 = vmatmul.mubr.msk.f32.gmra.mxu0 %vm107_vm0, %v52_v7 }
  0x7f   :  { %544 = vmatprep.mubr.f32.mxu0 %v1753_v3 }
  0x82   :  { %1652 = vmatmul.mubr.msk.f32.gmra.mxu0 %vm107_vm0, %v53_v8 }
  0x83   :  { %550 = vmatprep.mubr.f32.mxu0 %v1753_v3 }
  0x86   :  { %1653 = vmatmul.mubr.msk.f32.gmra.mxu0 %vm107_vm0, %v54_v9 }
  0x87   :  { %556 = vmatprep.mubr.f32.mxu0 %v1753_v3 }
  0x8a   :  { %1654 = vmatmul.mubr.msk.f32.gmra.mxu0 %vm107_vm0, %v55_v10 }
  0x8b   :  { %562 = vmatprep.mubr.f32.mxu0 %v1753_v3 }
  0x8e   :  { %1655 = vmatmul.mubr.msk.f32.gmra.mxu0 %vm107_vm0, %v56_v11 }
  0x8f   :  { %568 = vmatprep.mubr.f32.mxu0 %v1753_v3 }
  0x92   :  { %1656 = vmatmul.mubr.msk.f32.gmra.mxu0 %vm107_vm0, %v57_v12 }
  0x93   :  { %574 = vmatprep.mubr.f32.mxu0 %v1753_v3 }
  0x96   :  { %1657 = vmatmul.mubr.msk.f32.gmra.mxu0 %vm107_vm0, %v58_v13  ;;  %v82_v13 = vld [vmem:[%s2731_s0 + $0x1d8] sm:$0xff] }
  0x97   :  { %580 = vmatprep.mubr.f32.mxu0 %v1753_v3 }
  0x9a   :  { %1658 = vmatmul.mubr.msk.f32.gmra.mxu0 %vm107_vm0, %v59_v14 }
  0x9b   :  { %586 = vmatprep.mubr.f32.mxu0 %v1753_v3 }
  0x9e   :  { %1659 = vmatmul.mubr.msk.f32.gmra.mxu0 %vm107_vm0, %v60_v15 }
  0x9f   :  { %592 = vmatprep.mubr.f32.mxu0 %v1753_v3 }
  0xa2   :  { %1660 = vmatmul.mubr.msk.f32.gmra.mxu0 %vm107_vm0, %v61_v16 }
  0xa3   :  { %598 = vmatprep.mubr.f32.mxu0 %v1753_v3 }
  0xa6   :  { %1661 = vmatmul.mubr.msk.f32.gmra.mxu0 %vm107_vm0, %v62_v17 }
  0xa7   :  { %604 = vmatprep.mubr.f32.mxu0 %v1753_v3 }
  0xaa   :  { %1662 = vmatmul.mubr.msk.f32.gmra.mxu0 %vm107_vm0, %v63_v18 }
  0xab   :  { %610 = vmatprep.mubr.f32.mxu0 %v1753_v3 }
  0xae   :  { %1663 = vmatmul.mubr.msk.f32.gmra.mxu0 %vm107_vm0, %v64_v19 }
  0xaf   :  { %616 = vmatprep.mubr.f32.mxu0 %v1753_v3 }
  0xb2   :  { %1664 = vmatmul.mubr.msk.f32.gmra.mxu0 %vm107_vm0, %v65_v20  ;;  %v83_v20 = vld [vmem:[%s2731_s0 + $0x1e0] sm:$0xff] }
  0xb3   :  { %622 = vmatprep.mubr.f32.mxu0 %v1753_v3 }
  0xb6   :  { %1665 = vmatmul.mubr.msk.f32.gmra.mxu0 %vm107_vm0, %v66_v21 }
  0xb7   :  { %628 = vmatprep.mubr.f32.mxu0 %v1753_v3 }
  0xba   :  { %1666 = vmatmul.mubr.msk.f32.gmra.mxu0 %vm107_vm0, %v67_v22 }
  0xbb   :  { %634 = vmatprep.mubr.f32.mxu0 %v1753_v3 }
  0xbe   :  { %1667 = vmatmul.mubr.msk.f32.gmra.mxu0 %vm107_vm0, %v68_v23 }
  0xbf   :  { %640 = vmatprep.mubr.f32.mxu0 %v1753_v3 }
  0xc2   :  { %1668 = vmatmul.mubr.msk.f32.gmra.mxu0 %vm107_vm0, %v69_v24 }
  0xc3   :  { %646 = vmatprep.mubr.f32.mxu0 %v1753_v3 }
  0xc6   :  { %1669 = vmatmul.mubr.msk.f32.gmra.mxu0 %vm107_vm0, %v70_v25 }
  0xc7   :  { %652 = vmatprep.mubr.f32.mxu0 %v1753_v3 }
  0xca   :  { %v2277_v27 = vpop.f32.mrf.mxu0  ;;  %1670 = vmatmul.mubr.msk.f32.gmra.mxu0 %vm107_vm0, %v71_v26 }
  0xcb   :  { %658 = vmatprep.mubr.f32.mxu0 %v1753_v3 }
  0xcc   :  { %v2284_v29 = vpop.f32.mrf.mxu0 }
  0xce   :  { %v2286_v30 = vpop.f32.mrf.mxu0  ;;  %1671 = vmatmul.mubr.msk.f32.gmra.mxu0 %vm107_vm0, %v72_v28  ;;  %v84_v28 = vld [vmem:[%s2731_s0 + $0x1e8] sm:$0xff] }
  0xcf   :  { %664 = vmatprep.mubr.f32.mxu0 %v1753_v3 }
  0xd0   :  { %v2293_v32 = vpop.f32.mrf.mxu0 }
  0xd2   :  { %v2295_v33 = vpop.f32.mrf.mxu0  ;;  %1672 = vmatmul.mubr.msk.f32.gmra.mxu0 %vm107_vm0, %v73_v31 }
  0xd3   :  { %670 = vmatprep.mubr.f32.mxu0 %v1753_v3 }
  0xd4   :  { %v2302_v35 = vpop.f32.mrf.mxu0 }
  0xd6   :  { %v2304_v36 = vpop.f32.mrf.mxu0  ;;  %1673 = vmatmul.mubr.msk.f32.gmra.mxu0 %vm107_vm0, %v74_v34 }
  0xd7   :  { %676 = vmatprep.mubr.f32.mxu0 %v1753_v3 }
  0xd8   :  { %v2311_v38 = vpop.f32.mrf.mxu0 }
  0xda   :  { %v2313_v40 = vpop.f32.mrf.mxu0  ;;  %1674 = vmatmul.mubr.msk.f32.gmra.mxu0 %vm107_vm0, %v75_v37 }
  0xdb   :  { %682 = vmatprep.mubr.f32.mxu0 %v1753_v3 }
  0xdc   :  { %v2320_v42 = vpop.f32.mrf.mxu0 }
  0xde   :  { %v2322_v44 = vpop.f32.mrf.mxu0  ;;  %1675 = vmatmul.mubr.msk.f32.gmra.mxu0 %vm107_vm0, %v76_v41 }
  0xdf   :  { %688 = vmatprep.mubr.f32.mxu0 %v1753_v3 }
  0xe0   :  { %v2329_v46 = vpop.f32.mrf.mxu0 }
  0xe2   :  { %v2331_v48 = vpop.f32.mrf.mxu0  ;;  %1676 = vmatmul.mubr.msk.f32.gmra.mxu0 %vm107_vm0, %v77_v45  ;;  %v85_v45 = vld [vmem:[%s2731_s0 + $0x1f0] sm:$0xff] }
  0xe3   :  { %694 = vmatprep.mubr.f32.mxu0 %v1753_v3 }
  0xe4   :  { %v2341_v52 = vpop.f32.mrf.mxu0 }
  0xe6   :  { %v408_v54 = vpop.f32.mrf.mxu0  ;;  %1677 = vmatmul.mubr.msk.f32.gmra.mxu0 %vm107_vm0, %v78_v51  ;;  %v369_v51 = vadd.f32 %v2284_v29, %v2346_v55 }
  0xe7   :  { %700 = vmatprep.mubr.f32.mxu0 %v1753_v3  ;;  %v409_v57 = vadd.f32 %v408_v54, %v2343_v53 }
  0xe8   :  { %v410_v58 = vpop.f32.mrf.mxu0 }
  0xe9   :  { %v411_v59 = vadd.f32 %v410_v58, %v2346_v55  ;;  %v763_v63 = vmax.f32 %v409_v57, 0.0  ;;  %v86_v58 = vld [vmem:[%s2731_s0 + $0x1f8] sm:$0xff] }
  0xea   :  { %v414_v60 = vpop.f32.mrf.mxu0  ;;  %1678 = vmatmul.mubr.msk.f32.gmra.mxu0 %vm107_vm0, %v79_v56 }
  0xeb   :  { %706 = vmatprep.mubr.f32.mxu0 %v1753_v3  ;;  %v764_v61 = vmax.f32 %v411_v59, 0.0  ;;  %v415_v0 = vadd.f32 %v414_v60, %v2343_v53  ;;  %v367_v59 = vadd.f32 %v2277_v27, %v2343_v53  ;;  %v373_v27 = vadd.f32 %v2286_v30, %v2343_v53 }
  0xec   :  { %v416_v1 = vpop.f32.mrf.mxu0  ;;  %v379_v30 = vadd.f32 %v2295_v33, %v2343_v53  ;;  %v385_v33 = vadd.f32 %v2304_v36, %v2343_v53  ;;  %v391_v36 = vadd.f32 %v2313_v40, %v2343_v53  ;;  %v397_v40 = vadd.f32 %v2322_v44, %v2343_v53 }
  0xed   :  { %v417_v2 = vadd.f32 %v416_v1, %v2346_v55  ;;  %1015 = vmatprep.mubr.f32.mxu1 %v764_v61  ;;  %v765_v7 = vmax.f32 %v415_v0, 0.0  ;;  %v403_v44 = vadd.f32 %v2331_v48, %v2343_v53 }
  0xee   :  { %v420_v4 = vpop.f32.mrf.mxu0  ;;  %1679 = vmatmul.mubr.msk.f32.gmra.mxu0 %vm107_vm0, %v80_v62  ;;  %1016 = vmatmul.mubr.f32.vlgmr.msra.gmra.mxu1 %v763_v63  ;;  %v750_v62 = vmax.f32 %v369_v51, 0.0  ;;  %v375_v63 = vadd.f32 %v2293_v32, %v2346_v55  ;;  %v381_v32 = vadd.f32 %v2302_v35, %v2346_v55  ;;  %v387_v35 = vadd.f32 %v2311_v38, %v2346_v55 }
  0xef   :  { %v766_v5 = vmax.f32 %v417_v2, 0.0  ;;  %712 = vmatprep.mubr.f32.mxu0 %v1753_v3  ;;  %v421_v8 = vadd.f32 %v420_v4, %v2343_v53  ;;  %v749_v2 = vmax.f32 %v367_v59, 0.0  ;;  %v393_v38 = vadd.f32 %v2320_v42, %v2346_v55 }
  0xf0   :  { %v422_v9 = vpop.f32.mrf.mxu0  ;;  %v399_v42 = vadd.f32 %v2329_v46, %v2346_v55  ;;  %v405_v46 = vadd.f32 %v2341_v52, %v2346_v55  ;;  %v759_v59 = vmax.f32 %v397_v40, 0.0 }
  0xf1   :  { %v423_v10 = vadd.f32 %v422_v9, %v2346_v55  ;;  %1020 = vmatprep.mubr.f32.mxu1 %v766_v5  ;;  %v767_v14 = vmax.f32 %v421_v8, 0.0 }
  0xf2   :  { %v426_v11 = vpop.f32.mrf.mxu0  ;;  %1680 = vmatmul.mubr.msk.f32.gmra.mxu0 %vm107_vm0, %v81_v6  ;;  %1021 = vmatmul.mubr.f32.gmra.mxu1 %v765_v7  ;;  %v752_v7 = vmax.f32 %v375_v63, 0.0 }
  0xf3   :  { %v768_v12 = vmax.f32 %v423_v10, 0.0  ;;  %718 = vmatprep.mubr.f32.mxu0 %v1753_v3  ;;  %v427_v15 = vadd.f32 %v426_v11, %v2343_v53  ;;  %v751_v11 = vmax.f32 %v373_v27, 0.0 }
  0xf4   :  { %v428_v16 = vpop.f32.mrf.mxu0 }
  0xf5   :  { %v429_v17 = vadd.f32 %v428_v16, %v2346_v55  ;;  %1025 = vmatprep.mubr.f32.mxu1 %v768_v12  ;;  %v769_v21 = vmax.f32 %v427_v15, 0.0  ;;  %v754_v15 = vmax.f32 %v381_v32, 0.0 }
  0xf6   :  { %v432_v18 = vpop.f32.mrf.mxu0  ;;  %1681 = vmatmul.mubr.msk.f32.gmra.mxu0 %vm107_vm0, %v82_v13  ;;  %1026 = vmatmul.mubr.f32.gmra.mxu1 %v767_v14 }
  0xf7   :  { %v770_v19 = vmax.f32 %v429_v17, 0.0  ;;  %724 = vmatprep.mubr.f32.mxu0 %v1753_v3  ;;  %v433_v22 = vadd.f32 %v432_v18, %v2343_v53 }
  0xf8   :  { %v434_v23 = vpop.f32.mrf.mxu0 }
  0xf9   :  { %v435_v24 = vadd.f32 %v434_v23, %v2346_v55  ;;  %1030 = vmatprep.mubr.f32.mxu1 %v770_v19  ;;  %v771_v31 = vmax.f32 %v433_v22, 0.0  ;;  %v753_v19 = vmax.f32 %v379_v30, 0.0  ;;  %v756_v23 = vmax.f32 %v387_v35, 0.0 }
  0xfa   :  { %v438_v25 = vpop.f32.mrf.mxu0  ;;  %1682 = vmatmul.mubr.msk.f32.gmra.mxu0 %vm107_vm0, %v83_v20  ;;  %1031 = vmatmul.mubr.f32.gmra.mxu1 %v769_v21 }
  0xfb   :  { %v772_v26 = vmax.f32 %v435_v24, 0.0  ;;  %730 = vmatprep.mubr.f32.mxu0 %v1753_v3  ;;  %v439_v34 = vadd.f32 %v438_v25, %v2343_v53 }
  0xfc   :  { %v440_v37 = vpop.f32.mrf.mxu0 }
  0xfd   :  { %v441_v39 = vadd.f32 %v440_v37, %v2346_v55  ;;  %1035 = vmatprep.mubr.f32.mxu1 %v772_v26  ;;  %v773_v47 = vmax.f32 %v439_v34, 0.0 }
  0xfe   :  { %v444_v41 = vpop.f32.mrf.mxu0  ;;  %1683 = vmatmul.mubr.msk.f32.gmra.mxu0 %vm107_vm0, %v84_v28  ;;  %1036 = vmatmul.mubr.f32.gmra.mxu1 %v771_v31  ;;  %v755_v28 = vmax.f32 %v385_v33, 0.0 }
  0xff   :  { %v774_v43 = vmax.f32 %v441_v39, 0.0  ;;  %736 = vmatprep.mubr.f32.mxu0 %v1753_v3  ;;  %v445_v49 = vadd.f32 %v444_v41, %v2343_v53  ;;  %v758_v39 = vmax.f32 %v393_v38, 0.0 }
 0x100   :  { %v446_v50 = vpop.f32.mrf.mxu0 }
 0x101   :  { %v447_v54 = vadd.f32 %v446_v50, %v2346_v55  ;;  %1040 = vmatprep.mubr.f32.mxu1 %v774_v43  ;;  %v775_v60 = vmax.f32 %v445_v49, 0.0 }
 0x102   :  { %v450_v56 = vpop.f32.mrf.mxu0  ;;  %1684 = vmatmul.mubr.msk.f32.gmra.mxu0 %vm107_vm0, %v85_v45  ;;  %1041 = vmatmul.mubr.f32.gmra.mxu1 %v773_v47  ;;  %v757_v47 = vmax.f32 %v391_v36, 0.0 }
 0x103   :  { %v776_v57 = vmax.f32 %v447_v54, 0.0  ;;  %742 = vmatprep.mubr.f32.mxu0 %v1753_v3  ;;  %v451_v29 = vadd.f32 %v450_v56, %v2343_v53  ;;  %v760_v54 = vmax.f32 %v399_v42, 0.0 }
 0x104   :  { %v452_v61 = vpop.f32.mrf.mxu0 }
 0x105   :  { %v453_v0 = vadd.f32 %v452_v61, %v2346_v55  ;;  %1045 = vmatprep.mubr.f32.mxu1 %v776_v57  ;;  %v777_v4 = vmax.f32 %v451_v29, 0.0 }
 0x106   :  { %v456_v1 = vpop.f32.mrf.mxu0  ;;  %1685 = vmatmul.mubr.msk.f32.gmra.mxu0 %vm107_vm0, %v86_v58  ;;  %1046 = vmatmul.mubr.f32.gmra.mxu1 %v775_v60 }
 0x107   :  { %v778_v3 = vmax.f32 %v453_v0, 0.0  ;;  %980 = vmatprep.mubr.f32.mxu0 %v750_v62  ;;  %v457_v5 = vadd.f32 %v456_v1, %v2343_v53  ;;  %v762_v62 = vmax.f32 %v405_v46, 0.0  ;;  %v761_v1 = vmax.f32 %v403_v44, 0.0 }
 0x108   :  { %v458_v6 = vpop.f32.mrf.mxu0 }
 0x109   :  { %v459_v8 = vadd.f32 %v458_v6, %v2346_v55  ;;  %1050 = vmatprep.mubr.f32.mxu1 %v778_v3  ;;  %v779_v12 = vmax.f32 %v457_v5, 0.0 }
 0x10a   :  { %v462_v9 = vpop.f32.mrf.mxu0  ;;  %981 = vmatmul.mubr.f32.vlgmr.msra.gmra.mxu0 %v749_v2  ;;  %1051 = vmatmul.mubr.f32.gmra.mxu1 %v777_v4 }
 0x10b   :  { %v780_v10 = vmax.f32 %v459_v8, 0.0  ;;  %985 = vmatprep.mubr.f32.mxu0 %v752_v7  ;;  %v463_v13 = vadd.f32 %v462_v9, %v2343_v53 }
 0x10c   :  { %v464_v14 = vpop.f32.mrf.mxu0 }
 0x10d   :  { %v465_v16 = vadd.f32 %v464_v14, %v2346_v55  ;;  %1055 = vmatprep.mubr.f32.mxu1 %v780_v10  ;;  %v781_v20 = vmax.f32 %v463_v13, 0.0 }
 0x10e   :  { %v468_v17 = vpop.f32.mrf.mxu0  ;;  %986 = vmatmul.mubr.f32.gmra.mxu0 %v751_v11  ;;  %1056 = vmatmul.mubr.f32.gmra.mxu1 %v779_v12 }
 0x10f   :  { %v782_v18 = vmax.f32 %v465_v16, 0.0  ;;  %990 = vmatprep.mubr.f32.mxu0 %v754_v15  ;;  %v469_v21 = vadd.f32 %v468_v17, %v2343_v53 }
 0x110   :  { %v470_v22 = vpop.f32.mrf.mxu0 }
 0x111   :  { %v471_v24 = vadd.f32 %v470_v22, %v2346_v55  ;;  %1060 = vmatprep.mubr.f32.mxu1 %v782_v18  ;;  %v783_v31 = vmax.f32 %v469_v21, 0.0 }
 0x112   :  { %v474_v25 = vpop.f32.mrf.mxu0  ;;  %991 = vmatmul.mubr.f32.gmra.mxu0 %v753_v19  ;;  %1061 = vmatmul.mubr.f32.gmra.mxu1 %v781_v20 }
 0x113   :  { %v784_v26 = vmax.f32 %v471_v24, 0.0  ;;  %995 = vmatprep.mubr.f32.mxu0 %v756_v23  ;;  %v475_v34 = vadd.f32 %v474_v25, %v2343_v53 }
 0x114   :  { %v476_v37 = vpop.f32.mrf.mxu0 }
 0x115   :  { %v477_v41 = vadd.f32 %v476_v37, %v2346_v55  ;;  %1065 = vmatprep.mubr.f32.mxu1 %v784_v26  ;;  %v785_v49 = vmax.f32 %v475_v34, 0.0 }
 0x116   :  { %v480_v43 = vpop.f32.mrf.mxu0  ;;  %996 = vmatmul.mubr.f32.gmra.mxu0 %v755_v28  ;;  %1066 = vmatmul.mubr.f32.gmra.mxu1 %v783_v31 }
 0x117   :  { %v786_v45 = vmax.f32 %v477_v41, 0.0  ;;  %1000 = vmatprep.mubr.f32.mxu0 %v758_v39  ;;  %v481_v50 = vadd.f32 %v480_v43, %v2343_v53 }
 0x118   :  { %v482_v51 = vpop.f32.mrf.mxu0 }
 0x119   :  { %v483_v56 = vadd.f32 %v482_v51, %v2346_v55  ;;  %1070 = vmatprep.mubr.f32.mxu1 %v786_v45  ;;  %v787_v60 = vmax.f32 %v481_v50, 0.0 }
 0x11a   :  { %v486_v57 = vpop.f32.mrf.mxu0  ;;  %1001 = vmatmul.mubr.f32.gmra.mxu0 %v757_v47  ;;  %1071 = vmatmul.mubr.f32.gmra.mxu1 %v785_v49 }
 0x11b   :  { %v788_v58 = vmax.f32 %v483_v56, 0.0  ;;  %1005 = vmatprep.mubr.f32.mxu0 %v760_v54  ;;  %v487_v29 = vadd.f32 %v486_v57, %v2343_v53 }
 0x11c   :  { %v488_v61 = vpop.f32.mrf.mxu0 }
 0x11d   :  { %v489_v63 = vadd.f32 %v488_v61, %v2346_v55  ;;  %1075 = vmatprep.mubr.f32.mxu1 %v788_v58  ;;  %v789_v3 = vmax.f32 %v487_v29, 0.0 }
 0x11e   :  { %v492_v52 = vpop.f32.mrf.mxu0  ;;  %1006 = vmatmul.mubr.f32.gmra.mxu0 %v759_v59  ;;  %1076 = vmatmul.mubr.f32.gmra.mxu1 %v787_v60 }
 0x11f   :  { %v790_v0 = vmax.f32 %v489_v63, 0.0  ;;  %1010 = vmatprep.mubr.f32.mxu0 %v762_v62  ;;  %v493_v2 = vadd.f32 %v492_v52, %v2343_v53 }
 0x120   :  { %v494_v27 = vpop.f32.mrf.mxu0 }
 0x121   :  { %v495_v48 = vadd.f32 %v494_v27, %v2346_v55  ;;  %1080 = vmatprep.mubr.f32.mxu1 %v790_v0  ;;  %v791_v6 = vmax.f32 %v493_v2, 0.0 }
 0x122   :  { %v498_v4 = vpop.f32.mrf.mxu0  ;;  %1011 = vmatmul.mubr.f32.gmra.mxu0 %v761_v1  ;;  %1081 = vmatmul.mubr.f32.gmra.mxu1 %v789_v3 }
 0x123   :  { %v792_v5 = vmax.f32 %v495_v48, 0.0  ;;  %v499_v7 = vadd.f32 %v498_v4, %v2343_v53 }
 0x124   :  { %v500_v32 = vpop.f32.mrf.mxu0 }
 0x125   :  { %v501_v8 = vadd.f32 %v500_v32, %v2346_v55  ;;  %1085 = vmatprep.mubr.f32.mxu1 %v792_v5  ;;  %v793_v11 = vmax.f32 %v499_v7, 0.0 }
 0x126   :  { %v504_v9 = vpop.f32.mrf.mxu0  ;;  %1086 = vmatmul.mubr.f32.gmra.mxu1 %v791_v6 }
 0x127   :  { %v794_v10 = vmax.f32 %v501_v8, 0.0  ;;  %v505_v30 = vadd.f32 %v504_v9, %v2343_v53 }
 0x128   :  { %v506_v12 = vpop.f32.mrf.mxu0 }
 0x129   :  { %v507_v13 = vadd.f32 %v506_v12, %v2346_v55  ;;  %1090 = vmatprep.mubr.f32.mxu1 %v794_v10  ;;  %v795_v35 = vmax.f32 %v505_v30, 0.0 }
 0x12a   :  { %v510_v14 = vpop.f32.mrf.mxu0  ;;  %1091 = vmatmul.mubr.f32.gmra.mxu1 %v793_v11 }
 0x12b   :  { %v796_v15 = vmax.f32 %v507_v13, 0.0  ;;  %v511_v16 = vadd.f32 %v510_v14, %v2343_v53 }
 0x12c   :  { %v512_v17 = vpop.f32.mrf.mxu0 }
 0x12d   :  { %v513_v18 = vadd.f32 %v512_v17, %v2346_v55  ;;  %1095 = vmatprep.mubr.f32.mxu1 %v796_v15  ;;  %v797_v20 = vmax.f32 %v511_v16, 0.0 }
 0x12e   :  { %v516_v19 = vpop.f32.mrf.mxu0  ;;  %1096 = vmatmul.mubr.f32.gmra.mxu1 %v795_v35 }
 0x12f   :  { %v798_v33 = vmax.f32 %v513_v18, 0.0  ;;  %v517_v21 = vadd.f32 %v516_v19, %v2343_v53 }
 0x130   :  { %v518_v22 = vpop.f32.mrf.mxu0 }
 0x131   :  { %v519_v23 = vadd.f32 %v518_v22, %v2346_v55  ;;  %1100 = vmatprep.mubr.f32.mxu1 %v798_v33  ;;  %v799_v25 = vmax.f32 %v517_v21, 0.0 }
 0x132   :  { %v522_v38 = vpop.f32.mrf.mxu0  ;;  %1101 = vmatmul.mubr.f32.gmra.mxu1 %v797_v20 }
 0x133   :  { %v800_v24 = vmax.f32 %v519_v23, 0.0  ;;  %v523_v26 = vadd.f32 %v522_v38, %v2343_v53 }
 0x134   :  { %v524_v28 = vpop.f32.mrf.mxu0 }
 0x135   :  { %v525_v36 = vadd.f32 %v524_v28, %v2346_v55  ;;  %1105 = vmatprep.mubr.f32.mxu1 %v800_v24  ;;  %v801_v37 = vmax.f32 %v523_v26, 0.0 }
 0x136   :  { %v528_v31 = vpop.f32.mrf.mxu0  ;;  %1106 = vmatmul.mubr.f32.gmra.mxu1 %v799_v25 }
 0x137   :  { %v802_v34 = vmax.f32 %v525_v36, 0.0  ;;  %v529_v39 = vadd.f32 %v528_v31, %v2343_v53 }
 0x138   :  { %v530_v42 = vpop.f32.mrf.mxu0 }
 0x139   :  { %v531_v41 = vadd.f32 %v530_v42, %v2346_v55  ;;  %1110 = vmatprep.mubr.f32.mxu1 %v802_v34  ;;  %v803_v47 = vmax.f32 %v529_v39, 0.0 }
 0x13a   :  { %v534_v43 = vpop.f32.mrf.mxu0  ;;  %1111 = vmatmul.mubr.f32.gmra.mxu1 %v801_v37 }
 0x13b   :  { %v804_v45 = vmax.f32 %v531_v41, 0.0  ;;  %v535_v40 = vadd.f32 %v534_v43, %v2343_v53 }
 0x13c   :  { %v536_v49 = vpop.f32.mrf.mxu0 }
 0x13d   :  { %v537_v50 = vadd.f32 %v536_v49, %v2346_v55  ;;  %1115 = vmatprep.mubr.f32.mxu1 %v804_v45  ;;  %v805_v46 = vmax.f32 %v535_v40, 0.0 }
 0x13e   :  { %v540_v51 = vpop.f32.mrf.mxu0  ;;  %1116 = vmatmul.mubr.f32.gmra.mxu1 %v803_v47 }
 0x13f   :  { %v806_v54 = vmax.f32 %v537_v50, 0.0  ;;  %v541_v56 = vadd.f32 %v540_v51, %v2343_v53 }
 0x140   :  { %v542_v57 = vpop.f32.mrf.mxu0 }
 0x141   :  { %v543_v58 = vadd.f32 %v542_v57, %v2346_v55  ;;  %1120 = vmatprep.mubr.f32.mxu1 %v806_v54  ;;  %v807_v60 = vmax.f32 %v541_v56, 0.0 }
 0x142   :  { %v546_v59 = vpop.f32.mrf.mxu0  ;;  %1121 = vmatmul.mubr.f32.gmra.mxu1 %v805_v46 }
 0x143   :  { %v808_v44 = vmax.f32 %v543_v58, 0.0  ;;  %v547_v29 = vadd.f32 %v546_v59, %v2343_v53 }
 0x144   :  { %v548_v61 = vpop.f32.mrf.mxu0 }
 0x145   :  { %v549_v62 = vadd.f32 %v548_v61, %v2346_v55  ;;  %1125 = vmatprep.mubr.f32.mxu1 %v808_v44  ;;  %v809_v0 = vmax.f32 %v547_v29, 0.0 }
 0x146   :  { %v552_v63 = vpop.f32.mrf.mxu0  ;;  %1126 = vmatmul.mubr.f32.gmra.mxu1 %v807_v60 }
 0x147   :  { %v810_v52 = vmax.f32 %v549_v62, 0.0  ;;  %v553_v1 = vadd.f32 %v552_v63, %v2343_v53 }
 0x148   :  { %v554_v3 = vpop.f32.mrf.mxu0 }
 0x149   :  { %v555_v2 = vadd.f32 %v554_v3, %v2346_v55  ;;  %1130 = vmatprep.mubr.f32.mxu1 %v810_v52  ;;  %v811_v4 = vmax.f32 %v553_v1, 0.0 }
 0x14a   :  { %v558_v27 = vpop.f32.mrf.mxu0  ;;  %1131 = vmatmul.mubr.f32.gmra.mxu1 %v809_v0 }
 0x14b   :  { %v812_v48 = vmax.f32 %v555_v2, 0.0  ;;  %v559_v5 = vadd.f32 %v558_v27, %v2343_v53 }
 0x14c   :  { %v560_v6 = vpop.f32.mrf.mxu0 }
 0x14d   :  { %v561_v7 = vadd.f32 %v560_v6, %v2346_v55  ;;  %1135 = vmatprep.mubr.f32.mxu1 %v812_v48  ;;  %v813_v9 = vmax.f32 %v559_v5, 0.0 }
 0x14e   :  { %v564_v32 = vpop.f32.mrf.mxu0  ;;  %1136 = vmatmul.mubr.f32.gmra.mxu1 %v811_v4 }
 0x14f   :  { %v814_v8 = vmax.f32 %v561_v7, 0.0  ;;  %v565_v10 = vadd.f32 %v564_v32, %v2343_v53 }
 0x150   :  { %v566_v11 = vpop.f32.mrf.mxu0 }
 0x151   :  { %v567_v30 = vadd.f32 %v566_v11, %v2346_v55  ;;  %1140 = vmatprep.mubr.f32.mxu1 %v814_v8  ;;  %v815_v14 = vmax.f32 %v565_v10, 0.0 }
 0x152   :  { %v570_v12 = vpop.f32.mrf.mxu0  ;;  %1141 = vmatmul.mubr.f32.gmra.mxu1 %v813_v9 }
 0x153   :  { %v816_v13 = vmax.f32 %v567_v30, 0.0  ;;  %v571_v15 = vadd.f32 %v570_v12, %v2343_v53 }
 0x154   :  { %v572_v35 = vpop.f32.mrf.mxu0 }
 0x155   :  { %v573_v16 = vadd.f32 %v572_v35, %v2346_v55  ;;  %1145 = vmatprep.mubr.f32.mxu1 %v816_v13  ;;  %v817_v19 = vmax.f32 %v571_v15, 0.0 }
 0x156   :  { %v576_v17 = vpop.f32.mrf.mxu0  ;;  %1146 = vmatmul.mubr.f32.gmra.mxu1 %v815_v14 }
 0x157   :  { %v818_v18 = vmax.f32 %v573_v16, 0.0  ;;  %v577_v33 = vadd.f32 %v576_v17, %v2343_v53 }
 0x158   :  { %v578_v20 = vpop.f32.mrf.mxu0 }
 0x159   :  { %v579_v21 = vadd.f32 %v578_v20, %v2346_v55  ;;  %1150 = vmatprep.mubr.f32.mxu1 %v818_v18  ;;  %v819_v38 = vmax.f32 %v577_v33, 0.0 }
 0x15a   :  { %v582_v22 = vpop.f32.mrf.mxu0  ;;  %1151 = vmatmul.mubr.f32.gmra.mxu1 %v817_v19 }
 0x15b   :  { %v820_v23 = vmax.f32 %v579_v21, 0.0  ;;  %v583_v24 = vadd.f32 %v582_v22, %v2343_v53 }
 0x15c   :  { %v584_v25 = vpop.f32.mrf.mxu0 }
 0x15d   :  { %v585_v26 = vadd.f32 %v584_v25, %v2346_v55  ;;  %1155 = vmatprep.mubr.f32.mxu1 %v820_v23  ;;  %v821_v31 = vmax.f32 %v583_v24, 0.0 }
 0x15e   :  { %v588_v28 = vpop.f32.mrf.mxu0  ;;  %1156 = vmatmul.mubr.f32.gmra.mxu1 %v819_v38 }
 0x15f   :  { %v822_v36 = vmax.f32 %v585_v26, 0.0  ;;  %v589_v34 = vadd.f32 %v588_v28, %v2343_v53 }
 0x160   :  { %v590_v37 = vpop.f32.mrf.mxu0 }
 0x161   :  { %v591_v39 = vadd.f32 %v590_v37, %v2346_v55  ;;  %1160 = vmatprep.mubr.f32.mxu1 %v822_v36  ;;  %v823_v43 = vmax.f32 %v589_v34, 0.0 }
 0x162   :  { %v594_v42 = vpop.f32.mrf.mxu0  ;;  %1161 = vmatmul.mubr.f32.gmra.mxu1 %v821_v31 }
 0x163   :  { %v824_v41 = vmax.f32 %v591_v39, 0.0  ;;  %v595_v45 = vadd.f32 %v594_v42, %v2343_v53 }
 0x164   :  { %v596_v47 = vpop.f32.mrf.mxu0 }
 0x165   :  { %v597_v40 = vadd.f32 %v596_v47, %v2346_v55  ;;  %1165 = vmatprep.mubr.f32.mxu1 %v824_v41  ;;  %v825_v51 = vmax.f32 %v595_v45, 0.0 }
 0x166   :  { %v600_v49 = vpop.f32.mrf.mxu0  ;;  %1166 = vmatmul.mubr.f32.gmra.mxu1 %v823_v43 }
 0x167   :  { %v826_v50 = vmax.f32 %v597_v40, 0.0  ;;  %v601_v54 = vadd.f32 %v600_v49, %v2343_v53 }
 0x168   :  { %v602_v46 = vpop.f32.mrf.mxu0 }
 0x169   :  { %v603_v56 = vadd.f32 %v602_v46, %v2346_v55  ;;  %1170 = vmatprep.mubr.f32.mxu1 %v826_v50  ;;  %v827_v59 = vmax.f32 %v601_v54, 0.0 }
 0x16a   :  { %v606_v57 = vpop.f32.mrf.mxu0  ;;  %1171 = vmatmul.mubr.f32.gmra.mxu1 %v825_v51 }
 0x16b   :  { %v828_v58 = vmax.f32 %v603_v56, 0.0  ;;  %v607_v44 = vadd.f32 %v606_v57, %v2343_v53 }
 0x16c   :  { %v608_v60 = vpop.f32.mrf.mxu0 }
 0x16d   :  { %v609_v29 = vadd.f32 %v608_v60, %v2346_v55  ;;  %1175 = vmatprep.mubr.f32.mxu1 %v828_v58  ;;  %v829_v63 = vmax.f32 %v607_v44, 0.0 }
 0x16e   :  { %v612_v61 = vpop.f32.mrf.mxu0  ;;  %1176 = vmatmul.mubr.f32.gmra.mxu1 %v827_v59 }
 0x16f   :  { %v830_v62 = vmax.f32 %v609_v29, 0.0  ;;  %v613_v52 = vadd.f32 %v612_v61, %v2343_v53 }
 0x170   :  { %v614_v0 = vpop.f32.mrf.mxu0 }
 0x171   :  { %v615_v1 = vadd.f32 %v614_v0, %v2346_v55  ;;  %1180 = vmatprep.mubr.f32.mxu1 %v830_v62  ;;  %v831_v27 = vmax.f32 %v613_v52, 0.0 }
 0x172   :  { %v618_v3 = vpop.f32.mrf.mxu0  ;;  %1181 = vmatmul.mubr.f32.gmra.mxu1 %v829_v63 }
 0x173   :  { %v832_v2 = vmax.f32 %v615_v1, 0.0  ;;  %v619_v48 = vadd.f32 %v618_v3, %v2343_v53 }
 0x174   :  { %v620_v4 = vpop.f32.mrf.mxu0 }
 0x175   :  { %v621_v5 = vadd.f32 %v620_v4, %v2346_v55  ;;  %1185 = vmatprep.mubr.f32.mxu1 %v832_v2  ;;  %v833_v32 = vmax.f32 %v619_v48, 0.0 }
 0x176   :  { %v624_v6 = vpop.f32.mrf.mxu0  ;;  %1186 = vmatmul.mubr.f32.gmra.mxu1 %v831_v27 }
 0x177   :  { %v834_v7 = vmax.f32 %v621_v5, 0.0  ;;  %v625_v8 = vadd.f32 %v624_v6, %v2343_v53 }
 0x178   :  { %v626_v9 = vpop.f32.mrf.mxu0 }
 0x179   :  { %v627_v10 = vadd.f32 %v626_v9, %v2346_v55  ;;  %1190 = vmatprep.mubr.f32.mxu1 %v834_v7  ;;  %v835_v12 = vmax.f32 %v625_v8, 0.0 }
 0x17a   :  { %v630_v11 = vpop.f32.mrf.mxu0  ;;  %1191 = vmatmul.mubr.f32.gmra.mxu1 %v833_v32 }
 0x17b   :  { %v836_v30 = vmax.f32 %v627_v10, 0.0  ;;  %v631_v13 = vadd.f32 %v630_v11, %v2343_v53 }
 0x17c   :  { %v632_v14 = vpop.f32.mrf.mxu0 }
 0x17d   :  { %v633_v15 = vadd.f32 %v632_v14, %v2346_v55  ;;  %1195 = vmatprep.mubr.f32.mxu1 %v836_v30  ;;  %v837_v17 = vmax.f32 %v631_v13, 0.0 }
 0x17e   :  { %v636_v35 = vpop.f32.mrf.mxu0  ;;  %1196 = vmatmul.mubr.f32.gmra.mxu1 %v835_v12 }
 0x17f   :  { %v838_v16 = vmax.f32 %v633_v15, 0.0  ;;  %v637_v18 = vadd.f32 %v636_v35, %v2343_v53 }
 0x180   :  { %v638_v19 = vpop.f32.mrf.mxu0 }
 0x181   :  { %v639_v33 = vadd.f32 %v638_v19, %v2346_v55  ;;  %1200 = vmatprep.mubr.f32.mxu1 %v838_v16  ;;  %v839_v22 = vmax.f32 %v637_v18, 0.0 }
 0x182   :  { %v642_v20 = vpop.f32.mrf.mxu0  ;;  %1201 = vmatmul.mubr.f32.gmra.mxu1 %v837_v17 }
 0x183   :  { %v840_v21 = vmax.f32 %v639_v33, 0.0  ;;  %v643_v23 = vadd.f32 %v642_v20, %v2343_v53 }
 0x184   :  { %v644_v38 = vpop.f32.mrf.mxu0 }
 0x185   :  { %v645_v24 = vadd.f32 %v644_v38, %v2346_v55  ;;  %1205 = vmatprep.mubr.f32.mxu1 %v840_v21  ;;  %v841_v28 = vmax.f32 %v643_v23, 0.0 }
 0x186   :  { %v648_v25 = vpop.f32.mrf.mxu0  ;;  %1206 = vmatmul.mubr.f32.gmra.mxu1 %v839_v22 }
 0x187   :  { %v842_v26 = vmax.f32 %v645_v24, 0.0  ;;  %v649_v36 = vadd.f32 %v648_v25, %v2343_v53 }
 0x188   :  { %v650_v31 = vpop.f32.mrf.mxu0 }
 0x189   :  { %v651_v34 = vadd.f32 %v650_v31, %v2346_v55  ;;  %1210 = vmatprep.mubr.f32.mxu1 %v842_v26  ;;  %v843_v42 = vmax.f32 %v649_v36, 0.0 }
 0x18a   :  { %v654_v37 = vpop.f32.mrf.mxu0  ;;  %1211 = vmatmul.mubr.f32.gmra.mxu1 %v841_v28 }
 0x18b   :  { %v844_v39 = vmax.f32 %v651_v34, 0.0  ;;  %v655_v41 = vadd.f32 %v654_v37, %v2343_v53  ;;  %v2523_v37 = vld [vmem:[%s2734_s4] ss:$0 sm:$0xff] }
 0x18c   :  { %v656_v43 = vpop.f32.mrf.mxu0 }
 0x18d   :  { %v657_v45 = vadd.f32 %v656_v43, %v2346_v55  ;;  %1215 = vmatprep.mubr.f32.mxu1 %v844_v39  ;;  %v845_v49 = vmax.f32 %v655_v41, 0.0 }
 0x18e   :  { %v660_v47 = vpop.f32.mrf.mxu0  ;;  %1216 = vmatmul.mubr.f32.gmra.mxu1 %v843_v42 }
 0x18f   :  { %v846_v40 = vmax.f32 %v657_v45, 0.0  ;;  %v661_v50 = vadd.f32 %v660_v47, %v2343_v53 }
 0x190   :  { %v662_v51 = vpop.f32.mrf.mxu0 }
 0x191   :  { %v663_v54 = vadd.f32 %v662_v51, %v2346_v55  ;;  %1220 = vmatprep.mubr.f32.mxu1 %v846_v40  ;;  %v847_v57 = vmax.f32 %v661_v50, 0.0 }
 0x192   :  { %v666_v46 = vpop.f32.mrf.mxu0  ;;  %1221 = vmatmul.mubr.f32.gmra.mxu1 %v845_v49 }
 0x193   :  { %v848_v56 = vmax.f32 %v663_v54, 0.0  ;;  %v667_v58 = vadd.f32 %v666_v46, %v2343_v53 }
 0x194   :  { %v668_v59 = vpop.f32.mrf.mxu0 }
 0x195   :  { %v669_v44 = vadd.f32 %v668_v59, %v2346_v55  ;;  %1225 = vmatprep.mubr.f32.mxu1 %v848_v56  ;;  %v849_v61 = vmax.f32 %v667_v58, 0.0  ;;  %v2532_v59 = vld [vmem:[%s2735_s5] sm:$0xff] }
 0x196   :  { %v672_v60 = vpop.f32.mrf.mxu0  ;;  %1226 = vmatmul.mubr.f32.gmra.mxu1 %v847_v57 }
 0x197   :  { %v850_v29 = vmax.f32 %v669_v44, 0.0  ;;  %v673_v62 = vadd.f32 %v672_v60, %v2343_v53  ;;  %v2538_v60 = vld [vmem:[%s2735_s5 + $0x8] sm:$0xff] }
 0x198   :  { %v674_v63 = vpop.f32.mrf.mxu0 }
 0x199   :  { %v675_v52 = vadd.f32 %v674_v63, %v2346_v55  ;;  %1230 = vmatprep.mubr.f32.mxu1 %v850_v29  ;;  %v851_v3 = vmax.f32 %v673_v62, 0.0 }
 0x19a   :  { %v678_v0 = vpop.f32.mrf.mxu0  ;;  %1231 = vmatmul.mubr.f32.gmra.mxu1 %v849_v61 }
 0x19b   :  { %v852_v1 = vmax.f32 %v675_v52, 0.0  ;;  %v679_v2 = vadd.f32 %v678_v0, %v2343_v53 }
 0x19c   :  { %v680_v27 = vpop.f32.mrf.mxu0 }
 0x19d   :  { %v681_v48 = vadd.f32 %v680_v27, %v2346_v55  ;;  %1235 = vmatprep.mubr.f32.mxu1 %v852_v1  ;;  %v853_v6 = vmax.f32 %v679_v2, 0.0 }
 0x19e   :  { %v684_v4 = vpop.f32.mrf.mxu0  ;;  %1236 = vmatmul.mubr.f32.gmra.mxu1 %v851_v3 }
 0x19f   :  { %v854_v5 = vmax.f32 %v681_v48, 0.0  ;;  %v685_v7 = vadd.f32 %v684_v4, %v2343_v53 }
 0x1a0   :  { %v686_v32 = vpop.f32.mrf.mxu0 }
 0x1a1   :  { %v687_v8 = vadd.f32 %v686_v32, %v2346_v55  ;;  %1240 = vmatprep.mubr.f32.mxu1 %v854_v5  ;;  %v855_v11 = vmax.f32 %v685_v7, 0.0  ;;  %v2548_v5 = vld [vmem:[%s2735_s5 + $0x10] sm:$0xff] }
 0x1a2   :  { %v690_v9 = vpop.f32.mrf.mxu0  ;;  %1241 = vmatmul.mubr.f32.gmra.mxu1 %v853_v6 }
 0x1a3   :  { %v856_v10 = vmax.f32 %v687_v8, 0.0  ;;  %v691_v30 = vadd.f32 %v690_v9, %v2343_v53 }
 0x1a4   :  { %v692_v12 = vpop.f32.mrf.mxu0 }
 0x1a5   :  { %v693_v13 = vadd.f32 %v692_v12, %v2346_v55  ;;  %1245 = vmatprep.mubr.f32.mxu1 %v856_v10  ;;  %v857_v35 = vmax.f32 %v691_v30, 0.0 }
 0x1a6   :  { %v696_v14 = vpop.f32.mrf.mxu0  ;;  %1246 = vmatmul.mubr.f32.gmra.mxu1 %v855_v11 }
 0x1a7   :  { %v858_v15 = vmax.f32 %v693_v13, 0.0  ;;  %v697_v16 = vadd.f32 %v696_v14, %v2343_v53 }
 0x1a8   :  { %v698_v17 = vpop.f32.mrf.mxu0 }
 0x1a9   :  { %v699_v18 = vadd.f32 %v698_v17, %v2346_v55  ;;  %1250 = vmatprep.mubr.f32.mxu1 %v858_v15  ;;  %v859_v20 = vmax.f32 %v697_v16, 0.0 }
 0x1aa   :  { %v702_v19 = vpop.f32.mrf.mxu0  ;;  %1251 = vmatmul.mubr.f32.gmra.mxu1 %v857_v35 }
 0x1ab   :  { %v860_v33 = vmax.f32 %v699_v18, 0.0  ;;  %v703_v21 = vadd.f32 %v702_v19, %v2343_v53 }
 0x1ac   :  { %v704_v22 = vpop.f32.mrf.mxu0 }
 0x1ad   :  { %v705_v23 = vadd.f32 %v704_v22, %v2346_v55  ;;  %1255 = vmatprep.mubr.f32.mxu1 %v860_v33  ;;  %v861_v26 = vmax.f32 %v703_v21, 0.0  ;;  %v2558_v33 = vld [vmem:[%s2735_s5 + $0x18] sm:$0xff] }
 0x1ae   :  { %v708_v38 = vpop.f32.mrf.mxu0  ;;  %v2516_v24 = vpop.f32.mrf.mxu1  ;;  %1256 = vmatmul.mubr.f32.gmra.mxu1 %v859_v20 }
 0x1af   :  { %v862_v25 = vmax.f32 %v705_v23, 0.0  ;;  %v709_v28 = vadd.f32 %v708_v38, %v2343_v53 }
 0x1b0   :  { %v710_v36 = vpop.f32.mrf.mxu0  ;;  %v1019_v31 = vpop.f32.mrf.mxu1 }
 0x1b1   :  { %v711_v34 = vadd.f32 %v710_v36, %v2346_v55  ;;  %1260 = vmatprep.mubr.f32.mxu1 %v862_v25  ;;  %v863_v45 = vmax.f32 %v709_v28, 0.0 }
 0x1b2   :  { %v714_v39 = vpop.f32.mrf.mxu0  ;;  %v1022_v42 = vpop.f32.mrf.mxu1  ;;  %1261 = vmatmul.mubr.f32.gmra.mxu1 %v861_v26 }
 0x1b3   :  { %v864_v41 = vmax.f32 %v711_v34, 0.0  ;;  %v1023_v43 = vadd.f32 %v2523_v37, %v1022_v42  ;;  %v715_v47 = vadd.f32 %v714_v39, %v2343_v53 }
 0x1b4   :  { %v716_v40 = vpop.f32.mrf.mxu0  ;;  %v1024_v49 = vpop.f32.mrf.mxu1 }
 0x1b5   :  { %v717_v50 = vadd.f32 %v716_v40, %v2346_v55  ;;  %1265 = vmatprep.mubr.f32.mxu1 %v864_v41  ;;  %v1309_v46 = vmax.f32 %v1023_v43, 0.0  ;;  %v865_v58 = vmax.f32 %v715_v47, 0.0 }
 0x1b6   :  { %v720_v51 = vpop.f32.mrf.mxu0  ;;  %v1027_v54 = vpop.f32.mrf.mxu1  ;;  %1266 = vmatmul.mubr.f32.gmra.mxu1 %v863_v45 }
 0x1b7   :  { %v866_v56 = vmax.f32 %v717_v50, 0.0  ;;  %v1028_v57 = vadd.f32 %v2523_v37, %v1027_v54  ;;  %v721_v44 = vadd.f32 %v720_v51, %v2343_v53  ;;  %v1377_v1 = vmul.f32 %v2532_v59, %v1309_v46 }
 0x1b8   :  { %v722_v29 = vpop.f32.mrf.mxu0  ;;  %v1029_v61 = vpop.f32.mrf.mxu1 }
 0x1b9   :  { %v1310_v62 = vmax.f32 %v1028_v57, 0.0  ;;  %v723_v63 = vadd.f32 %v722_v29, %v2346_v55  ;;  %1270 = vmatprep.mubr.f32.mxu1 %v866_v56  ;;  %v867_v48 = vmax.f32 %v721_v44, 0.0 }
 0x1ba   :  { %v726_v52 = vpop.f32.mrf.mxu0  ;;  %v1032_v0 = vpop.f32.mrf.mxu1  ;;  %1271 = vmatmul.mubr.f32.gmra.mxu1 %v865_v58 }
 0x1bb   :  { %v1378_v3 = vmul.f32 %v2538_v60, %v1310_v62  ;;  %v868_v2 = vmax.f32 %v723_v63, 0.0  ;;  %v1033_v27 = vadd.f32 %v2523_v37, %v1032_v0  ;;  %v727_v4 = vadd.f32 %v726_v52, %v2343_v53 }
 0x1bc   :  { %v728_v6 = vpop.f32.mrf.mxu0  ;;  %v1034_v7 = vpop.f32.mrf.mxu1 }
 0x1bd   :  { %v1451_v32 = vadd.f32 %v1378_v3, %v1377_v1  ;;  %v1311_v8 = vmax.f32 %v1033_v27, 0.0  ;;  %v729_v9 = vadd.f32 %v728_v6, %v2346_v55  ;;  %1275 = vmatprep.mubr.f32.mxu1 %v868_v2  ;;  %v869_v14 = vmax.f32 %v727_v4, 0.0 }
 0x1be   :  { %v732_v10 = vpop.f32.mrf.mxu0  ;;  %v1037_v11 = vpop.f32.mrf.mxu1  ;;  %1276 = vmatmul.mubr.f32.gmra.mxu1 %v867_v48 }
 0x1bf   :  { %v1379_v30 = vmul.f32 %v2548_v5, %v1311_v8  ;;  %v870_v12 = vmax.f32 %v729_v9, 0.0  ;;  %v1038_v13 = vadd.f32 %v2523_v37, %v1037_v11  ;;  %v733_v15 = vadd.f32 %v732_v10, %v2343_v53 }
 0x1c0   :  { %v734_v35 = vpop.f32.mrf.mxu0  ;;  %v1039_v16 = vpop.f32.mrf.mxu1 }
 0x1c1   :  { %v1452_v17 = vadd.f32 %v1451_v32, %v1379_v30  ;;  %v1312_v18 = vmax.f32 %v1038_v13, 0.0  ;;  %v735_v19 = vadd.f32 %v734_v35, %v2346_v55  ;;  %1280 = vmatprep.mubr.f32.mxu1 %v870_v12  ;;  %v871_v38 = vmax.f32 %v733_v15, 0.0 }
 0x1c2   :  { %v738_v20 = vpop.f32.mrf.mxu0  ;;  %v1042_v21 = vpop.f32.mrf.mxu1  ;;  %1281 = vmatmul.mubr.f32.gmra.mxu1 %v869_v14 }
 0x1c3   :  { %v1380_v22 = vmul.f32 %v2558_v33, %v1312_v18  ;;  %v872_v23 = vmax.f32 %v735_v19, 0.0  ;;  %v739_v25 = vadd.f32 %v738_v20, %v2343_v53  ;;  %v1043_v26 = vadd.f32 %v2523_v37, %v1042_v21 }
 0x1c4   :  { %v740_v28 = vpop.f32.mrf.mxu0  ;;  %v1044_v36 = vpop.f32.mrf.mxu1 }
 0x1c5   :  { %v2563_v31 = vadd.f32 %v1452_v17, %v1380_v22  ;;  %v741_v34 = vadd.f32 %v740_v28, %v2346_v55  ;;  %1285 = vmatprep.mubr.f32.mxu1 %v872_v23  ;;  %v873_v43 = vmax.f32 %v739_v25, 0.0  ;;  %v1313_v45 = vmax.f32 %v1043_v26, 0.0 }
 0x1c6   :  { %v744_v39 = vpop.f32.mrf.mxu0  ;;  %v1047_v42 = vpop.f32.mrf.mxu1  ;;  %1286 = vmatmul.mubr.f32.gmra.mxu1 %v871_v38 }
 0x1c7   :  { %v874_v41 = vmax.f32 %v741_v34, 0.0  ;;  %v745_v47 = vadd.f32 %v744_v39, %v2343_v53  ;;  %v1048_v40 = vadd.f32 %v2523_v37, %v1047_v42  ;;  %v1381_v58 = vmul.f32 %v2532_v59, %v1313_v45 }
 0x1c8   :  { %v746_v49 = vpop.f32.mrf.mxu0  ;;  %v1049_v50 = vpop.f32.mrf.mxu1 }
 0x1c9   :  { %v747_v51 = vadd.f32 %v746_v49, %v2346_v55  ;;  %1290 = vmatprep.mubr.f32.mxu1 %v874_v41  ;;  %v1314_v54 = vmax.f32 %v1048_v40, 0.0  ;;  %v875_v44 = vmax.f32 %v745_v47, 0.0  ;;  %v1018_v49 = vadd.f32 %v2523_v37, %v2516_v24 }
 0x1ca   :  { %v982_v46 = vpop.f32.mrf.mxu0  ;;  %v1052_v56 = vpop.f32.mrf.mxu1  ;;  %1291 = vmatmul.mubr.f32.gmra.mxu1 %v873_v43 }
 0x1cb   :  { %v876_v57 = vmax.f32 %v747_v51, 0.0  ;;  %v1382_v29 = vmul.f32 %v2538_v60, %v1314_v54  ;;  %v983_v3 = vadd.f32 %v2523_v37, %v982_v46  ;;  %v1053_v48 = vadd.f32 %v2523_v37, %v1052_v56 }
 0x1cc   :  { %v984_v61 = vpop.f32.mrf.mxu0  ;;  %v1054_v62 = vpop.f32.mrf.mxu1 }
 0x1cd   :  { %1295 = vmatprep.mubr.f32.mxu1 %v876_v57  ;;  %v1460_v53 = vadd.f32 %v1382_v29, %v1381_v58  ;;  %v1301_v8 = vmax.f32 %v983_v3, 0.0  ;;  %v1315_v12 = vmax.f32 %v1053_v48, 0.0  ;;  %v1454_v29 = vrot.slane %v2563_v31, 4 }
 0x1ce   :  { %v987_v63 = vpop.f32.mrf.mxu0  ;;  %v1057_v52 = vpop.f32.mrf.mxu1  ;;  %1296 = vmatmul.mubr.f32.gmra.mxu1 %v875_v44 }
 0x1cf   :  { %v988_v55 = vadd.f32 %v2523_v37, %v987_v63  ;;  %v1058_v9 = vadd.f32 %v2523_v37, %v1057_v52  ;;  %v1369_v16 = vmul.f32 %v2532_v59, %v1301_v8  ;;  %v1383_v22 = vmul.f32 %v2548_v5, %v1315_v12 }
 0x1d0   :  { %v989_v0 = vpop.f32.mrf.mxu0  ;;  %v1059_v1 = vpop.f32.mrf.mxu1 }
 0x1d1   :  { %v1302_v4 = vmax.f32 %v988_v55, 0.0  ;;  %v1316_v17 = vmax.f32 %v1058_v9, 0.0  ;;  %v1461_v41 = vadd.f32 %v1460_v53, %v1383_v22  ;;  %v1308_v53 = vmax.f32 %v1018_v49, 0.0 }
 0x1d2   :  { %v992_v2 = vpop.f32.mrf.mxu0  ;;  %v2573_v27 = vpop.f32.mrf.mxu1 }
 0x1d3   :  { %v993_v6 = vadd.f32 %v2523_v37, %v992_v2  ;;  %v1370_v13 = vmul.f32 %v2538_v60, %v1302_v4  ;;  %v1384_v28 = vmul.f32 %v2558_v33, %v1316_v17  ;;  %v1455_v2 = vadd.f32 %v1454_v29, %v2563_v31 }
 0x1d4   :  { %v994_v7 = vpop.f32.mrf.mxu0  ;;  %v1064_v32 = vpop.f32.mrf.mxu1  ;;  %v1376_v4 = vmul.f32 %v2558_v33, %v1308_v53  ;;  %v1063_v49 = vadd.f32 %v2523_v37, %v2573_v27 }
 0x1d5   :  { %v1303_v10 = vmax.f32 %v993_v6, 0.0  ;;  %v1433_v23 = vadd.f32 %v1370_v13, %v1369_v16  ;;  %v1462_v50 = vadd.f32 %v1461_v41, %v1384_v28 }
 0x1d6   :  { %v997_v11 = vpop.f32.mrf.mxu0  ;;  %v2578_v30 = vpop.f32.mrf.mxu1 }
 0x1d7   :  { %v998_v14 = vadd.f32 %v2523_v37, %v997_v11  ;;  %v1371_v18 = vmul.f32 %v2548_v5, %v1303_v10  ;;  %v1463_v63 = vrot.slane %v1462_v50, 4  ;;  %v1456_v10 = vrot.slane %v1455_v2, 2 }
 0x1d8   :  { %v999_v15 = vpop.f32.mrf.mxu0  ;;  %v1069_v35 = vpop.f32.mrf.mxu1 }
 0x1d9   :  { %v1304_v19 = vmax.f32 %v998_v14, 0.0  ;;  %v1434_v36 = vadd.f32 %v1433_v23, %v1371_v18  ;;  %v1464_v6 = vadd.f32 %v1463_v63, %v1462_v50  ;;  %v1457_v16 = vadd.f32 %v1456_v10, %v1455_v2 }
 0x1da   :  { %v1002_v20 = vpop.f32.mrf.mxu0  ;;  %v2584_v21 = vpop.f32.mrf.mxu1 }
 0x1db   :  { %v1372_v38 = vmul.f32 %v2558_v33, %v1304_v19  ;;  %v1003_v34 = vadd.f32 %v2523_v37, %v1002_v20  ;;  %v1465_v12 = vrot.slane %v1464_v6, 2  ;;  %v1458_v23 = vrot.slane %v1457_v16, 1 }
 0x1dc   :  { %v1004_v25 = vpop.f32.mrf.mxu0  ;;  %v1074_v26 = vpop.f32.mrf.mxu1  ;;  %v1073_v50 = vadd.f32 %v2523_v37, %v2584_v21 }
 0x1dd   :  { %v1435_v43 = vadd.f32 %v1434_v36, %v1372_v38  ;;  %v1305_v51 = vmax.f32 %v1003_v34, 0.0  ;;  %v1466_v18 = vadd.f32 %v1465_v12, %v1464_v6  ;;  %v1068_v36 = vadd.f32 %v2523_v37, %v2578_v30 }
 0x1de   :  { %v1007_v39 = vpop.f32.mrf.mxu0  ;;  %v2590_v42 = vpop.f32.mrf.mxu1 }
 0x1df   :  { %v1008_v45 = vadd.f32 %v2523_v37, %v1007_v39  ;;  %v1436_v57 = vrot.slane %v1435_v43, 4  ;;  %v1373_v52 = vmul.f32 %v2532_v59, %v1305_v51  ;;  %v1467_v25 = vrot.slane %v1466_v18, 1 }
 0x1e0   :  { %v1009_v47 = vpop.f32.mrf.mxu0  ;;  %v1079_v40 = vpop.f32.mrf.mxu1 }
 0x1e1   :  { %v1306_v54 = vmax.f32 %v1008_v45, 0.0  ;;  %v1437_v0 = vadd.f32 %v1436_v57, %v1435_v43  ;;  %v1459_v40 = vadd.f32 %v1458_v23, %v1457_v16 }
 0x1e2   :  { %v1012_v46 = vpop.f32.mrf.mxu0  ;;  %v1082_v56 = vpop.f32.mrf.mxu1 }
 0x1e3   :  { %v1374_v58 = vmul.f32 %v2538_v60, %v1306_v54  ;;  %v1013_v44 = vadd.f32 %v2523_v37, %v1012_v46  ;;  %v1438_v8 = vrot.slane %v1437_v0, 2  ;;  %v1083_v34 = vadd.f32 %v2523_v37, %v1082_v56 }
 0x1e4   :  { %v1014_v61 = vpop.f32.mrf.mxu0  ;;  %v1084_v62 = vpop.f32.mrf.mxu1  ;;  %v1468_v54 = vadd.f32 %v1467_v25, %v1466_v18 }
 0x1e5   :  { %v1307_v55 = vmax.f32 %v1013_v44, 0.0  ;;  %v1442_v1 = vadd.f32 %v1374_v58, %v1373_v52  ;;  %v1439_v15 = vadd.f32 %v1438_v8, %v1437_v0  ;;  %v1318_v58 = vmax.f32 %v1068_v36, 0.0 }
 0x1e6   :  { %v1087_v24 = vpop.f32.mrf.mxu1  ;;  %v1078_v44 = vadd.f32 %v2523_v37, %v2590_v42  ;;  %v1321_v62 = vmax.f32 %v1083_v34, 0.0  ;;  %v1317_v52 = vmax.f32 %v1063_v49, 0.0 }
 0x1e7   :  { %v1375_v3 = vmul.f32 %v2548_v5, %v1307_v55  ;;  %v1440_v20 = vrot.slane %v1439_v15, 1  ;;  %v1088_v28 = vadd.f32 %v2523_v37, %v1087_v24  ;;  %v1319_v55 = vmax.f32 %v1073_v50, 0.0 }
 0x1e8   :  { %v1089_v48 = vpop.f32.mrf.mxu1  ;;  %v1386_v42 = vmul.f32 %v2538_v60, %v1318_v58 }
 0x1e9   :  { %v1443_v7 = vadd.f32 %v1442_v1, %v1375_v3  ;;  %v1441_v41 = vadd.f32 %v1440_v20, %v1439_v15  ;;  %v1322_v56 = vmax.f32 %v1088_v28, 0.0  ;;  %v1320_v48 = vmax.f32 %v1078_v44, 0.0 }
 0x1ea   :  { %v1092_v32 = vpop.f32.mrf.mxu1  ;;  %v1387_v10 = vmul.f32 %v2548_v5, %v1319_v55 }
 0x1eb   :  { %v1444_v9 = vadd.f32 %v1443_v7, %v1376_v4  ;;  %v1093_v45 = vadd.f32 %v2523_v37, %v1092_v32  ;;  %v1390_v1 = vmul.f32 %v2538_v60, %v1322_v56  ;;  %v1389_v7 = vmul.f32 %v2532_v59, %v1321_v62 }
 0x1ec   :  { %v1094_v11 = vpop.f32.mrf.mxu1 }
 0x1ed   :  { %v1445_v13 = vrot.slane %v1444_v9, 4  ;;  %v1323_v53 = vmax.f32 %v1093_v45, 0.0 }
 0x1ee   :  { %v1097_v14 = vpop.f32.mrf.mxu1 }
 0x1ef   :  { %v1446_v35 = vadd.f32 %v1445_v13, %v1444_v9  ;;  %v1098_v57 = vadd.f32 %v2523_v37, %v1097_v14  ;;  %v1391_v32 = vmul.f32 %v2548_v5, %v1323_v53  ;;  %v1385_v9 = vmul.f32 %v2532_v59, %v1317_v52 }
 0x1f0   :  { %v1099_v17 = vpop.f32.mrf.mxu1  ;;  %v1478_v14 = vadd.f32 %v1390_v1, %v1389_v7 }
 0x1f1   :  { %v1447_v19 = vrot.slane %v1446_v35, 2  ;;  %v1324_v3 = vmax.f32 %v1098_v57, 0.0  ;;  %v1469_v16 = vadd.f32 %v1386_v42, %v1385_v9  ;;  %v1388_v17 = vmul.f32 %v2558_v33, %v1320_v48 }
 0x1f2   :  { %v1102_v31 = vpop.f32.mrf.mxu1 }
 0x1f3   :  { %v1448_v22 = vadd.f32 %v1447_v19, %v1446_v35  ;;  %v1103_v30 = vadd.f32 %v2523_v37, %v1102_v31  ;;  %v1392_v15 = vmul.f32 %v2558_v33, %v1324_v3  ;;  %v1479_v31 = vadd.f32 %v1478_v14, %v1391_v32 }
 0x1f4   :  { %v1104_v38 = vpop.f32.mrf.mxu1 }
 0x1f5   :  { %v1449_v26 = vrot.slane %v1448_v22, 1  ;;  %v1325_v24 = vmax.f32 %v1103_v30, 0.0  ;;  %v1480_v25 = vadd.f32 %v1479_v31, %v1392_v15 }
 0x1f6   :  { %v1107_v39 = vpop.f32.mrf.mxu1 }
 0x1f7   :  { %v1450_v43 = vadd.f32 %v1449_v26, %v1448_v22  ;;  %v1108_v47 = vadd.f32 %v2523_v37, %v1107_v39  ;;  %v1393_v11 = vmul.f32 %v2532_v59, %v1325_v24  ;;  %v1470_v22 = vadd.f32 %v1469_v16, %v1387_v10 }
 0x1f8   :  { %v1109_v51 = vpop.f32.mrf.mxu1 }
 0x1f9   :  { %v1594_v46 = vsel %vm1593_vm1, %v1450_v43, %v1441_v41  ;;  %v1326_v61 = vmax.f32 %v1108_v47, 0.0  ;;  %v1471_v26 = vadd.f32 %v1470_v22, %v1388_v17  ;;  %v1481_v43 = vrot.slane %v1480_v25, 4 }
 0x1fa   :  { %v1596_v29 = vsel %vm1595_vm2, %v1459_v40, %v1594_v46  ;;  %v1112_v27 = vpop.f32.mrf.mxu1 }
 0x1fb   :  { %v2619_v21 = vsel %vm1597_vm3, %v1468_v54, %v1596_v29  ;;  %v1113_v63 = vadd.f32 %v2523_v37, %v1112_v27  ;;  %v1394_v4 = vmul.f32 %v2538_v60, %v1326_v61  ;;  %v1472_v47 = vrot.slane %v1471_v26, 4 }
 0x1fc   :  { %v1114_v0 = vpop.f32.mrf.mxu1  ;;  %v1482_v54 = vadd.f32 %v1481_v43, %v1480_v25 }
 0x1fd   :  { %v1327_v2 = vmax.f32 %v1113_v63, 0.0  ;;  %v1487_v18 = vadd.f32 %v1394_v4, %v1393_v11  ;;  %v1473_v57 = vadd.f32 %v1472_v47, %v1471_v26 }
 0x1fe   :  { %v1117_v6 = vpop.f32.mrf.mxu1  ;;  %v1483_v53 = vrot.slane %v1482_v54, 2 }
 0x1ff   :  { %v1118_v8 = vadd.f32 %v2523_v37, %v1117_v6  ;;  %v1395_v12 = vmul.f32 %v2548_v5, %v1327_v2  ;;  %v1474_v55 = vrot.slane %v1473_v57, 2 }
 0x200   :  { %v1119_v13 = vpop.f32.mrf.mxu1  ;;  %v1484_v48 = vadd.f32 %v1483_v53, %v1482_v54 }
 0x201   :  { %v1328_v35 = vmax.f32 %v1118_v8, 0.0  ;;  %v1488_v23 = vadd.f32 %v1487_v18, %v1395_v12  ;;  %v1475_v6 = vadd.f32 %v1474_v55, %v1473_v57 }
 0x202   :  { %v1122_v19 = vpop.f32.mrf.mxu1  ;;  %v1485_v12 = vrot.slane %v1484_v48, 1 }
 0x203   :  { %v1396_v20 = vmul.f32 %v2558_v33, %v1328_v35  ;;  %v1123_v34 = vadd.f32 %v2523_v37, %v1122_v19  ;;  %v1476_v15 = vrot.slane %v1475_v6, 1 }
 0x204   :  { %v1124_v38 = vpop.f32.mrf.mxu1  ;;  %v1486_v22 = vadd.f32 %v1485_v12, %v1484_v48 }
 0x205   :  { %v1489_v28 = vadd.f32 %v1488_v23, %v1396_v20  ;;  %v1329_v50 = vmax.f32 %v1123_v34, 0.0  ;;  %v1477_v26 = vadd.f32 %v1476_v15, %v1475_v6 }
 0x206   :  { %v1127_v36 = vpop.f32.mrf.mxu1 }
 0x207   :  { %v1128_v39 = vadd.f32 %v2523_v37, %v1127_v36  ;;  %v1490_v40 = vrot.slane %v1489_v28, 4  ;;  %v1397_v29 = vmul.f32 %v2532_v59, %v1329_v50  ;;  %v1600_v43 = vsel %vm1599_vm4, %v1477_v26, %v2619_v21 }
 0x208   :  { %v1129_v41 = vpop.f32.mrf.mxu1  ;;  %v1602_v47 = vsel %vm1601_vm5, %v1486_v22, %v1600_v43 }
 0x209   :  { %v1330_v45 = vmax.f32 %v1128_v39, 0.0  ;;  %v1491_v58 = vadd.f32 %v1490_v40, %v1489_v28 }
 0x20a   :  { %v1132_v49 = vpop.f32.mrf.mxu1 }
 0x20b   :  { %v1133_v30 = vadd.f32 %v2523_v37, %v1132_v49  ;;  %v1398_v46 = vmul.f32 %v2538_v60, %v1330_v45  ;;  %v1492_v24 = vrot.slane %v1491_v58, 2 }
 0x20c   :  { %v1134_v51 = vpop.f32.mrf.mxu1 }
 0x20d   :  { %v1331_v56 = vmax.f32 %v1133_v30, 0.0  ;;  %v1496_v63 = vadd.f32 %v1398_v46, %v1397_v29  ;;  %v1493_v7 = vadd.f32 %v1492_v24, %v1491_v58 }
 0x20e   :  { %v1137_v44 = vpop.f32.mrf.mxu1 }
 0x20f   :  { %v1399_v61 = vmul.f32 %v2548_v5, %v1331_v56  ;;  %v1138_v27 = vadd.f32 %v2523_v37, %v1137_v44  ;;  %v1494_v35 = vrot.slane %v1493_v7, 1 }
 0x210   :  { %v1139_v62 = vpop.f32.mrf.mxu1 }
 0x211   :  { %v1332_v52 = vmax.f32 %v1138_v27, 0.0  ;;  %v1497_v1 = vadd.f32 %v1496_v63, %v1399_v61  ;;  %v1495_v28 = vadd.f32 %v1494_v35, %v1493_v7 }
 0x212   :  { %v1142_v0 = vpop.f32.mrf.mxu1 }
 0x213   :  { %v1400_v3 = vmul.f32 %v2558_v33, %v1332_v52  ;;  %v1143_v2 = vadd.f32 %v2523_v37, %v1142_v0  ;;  %v1604_v30 = vsel %vm1603_vm6, %v1495_v28, %v1602_v47 }
 0x214   :  { %v1144_v42 = vpop.f32.mrf.mxu1 }
 0x215   :  { %v1498_v4 = vadd.f32 %v1497_v1, %v1400_v3  ;;  %v1333_v9 = vmax.f32 %v1143_v2, 0.0 }
 0x216   :  { %v1147_v32 = vpop.f32.mrf.mxu1 }
 0x217   :  { %v1499_v8 = vrot.slane %v1498_v4, 4  ;;  %v1148_v10 = vadd.f32 %v2523_v37, %v1147_v32  ;;  %v1401_v18 = vmul.f32 %v2532_v59, %v1333_v9 }
 0x218   :  { %v1149_v11 = vpop.f32.mrf.mxu1 }
 0x219   :  { %v1500_v13 = vadd.f32 %v1499_v8, %v1498_v4  ;;  %v1334_v14 = vmax.f32 %v1148_v10, 0.0 }
 0x21a   :  { %v1152_v16 = vpop.f32.mrf.mxu1 }
 0x21b   :  { %v1501_v17 = vrot.slane %v1500_v13, 2  ;;  %v1402_v19 = vmul.f32 %v2538_v60, %v1334_v14  ;;  %v1153_v31 = vadd.f32 %v2523_v37, %v1152_v16 }
 0x21c   :  { %v1154_v20 = vpop.f32.mrf.mxu1 }
 0x21d   :  { %v1502_v23 = vadd.f32 %v1501_v17, %v1500_v13  ;;  %v1505_v38 = vadd.f32 %v1402_v19, %v1401_v18  ;;  %v1335_v25 = vmax.f32 %v1153_v31, 0.0 }
 0x21e   :  { %v1157_v36 = vpop.f32.mrf.mxu1 }
 0x21f   :  { %v1503_v34 = vrot.slane %v1502_v23, 1  ;;  %v1403_v39 = vmul.f32 %v2548_v5, %v1335_v25  ;;  %v1158_v41 = vadd.f32 %v2523_v37, %v1157_v36 }
 0x220   :  { %v1159_v45 = vpop.f32.mrf.mxu1 }
 0x221   :  { %v1504_v40 = vadd.f32 %v1503_v34, %v1502_v23  ;;  %v1506_v49 = vadd.f32 %v1505_v38, %v1403_v39  ;;  %v1336_v50 = vmax.f32 %v1158_v41, 0.0 }
 0x222   :  { %v1162_v51 = vpop.f32.mrf.mxu1 }
 0x223   :  { %v1606_v54 = vsel %vm1605_vm7, %v1504_v40, %v1604_v30  ;;  %v1404_v46 = vmul.f32 %v2558_v33, %v1336_v50  ;;  %v1163_v56 = vadd.f32 %v2523_v37, %v1162_v51 }
 0x224   :  { %1616 = vst [vmem:[%s2736_s6] sm:$0xff] %v1606_v54  ;;  %v1164_v21 = vpop.f32.mrf.mxu1 }
 0x225   :  { %v1507_v57 = vadd.f32 %v1506_v49, %v1404_v46  ;;  %v1337_v44 = vmax.f32 %v1163_v56, 0.0 }
 0x226   :  { %v1167_v58 = vpop.f32.mrf.mxu1 }
 0x227   :  { %v1168_v29 = vadd.f32 %v2523_v37, %v1167_v58  ;;  %v1405_v53 = vmul.f32 %v2532_v59, %v1337_v44  ;;  %v1508_v24 = vrot.slane %v1507_v57, 4 }
 0x228   :  { %v1169_v61 = vpop.f32.mrf.mxu1 }
 0x229   :  { %v1338_v27 = vmax.f32 %v1168_v29, 0.0  ;;  %v1509_v4 = vadd.f32 %v1508_v24, %v1507_v57 }
 0x22a   :  { %v1172_v62 = vpop.f32.mrf.mxu1 }
 0x22b   :  { %v1406_v63 = vmul.f32 %v2538_v60, %v1338_v27  ;;  %v1173_v52 = vadd.f32 %v2523_v37, %v1172_v62  ;;  %v1510_v11 = vrot.slane %v1509_v4, 2 }
 0x22c   :  { %v1174_v55 = vpop.f32.mrf.mxu1 }
 0x22d   :  { %v1514_v0 = vadd.f32 %v1406_v63, %v1405_v53  ;;  %v1339_v1 = vmax.f32 %v1173_v52, 0.0  ;;  %v1511_v17 = vadd.f32 %v1510_v11, %v1509_v4 }
 0x22e   :  { %v1177_v3 = vpop.f32.mrf.mxu1 }
 0x22f   :  { %v1407_v2 = vmul.f32 %v2548_v5, %v1339_v1  ;;  %v1178_v42 = vadd.f32 %v2523_v37, %v1177_v3  ;;  %v1512_v26 = vrot.slane %v1511_v17, 1 }
 0x230   :  { %v1179_v48 = vpop.f32.mrf.mxu1 }
 0x231   :  { %v1515_v6 = vadd.f32 %v1514_v0, %v1407_v2  ;;  %v1340_v7 = vmax.f32 %v1178_v42, 0.0  ;;  %v1513_v40 = vadd.f32 %v1512_v26, %v1511_v17 }
 0x232   :  { %v1182_v32 = vpop.f32.mrf.mxu1 }
 0x233   :  { %v1408_v8 = vmul.f32 %v2558_v33, %v1340_v7  ;;  %v1183_v9 = vadd.f32 %v2523_v37, %v1182_v32 }
 0x234   :  { %v1184_v10 = vpop.f32.mrf.mxu1 }
 0x235   :  { %v1516_v12 = vadd.f32 %v1515_v6, %v1408_v8  ;;  %v1341_v15 = vmax.f32 %v1183_v9, 0.0 }
 0x236   :  { %v1187_v13 = vpop.f32.mrf.mxu1 }
 0x237   :  { %v1517_v14 = vrot.slane %v1516_v12, 4  ;;  %v1188_v35 = vadd.f32 %v2523_v37, %v1187_v13  ;;  %v1409_v22 = vmul.f32 %v2532_v59, %v1341_v15 }
 0x238   :  { %v1189_v16 = vpop.f32.mrf.mxu1 }
 0x239   :  { %v1518_v18 = vadd.f32 %v1517_v14, %v1516_v12  ;;  %v1342_v19 = vmax.f32 %v1188_v35, 0.0 }
 0x23a   :  { %v1192_v31 = vpop.f32.mrf.mxu1 }
 0x23b   :  { %v1519_v20 = vrot.slane %v1518_v18, 2  ;;  %v1410_v23 = vmul.f32 %v2538_v60, %v1342_v19  ;;  %v1193_v38 = vadd.f32 %v2523_v37, %v1192_v31 }
 0x23c   :  { %v1194_v25 = vpop.f32.mrf.mxu1 }
 0x23d   :  { %v1520_v28 = vadd.f32 %v1519_v20, %v1518_v18  ;;  %v1523_v36 = vadd.f32 %v1410_v23, %v1409_v22  ;;  %v1343_v34 = vmax.f32 %v1193_v38, 0.0 }
 0x23e   :  { %v1197_v39 = vpop.f32.mrf.mxu1 }
 0x23f   :  { %v1521_v41 = vrot.slane %v1520_v28, 1  ;;  %v1411_v43 = vmul.f32 %v2548_v5, %v1343_v34  ;;  %v1198_v45 = vadd.f32 %v2523_v37, %v1197_v39 }
 0x240   :  { %v1199_v47 = vpop.f32.mrf.mxu1 }
 0x241   :  { %v1522_v49 = vadd.f32 %v1521_v41, %v1520_v28  ;;  %v1524_v50 = vadd.f32 %v1523_v36, %v1411_v43  ;;  %v1344_v30 = vmax.f32 %v1198_v45, 0.0 }
 0x242   :  { %v1202_v51 = vpop.f32.mrf.mxu1 }
 0x243   :  { %v1607_v54 = vsel %vm1593_vm1, %v1522_v49, %v1513_v40  ;;  %v1412_v46 = vmul.f32 %v2558_v33, %v1344_v30  ;;  %v1203_v56 = vadd.f32 %v2523_v37, %v1202_v51 }
 0x244   :  { %v1204_v21 = vpop.f32.mrf.mxu1 }
 0x245   :  { %v1525_v57 = vadd.f32 %v1524_v50, %v1412_v46  ;;  %v1345_v29 = vmax.f32 %v1203_v56, 0.0 }
 0x246   :  { %v1207_v58 = vpop.f32.mrf.mxu1 }
 0x247   :  { %v1526_v44 = vrot.slane %v1525_v57, 4  ;;  %v1208_v61 = vadd.f32 %v2523_v37, %v1207_v58  ;;  %v1413_v55 = vmul.f32 %v2532_v59, %v1345_v29 }
 0x248   :  { %v1209_v27 = vpop.f32.mrf.mxu1 }
 0x249   :  { %v1527_v62 = vadd.f32 %v1526_v44, %v1525_v57  ;;  %v1346_v53 = vmax.f32 %v1208_v61, 0.0 }
 0x24a   :  { %v1212_v63 = vpop.f32.mrf.mxu1 }
 0x24b   :  { %v1528_v52 = vrot.slane %v1527_v62, 2  ;;  %v1414_v24 = vmul.f32 %v2538_v60, %v1346_v53  ;;  %v1213_v0 = vadd.f32 %v2523_v37, %v1212_v63 }
 0x24c   :  { %v1214_v1 = vpop.f32.mrf.mxu1 }
 0x24d   :  { %v1529_v3 = vadd.f32 %v1528_v52, %v1527_v62  ;;  %v1532_v2 = vadd.f32 %v1414_v24, %v1413_v55  ;;  %v1347_v42 = vmax.f32 %v1213_v0, 0.0 }
 0x24e   :  { %v1217_v48 = vpop.f32.mrf.mxu1 }
 0x24f   :  { %v1530_v4 = vrot.slane %v1529_v3, 1  ;;  %v1415_v6 = vmul.f32 %v2548_v5, %v1347_v42  ;;  %v1218_v7 = vadd.f32 %v2523_v37, %v1217_v48 }
 0x250   :  { %v1219_v32 = vpop.f32.mrf.mxu1 }
 0x251   :  { %v1531_v8 = vadd.f32 %v1530_v4, %v1529_v3  ;;  %v1348_v9 = vmax.f32 %v1218_v7, 0.0  ;;  %v1533_v12 = vadd.f32 %v1532_v2, %v1415_v6 }
 0x252   :  { %v1222_v10 = vpop.f32.mrf.mxu1 }
 0x253   :  { %v1608_v11 = vsel %vm1595_vm2, %v1531_v8, %v1607_v54  ;;  %v1416_v13 = vmul.f32 %v2558_v33, %v1348_v9  ;;  %v1223_v54 = vadd.f32 %v2523_v37, %v1222_v10 }
 0x254   :  { %v1224_v14 = vpop.f32.mrf.mxu1 }
 0x255   :  { %v1534_v15 = vadd.f32 %v1533_v12, %v1416_v13  ;;  %v1349_v63 = vmax.f32 %v1223_v54, 0.0 }
 0x256   :  { %v1227_v35 = vpop.f32.mrf.mxu1 }
 0x257   :  { %v1535_v16 = vrot.slane %v1534_v15, 4  ;;  %v1228_v50 = vadd.f32 %v2523_v37, %v1227_v35  ;;  %v1417_v8 = vmul.f32 %v2532_v59, %v1349_v63 }
 0x258   :  { %v1229_v17 = vpop.f32.mrf.mxu1 }
 0x259   :  { %v1536_v18 = vadd.f32 %v1535_v16, %v1534_v15  ;;  %v1350_v44 = vmax.f32 %v1228_v50, 0.0 }
 0x25a   :  { %v1232_v19 = vpop.f32.mrf.mxu1 }
 0x25b   :  { %v1537_v31 = vrot.slane %v1536_v18, 2  ;;  %v1233_v46 = vadd.f32 %v2523_v37, %v1232_v19  ;;  %v1418_v2 = vmul.f32 %v2538_v60, %v1350_v44 }
 0x25c   :  { %v1234_v20 = vpop.f32.mrf.mxu1 }
 0x25d   :  { %v1538_v22 = vadd.f32 %v1537_v31, %v1536_v18  ;;  %v1351_v52 = vmax.f32 %v1233_v46, 0.0  ;;  %v1541_v15 = vadd.f32 %v1418_v2, %v1417_v8 }
 0x25e   :  { %v1237_v23 = vpop.f32.mrf.mxu1 }
 0x25f   :  { %v1539_v38 = vrot.slane %v1538_v22, 1  ;;  %v1238_v29 = vadd.f32 %v2523_v37, %v1237_v23  ;;  %v1419_v9 = vmul.f32 %v2548_v5, %v1351_v52  ;;  %v1752_v52 = vld [vmem:[%s2734_s4] ss:$0 sm:$0xff] }
 0x260   :  { %v1239_v25 = vpop.f32.mrf.mxu1 }
 0x261   :  { %v1540_v26 = vadd.f32 %v1539_v38, %v1538_v22  ;;  %v1352_v42 = vmax.f32 %v1238_v29, 0.0  ;;  %v1542_v22 = vadd.f32 %v1541_v15, %v1419_v9 }
 0x262   :  { %v1242_v28 = vpop.f32.mrf.mxu1 }
 0x263   :  { %v2686_v36 = vsel %vm1597_vm3, %v1540_v26, %v1608_v11  ;;  %v1243_v21 = vadd.f32 %v2523_v37, %v1242_v28  ;;  %v1420_v35 = vmul.f32 %v2558_v33, %v1352_v42 }
 0x264   :  { %v1244_v34 = vpop.f32.mrf.mxu1 }
 0x265   :  { %v1353_v0 = vmax.f32 %v1243_v21, 0.0  ;;  %v1543_v28 = vadd.f32 %v1542_v22, %v1420_v35 }
 0x266   :  { %v1247_v39 = vpop.f32.mrf.mxu1 }
 0x267   :  { %v1248_v51 = vadd.f32 %v2523_v37, %v1247_v39  ;;  %v1421_v12 = vmul.f32 %v2532_v59, %v1353_v0 }
 0x268   :  { %v1249_v41 = vpop.f32.mrf.mxu1 }
 0x269   :  { %v1354_v62 = vmax.f32 %v1248_v51, 0.0 }
 0x26a   :  { %v1252_v43 = vpop.f32.mrf.mxu1 }
 0x26b   :  { %v1253_v57 = vadd.f32 %v2523_v37, %v1252_v43  ;;  %v1422_v6 = vmul.f32 %v2538_v60, %v1354_v62 }
 0x26c   :  { %v1254_v45 = vpop.f32.mrf.mxu1 }
 0x26d   :  { %v1355_v1 = vmax.f32 %v1253_v57, 0.0  ;;  %v1550_v19 = vadd.f32 %v1422_v6, %v1421_v12 }
 0x26e   :  { %v1257_v47 = vpop.f32.mrf.mxu1 }
 0x26f   :  { %v1258_v53 = vadd.f32 %v2523_v37, %v1257_v47  ;;  %v1423_v13 = vmul.f32 %v2548_v5, %v1355_v1 }
 0x270   :  { %v1259_v40 = vpop.f32.mrf.mxu1 }
 0x271   :  { %v1356_v7 = vmax.f32 %v1258_v53, 0.0  ;;  %v1551_v25 = vadd.f32 %v1550_v19, %v1423_v13 }
 0x272   :  { %v1262_v49 = vpop.f32.mrf.mxu1 }
 0x273   :  { %v1263_v61 = vadd.f32 %v2523_v37, %v1262_v49  ;;  %v1424_v31 = vmul.f32 %v2558_v33, %v1356_v7  ;;  %v1544_v49 = vrot.slane %v1543_v28, 4 }
 0x274   :  { %v1264_v30 = vpop.f32.mrf.mxu1 }
 0x275   :  { %v1357_v48 = vmax.f32 %v1263_v61, 0.0  ;;  %v1552_v41 = vadd.f32 %v1551_v25, %v1424_v31  ;;  %v1545_v57 = vadd.f32 %v1544_v49, %v1543_v28 }
 0x276   :  { %v1267_v56 = vpop.f32.mrf.mxu1 }
 0x277   :  { %v1268_v58 = vadd.f32 %v2523_v37, %v1267_v56  ;;  %v1425_v16 = vmul.f32 %v2532_v59, %v1357_v48  ;;  %v1553_v30 = vrot.slane %v1552_v41, 4 }
 0x278   :  { %v1269_v27 = vpop.f32.mrf.mxu1 }
 0x279   :  { %v1358_v55 = vmax.f32 %v1268_v58, 0.0  ;;  %v1554_v44 = vadd.f32 %v1553_v30, %v1552_v41 }
 0x27a   :  { %v1272_v24 = vpop.f32.mrf.mxu1 }
 0x27b   :  { %v1273_v3 = vadd.f32 %v2523_v37, %v1272_v24  ;;  %v1426_v10 = vmul.f32 %v2538_v60, %v1358_v55  ;;  %v1546_v24 = vrot.slane %v1545_v57, 2 }
 0x27c   :  { %v1274_v4 = vpop.f32.mrf.mxu1 }
 0x27d   :  { %v1359_v32 = vmax.f32 %v1273_v3, 0.0  ;;  %v1559_v23 = vadd.f32 %v1426_v10, %v1425_v16  ;;  %v1547_v48 = vadd.f32 %v1546_v24, %v1545_v57 }
 0x27e   :  { %v1277_v11 = vpop.f32.mrf.mxu1 }
 0x27f   :  { %v1278_v14 = vadd.f32 %v2523_v37, %v1277_v11  ;;  %v1427_v17 = vmul.f32 %v2548_v5, %v1359_v32 }
 0x280   :  { %v1279_v18 = vpop.f32.mrf.mxu1 }
 0x281   :  { %v1360_v20 = vmax.f32 %v1278_v14, 0.0  ;;  %v1560_v34 = vadd.f32 %v1559_v23, %v1427_v17 }
 0x282   :  { %v1282_v38 = vpop.f32.mrf.mxu1 }
 0x283   :  { %v1428_v26 = vmul.f32 %v2558_v33, %v1360_v20  ;;  %v1283_v47 = vadd.f32 %v2523_v37, %v1282_v38 }
 0x284   :  { %v1284_v39 = vpop.f32.mrf.mxu1 }
 0x285   :  { %v1561_v43 = vadd.f32 %v1560_v34, %v1428_v26  ;;  %v1361_v56 = vmax.f32 %v1283_v47, 0.0 }
 0x286   :  { %v1287_v45 = vpop.f32.mrf.mxu1 }
 0x287   :  { %v1288_v40 = vadd.f32 %v2523_v37, %v1287_v45  ;;  %v1562_v54 = vrot.slane %v1561_v43, 4  ;;  %v1429_v53 = vmul.f32 %v2532_v59, %v1361_v56 }
 0x288   :  { %v1289_v50 = vpop.f32.mrf.mxu1 }
 0x289   :  { %v1362_v51 = vmax.f32 %v1288_v40, 0.0  ;;  %v1563_v27 = vadd.f32 %v1562_v54, %v1561_v43 }
 0x28a   :  { %v1292_v46 = vpop.f32.mrf.mxu1 }
 0x28b   :  { %v1293_v21 = vadd.f32 %v2523_v37, %v1292_v46  ;;  %v1430_v29 = vmul.f32 %v2538_v60, %v1362_v51  ;;  %v1555_v37 = vrot.slane %v1554_v44, 2  ;;  %v1564_v2 = vrot.slane %v1563_v27, 2 }
 0x28c   :  { %v1294_v58 = vpop.f32.mrf.mxu1 }
 0x28d   :  { %v1363_v61 = vmax.f32 %v1293_v21, 0.0  ;;  %v1568_v1 = vadd.f32 %v1430_v29, %v1429_v53  ;;  %v1556_v4 = vadd.f32 %v1555_v37, %v1554_v44  ;;  %v1565_v59 = vadd.f32 %v1564_v2, %v1563_v27 }
 0x28e   :  { %v1297_v62 = vpop.f32.mrf.mxu1 }
 0x28f   :  { %v1431_v63 = vmul.f32 %v2548_v5, %v1363_v61  ;;  %v1298_v55 = vadd.f32 %v1752_v52, %v1297_v62  ;;  %v1548_v5 = vrot.slane %v1547_v48, 1  ;;  %v1557_v32 = vrot.slane %v1556_v4, 1 }
 0x290   :  { %v1299_v0 = vpop.f32.mrf.mxu1  ;;  %v1566_v9 = vrot.slane %v1565_v59, 1 }
 0x291   :  { %v1364_v3 = vmax.f32 %v1298_v55, 0.0  ;;  %v1569_v42 = vadd.f32 %v1568_v1, %v1431_v63  ;;  %v1549_v11 = vadd.f32 %v1548_v5, %v1547_v48  ;;  %v1558_v12 = vadd.f32 %v1557_v32, %v1556_v4 }
 0x292   :  { %v1567_v14 = vadd.f32 %v1566_v9, %v1565_v59 }
 0x293   :  { %v1432_v60 = vmul.f32 %v2558_v33, %v1364_v3  ;;  %v1610_v35 = vsel %vm1599_vm4, %v1549_v11, %v2686_v36 }
 0x294   :  { %v1611_v33 = vsel %vm1601_vm5, %v1558_v12, %v1610_v35 }
 0x295   :  { %v1570_v6 = vadd.f32 %v1569_v42, %v1432_v60  ;;  %v1612_v17 = vsel %vm1603_vm6, %v1567_v14, %v1611_v33 }
 0x297   :  { %v1571_v7 = vrot.slane %v1570_v6, 4 }
 0x299   :  { %v1572_v8 = vadd.f32 %v1571_v7, %v1570_v6 }
 0x29b   :  { %v1573_v10 = vrot.slane %v1572_v8, 2 }
 0x29d   :  { %v1574_v13 = vadd.f32 %v1573_v10, %v1572_v8 }
 0x29f   :  { %v1575_v15 = vrot.slane %v1574_v13, 1 }
 0x2a1   :  { %v1576_v16 = vadd.f32 %v1575_v15, %v1574_v13 }
 0x2a3   :  { %v1613_v18 = vsel %vm1605_vm7, %v1576_v16, %v1612_v17 }
 0x2a4   :  { %1617 = vst [vmem:[%s2736_s6 + $0x8] sm:$0xff] %v1613_v18 }

// kernel: model_forward.3
= control target key start
LH: loop header
LB: loop body
LE: loop exit
PB: predicated region body
PF: predicated region fallthrough
CT: control target
= control target key end

     0   :  { %s8704_s0 = inlined_call_operand.vmem [shape: f32[16,128], index: 0, kind: input, shape index: {}]   ;;  %s8705_s1 = inlined_call_operand.vmem [shape: f32[16,128], index: 1, kind: input, shape index: {}]   ;;  %s8706_s2 = inlined_call_operand.vmem [shape: f32[128,512], index: 2, kind: input, shape index: {}]   ;;  %s8707_s3 = inlined_call_operand.vmem [shape: f32[128,512], index: 3, kind: input, shape index: {}]   ;;  %s8708_s4 = inlined_call_operand.vmem [shape: f32[1,512], index: 4, kind: input, shape index: {}]   ;;  %s8709_s5 = inlined_call_operand.vmem [shape: f32[128,512], index: 5, kind: input, shape index: {}]   ;;  %s8710_s6 = inlined_call_operand.vmem [shape: f32[128,512], index: 6, kind: input, shape index: {}]   ;;  %s8711_s7 = inlined_call_operand.vmem [shape: f32[1,512], index: 7, kind: input, shape index: {}]   ;;  %s8712_s8 = inlined_call_operand.vmem [shape: f32[128,256], index: 8, kind: input, shape index: {}]   ;;  %s8713_s9 = inlined_call_operand.vmem [shape: f32[128,256], index: 9, kind: input, shape index: {}]   ;;  %s8714_s10 = inlined_call_operand.vmem [shape: f32[1,256], index: 10, kind: input, shape index: {}]   ;;  %s8715_s11 = inlined_call_operand.vmem [shape: f32[256,128], index: 11, kind: input, shape index: {}]   ;;  %s8716_s12 = inlined_call_operand.vmem [shape: f32[1,128], index: 12, kind: input, shape index: {}]   ;;  %s8717_s13 = inlined_call_operand.hbm [shape: f32[2,128], index: 13, kind: output, shape index: {}]  }
   0x1   :  { %v112_v0 = vld [vmem:[%s8706_s2 + $0x1e8] sm:$0xff]  ;;  %v114_v1 = vld [vmem:[%s8706_s2 + $0x1f8] sm:$0xff]  ;;  %v111_v2 = vld [vmem:[%s8706_s2 + $0x1e0] sm:$0xff] }
   0x2   :  { %137 = vmatprep.subr.mxu0 %v112_v0  ;;  %214 = vmatprep.subr.mxu1 %v114_v1  ;;  %v113_v3 = vld [vmem:[%s8706_s2 + $0x1f0] sm:$0xff]  ;;  %v108_v4 = vld [vmem:[%s8706_s2 + $0x1c8] sm:$0xff]  ;;  %v110_v5 = vld [vmem:[%s8706_s2 + $0x1d8] sm:$0xff] }
   0x3   :  { %138 = vmatpush1.msra.mxu0 %v111_v2  ;;  %215 = vmatpush1.msra.mxu1 %v113_v3  ;;  %v107_v6 = vld [vmem:[%s8706_s2 + $0x1c0] sm:$0xff]  ;;  %v109_v7 = vld [vmem:[%s8706_s2 + $0x1d0] sm:$0xff]  ;;  %v104_v8 = vld [vmem:[%s8706_s2 + $0x1a8] sm:$0xff] }
   0x4   :  { %139 = vmatprep.subr.mxu0 %v108_v4  ;;  %216 = vmatprep.subr.mxu1 %v110_v5  ;;  %v106_v9 = vld [vmem:[%s8706_s2 + $0x1b8] sm:$0xff]  ;;  %v103_v10 = vld [vmem:[%s8706_s2 + $0x1a0] sm:$0xff]  ;;  %v105_v11 = vld [vmem:[%s8706_s2 + $0x1b0] sm:$0xff]  ;;  %v8718_v4 = vmov 0.0  }
   0x5   :  { %140 = vmatpush1.msra.mxu0 %v107_v6  ;;  %217 = vmatpush1.msra.mxu1 %v109_v7  ;;  %v100_v12 = vld [vmem:[%s8706_s2 + $0x188] sm:$0xff]  ;;  %v102_v13 = vld [vmem:[%s8706_s2 + $0x198] sm:$0xff]  ;;  %v99_v14 = vld [vmem:[%s8706_s2 + $0x180] sm:$0xff] }
   0x6   :  { %141 = vmatprep.subr.mxu0 %v104_v8  ;;  %218 = vmatprep.subr.mxu1 %v106_v9  ;;  %v101_v15 = vld [vmem:[%s8706_s2 + $0x190] sm:$0xff]  ;;  %v96_v16 = vld [vmem:[%s8706_s2 + $0x168] sm:$0xff]  ;;  %v98_v17 = vld [vmem:[%s8706_s2 + $0x178] sm:$0xff] }
   0x7   :  { %142 = vmatpush1.msra.mxu0 %v103_v10  ;;  %219 = vmatpush1.msra.mxu1 %v105_v11  ;;  %v95_v18 = vld [vmem:[%s8706_s2 + $0x160] sm:$0xff]  ;;  %v97_v19 = vld [vmem:[%s8706_s2 + $0x170] sm:$0xff]  ;;  %v92_v20 = vld [vmem:[%s8706_s2 + $0x148] sm:$0xff] }
   0x8   :  { %143 = vmatprep.subr.mxu0 %v100_v12  ;;  %220 = vmatprep.subr.mxu1 %v102_v13  ;;  %v94_v21 = vld [vmem:[%s8706_s2 + $0x158] sm:$0xff]  ;;  %v91_v22 = vld [vmem:[%s8706_s2 + $0x140] sm:$0xff]  ;;  %v93_v23 = vld [vmem:[%s8706_s2 + $0x150] sm:$0xff] }
   0x9   :  { %144 = vmatpush1.msra.mxu0 %v99_v14  ;;  %221 = vmatpush1.msra.mxu1 %v101_v15  ;;  %v88_v24 = vld [vmem:[%s8706_s2 + $0x128] sm:$0xff]  ;;  %v90_v25 = vld [vmem:[%s8706_s2 + $0x138] sm:$0xff]  ;;  %v87_v26 = vld [vmem:[%s8706_s2 + $0x120] sm:$0xff] }
   0xa   :  { %145 = vmatprep.subr.mxu0 %v96_v16  ;;  %222 = vmatprep.subr.mxu1 %v98_v17  ;;  %v89_v27 = vld [vmem:[%s8706_s2 + $0x130] sm:$0xff]  ;;  %v84_v28 = vld [vmem:[%s8706_s2 + $0x108] sm:$0xff]  ;;  %v86_v29 = vld [vmem:[%s8706_s2 + $0x118] sm:$0xff] }
   0xb   :  { %146 = vmatpush1.msra.mxu0 %v95_v18  ;;  %223 = vmatpush1.msra.mxu1 %v97_v19  ;;  %v83_v30 = vld [vmem:[%s8706_s2 + $0x100] sm:$0xff]  ;;  %v85_v31 = vld [vmem:[%s8706_s2 + $0x110] sm:$0xff]  ;;  %v80_v32 = vld [vmem:[%s8706_s2 + $0xe8] sm:$0xff] }
   0xc   :  { %147 = vmatprep.subr.mxu0 %v92_v20  ;;  %224 = vmatprep.subr.mxu1 %v94_v21  ;;  %v82_v33 = vld [vmem:[%s8706_s2 + $0xf8] sm:$0xff]  ;;  %v79_v34 = vld [vmem:[%s8706_s2 + $0xe0] sm:$0xff]  ;;  %v81_v35 = vld [vmem:[%s8706_s2 + $0xf0] sm:$0xff] }
   0xd   :  { %148 = vmatpush1.msra.mxu0 %v91_v22  ;;  %225 = vmatpush1.msra.mxu1 %v93_v23  ;;  %v76_v36 = vld [vmem:[%s8706_s2 + $0xc8] sm:$0xff]  ;;  %v78_v37 = vld [vmem:[%s8706_s2 + $0xd8] sm:$0xff]  ;;  %v75_v38 = vld [vmem:[%s8706_s2 + $0xc0] sm:$0xff] }
   0xe   :  { %149 = vmatprep.subr.mxu0 %v88_v24  ;;  %226 = vmatprep.subr.mxu1 %v90_v25  ;;  %v77_v39 = vld [vmem:[%s8706_s2 + $0xd0] sm:$0xff]  ;;  %v72_v40 = vld [vmem:[%s8706_s2 + $0xa8] sm:$0xff]  ;;  %v74_v41 = vld [vmem:[%s8706_s2 + $0xb8] sm:$0xff] }
   0xf   :  { %150 = vmatpush1.msra.mxu0 %v87_v26  ;;  %227 = vmatpush1.msra.mxu1 %v89_v27  ;;  %v71_v42 = vld [vmem:[%s8706_s2 + $0xa0] sm:$0xff]  ;;  %v73_v43 = vld [vmem:[%s8706_s2 + $0xb0] sm:$0xff]  ;;  %v68_v44 = vld [vmem:[%s8706_s2 + $0x88] sm:$0xff] }
  0x10   :  { %151 = vmatprep.subr.mxu0 %v84_v28  ;;  %228 = vmatprep.subr.mxu1 %v86_v29  ;;  %v70_v45 = vld [vmem:[%s8706_s2 + $0x98] sm:$0xff]  ;;  %v67_v46 = vld [vmem:[%s8706_s2 + $0x80] sm:$0xff]  ;;  %v69_v47 = vld [vmem:[%s8706_s2 + $0x90] sm:$0xff] }
  0x11   :  { %152 = vmatpush1.msra.mxu0 %v83_v30  ;;  %229 = vmatpush1.msra.mxu1 %v85_v31  ;;  %v64_v48 = vld [vmem:[%s8706_s2 + $0x68] sm:$0xff]  ;;  %v66_v49 = vld [vmem:[%s8706_s2 + $0x78] sm:$0xff]  ;;  %v63_v50 = vld [vmem:[%s8706_s2 + $0x60] sm:$0xff] }
  0x12   :  { %153 = vmatprep.subr.mxu0 %v80_v32  ;;  %230 = vmatprep.subr.mxu1 %v82_v33  ;;  %v65_v51 = vld [vmem:[%s8706_s2 + $0x70] sm:$0xff]  ;;  %v60_v52 = vld [vmem:[%s8706_s2 + $0x48] sm:$0xff]  ;;  %v62_v53 = vld [vmem:[%s8706_s2 + $0x58] sm:$0xff] }
  0x13   :  { %154 = vmatpush1.msra.mxu0 %v79_v34  ;;  %231 = vmatpush1.msra.mxu1 %v81_v35  ;;  %v59_v54 = vld [vmem:[%s8706_s2 + $0x40] sm:$0xff]  ;;  %v61_v55 = vld [vmem:[%s8706_s2 + $0x50] sm:$0xff]  ;;  %v56_v56 = vld [vmem:[%s8706_s2 + $0x28] sm:$0xff] }
  0x14   :  { %155 = vmatprep.subr.mxu0 %v76_v36  ;;  %232 = vmatprep.subr.mxu1 %v78_v37  ;;  %v58_v57 = vld [vmem:[%s8706_s2 + $0x38] sm:$0xff]  ;;  %v45_v58 = vld [vmem:[%s8705_s1] sm:$0xff]  ;;  %v57_v61 = vld [vmem:[%s8706_s2 + $0x30] sm:$0xff] }
  0x15   :  { %156 = vmatpush1.msra.mxu0 %v75_v38  ;;  %233 = vmatpush1.msra.mxu1 %v77_v39  ;;  %v47_v59 = vld [vmem:[%s8704_s0] sm:$0xff]  ;;  %v52_v62 = vld [vmem:[%s8706_s2 + $0x8] sm:$0xff]  ;;  %v54_v63 = vld [vmem:[%s8706_s2 + $0x18] sm:$0xff] }
  0x16   :  { %157 = vmatprep.subr.mxu0 %v72_v40  ;;  %234 = vmatprep.subr.mxu1 %v74_v41  ;;  %v55_v60 = vld [vmem:[%s8706_s2 + $0x20] sm:$0xff]  ;;  %v4940_v1 = vmul.f32 %v47_v59, %v45_v58  ;;  %v53_v2 = vld [vmem:[%s8706_s2 + $0x10] sm:$0xff]  ;;  %v352_v3 = vld [vmem:[%s8709_s5 + $0x1e8] sm:$0xff] }
  0x17   :  { %158 = vmatpush1.msra.mxu0 %v71_v42  ;;  %235 = vmatpush1.msra.mxu1 %v73_v43  ;;  %v51_v0 = vld [vmem:[%s8706_s2] sm:$0xff]  ;;  %v354_v5 = vld [vmem:[%s8709_s5 + $0x1f8] sm:$0xff]  ;;  %v353_v7 = vld [vmem:[%s8709_s5 + $0x1f0] sm:$0xff] }
  0x18   :  { %159 = vmatprep.subr.mxu0 %v68_v44  ;;  %236 = vmatprep.subr.mxu1 %v70_v45  ;;  %v351_v6 = vld [vmem:[%s8709_s5 + $0x1e0] sm:$0xff]  ;;  %v348_v8 = vld [vmem:[%s8709_s5 + $0x1c8] sm:$0xff]  ;;  %v350_v9 = vld [vmem:[%s8709_s5 + $0x1d8] sm:$0xff] }
  0x19   :  { %160 = vmatpush1.msra.mxu0 %v67_v46  ;;  %237 = vmatpush1.msra.mxu1 %v69_v47  ;;  %v347_v10 = vld [vmem:[%s8709_s5 + $0x1c0] sm:$0xff]  ;;  %v349_v11 = vld [vmem:[%s8709_s5 + $0x1d0] sm:$0xff]  ;;  %v344_v12 = vld [vmem:[%s8709_s5 + $0x1a8] sm:$0xff] }
  0x1a   :  { %161 = vmatprep.subr.mxu0 %v64_v48  ;;  %238 = vmatprep.subr.mxu1 %v66_v49  ;;  %v346_v13 = vld [vmem:[%s8709_s5 + $0x1b8] sm:$0xff]  ;;  %v343_v14 = vld [vmem:[%s8709_s5 + $0x1a0] sm:$0xff]  ;;  %v345_v15 = vld [vmem:[%s8709_s5 + $0x1b0] sm:$0xff] }
  0x1b   :  { %162 = vmatpush1.msra.mxu0 %v63_v50  ;;  %239 = vmatpush1.msra.mxu1 %v65_v51  ;;  %v340_v16 = vld [vmem:[%s8709_s5 + $0x188] sm:$0xff]  ;;  %v342_v17 = vld [vmem:[%s8709_s5 + $0x198] sm:$0xff]  ;;  %v339_v18 = vld [vmem:[%s8709_s5 + $0x180] sm:$0xff] }
  0x1c   :  { %163 = vmatprep.subr.mxu0 %v60_v52  ;;  %240 = vmatprep.subr.mxu1 %v62_v53  ;;  %v341_v19 = vld [vmem:[%s8709_s5 + $0x190] sm:$0xff]  ;;  %v336_v20 = vld [vmem:[%s8709_s5 + $0x168] sm:$0xff]  ;;  %v338_v21 = vld [vmem:[%s8709_s5 + $0x178] sm:$0xff] }
  0x1d   :  { %164 = vmatpush1.msra.mxu0 %v59_v54  ;;  %241 = vmatpush1.msra.mxu1 %v61_v55  ;;  %v335_v22 = vld [vmem:[%s8709_s5 + $0x160] sm:$0xff]  ;;  %v337_v23 = vld [vmem:[%s8709_s5 + $0x170] sm:$0xff]  ;;  %v332_v24 = vld [vmem:[%s8709_s5 + $0x148] sm:$0xff] }
  0x1e   :  { %165 = vmatprep.subr.mxu0 %v56_v56  ;;  %242 = vmatprep.subr.mxu1 %v58_v57  ;;  %v334_v25 = vld [vmem:[%s8709_s5 + $0x158] sm:$0xff]  ;;  %v331_v26 = vld [vmem:[%s8709_s5 + $0x140] sm:$0xff]  ;;  %v333_v27 = vld [vmem:[%s8709_s5 + $0x150] sm:$0xff] }
  0x1f   :  { %166 = vmatpush1.msra.mxu0 %v55_v60  ;;  %243 = vmatpush1.msra.mxu1 %v57_v61  ;;  %v328_v28 = vld [vmem:[%s8709_s5 + $0x128] sm:$0xff]  ;;  %v330_v29 = vld [vmem:[%s8709_s5 + $0x138] sm:$0xff]  ;;  %v327_v30 = vld [vmem:[%s8709_s5 + $0x120] sm:$0xff] }
  0x20   :  { %167 = vmatprep.subr.mxu0 %v52_v62  ;;  %244 = vmatprep.subr.mxu1 %v54_v63  ;;  %v329_v31 = vld [vmem:[%s8709_s5 + $0x130] sm:$0xff]  ;;  %v324_v32 = vld [vmem:[%s8709_s5 + $0x108] sm:$0xff]  ;;  %v326_v33 = vld [vmem:[%s8709_s5 + $0x118] sm:$0xff] }
  0x21   :  { %168 = vmatpush1.msra.mxu0 %v51_v0  ;;  %201 = vmatprep.mubr.f32.mxu0 %v8718_v4  ;;  %v323_v34 = vld [vmem:[%s8709_s5 + $0x100] sm:$0xff]  ;;  %v325_v35 = vld [vmem:[%s8709_s5 + $0x110] sm:$0xff]  ;;  %v320_v36 = vld [vmem:[%s8709_s5 + $0xe8] sm:$0xff] }
  0x22   :  { %245 = vmatpush1.msra.mxu1 %v53_v2  ;;  %202 = vmatmul.mubr.f32.vlgmr.msra.gmra.mxu0 %v4940_v1  ;;  %v322_v37 = vld [vmem:[%s8709_s5 + $0xf8] sm:$0xff]  ;;  %v319_v38 = vld [vmem:[%s8709_s5 + $0xe0] sm:$0xff]  ;;  %v321_v39 = vld [vmem:[%s8709_s5 + $0xf0] sm:$0xff] }
  0x23   :  { %278 = vmatprep.mubr.f32.mxu1 %v8718_v4  ;;  %377 = vmatprep.subr.mxu0 %v352_v3  ;;  %v316_v40 = vld [vmem:[%s8709_s5 + $0xc8] sm:$0xff]  ;;  %v318_v41 = vld [vmem:[%s8709_s5 + $0xd8] sm:$0xff]  ;;  %v315_v42 = vld [vmem:[%s8709_s5 + $0xc0] sm:$0xff] }
  0x24   :  { %454 = vmatprep.subr.mxu1 %v354_v5  ;;  %279 = vmatmul.mubr.f32.vlgmr.msra.gmra.mxu1 %v4940_v1  ;;  %v317_v43 = vld [vmem:[%s8709_s5 + $0xd0] sm:$0xff]  ;;  %v312_v44 = vld [vmem:[%s8709_s5 + $0xa8] sm:$0xff]  ;;  %v314_v45 = vld [vmem:[%s8709_s5 + $0xb8] sm:$0xff] }
  0x25   :  { %378 = vmatpush1.msra.mxu0 %v351_v6  ;;  %455 = vmatpush1.msra.mxu1 %v353_v7  ;;  %v311_v46 = vld [vmem:[%s8709_s5 + $0xa0] sm:$0xff]  ;;  %v313_v47 = vld [vmem:[%s8709_s5 + $0xb0] sm:$0xff]  ;;  %v308_v48 = vld [vmem:[%s8709_s5 + $0x88] sm:$0xff] }
  0x26   :  { %379 = vmatprep.subr.mxu0 %v348_v8  ;;  %456 = vmatprep.subr.mxu1 %v350_v9  ;;  %v310_v49 = vld [vmem:[%s8709_s5 + $0x98] sm:$0xff]  ;;  %v307_v50 = vld [vmem:[%s8709_s5 + $0x80] sm:$0xff]  ;;  %v309_v51 = vld [vmem:[%s8709_s5 + $0x90] sm:$0xff] }
  0x27   :  { %380 = vmatpush1.msra.mxu0 %v347_v10  ;;  %457 = vmatpush1.msra.mxu1 %v349_v11  ;;  %v46_v52 = vld [vmem:[%s8705_s1 + $0x8] sm:$0xff]  ;;  %v306_v55 = vld [vmem:[%s8709_s5 + $0x78] sm:$0xff]  ;;  %v303_v56 = vld [vmem:[%s8709_s5 + $0x60] sm:$0xff] }
  0x28   :  { %381 = vmatprep.subr.mxu0 %v344_v12  ;;  %458 = vmatprep.subr.mxu1 %v346_v13  ;;  %v48_v53 = vld [vmem:[%s8704_s0 + $0x8] sm:$0xff]  ;;  %v305_v57 = vld [vmem:[%s8709_s5 + $0x70] sm:$0xff]  ;;  %v302_v60 = vld [vmem:[%s8709_s5 + $0x58] sm:$0xff] }
  0x29   :  { %382 = vmatpush1.msra.mxu0 %v343_v14  ;;  %459 = vmatpush1.msra.mxu1 %v345_v15  ;;  %v304_v54 = vld [vmem:[%s8709_s5 + $0x68] sm:$0xff]  ;;  %v5114_v59 = vmul.f32 %v48_v53, %v46_v52  ;;  %v299_v61 = vld [vmem:[%s8709_s5 + $0x40] sm:$0xff]  ;;  %v301_v62 = vld [vmem:[%s8709_s5 + $0x50] sm:$0xff] }
  0x2a   :  { %383 = vmatprep.subr.mxu0 %v340_v16  ;;  %460 = vmatprep.subr.mxu1 %v342_v17  ;;  %v300_v58 = vld [vmem:[%s8709_s5 + $0x48] sm:$0xff]  ;;  %v298_v0 = vld [vmem:[%s8709_s5 + $0x38] sm:$0xff]  ;;  %v295_v2 = vld [vmem:[%s8709_s5 + $0x20] sm:$0xff] }
  0x2b   :  { %384 = vmatpush1.msra.mxu0 %v339_v18  ;;  %461 = vmatpush1.msra.mxu1 %v341_v19  ;;  %v296_v63 = vld [vmem:[%s8709_s5 + $0x28] sm:$0xff]  ;;  %v297_v3 = vld [vmem:[%s8709_s5 + $0x30] sm:$0xff]  ;;  %v294_v6 = vld [vmem:[%s8709_s5 + $0x18] sm:$0xff] }
  0x2c   :  { %385 = vmatprep.subr.mxu0 %v336_v20  ;;  %462 = vmatprep.subr.mxu1 %v338_v21  ;;  %v292_v5 = vld [vmem:[%s8709_s5 + $0x8] sm:$0xff]  ;;  %v291_v7 = vld [vmem:[%s8709_s5] sm:$0xff]  ;;  %v293_v8 = vld [vmem:[%s8709_s5 + $0x10] sm:$0xff] }
  0x2d   :  { %386 = vmatpush1.msra.mxu0 %v335_v22  ;;  %463 = vmatpush1.msra.mxu1 %v337_v23  ;;  %v5156_v9 = vld [vmem:[%s8707_s3 + $0x1e8] sm:$0xff]  ;;  %v5162_v10 = vld [vmem:[%s8707_s3 + $0x1f8] sm:$0xff]  ;;  %v5168_v11 = vld [vmem:[%s8707_s3 + $0x1e0] sm:$0xff] }
  0x2e   :  { %387 = vmatprep.subr.mxu0 %v332_v24  ;;  %464 = vmatprep.subr.mxu1 %v334_v25  ;;  %v5173_v12 = vld [vmem:[%s8707_s3 + $0x1f0] sm:$0xff]  ;;  %v5180_v13 = vld [vmem:[%s8707_s3 + $0x1c8] sm:$0xff]  ;;  %v5185_v14 = vld [vmem:[%s8707_s3 + $0x1d8] sm:$0xff] }
  0x2f   :  { %388 = vmatpush1.msra.mxu0 %v331_v26  ;;  %465 = vmatpush1.msra.mxu1 %v333_v27  ;;  %v5192_v15 = vld [vmem:[%s8707_s3 + $0x1c0] sm:$0xff]  ;;  %v5197_v16 = vld [vmem:[%s8707_s3 + $0x1d0] sm:$0xff]  ;;  %v5204_v17 = vld [vmem:[%s8707_s3 + $0x1a8] sm:$0xff] }
  0x30   :  { %389 = vmatprep.subr.mxu0 %v328_v28  ;;  %466 = vmatprep.subr.mxu1 %v330_v29  ;;  %v5216_v18 = vld [vmem:[%s8707_s3 + $0x1a0] sm:$0xff]  ;;  %v5221_v19 = vld [vmem:[%s8707_s3 + $0x1b0] sm:$0xff]  ;;  %v5228_v20 = vld [vmem:[%s8707_s3 + $0x188] sm:$0xff] }
  0x31   :  { %390 = vmatpush1.msra.mxu0 %v327_v30  ;;  %467 = vmatpush1.msra.mxu1 %v329_v31  ;;  %v5233_v21 = vld [vmem:[%s8707_s3 + $0x198] sm:$0xff]  ;;  %v5240_v22 = vld [vmem:[%s8707_s3 + $0x180] sm:$0xff]  ;;  %v5245_v23 = vld [vmem:[%s8707_s3 + $0x190] sm:$0xff] }
  0x32   :  { %391 = vmatprep.subr.mxu0 %v324_v32  ;;  %468 = vmatprep.subr.mxu1 %v326_v33  ;;  %v5252_v24 = vld [vmem:[%s8707_s3 + $0x168] sm:$0xff]  ;;  %v5257_v25 = vld [vmem:[%s8707_s3 + $0x178] sm:$0xff]  ;;  %v5264_v26 = vld [vmem:[%s8707_s3 + $0x160] sm:$0xff] }
  0x33   :  { %392 = vmatpush1.msra.mxu0 %v323_v34  ;;  %469 = vmatpush1.msra.mxu1 %v325_v35  ;;  %v5269_v27 = vld [vmem:[%s8707_s3 + $0x170] sm:$0xff]  ;;  %v5276_v28 = vld [vmem:[%s8707_s3 + $0x148] sm:$0xff]  ;;  %v5281_v29 = vld [vmem:[%s8707_s3 + $0x158] sm:$0xff] }
  0x34   :  { %393 = vmatprep.subr.mxu0 %v320_v36  ;;  %470 = vmatprep.subr.mxu1 %v322_v37  ;;  %v5288_v30 = vld [vmem:[%s8707_s3 + $0x140] sm:$0xff]  ;;  %v5293_v31 = vld [vmem:[%s8707_s3 + $0x150] sm:$0xff]  ;;  %v5300_v32 = vld [vmem:[%s8707_s3 + $0x128] sm:$0xff] }
  0x35   :  { %394 = vmatpush1.msra.mxu0 %v319_v38  ;;  %471 = vmatpush1.msra.mxu1 %v321_v39  ;;  %v5305_v33 = vld [vmem:[%s8707_s3 + $0x138] sm:$0xff]  ;;  %v5312_v34 = vld [vmem:[%s8707_s3 + $0x120] sm:$0xff]  ;;  %v5317_v35 = vld [vmem:[%s8707_s3 + $0x130] sm:$0xff] }
  0x36   :  { %395 = vmatprep.subr.mxu0 %v316_v40  ;;  %472 = vmatprep.subr.mxu1 %v318_v41  ;;  %v5324_v36 = vld [vmem:[%s8707_s3 + $0x108] sm:$0xff]  ;;  %v5329_v37 = vld [vmem:[%s8707_s3 + $0x118] sm:$0xff]  ;;  %v5336_v38 = vld [vmem:[%s8707_s3 + $0x100] sm:$0xff] }
  0x37   :  { %396 = vmatpush1.msra.mxu0 %v315_v42  ;;  %473 = vmatpush1.msra.mxu1 %v317_v43  ;;  %v5341_v39 = vld [vmem:[%s8707_s3 + $0x110] sm:$0xff]  ;;  %v5348_v40 = vld [vmem:[%s8707_s3 + $0xe8] sm:$0xff]  ;;  %v5353_v41 = vld [vmem:[%s8707_s3 + $0xf8] sm:$0xff] }
  0x38   :  { %397 = vmatprep.subr.mxu0 %v312_v44  ;;  %474 = vmatprep.subr.mxu1 %v314_v45  ;;  %v5360_v42 = vld [vmem:[%s8707_s3 + $0xe0] sm:$0xff]  ;;  %v5365_v43 = vld [vmem:[%s8707_s3 + $0xf0] sm:$0xff]  ;;  %v5372_v44 = vld [vmem:[%s8707_s3 + $0xc8] sm:$0xff] }
  0x39   :  { %398 = vmatpush1.msra.mxu0 %v311_v46  ;;  %475 = vmatpush1.msra.mxu1 %v313_v47  ;;  %v5377_v45 = vld [vmem:[%s8707_s3 + $0xd8] sm:$0xff]  ;;  %v5384_v46 = vld [vmem:[%s8707_s3 + $0xc0] sm:$0xff]  ;;  %v5389_v47 = vld [vmem:[%s8707_s3 + $0xd0] sm:$0xff] }
  0x3a   :  { %399 = vmatprep.subr.mxu0 %v308_v48  ;;  %476 = vmatprep.subr.mxu1 %v310_v49 }
  0x3b   :  { %400 = vmatpush1.msra.mxu0 %v307_v50  ;;  %477 = vmatpush1.msra.mxu1 %v309_v51 }
  0x3c   :  { %401 = vmatprep.subr.mxu0 %v304_v54  ;;  %478 = vmatprep.subr.mxu1 %v306_v55 }
  0x3d   :  { %402 = vmatpush1.msra.mxu0 %v303_v56  ;;  %479 = vmatpush1.msra.mxu1 %v305_v57 }
  0x3e   :  { %207 = vmatprep.mubr.f32.mxu0 %v8718_v4  ;;  %403 = vmatprep.subr.mxu0 %v300_v58 }
  0x3f   :  { %480 = vmatprep.subr.mxu1 %v302_v60  ;;  %208 = vmatmul.mubr.f32.gmra.mxu0 %v5114_v59 }
  0x40   :  { %404 = vmatpush1.msra.mxu0 %v299_v61  ;;  %481 = vmatpush1.msra.mxu1 %v301_v62 }
  0x41   :  { %284 = vmatprep.mubr.f32.mxu1 %v8718_v4  ;;  %405 = vmatprep.subr.mxu0 %v296_v63 }
  0x42   :  { %482 = vmatprep.subr.mxu1 %v298_v0  ;;  %285 = vmatmul.mubr.f32.gmra.mxu1 %v5114_v59 }
  0x43   :  { %406 = vmatpush1.msra.mxu0 %v295_v2  ;;  %483 = vmatpush1.msra.mxu1 %v297_v3 }
  0x44   :  { %407 = vmatprep.subr.mxu0 %v292_v5  ;;  %484 = vmatprep.subr.mxu1 %v294_v6 }
  0x45   :  { %408 = vmatpush1.msra.mxu0 %v291_v7  ;;  %441 = vmatprep.mubr.f32.mxu0 %v8718_v4 }
  0x46   :  { %485 = vmatpush1.msra.mxu1 %v293_v8  ;;  %442 = vmatmul.mubr.f32.vlgmr.msra.gmra.mxu0 %v4940_v1 }
  0x47   :  { %518 = vmatprep.mubr.f32.mxu1 %v8718_v4  ;;  %659 = vmatprep.subr.mxu0 %v5156_v9 }
  0x48   :  { %730 = vmatprep.subr.mxu1 %v5162_v10  ;;  %519 = vmatmul.mubr.f32.vlgmr.msra.gmra.mxu1 %v4940_v1  ;;  %v5209_v1 = vld [vmem:[%s8707_s3 + $0x1b8] sm:$0xff] }
  0x49   :  { %660 = vmatpush1.msra.mxu0 %v5168_v11  ;;  %731 = vmatpush1.msra.mxu1 %v5173_v12 }
  0x4a   :  { %661 = vmatprep.subr.mxu0 %v5180_v13  ;;  %732 = vmatprep.subr.mxu1 %v5185_v14 }
  0x4b   :  { %662 = vmatpush1.msra.mxu0 %v5192_v15  ;;  %733 = vmatpush1.msra.mxu1 %v5197_v16 }
  0x4c   :  { %663 = vmatprep.subr.mxu0 %v5204_v17  ;;  %734 = vmatprep.subr.mxu1 %v5209_v1 }
  0x4d   :  { %664 = vmatpush1.msra.mxu0 %v5216_v18  ;;  %735 = vmatpush1.msra.mxu1 %v5221_v19 }
  0x4e   :  { %665 = vmatprep.subr.mxu0 %v5228_v20  ;;  %736 = vmatprep.subr.mxu1 %v5233_v21 }
  0x4f   :  { %666 = vmatpush1.msra.mxu0 %v5240_v22  ;;  %737 = vmatpush1.msra.mxu1 %v5245_v23 }
  0x50   :  { %667 = vmatprep.subr.mxu0 %v5252_v24  ;;  %738 = vmatprep.subr.mxu1 %v5257_v25 }
  0x51   :  { %668 = vmatpush1.msra.mxu0 %v5264_v26  ;;  %739 = vmatpush1.msra.mxu1 %v5269_v27 }
  0x52   :  { %669 = vmatprep.subr.mxu0 %v5276_v28  ;;  %740 = vmatprep.subr.mxu1 %v5281_v29 }
  0x53   :  { %670 = vmatpush1.msra.mxu0 %v5288_v30  ;;  %741 = vmatpush1.msra.mxu1 %v5293_v31 }
  0x54   :  { %671 = vmatprep.subr.mxu0 %v5300_v32  ;;  %742 = vmatprep.subr.mxu1 %v5305_v33 }
  0x55   :  { %672 = vmatpush1.msra.mxu0 %v5312_v34  ;;  %743 = vmatpush1.msra.mxu1 %v5317_v35 }
  0x56   :  { %673 = vmatprep.subr.mxu0 %v5324_v36  ;;  %744 = vmatprep.subr.mxu1 %v5329_v37 }
  0x57   :  { %674 = vmatpush1.msra.mxu0 %v5336_v38  ;;  %745 = vmatpush1.msra.mxu1 %v5341_v39 }
  0x58   :  { %675 = vmatprep.subr.mxu0 %v5348_v40  ;;  %746 = vmatprep.subr.mxu1 %v5353_v41 }
  0x59   :  { %18 = vsyncpa [#allocation3], 0  ;;  %676 = vmatpush1.msra.mxu0 %v5360_v42  ;;  %747 = vmatpush1.msra.mxu1 %v5365_v43  ;;  %v5396_v48 = vld [vmem:[%s8707_s3 + $0xa8] sm:$0xff]  ;;  %v5401_v49 = vld [vmem:[%s8707_s3 + $0xb8] sm:$0xff]  ;;  %s4674_s27 = smov [#allocation2]  }
  0x5a   :  { %677 = vmatprep.subr.mxu0 %v5372_v44  ;;  %748 = vmatprep.subr.mxu1 %v5377_v45  ;;  %v5408_v50 = vld [vmem:[%s8707_s3 + $0xa0] sm:$0xff]  ;;  %v5413_v51 = vld [vmem:[%s8707_s3 + $0xb0] sm:$0xff]  ;;  %v5420_v52 = vld [vmem:[%s8707_s3 + $0x88] sm:$0xff]  ;;  %s4037_s28 = sshll.u32 %s4674_s27, 4  ;;  %s4038_s28 = int_to_ptr.vmem [resolvable:$true] %s4037_s28 }
  0x5b   :  { %678 = vmatpush1.msra.mxu0 %v5384_v46  ;;  %749 = vmatpush1.msra.mxu1 %v5389_v47  ;;  %v5425_v53 = vld [vmem:[%s8707_s3 + $0x98] sm:$0xff]  ;;  %v5432_v54 = vld [vmem:[%s8707_s3 + $0x80] sm:$0xff]  ;;  %v5437_v55 = vld [vmem:[%s8707_s3 + $0x90] sm:$0xff]  ;;  %s4651_s5 = scalar_lea.vmem %s4038_s28, 32  ;;  %p4656_p1 = scmp.lt.s32.totalorder %s4038_s28, %s4038_s28 }
  0x5c   :  { %679 = vmatprep.subr.mxu0 %v5396_v48  ;;  %750 = vmatprep.subr.mxu1 %v5401_v49  ;;  %9202 = vst [vmem:[#allocation5_spill] sm:$0xff] %v5437_v55  ;;  %v5444_v56 = vld [vmem:[%s8707_s3 + $0x68] sm:$0xff]  ;;  %v5449_v57 = vld [vmem:[%s8707_s3 + $0x78] sm:$0xff]  ;;  %v5456_v58 = vld [vmem:[%s8707_s3 + $0x60] sm:$0xff]  ;;  %p4652_p0 = scmp.ne.s32.totalorder %s4038_s28, %s4651_s5  ;;  %p4657_p2 = scmp.lt.s32.totalorder %s4651_s5, %s4651_s5 }
  0x5d   :  { %680 = vmatpush1.msra.mxu0 %v5408_v50  ;;  %751 = vmatpush1.msra.mxu1 %v5413_v51  ;;  %9203 = vst [vmem:[#allocation6_spill] sm:$0xff] %v5444_v56  ;;  %9204 = vst [vmem:[#allocation7_spill] sm:$0xff] %v5449_v57  ;;  %v5461_v60 = vld [vmem:[%s8707_s3 + $0x70] sm:$0xff]  ;;  %v5468_v61 = vld [vmem:[%s8707_s3 + $0x48] sm:$0xff] }
  0x5e   :  { %681 = vmatprep.subr.mxu0 %v5420_v52  ;;  %752 = vmatprep.subr.mxu1 %v5425_v53  ;;  %9205 = vst [vmem:[#allocation8_spill] sm:$0xff] %v5456_v58  ;;  %9206 = vst [vmem:[#allocation9_spill] sm:$0xff] %v5461_v60  ;;  %v5475_v62 = vld [vmem:[%s8707_s3 + $0x58] sm:$0xff]  ;;  %v5482_v63 = vld [vmem:[%s8707_s3 + $0x40] sm:$0xff]  ;;  %p4658_p3 = por %p4657_p2, %p4656_p1 }
  0x5f   :  { %682 = vmatpush1.msra.mxu0 %v5432_v54  ;;  %753 = vmatpush1.msra.mxu1 %v5437_v55  ;;  %9207 = vst [vmem:[#allocation10_spill] sm:$0xff] %v5468_v61  ;;  %9208 = vst [vmem:[#allocation11_spill] sm:$0xff] %v5475_v62  ;;  %v5489_v0 = vld [vmem:[%s8707_s3 + $0x50] sm:$0xff]  ;;  %v5494_v2 = vld [vmem:[%s8707_s3 + $0x28] sm:$0xff] }
  0x60   :  { %683 = vmatprep.subr.mxu0 %v5444_v56  ;;  %754 = vmatprep.subr.mxu1 %v5449_v57  ;;  %9209 = vst [vmem:[#allocation12_spill] sm:$0xff] %v5482_v63  ;;  %9210 = vst [vmem:[#allocation13_spill] sm:$0xff] %v5489_v0  ;;  %v5501_v3 = vld [vmem:[%s8707_s3 + $0x38] sm:$0xff]  ;;  %v5508_v5 = vld [vmem:[%s8707_s3 + $0x20] sm:$0xff]  ;;  %p4659_p4 = pnand %p4658_p3, %p4652_p0 }
  0x61   :  { %684 = vmatpush1.msra.mxu0 %v5456_v58  ;;  %755 = vmatpush1.msra.mxu1 %v5461_v60  ;;  %9211 = vst [vmem:[#allocation14_spill] sm:$0xff] %v5494_v2  ;;  %9212 = vst [vmem:[#allocation15_spill] sm:$0xff] %v5501_v3  ;;  %v5513_v6 = vld [vmem:[%s8707_s3 + $0x30] sm:$0xff]  ;;  %v5520_v7 = vld [vmem:[%s8707_s3 + $0x8] sm:$0xff] }
  0x62   :  { %447 = vmatprep.mubr.f32.mxu0 %v8718_v4  ;;  %685 = vmatprep.subr.mxu0 %v5468_v61  ;;  %9213 = vst [vmem:[#allocation16_spill] sm:$0xff] %v5508_v5  ;;  %9214 = vst [vmem:[#allocation17_spill] sm:$0xff] %v5513_v6  ;;  %v5525_v8 = vld [vmem:[%s8707_s3 + $0x18] sm:$0xff] }
  0x63   :  { %756 = vmatprep.subr.mxu1 %v5475_v62  ;;  %448 = vmatmul.mubr.f32.gmra.mxu0 %v5114_v59  ;;  %9215 = vst [vmem:[#allocation18_spill] sm:$0xff] %v5520_v7  ;;  %9216 = vst [vmem:[#allocation19_spill] sm:$0xff] %v5525_v8 }
  0x64   :  { %524 = vmatprep.mubr.f32.mxu1 %v8718_v4  ;;  %686 = vmatpush1.msra.mxu0 %v5482_v63  ;;  %v5532_v4 = vld [vmem:[%s8707_s3] sm:$0xff] }
  0x65   :  { %757 = vmatpush1.msra.mxu1 %v5489_v0  ;;  %687 = vmatprep.subr.mxu0 %v5494_v2  ;;  %9217 = vst [vmem:[#allocation20_spill] sm:$0xff] %v5532_v4  ;;  %v5539_v2 = vld [vmem:[%s8707_s3 + $0x10] sm:$0xff] }
  0x66   :  { %525 = vmatmul.mubr.f32.gmra.mxu1 %v5114_v59  ;;  %758 = vmatprep.subr.mxu1 %v5501_v3  ;;  %9218 = vst [vmem:[#allocation21_spill] sm:$0xff] %v5539_v2  ;;  %v9219_v59 = vmov 0.0   ;;  %v5548_v3 = vld [vmem:[%s8710_s6 + $0x1e8] sm:$0xff]  ;;  %v5589_v0 = vld [vmem:[%s8710_s6 + $0x1d0] sm:$0xff] }
  0x67   :  { %688 = vmatpush1.msra.mxu0 %v5508_v5  ;;  %759 = vmatpush1.msra.mxu1 %v5513_v6  ;;  %9220 = vst [vmem:[#allocation22_spill] sm:$0xff] %v5548_v3  ;;  %v5553_v6 = vld [vmem:[%s8710_s6 + $0x1f8] sm:$0xff]  ;;  %v5584_v5 = vld [vmem:[%s8710_s6 + $0x1c0] sm:$0xff]  ;;  %9227 = vst [vmem:[#allocation29_spill] sm:$0xff] %v5589_v0 }
  0x68   :  { %689 = vmatprep.subr.mxu0 %v5520_v7  ;;  %760 = vmatprep.subr.mxu1 %v5525_v8  ;;  %9221 = vst [vmem:[#allocation23_spill] sm:$0xff] %v5553_v6  ;;  %v5565_v8 = vld [vmem:[%s8710_s6 + $0x1f0] sm:$0xff]  ;;  %v5577_v7 = vld [vmem:[%s8710_s6 + $0x1d8] sm:$0xff]  ;;  %9226 = vst [vmem:[#allocation28_spill] sm:$0xff] %v5584_v5 }
  0x69   :  { %690 = vmatpush1.msra.mxu0 %v5532_v4  ;;  %723 = vmatprep.mubr.f32.mxu0 %v9219_v59  ;;  %v5560_v4 = vld [vmem:[%s8710_s6 + $0x1e0] sm:$0xff]  ;;  %9223 = vst [vmem:[#allocation25_spill] sm:$0xff] %v5565_v8  ;;  %9225 = vst [vmem:[#allocation27_spill] sm:$0xff] %v5577_v7 }
  0x6a   :  { %761 = vmatpush1.msra.mxu1 %v5539_v2  ;;  %794 = vmatprep.mubr.f32.mxu1 %v9219_v59  ;;  %9222 = vst [vmem:[#allocation24_spill] sm:$0xff] %v5560_v4  ;;  %v5572_v2 = vld [vmem:[%s8710_s6 + $0x1c8] sm:$0xff] }
  0x6b   :  { %724 = vmatmul.mubr.f32.vlgmr.msra.gmra.mxu0 %v9219_v59  ;;  %795 = vmatmul.mubr.f32.vlgmr.msra.gmra.mxu1 %v9219_v59  ;;  %9224 = vst [vmem:[#allocation26_spill] sm:$0xff] %v5572_v2 }
  0x6c   :  { %805 = vmatprep.subr.mxu0 %v5548_v3  ;;  %876 = vmatprep.subr.mxu1 %v5553_v6  ;;  %v5596_v3 = vld [vmem:[%s8710_s6 + $0x1a8] sm:$0xff]  ;;  %v5601_v6 = vld [vmem:[%s8710_s6 + $0x1b8] sm:$0xff] }
  0x6d   :  { %806 = vmatpush1.msra.mxu0 %v5560_v4  ;;  %877 = vmatpush1.msra.mxu1 %v5565_v8  ;;  %9228 = vst [vmem:[#allocation30_spill] sm:$0xff] %v5596_v3  ;;  %9229 = vst [vmem:[#allocation31_spill] sm:$0xff] %v5601_v6  ;;  %v5608_v4 = vld [vmem:[%s8710_s6 + $0x1a0] sm:$0xff]  ;;  %v5613_v8 = vld [vmem:[%s8710_s6 + $0x1b0] sm:$0xff] }
  0x6e   :  { %807 = vmatprep.subr.mxu0 %v5572_v2  ;;  %878 = vmatprep.subr.mxu1 %v5577_v7  ;;  %9230 = vst [vmem:[#allocation32_spill] sm:$0xff] %v5608_v4  ;;  %9231 = vst [vmem:[#allocation33_spill] sm:$0xff] %v5613_v8  ;;  %v5620_v2 = vld [vmem:[%s8710_s6 + $0x188] sm:$0xff]  ;;  %v5625_v7 = vld [vmem:[%s8710_s6 + $0x198] sm:$0xff] }
  0x6f   :  { %808 = vmatpush1.msra.mxu0 %v5584_v5  ;;  %879 = vmatpush1.msra.mxu1 %v5589_v0  ;;  %9232 = vst [vmem:[#allocation34_spill] sm:$0xff] %v5620_v2  ;;  %9233 = vst [vmem:[#allocation35_spill] sm:$0xff] %v5625_v7  ;;  %v5632_v5 = vld [vmem:[%s8710_s6 + $0x180] sm:$0xff]  ;;  %v5637_v0 = vld [vmem:[%s8710_s6 + $0x190] sm:$0xff] }
  0x70   :  { %809 = vmatprep.subr.mxu0 %v5596_v3  ;;  %880 = vmatprep.subr.mxu1 %v5601_v6  ;;  %9234 = vst [vmem:[#allocation36_spill] sm:$0xff] %v5632_v5  ;;  %9235 = vst [vmem:[#allocation37_spill] sm:$0xff] %v5637_v0  ;;  %v5644_v3 = vld [vmem:[%s8710_s6 + $0x168] sm:$0xff]  ;;  %v5649_v6 = vld [vmem:[%s8710_s6 + $0x178] sm:$0xff] }
  0x71   :  { %810 = vmatpush1.msra.mxu0 %v5608_v4  ;;  %881 = vmatpush1.msra.mxu1 %v5613_v8  ;;  %9236 = vst [vmem:[#allocation38_spill] sm:$0xff] %v5644_v3  ;;  %9237 = vst [vmem:[#allocation39_spill] sm:$0xff] %v5649_v6  ;;  %v5656_v4 = vld [vmem:[%s8710_s6 + $0x160] sm:$0xff]  ;;  %v5661_v8 = vld [vmem:[%s8710_s6 + $0x170] sm:$0xff] }
  0x72   :  { %811 = vmatprep.subr.mxu0 %v5620_v2  ;;  %882 = vmatprep.subr.mxu1 %v5625_v7  ;;  %9238 = vst [vmem:[#allocation40_spill] sm:$0xff] %v5656_v4  ;;  %9239 = vst [vmem:[#allocation41_spill] sm:$0xff] %v5661_v8  ;;  %v5668_v2 = vld [vmem:[%s8710_s6 + $0x148] sm:$0xff]  ;;  %v5673_v7 = vld [vmem:[%s8710_s6 + $0x158] sm:$0xff] }
  0x73   :  { %812 = vmatpush1.msra.mxu0 %v5632_v5  ;;  %883 = vmatpush1.msra.mxu1 %v5637_v0  ;;  %9240 = vst [vmem:[#allocation42_spill] sm:$0xff] %v5668_v2  ;;  %9241 = vst [vmem:[#allocation43_spill] sm:$0xff] %v5673_v7  ;;  %v5680_v5 = vld [vmem:[%s8710_s6 + $0x140] sm:$0xff]  ;;  %v5685_v0 = vld [vmem:[%s8710_s6 + $0x150] sm:$0xff] }
  0x74   :  { %813 = vmatprep.subr.mxu0 %v5644_v3  ;;  %884 = vmatprep.subr.mxu1 %v5649_v6  ;;  %9242 = vst [vmem:[#allocation44_spill] sm:$0xff] %v5680_v5  ;;  %9243 = vst [vmem:[#allocation45_spill] sm:$0xff] %v5685_v0  ;;  %v5692_v3 = vld [vmem:[%s8710_s6 + $0x128] sm:$0xff]  ;;  %v5697_v6 = vld [vmem:[%s8710_s6 + $0x138] sm:$0xff] }
  0x75   :  { %814 = vmatpush1.msra.mxu0 %v5656_v4  ;;  %885 = vmatpush1.msra.mxu1 %v5661_v8  ;;  %9244 = vst [vmem:[#allocation46_spill] sm:$0xff] %v5692_v3  ;;  %9245 = vst [vmem:[#allocation47_spill] sm:$0xff] %v5697_v6  ;;  %v5704_v4 = vld [vmem:[%s8710_s6 + $0x120] sm:$0xff]  ;;  %v5709_v8 = vld [vmem:[%s8710_s6 + $0x130] sm:$0xff] }
  0x76   :  { %815 = vmatprep.subr.mxu0 %v5668_v2  ;;  %886 = vmatprep.subr.mxu1 %v5673_v7  ;;  %9246 = vst [vmem:[#allocation48_spill] sm:$0xff] %v5704_v4  ;;  %9247 = vst [vmem:[#allocation49_spill] sm:$0xff] %v5709_v8  ;;  %v5716_v2 = vld [vmem:[%s8710_s6 + $0x108] sm:$0xff]  ;;  %v5721_v7 = vld [vmem:[%s8710_s6 + $0x118] sm:$0xff] }
  0x77   :  { %816 = vmatpush1.msra.mxu0 %v5680_v5  ;;  %887 = vmatpush1.msra.mxu1 %v5685_v0  ;;  %9248 = vst [vmem:[#allocation50_spill] sm:$0xff] %v5716_v2  ;;  %9249 = vst [vmem:[#allocation51_spill] sm:$0xff] %v5721_v7  ;;  %v5728_v5 = vld [vmem:[%s8710_s6 + $0x100] sm:$0xff]  ;;  %v5733_v0 = vld [vmem:[%s8710_s6 + $0x110] sm:$0xff] }
  0x78   :  { %817 = vmatprep.subr.mxu0 %v5692_v3  ;;  %888 = vmatprep.subr.mxu1 %v5697_v6  ;;  %9250 = vst [vmem:[#allocation52_spill] sm:$0xff] %v5728_v5  ;;  %9251 = vst [vmem:[#allocation53_spill] sm:$0xff] %v5733_v0  ;;  %v5740_v3 = vld [vmem:[%s8710_s6 + $0xe8] sm:$0xff]  ;;  %v5745_v6 = vld [vmem:[%s8710_s6 + $0xf8] sm:$0xff] }
  0x79   :  { %818 = vmatpush1.msra.mxu0 %v5704_v4  ;;  %889 = vmatpush1.msra.mxu1 %v5709_v8  ;;  %9252 = vst [vmem:[#allocation54_spill] sm:$0xff] %v5740_v3  ;;  %9253 = vst [vmem:[#allocation55_spill] sm:$0xff] %v5745_v6  ;;  %v5752_v4 = vld [vmem:[%s8710_s6 + $0xe0] sm:$0xff]  ;;  %v5757_v8 = vld [vmem:[%s8710_s6 + $0xf0] sm:$0xff] }
  0x7a   :  { %819 = vmatprep.subr.mxu0 %v5716_v2  ;;  %890 = vmatprep.subr.mxu1 %v5721_v7  ;;  %9254 = vst [vmem:[#allocation56_spill] sm:$0xff] %v5752_v4  ;;  %9255 = vst [vmem:[#allocation57_spill] sm:$0xff] %v5757_v8  ;;  %v5764_v2 = vld [vmem:[%s8710_s6 + $0xc8] sm:$0xff]  ;;  %v5769_v7 = vld [vmem:[%s8710_s6 + $0xd8] sm:$0xff] }
  0x7b   :  { %820 = vmatpush1.msra.mxu0 %v5728_v5  ;;  %891 = vmatpush1.msra.mxu1 %v5733_v0  ;;  %9256 = vst [vmem:[#allocation58_spill] sm:$0xff] %v5764_v2  ;;  %9257 = vst [vmem:[#allocation59_spill] sm:$0xff] %v5769_v7  ;;  %v5776_v5 = vld [vmem:[%s8710_s6 + $0xc0] sm:$0xff]  ;;  %v5781_v0 = vld [vmem:[%s8710_s6 + $0xd0] sm:$0xff] }
  0x7c   :  { %821 = vmatprep.subr.mxu0 %v5740_v3  ;;  %892 = vmatprep.subr.mxu1 %v5745_v6  ;;  %9258 = vst [vmem:[#allocation60_spill] sm:$0xff] %v5776_v5  ;;  %9259 = vst [vmem:[#allocation61_spill] sm:$0xff] %v5781_v0  ;;  %v5788_v3 = vld [vmem:[%s8710_s6 + $0xa8] sm:$0xff]  ;;  %v5793_v6 = vld [vmem:[%s8710_s6 + $0xb8] sm:$0xff] }
  0x7d   :  { %822 = vmatpush1.msra.mxu0 %v5752_v4  ;;  %893 = vmatpush1.msra.mxu1 %v5757_v8  ;;  %9260 = vst [vmem:[#allocation62_spill] sm:$0xff] %v5788_v3  ;;  %9261 = vst [vmem:[#allocation63_spill] sm:$0xff] %v5793_v6  ;;  %v5800_v4 = vld [vmem:[%s8710_s6 + $0xa0] sm:$0xff]  ;;  %v5805_v8 = vld [vmem:[%s8710_s6 + $0xb0] sm:$0xff] }
  0x7e   :  { %823 = vmatprep.subr.mxu0 %v5764_v2  ;;  %894 = vmatprep.subr.mxu1 %v5769_v7  ;;  %9262 = vst [vmem:[#allocation64_spill] sm:$0xff] %v5800_v4  ;;  %9263 = vst [vmem:[#allocation65_spill] sm:$0xff] %v5805_v8  ;;  %v5812_v2 = vld [vmem:[%s8710_s6 + $0x88] sm:$0xff]  ;;  %v5817_v7 = vld [vmem:[%s8710_s6 + $0x98] sm:$0xff] }
  0x7f   :  { %824 = vmatpush1.msra.mxu0 %v5776_v5  ;;  %895 = vmatpush1.msra.mxu1 %v5781_v0  ;;  %9264 = vst [vmem:[#allocation66_spill] sm:$0xff] %v5812_v2  ;;  %9265 = vst [vmem:[#allocation67_spill] sm:$0xff] %v5817_v7  ;;  %v5824_v5 = vld [vmem:[%s8710_s6 + $0x80] sm:$0xff]  ;;  %v5829_v0 = vld [vmem:[%s8710_s6 + $0x90] sm:$0xff] }
  0x80   :  { %825 = vmatprep.subr.mxu0 %v5788_v3  ;;  %896 = vmatprep.subr.mxu1 %v5793_v6  ;;  %9266 = vst [vmem:[#allocation68_spill] sm:$0xff] %v5824_v5  ;;  %9267 = vst [vmem:[#allocation69_spill] sm:$0xff] %v5829_v0  ;;  %v5836_v3 = vld [vmem:[%s8710_s6 + $0x68] sm:$0xff]  ;;  %v5841_v6 = vld [vmem:[%s8710_s6 + $0x78] sm:$0xff] }
  0x81   :  { %826 = vmatpush1.msra.mxu0 %v5800_v4  ;;  %897 = vmatpush1.msra.mxu1 %v5805_v8  ;;  %9268 = vst [vmem:[#allocation70_spill] sm:$0xff] %v5836_v3  ;;  %9269 = vst [vmem:[#allocation71_spill] sm:$0xff] %v5841_v6  ;;  %v5848_v4 = vld [vmem:[%s8710_s6 + $0x60] sm:$0xff]  ;;  %v5853_v8 = vld [vmem:[%s8710_s6 + $0x70] sm:$0xff] }
  0x82   :  { %827 = vmatprep.subr.mxu0 %v5812_v2  ;;  %898 = vmatprep.subr.mxu1 %v5817_v7  ;;  %9270 = vst [vmem:[#allocation72_spill] sm:$0xff] %v5848_v4  ;;  %9271 = vst [vmem:[#allocation73_spill] sm:$0xff] %v5853_v8  ;;  %v5860_v2 = vld [vmem:[%s8710_s6 + $0x48] sm:$0xff]  ;;  %v5865_v7 = vld [vmem:[%s8710_s6 + $0x58] sm:$0xff] }
  0x83   :  { %828 = vmatpush1.msra.mxu0 %v5824_v5  ;;  %899 = vmatpush1.msra.mxu1 %v5829_v0  ;;  %9272 = vst [vmem:[#allocation74_spill] sm:$0xff] %v5860_v2  ;;  %9273 = vst [vmem:[#allocation75_spill] sm:$0xff] %v5865_v7  ;;  %v5872_v5 = vld [vmem:[%s8710_s6 + $0x40] sm:$0xff]  ;;  %v5877_v0 = vld [vmem:[%s8710_s6 + $0x50] sm:$0xff] }
  0x84   :  { %829 = vmatprep.subr.mxu0 %v5836_v3  ;;  %900 = vmatprep.subr.mxu1 %v5841_v6  ;;  %9274 = vst [vmem:[#allocation76_spill] sm:$0xff] %v5872_v5  ;;  %9275 = vst [vmem:[#allocation77_spill] sm:$0xff] %v5877_v0  ;;  %v5884_v3 = vld [vmem:[%s8710_s6 + $0x28] sm:$0xff]  ;;  %v5889_v6 = vld [vmem:[%s8710_s6 + $0x38] sm:$0xff] }
  0x85   :  { %830 = vmatpush1.msra.mxu0 %v5848_v4  ;;  %901 = vmatpush1.msra.mxu1 %v5853_v8  ;;  %9276 = vst [vmem:[#allocation78_spill] sm:$0xff] %v5884_v3  ;;  %v5896_v4 = vld [vmem:[%s8710_s6 + $0x20] sm:$0xff]  ;;  %v5901_v8 = vld [vmem:[%s8710_s6 + $0x30] sm:$0xff] }
  0x86   :  { %831 = vmatprep.subr.mxu0 %v5860_v2  ;;  %902 = vmatprep.subr.mxu1 %v5865_v7  ;;  %9277 = vst [vmem:[#allocation79_spill] sm:$0xff] %v5896_v4  ;;  %v5908_v2 = vld [vmem:[%s8710_s6 + $0x8] sm:$0xff]  ;;  %v5913_v7 = vld [vmem:[%s8710_s6 + $0x18] sm:$0xff] }
  0x87   :  { %832 = vmatpush1.msra.mxu0 %v5872_v5  ;;  %903 = vmatpush1.msra.mxu1 %v5877_v0  ;;  %9278 = vst [vmem:[#allocation80_spill] sm:$0xff] %v5908_v2  ;;  %9279 = vst [vmem:[#allocation81_spill] sm:$0xff] %v5913_v7  ;;  %v5920_v5 = vld [vmem:[%s8710_s6] sm:$0xff]  ;;  %v5927_v0 = vld [vmem:[%s8710_s6 + $0x10] sm:$0xff] }
  0x88   :  { %833 = vmatprep.subr.mxu0 %v5884_v3  ;;  %904 = vmatprep.subr.mxu1 %v5889_v6  ;;  %9280 = vst [vmem:[#allocation82_spill] sm:$0xff] %v5920_v5  ;;  %9281 = vst [vmem:[#allocation83_spill] sm:$0xff] %v5927_v0 }
  0x89   :  { %834 = vmatpush1.msra.mxu0 %v5896_v4  ;;  %905 = vmatpush1.msra.mxu1 %v5901_v8 }
  0x8a   :  { %835 = vmatprep.subr.mxu0 %v5908_v2  ;;  %906 = vmatprep.subr.mxu1 %v5913_v7 }
  0x8b   :  { %836 = vmatpush1.msra.mxu0 %v5920_v5  ;;  %869 = vmatprep.mubr.f32.mxu0 %v9219_v59 }
  0x8c   :  { %907 = vmatpush1.msra.mxu1 %v5927_v0  ;;  %940 = vmatprep.mubr.f32.mxu1 %v9219_v59 }
  0x8d   :  { %870 = vmatmul.mubr.f32.vlgmr.msra.gmra.mxu0 %v9219_v59  ;;  %941 = vmatmul.mubr.f32.vlgmr.msra.gmra.mxu1 %v9219_v59 }
  0x8e   :  { %1016 = vmatprep.subr.mxu0 %v5156_v9  ;;  %1087 = vmatprep.subr.mxu1 %v5162_v10  ;;  %v9282_v9 = vld [vmem:[#allocation13_spill] sm:$0xff]  ;;  %v9283_v10 = vld [vmem:[#allocation14_spill] sm:$0xff] }
  0x8f   :  { %1017 = vmatpush1.msra.mxu0 %v5168_v11  ;;  %1088 = vmatpush1.msra.mxu1 %v5173_v12  ;;  %v9284_v11 = vld [vmem:[#allocation15_spill] sm:$0xff]  ;;  %v9285_v12 = vld [vmem:[#allocation16_spill] sm:$0xff] }
  0x90   :  { %1018 = vmatprep.subr.mxu0 %v5180_v13  ;;  %1089 = vmatprep.subr.mxu1 %v5185_v14  ;;  %v9286_v13 = vld [vmem:[#allocation17_spill] sm:$0xff]  ;;  %v9287_v14 = vld [vmem:[#allocation18_spill] sm:$0xff] }
  0x91   :  { %1019 = vmatpush1.msra.mxu0 %v5192_v15  ;;  %1090 = vmatpush1.msra.mxu1 %v5197_v16  ;;  %v9288_v15 = vld [vmem:[#allocation19_spill] sm:$0xff]  ;;  %v9289_v16 = vld [vmem:[#allocation20_spill] sm:$0xff] }
  0x92   :  { %1020 = vmatprep.subr.mxu0 %v5204_v17  ;;  %1091 = vmatprep.subr.mxu1 %v5209_v1  ;;  %v9290_v17 = vld [vmem:[#allocation21_spill] sm:$0xff]  ;;  %v9291_v1 = vld [vmem:[#allocation22_spill] sm:$0xff] }
  0x93   :  { %1021 = vmatpush1.msra.mxu0 %v5216_v18  ;;  %1092 = vmatpush1.msra.mxu1 %v5221_v19  ;;  %v9292_v18 = vld [vmem:[#allocation23_spill] sm:$0xff]  ;;  %v117_v19 = vlaneseq }
  0x94   :  { %1022 = vmatprep.subr.mxu0 %v5228_v20  ;;  %1093 = vmatprep.subr.mxu1 %v5233_v21 }
  0x95   :  { %1023 = vmatpush1.msra.mxu0 %v5240_v22  ;;  %1094 = vmatpush1.msra.mxu1 %v5245_v23  ;;  %v118_v20 = vshrl.u32 %v117_v19, 7  ;;  %v115_v23 = vld [vmem:[%s8708_s4] sm:$0xf] }
  0x96   :  { %1024 = vmatprep.subr.mxu0 %v5252_v24  ;;  %1095 = vmatprep.subr.mxu1 %v5257_v25 }
  0x97   :  { %1025 = vmatpush1.msra.mxu0 %v5264_v26  ;;  %1096 = vmatpush1.msra.mxu1 %v5269_v27  ;;  %v6005_v22 = vsub.s32 0, %v118_v20  ;;  %v6010_v24 = vsub.s32 1, %v118_v20  ;;  %v127_v27 = vsub.s32 2, %v118_v20 }
  0x98   :  { %1026 = vmatprep.subr.mxu0 %v5276_v28  ;;  %1097 = vmatprep.subr.mxu1 %v5281_v29 }
  0x99   :  { %1027 = vmatpush1.msra.mxu0 %v5288_v30  ;;  %1098 = vmatpush1.msra.mxu1 %v5293_v31  ;;  %9293 = vst [vmem:[#allocation84_spill] sm:$0xff] %v6005_v22  ;;  %9294 = vst [vmem:[#allocation85_spill] sm:$0xff] %v6010_v24 }
  0x9a   :  { %1028 = vmatprep.subr.mxu0 %v5300_v32  ;;  %1099 = vmatprep.subr.mxu1 %v5305_v33 }
  0x9b   :  { %1029 = vmatpush1.msra.mxu0 %v5312_v34  ;;  %1100 = vmatpush1.msra.mxu1 %v5317_v35 }
  0x9c   :  { %1030 = vmatprep.subr.mxu0 %v5324_v36  ;;  %1101 = vmatprep.subr.mxu1 %v5329_v37 }
  0x9d   :  { %1031 = vmatpush1.msra.mxu0 %v5336_v38  ;;  %1102 = vmatpush1.msra.mxu1 %v5341_v39 }
  0x9e   :  { %1032 = vmatprep.subr.mxu0 %v5348_v40  ;;  %1103 = vmatprep.subr.mxu1 %v5353_v41 }
  0x9f   :  { %1033 = vmatpush1.msra.mxu0 %v5360_v42  ;;  %1104 = vmatpush1.msra.mxu1 %v5365_v43 }
  0xa0   :  { %1034 = vmatprep.subr.mxu0 %v5372_v44  ;;  %1105 = vmatprep.subr.mxu1 %v5377_v45 }
  0xa1   :  { %1035 = vmatpush1.msra.mxu0 %v5384_v46  ;;  %1106 = vmatpush1.msra.mxu1 %v5389_v47 }
  0xa2   :  { %1036 = vmatprep.subr.mxu0 %v5396_v48  ;;  %1107 = vmatprep.subr.mxu1 %v5401_v49 }
  0xa3   :  { %1037 = vmatpush1.msra.mxu0 %v5408_v50  ;;  %1108 = vmatpush1.msra.mxu1 %v5413_v51 }
  0xa4   :  { %1038 = vmatprep.subr.mxu0 %v5420_v52  ;;  %1109 = vmatprep.subr.mxu1 %v5425_v53 }
  0xa5   :  { %1039 = vmatpush1.msra.mxu0 %v5432_v54  ;;  %1110 = vmatpush1.msra.mxu1 %v5437_v55 }
  0xa6   :  { %1040 = vmatprep.subr.mxu0 %v5444_v56  ;;  %1111 = vmatprep.subr.mxu1 %v5449_v57 }
  0xa7   :  { %1041 = vmatpush1.msra.mxu0 %v5456_v58  ;;  %1112 = vmatpush1.msra.mxu1 %v5461_v60 }
  0xa8   :  { %1042 = vmatprep.subr.mxu0 %v5468_v61  ;;  %1113 = vmatprep.subr.mxu1 %v5475_v62 }
  0xa9   :  { %1043 = vmatpush1.msra.mxu0 %v5482_v63  ;;  %1114 = vmatpush1.msra.mxu1 %v9282_v9 }
  0xaa   :  { %1044 = vmatprep.subr.mxu0 %v9283_v10  ;;  %1115 = vmatprep.subr.mxu1 %v9284_v11 }
  0xab   :  { %1045 = vmatpush1.msra.mxu0 %v9285_v12  ;;  %1116 = vmatpush1.msra.mxu1 %v9286_v13  ;;  %v128_v13 = vrot.slane %v115_v23, %v127_v27 }
  0xac   :  { %1046 = vmatprep.subr.mxu0 %v9287_v14  ;;  %1117 = vmatprep.subr.mxu1 %v9288_v15  ;;  %v355_v14 = vld [vmem:[%s8711_s7] sm:$0xf] }
  0xad   :  { %1047 = vmatpush1.msra.mxu0 %v9289_v16  ;;  %1080 = vmatprep.mubr.f32.mxu0 %v9219_v59  ;;  %v131_v16 = vsub.s32 3, %v118_v20  ;;  %v360_v63 = vrot.slane %v355_v14, %v6005_v22  ;;  %v364_v61 = vrot.slane %v355_v14, %v6010_v24 }
  0xae   :  { %1118 = vmatpush1.msra.mxu1 %v9290_v17  ;;  %1151 = vmatprep.mubr.f32.mxu1 %v9219_v59  ;;  %v120_v17 = vrot.slane %v115_v23, %v6005_v22 }
  0xaf   :  { %1177 = vmatprep.subr.mxu0 %v9291_v1  ;;  %1248 = vmatprep.subr.mxu1 %v9292_v18  ;;  %v124_v18 = vrot.slane %v115_v23, %v6010_v24  ;;  %v132_v9 = vrot.slane %v115_v23, %v131_v16  ;;  %v372_v57 = vrot.slane %v355_v14, %v131_v16 }
  0xe2   :  { %v203_v21 = vpop.f32.mrf.mxu0 }
  0xe4   :  { %v280_v25 = vpop.f32.mrf.mxu1  ;;  %v205_v26 = vpop.f32.mrf.mxu0 }
  0xe5   :  { %v6040_v55 = vadd.f32 %v205_v26, %v124_v18 }
  0xe6   :  { %v282_v15 = vpop.f32.mrf.mxu1 }
  0xff   :  { %v209_v1 = vpop.f32.mrf.mxu0 }
 0x100   :  { %v6014_v19 = vadd.f32 %v209_v1, %v120_v17  ;;  %v6027_v1 = vrot.slane %v355_v14, %v127_v27 }
 0x101   :  { %v211_v12 = vpop.f32.mrf.mxu0 }
 0x102   :  { %9295 = vst [vmem:[#allocation86_spill] sm:$0xff] %v6014_v19  ;;  %v6019_v11 = vadd.f32 %v211_v12, %v124_v18  ;;  %v286_v10 = vpop.f32.mrf.mxu1 }
 0x103   :  { %v6022_v62 = vadd.f32 %v286_v10, %v128_v13 }
 0x104   :  { %9296 = vst [vmem:[#allocation87_spill] sm:$0xff] %v6019_v11  ;;  %v288_v20 = vpop.f32.mrf.mxu1 }
 0x105   :  { %9297 = vst [vmem:[#allocation88_spill] sm:$0xff] %v6022_v62  ;;  %v6025_v60 = vadd.f32 %v288_v20, %v132_v9 }
 0x106   :  { %v443_v19 = vpop.f32.mrf.mxu0 }
 0x107   :  { %9298 = vst [vmem:[#allocation89_spill] sm:$0xff] %v6025_v60  ;;  %v6029_v58 = vadd.f32 %v443_v19, %v360_v63  ;;  %v6038_v60 = vadd.f32 %v203_v21, %v120_v17  ;;  %v6047_v21 = vadd.f32 %v280_v25, %v128_v13 }
 0x108   :  { %v445_v56 = vpop.f32.mrf.mxu0  ;;  %v520_v12 = vpop.f32.mrf.mxu1 }
 0x109   :  { %9299 = vst [vmem:[#allocation90_spill] sm:$0xff] %v6029_v58  ;;  %v6031_v11 = vadd.f32 %v445_v56, %v364_v61  ;;  %v6034_v23 = vadd.f32 %v520_v12, %v6027_v1  ;;  %9303 = vst [vmem:[#allocation94_spill] sm:$0xff] %v6038_v60 }
 0x10a   :  { %v522_v10 = vpop.f32.mrf.mxu1  ;;  %9305 = vst [vmem:[#allocation96_spill] sm:$0xff] %v6047_v21 }
 0x10b   :  { %9300 = vst [vmem:[#allocation91_spill] sm:$0xff] %v6031_v11  ;;  %9301 = vst [vmem:[#allocation92_spill] sm:$0xff] %v6034_v23  ;;  %v6036_v22 = vadd.f32 %v522_v10, %v372_v57 }
 0x10d   :  { %9302 = vst [vmem:[#allocation93_spill] sm:$0xff] %v6036_v22  ;;  %v6044_v22 = vadd.f32 %v282_v15, %v132_v9 }
 0x10f   :  { %9304 = vst [vmem:[#allocation95_spill] sm:$0xff] %v6044_v22 }
 0x123   :  { %v449_v62 = vpop.f32.mrf.mxu0 }
 0x124   :  { %v6050_v15 = vadd.f32 %v449_v62, %v360_v63 }
 0x125   :  { %v451_v24 = vpop.f32.mrf.mxu0 }
 0x126   :  { %v526_v20 = vpop.f32.mrf.mxu1  ;;  %v6052_v25 = vadd.f32 %v451_v24, %v364_v61 }
 0x128   :  { %v528_v19 = vpop.f32.mrf.mxu1 }
 0x129   :  { %v6059_v24 = vadd.f32 %v528_v19, %v372_v57  ;;  %v9308_v19 = vld [vmem:[#allocation26_spill] sm:$0xff] }
 0x12b   :  { %v725_v27 = vpop.f32.mrf.mxu0  ;;  %v796_v12 = vpop.f32.mrf.mxu1 }
 0x12c   :  { %v801_v14 = vadd.f32 %v725_v27, %v6038_v60  ;;  %v803_v58 = vadd.f32 %v796_v12, %v6047_v21 }
 0x12d   :  { %v727_v16 = vpop.f32.mrf.mxu0  ;;  %v798_v10 = vpop.f32.mrf.mxu1 }
 0x12e   :  { %v4045_v56 = vmul.f32 -1.442695, %v801_v14  ;;  %v802_v11 = vadd.f32 %v727_v16, %v6040_v55  ;;  %v804_v17 = vadd.f32 %v798_v10, %v6044_v22 }
 0x130   :  { %4131 = vpow2.f32 %v4045_v56  ;;  %v4046_v23 = vmul.f32 -1.442695, %v802_v11  ;;  %v4047_v18 = vmul.f32 -1.442695, %v804_v17 }
 0x132   :  { %4133 = vpow2.f32 %v4046_v23 }
 0x133   :  { %4135 = vpow2.f32 %v4047_v18 }
 0x13d   :  { %v4132_v26 = vpop.eup %4131 }
 0x13e   :  { %v966_v27 = vadd.f32 1.0, %v4132_v26 }
 0x13f   :  { %v4134_v60 = vpop.eup %4133 }
 0x140   :  { %4137 = vrcp.f32 %v966_v27  ;;  %v972_v14 = vadd.f32 1.0, %v4134_v60  ;;  %v4136_v11 = vpop.eup %4135 }
 0x141   :  { %4139 = vtanh.f32 %v803_v58  ;;  %v979_v10 = vadd.f32 1.0, %v4136_v11 }
 0x142   :  { %4141 = vrcp.f32 %v972_v14 }
 0x143   :  { %4143 = vrcp.f32 %v979_v10 }
 0x14d   :  { %v4138_v23 = vpop.eup %4137  ;;  %v871_v16 = vpop.f32.mrf.mxu0 }
 0x14e   :  { %v4140_v9 = vpop.eup %4139  ;;  %v951_v56 = vrot.slane %v871_v16, 2  ;;  %v942_v27 = vpop.f32.mrf.mxu1  ;;  %v6063_v16 = vadd.f32 %v526_v20, %v6027_v1  ;;  %v9306_v1 = vld [vmem:[#allocation24_spill] sm:$0xff]  ;;  %v9307_v20 = vld [vmem:[#allocation25_spill] sm:$0xff] }
 0x14f   :  { %v4142_v13 = vpop.eup %4141  ;;  %v873_v17 = vpop.f32.mrf.mxu0  ;;  %v983_v26 = vmul.f32 %v4140_v9, %v4138_v23  ;;  %v953_v23 = vrot.slane %v942_v27, 2  ;;  %v9310_v27 = vld [vmem:[#allocation28_spill] sm:$0xff] }
 0x150   :  { %v982_v12 = vmul.f32 0.0, %v4142_v13  ;;  %v959_v18 = vadd.f32 %v951_v56, %v6050_v15  ;;  %v952_v60 = vrot.slane %v873_v17, 2  ;;  %v944_v63 = vpop.f32.mrf.mxu1  ;;  %v4144_v56 = vpop.eup %4143 }
 0x151   :  { %v954_v61 = vrot.slane %v944_v63, 2  ;;  %v961_v13 = vadd.f32 %v953_v23, %v6063_v16  ;;  %v9314_v63 = vld [vmem:[#allocation32_spill] sm:$0xff]  ;;  %v9317_v23 = vld [vmem:[#allocation35_spill] sm:$0xff] }
 0x152   :  { %v6055_v58 = vadd.f32 %v983_v26, %v982_v12  ;;  %v4048_v14 = vmul.f32 -1.442695, %v959_v18  ;;  %v960_v21 = vadd.f32 %v952_v60, %v6052_v25  ;;  %v9309_v18 = vld [vmem:[#allocation27_spill] sm:$0xff]  ;;  %v9311_v60 = vld [vmem:[#allocation29_spill] sm:$0xff] }
 0x153   :  { %v962_v11 = vadd.f32 %v954_v61, %v6059_v24  ;;  %v9315_v61 = vld [vmem:[#allocation33_spill] sm:$0xff] }
 0x154   :  { %4145 = vtanh.f32 %v6055_v58  ;;  %v4049_v62 = vmul.f32 -1.442695, %v960_v21 }
 0x155   :  { %4147 = vpow2.f32 %v4048_v14  ;;  %v4050_v9 = vmul.f32 -1.442695, %v962_v11  ;;  %v9312_v14 = vld [vmem:[#allocation30_spill] sm:$0xff] }
 0x156   :  { %4149 = vpow2.f32 %v4049_v62  ;;  %v9313_v62 = vld [vmem:[#allocation31_spill] sm:$0xff]  ;;  %v9316_v11 = vld [vmem:[#allocation34_spill] sm:$0xff] }
 0x157   :  { %4151 = vpow2.f32 %v4050_v9  ;;  %v9318_v9 = vld [vmem:[#allocation36_spill] sm:$0xff] }
 0x158   :  { %4153 = vtanh.f32 %v961_v13  ;;  %v9320_v13 = vld [vmem:[#allocation38_spill] sm:$0xff] }
 0x161   :  { %v4146_v10 = vpop.eup %4145 }
 0x162   :  { %v4148_v17 = vpop.eup %4147  ;;  %v6066_v12 = vmul.f32 %v4146_v10, %v4144_v56  ;;  %v9319_v56 = vld [vmem:[#allocation37_spill] sm:$0xff]  ;;  %v9321_v10 = vld [vmem:[#allocation39_spill] sm:$0xff] }
 0x163   :  { %v4150_v21 = vpop.eup %4149  ;;  %v990_v26 = vadd.f32 1.0, %v4148_v17  ;;  %v9322_v17 = vld [vmem:[#allocation40_spill] sm:$0xff] }
 0x164   :  { %v996_v57 = vadd.f32 1.0, %v4150_v21  ;;  %1081 = vmatmul.mubr.f32.vlgmr.msra.gmra.mxu0 %v6066_v12  ;;  %1152 = vmatmul.mubr.f32.vlgmr.msra.gmra.mxu1 %v6066_v12  ;;  %v9323_v21 = vld [vmem:[#allocation41_spill] sm:$0xff] }
 0x165   :  { %4155 = vrcp.f32 %v990_v26  ;;  %1178 = vmatpush1.msra.mxu0 %v9306_v1  ;;  %1249 = vmatpush1.msra.mxu1 %v9307_v20  ;;  %v9324_v26 = vld [vmem:[#allocation42_spill] sm:$0xff]  ;;  %v9326_v1 = vld [vmem:[#allocation44_spill] sm:$0xff]  ;;  %v9327_v20 = vld [vmem:[#allocation45_spill] sm:$0xff] }
 0x166   :  { %4157 = vrcp.f32 %v996_v57  ;;  %1179 = vmatprep.subr.mxu0 %v9308_v19  ;;  %1250 = vmatprep.subr.mxu1 %v9309_v18  ;;  %v9325_v57 = vld [vmem:[#allocation43_spill] sm:$0xff]  ;;  %v4152_v19 = vpop.eup %4151  ;;  %v9328_v18 = vld [vmem:[#allocation46_spill] sm:$0xff] }
 0x167   :  { %1180 = vmatpush1.msra.mxu0 %v9310_v27  ;;  %1251 = vmatpush1.msra.mxu1 %v9311_v60  ;;  %v9329_v27 = vld [vmem:[#allocation47_spill] sm:$0xff]  ;;  %v4154_v60 = vpop.eup %4153 }
 0x168   :  { %1181 = vmatprep.subr.mxu0 %v9312_v14  ;;  %1252 = vmatprep.subr.mxu1 %v9313_v62  ;;  %v9330_v14 = vld [vmem:[#allocation48_spill] sm:$0xff]  ;;  %v9331_v62 = vld [vmem:[#allocation49_spill] sm:$0xff] }
 0x169   :  { %1182 = vmatpush1.msra.mxu0 %v9314_v63  ;;  %1253 = vmatpush1.msra.mxu1 %v9315_v61  ;;  %v9332_v61 = vld [vmem:[#allocation50_spill] sm:$0xff] }
 0x16a   :  { %1183 = vmatprep.subr.mxu0 %v9316_v11  ;;  %1254 = vmatprep.subr.mxu1 %v9317_v23  ;;  %v9333_v11 = vld [vmem:[#allocation51_spill] sm:$0xff] }
 0x16b   :  { %1184 = vmatpush1.msra.mxu0 %v9318_v9  ;;  %1255 = vmatpush1.msra.mxu1 %v9319_v56  ;;  %v1003_v9 = vadd.f32 1.0, %v4152_v19  ;;  %v9334_v56 = vld [vmem:[#allocation52_spill] sm:$0xff] }
 0x16c   :  { %1185 = vmatprep.subr.mxu0 %v9320_v13  ;;  %1256 = vmatprep.subr.mxu1 %v9321_v10  ;;  %v9335_v13 = vld [vmem:[#allocation53_spill] sm:$0xff]  ;;  %v9342_v19 = vld [vmem:[#allocation60_spill] sm:$0xff] }
 0x16d   :  { %1186 = vmatpush1.msra.mxu0 %v9322_v17  ;;  %1257 = vmatpush1.msra.mxu1 %v9323_v21  ;;  %v9336_v21 = vld [vmem:[#allocation54_spill] sm:$0xff]  ;;  %4159 = vrcp.f32 %v1003_v9  ;;  %v9351_v9 = vld [vmem:[#allocation69_spill] sm:$0xff] }
 0x16e   :  { %1187 = vmatprep.subr.mxu0 %v9324_v26  ;;  %1258 = vmatprep.subr.mxu1 %v9325_v57 }
 0x16f   :  { %1188 = vmatpush1.msra.mxu0 %v9326_v1  ;;  %1259 = vmatpush1.msra.mxu1 %v9327_v20 }
 0x170   :  { %1189 = vmatprep.subr.mxu0 %v9328_v18  ;;  %1260 = vmatprep.subr.mxu1 %v9329_v27  ;;  %v9337_v27 = vld [vmem:[#allocation55_spill] sm:$0xff] }
 0x171   :  { %1190 = vmatpush1.msra.mxu0 %v9330_v14  ;;  %1261 = vmatpush1.msra.mxu1 %v9331_v62  ;;  %v9338_v14 = vld [vmem:[#allocation56_spill] sm:$0xff]  ;;  %v9339_v62 = vld [vmem:[#allocation57_spill] sm:$0xff] }
 0x172   :  { %v4156_v63 = vpop.eup %4155  ;;  %1191 = vmatprep.subr.mxu0 %v9332_v61  ;;  %1262 = vmatprep.subr.mxu1 %v9333_v11  ;;  %v9340_v61 = vld [vmem:[#allocation58_spill] sm:$0xff]  ;;  %v9341_v11 = vld [vmem:[#allocation59_spill] sm:$0xff] }
 0x173   :  { %v4158_v23 = vpop.eup %4157  ;;  %1192 = vmatpush1.msra.mxu0 %v9334_v56  ;;  %1263 = vmatpush1.msra.mxu1 %v9335_v13  ;;  %v1007_v17 = vmul.f32 %v4156_v63, %v4154_v60  ;;  %v9343_v13 = vld [vmem:[#allocation61_spill] sm:$0xff]  ;;  %v9344_v60 = vld [vmem:[#allocation62_spill] sm:$0xff]  ;;  %v9345_v63 = vld [vmem:[#allocation63_spill] sm:$0xff] }
 0x174   :  { %v1006_v10 = vmul.f32 0.0, %v4158_v23  ;;  %1193 = vmatprep.subr.mxu0 %v9336_v21  ;;  %1264 = vmatprep.subr.mxu1 %v9337_v27  ;;  %v9346_v23 = vld [vmem:[#allocation64_spill] sm:$0xff] }
 0x175   :  { %1194 = vmatpush1.msra.mxu0 %v9338_v14  ;;  %1265 = vmatpush1.msra.mxu1 %v9339_v62  ;;  %v9347_v62 = vld [vmem:[#allocation65_spill] sm:$0xff] }
 0x176   :  { %v6104_v18 = vadd.f32 %v1007_v17, %v1006_v10  ;;  %1195 = vmatprep.subr.mxu0 %v9340_v61  ;;  %1266 = vmatprep.subr.mxu1 %v9341_v11  ;;  %v9348_v10 = vld [vmem:[#allocation66_spill] sm:$0xff]  ;;  %v9349_v17 = vld [vmem:[#allocation67_spill] sm:$0xff]  ;;  %v9350_v11 = vld [vmem:[#allocation68_spill] sm:$0xff] }
 0x177   :  { %1196 = vmatpush1.msra.mxu0 %v9342_v19  ;;  %1267 = vmatpush1.msra.mxu1 %v9343_v13  ;;  %v9352_v19 = vld [vmem:[#allocation70_spill] sm:$0xff]  ;;  %v9353_v13 = vld [vmem:[#allocation71_spill] sm:$0xff]  ;;  %v9354_v61 = vld [vmem:[#allocation72_spill] sm:$0xff] }
 0x178   :  { %4161 = vtanh.f32 %v6104_v18  ;;  %1197 = vmatprep.subr.mxu0 %v9344_v60  ;;  %1268 = vmatprep.subr.mxu1 %v9345_v63  ;;  %v9355_v60 = vld [vmem:[#allocation73_spill] sm:$0xff]  ;;  %v9356_v63 = vld [vmem:[#allocation74_spill] sm:$0xff] }
 0x179   :  { %1198 = vmatpush1.msra.mxu0 %v9346_v23  ;;  %1269 = vmatpush1.msra.mxu1 %v9347_v62  ;;  %v9357_v23 = vld [vmem:[#allocation75_spill] sm:$0xff]  ;;  %v9358_v62 = vld [vmem:[#allocation76_spill] sm:$0xff] }
 0x17a   :  { %1199 = vmatprep.subr.mxu0 %v9348_v10  ;;  %1270 = vmatprep.subr.mxu1 %v9349_v17  ;;  %v9359_v10 = vld [vmem:[#allocation77_spill] sm:$0xff] }
 0x17b   :  { %1200 = vmatpush1.msra.mxu0 %v9350_v11  ;;  %1271 = vmatpush1.msra.mxu1 %v9351_v9 }
 0x17c   :  { %1201 = vmatprep.subr.mxu0 %v9352_v19  ;;  %1272 = vmatprep.subr.mxu1 %v9353_v13 }
 0x17d   :  { %1202 = vmatpush1.msra.mxu0 %v9354_v61  ;;  %1273 = vmatpush1.msra.mxu1 %v9355_v60 }
 0x17e   :  { %1203 = vmatprep.subr.mxu0 %v9356_v63  ;;  %1274 = vmatprep.subr.mxu1 %v9357_v23  ;;  %v4160_v23 = vpop.eup %4159 }
 0x17f   :  { %1204 = vmatpush1.msra.mxu0 %v9358_v62  ;;  %1275 = vmatpush1.msra.mxu1 %v9359_v10 }
 0x180   :  { %1205 = vmatprep.subr.mxu0 %v5884_v3  ;;  %1276 = vmatprep.subr.mxu1 %v5889_v6 }
 0x181   :  { %1206 = vmatpush1.msra.mxu0 %v5896_v4  ;;  %1277 = vmatpush1.msra.mxu1 %v5901_v8  ;;  %v6140_v4 = vld [vmem:[%s8707_s3 + $0x1e8] sm:$0xff] }
 0x182   :  { %1207 = vmatprep.subr.mxu0 %v5908_v2  ;;  %1278 = vmatprep.subr.mxu1 %v5913_v7  ;;  %9360 = vst [vmem:[#allocation24_spill] sm:$0xff] %v6140_v4  ;;  %v6146_v7 = vld [vmem:[%s8707_s3 + $0x1f8] sm:$0xff]  ;;  %v6155_v2 = vld [vmem:[%s8707_s3 + $0x1e0] sm:$0xff] }
 0x183   :  { %1208 = vmatpush1.msra.mxu0 %v5920_v5  ;;  %1241 = vmatprep.mubr.f32.mxu0 %v9219_v59 }
 0x184   :  { %1279 = vmatpush1.msra.mxu1 %v5927_v0  ;;  %1312 = vmatprep.mubr.f32.mxu1 %v9219_v59 }
 0x185   :  { %v4162_v3 = vpop.eup %4161  ;;  %1406 = vmatprep.subr.mxu0 %v6140_v4  ;;  %1477 = vmatprep.subr.mxu1 %v6146_v7  ;;  %v6161_v4 = vld [vmem:[%s8707_s3 + $0x1f0] sm:$0xff] }
 0x186   :  { %v6149_v5 = vmul.f32 %v4162_v3, %v4160_v23  ;;  %9361 = vst [vmem:[#allocation25_spill] sm:$0xff] %v6161_v4  ;;  %v6167_v3 = vld [vmem:[%s8707_s3 + $0x1c8] sm:$0xff]  ;;  %v6179_v23 = vld [vmem:[%s8707_s3 + $0x1c0] sm:$0xff] }
 0x187   :  { %9362 = vst [vmem:[#allocation26_spill] sm:$0xff] %v6167_v3  ;;  %9364 = vst [vmem:[#allocation28_spill] sm:$0xff] %v6179_v23 }
 0x188   :  { %v1175_v0 = vrot.slane %v6149_v5, 6 }
 0x18a   :  { %1242 = vmatmul.mubr.f32.vlgmr.msra.gmra.mxu0 %v1175_v0  ;;  %1313 = vmatmul.mubr.f32.vlgmr.msra.gmra.mxu1 %v1175_v0  ;;  %v6173_v0 = vld [vmem:[%s8707_s3 + $0x1d8] sm:$0xff] }
 0x18b   :  { %1407 = vmatpush1.msra.mxu0 %v6155_v2  ;;  %1478 = vmatpush1.msra.mxu1 %v6161_v4  ;;  %9363 = vst [vmem:[#allocation27_spill] sm:$0xff] %v6173_v0  ;;  %v6185_v4 = vld [vmem:[%s8707_s3 + $0x1d0] sm:$0xff] }
 0x18c   :  { %1408 = vmatprep.subr.mxu0 %v6167_v3  ;;  %1479 = vmatprep.subr.mxu1 %v6173_v0  ;;  %9365 = vst [vmem:[#allocation29_spill] sm:$0xff] %v6185_v4  ;;  %v6191_v3 = vld [vmem:[%s8707_s3 + $0x1a8] sm:$0xff]  ;;  %v6197_v0 = vld [vmem:[%s8707_s3 + $0x1b8] sm:$0xff] }
 0x18d   :  { %1409 = vmatpush1.msra.mxu0 %v6179_v23  ;;  %1480 = vmatpush1.msra.mxu1 %v6185_v4  ;;  %9366 = vst [vmem:[#allocation30_spill] sm:$0xff] %v6191_v3  ;;  %9367 = vst [vmem:[#allocation31_spill] sm:$0xff] %v6197_v0  ;;  %v6203_v23 = vld [vmem:[%s8707_s3 + $0x1a0] sm:$0xff]  ;;  %v6209_v4 = vld [vmem:[%s8707_s3 + $0x1b0] sm:$0xff] }
 0x18e   :  { %1410 = vmatprep.subr.mxu0 %v6191_v3  ;;  %1481 = vmatprep.subr.mxu1 %v6197_v0  ;;  %9368 = vst [vmem:[#allocation32_spill] sm:$0xff] %v6203_v23  ;;  %9369 = vst [vmem:[#allocation33_spill] sm:$0xff] %v6209_v4  ;;  %v6215_v3 = vld [vmem:[%s8707_s3 + $0x188] sm:$0xff]  ;;  %v6221_v0 = vld [vmem:[%s8707_s3 + $0x198] sm:$0xff] }
 0x18f   :  { %1411 = vmatpush1.msra.mxu0 %v6203_v23  ;;  %1482 = vmatpush1.msra.mxu1 %v6209_v4  ;;  %9370 = vst [vmem:[#allocation34_spill] sm:$0xff] %v6215_v3  ;;  %9371 = vst [vmem:[#allocation35_spill] sm:$0xff] %v6221_v0  ;;  %v6227_v23 = vld [vmem:[%s8707_s3 + $0x180] sm:$0xff]  ;;  %v6233_v4 = vld [vmem:[%s8707_s3 + $0x190] sm:$0xff] }
 0x190   :  { %1412 = vmatprep.subr.mxu0 %v6215_v3  ;;  %1483 = vmatprep.subr.mxu1 %v6221_v0  ;;  %9372 = vst [vmem:[#allocation36_spill] sm:$0xff] %v6227_v23  ;;  %9373 = vst [vmem:[#allocation37_spill] sm:$0xff] %v6233_v4  ;;  %v6239_v3 = vld [vmem:[%s8707_s3 + $0x168] sm:$0xff]  ;;  %v6245_v0 = vld [vmem:[%s8707_s3 + $0x178] sm:$0xff] }
 0x191   :  { %1413 = vmatpush1.msra.mxu0 %v6227_v23  ;;  %1484 = vmatpush1.msra.mxu1 %v6233_v4  ;;  %v6251_v23 = vld [vmem:[%s8707_s3 + $0x160] sm:$0xff]  ;;  %v6257_v4 = vld [vmem:[%s8707_s3 + $0x170] sm:$0xff] }
 0x192   :  { %1414 = vmatprep.subr.mxu0 %v6239_v3  ;;  %1485 = vmatprep.subr.mxu1 %v6245_v0  ;;  %9374 = vst [vmem:[#allocation38_spill] sm:$0xff] %v6251_v23  ;;  %9375 = vst [vmem:[#allocation39_spill] sm:$0xff] %v6257_v4 }
 0x193   :  { %1415 = vmatpush1.msra.mxu0 %v6251_v23  ;;  %1486 = vmatpush1.msra.mxu1 %v6257_v4 }
 0x194   :  { %1416 = vmatprep.subr.mxu0 %v5276_v28  ;;  %1487 = vmatprep.subr.mxu1 %v5281_v29  ;;  %v9376_v28 = vld [vmem:[#allocation5_spill] sm:$0xff]  ;;  %v9377_v29 = vld [vmem:[#allocation6_spill] sm:$0xff] }
 0x195   :  { %1417 = vmatpush1.msra.mxu0 %v5288_v30  ;;  %1488 = vmatpush1.msra.mxu1 %v5293_v31  ;;  %v9378_v30 = vld [vmem:[#allocation7_spill] sm:$0xff]  ;;  %v9379_v31 = vld [vmem:[#allocation8_spill] sm:$0xff] }
 0x196   :  { %1418 = vmatprep.subr.mxu0 %v5300_v32  ;;  %1489 = vmatprep.subr.mxu1 %v5305_v33  ;;  %v9380_v32 = vld [vmem:[#allocation9_spill] sm:$0xff]  ;;  %v9381_v33 = vld [vmem:[#allocation10_spill] sm:$0xff] }
 0x197   :  { %1419 = vmatpush1.msra.mxu0 %v5312_v34  ;;  %1490 = vmatpush1.msra.mxu1 %v5317_v35  ;;  %v9382_v34 = vld [vmem:[#allocation11_spill] sm:$0xff]  ;;  %v9383_v35 = vld [vmem:[#allocation12_spill] sm:$0xff] }
 0x198   :  { %1420 = vmatprep.subr.mxu0 %v5324_v36  ;;  %1491 = vmatprep.subr.mxu1 %v5329_v37  ;;  %v9384_v36 = vld [vmem:[#allocation13_spill] sm:$0xff]  ;;  %v9385_v37 = vld [vmem:[#allocation14_spill] sm:$0xff] }
 0x199   :  { %1421 = vmatpush1.msra.mxu0 %v5336_v38  ;;  %1492 = vmatpush1.msra.mxu1 %v5341_v39  ;;  %v9386_v38 = vld [vmem:[#allocation15_spill] sm:$0xff]  ;;  %v9387_v39 = vld [vmem:[#allocation16_spill] sm:$0xff] }
 0x19a   :  { %1422 = vmatprep.subr.mxu0 %v5348_v40  ;;  %1493 = vmatprep.subr.mxu1 %v5353_v41  ;;  %v9388_v40 = vld [vmem:[#allocation17_spill] sm:$0xff]  ;;  %v9389_v41 = vld [vmem:[#allocation18_spill] sm:$0xff] }
 0x19b   :  { %1423 = vmatpush1.msra.mxu0 %v5360_v42  ;;  %1494 = vmatpush1.msra.mxu1 %v5365_v43  ;;  %v9390_v42 = vld [vmem:[#allocation19_spill] sm:$0xff]  ;;  %v9391_v43 = vld [vmem:[#allocation20_spill] sm:$0xff] }
 0x19c   :  { %1424 = vmatprep.subr.mxu0 %v5372_v44  ;;  %1495 = vmatprep.subr.mxu1 %v5377_v45  ;;  %v9392_v44 = vld [vmem:[#allocation21_spill] sm:$0xff]  ;;  %v9393_v45 = vld [vmem:[#allocation22_spill] sm:$0xff] }
 0x19d   :  { %1425 = vmatpush1.msra.mxu0 %v5384_v46  ;;  %1496 = vmatpush1.msra.mxu1 %v5389_v47  ;;  %v9394_v46 = vld [vmem:[#allocation23_spill] sm:$0xff] }
 0x19e   :  { %1426 = vmatprep.subr.mxu0 %v5396_v48  ;;  %1497 = vmatprep.subr.mxu1 %v5401_v49 }
 0x19f   :  { %1427 = vmatpush1.msra.mxu0 %v5408_v50  ;;  %1498 = vmatpush1.msra.mxu1 %v5413_v51  ;;  %v9395_v50 = vld [vmem:[#allocation94_spill] sm:$0xff] }
 0x1a0   :  { %1428 = vmatprep.subr.mxu0 %v5420_v52  ;;  %1499 = vmatprep.subr.mxu1 %v5425_v53 }
 0x1a1   :  { %1429 = vmatpush1.msra.mxu0 %v5432_v54  ;;  %1500 = vmatpush1.msra.mxu1 %v9376_v28 }
 0x1a2   :  { %1430 = vmatprep.subr.mxu0 %v9377_v29  ;;  %1501 = vmatprep.subr.mxu1 %v9378_v30 }
 0x1a3   :  { %1431 = vmatpush1.msra.mxu0 %v9379_v31  ;;  %1502 = vmatpush1.msra.mxu1 %v9380_v32 }
 0x1a4   :  { %1432 = vmatprep.subr.mxu0 %v9381_v33  ;;  %1503 = vmatprep.subr.mxu1 %v9382_v34 }
 0x1a5   :  { %1433 = vmatpush1.msra.mxu0 %v9383_v35  ;;  %1504 = vmatpush1.msra.mxu1 %v9384_v36  ;;  %v9396_v36 = vld [vmem:[#allocation96_spill] sm:$0xff] }
 0x1a6   :  { %1434 = vmatprep.subr.mxu0 %v9385_v37  ;;  %1505 = vmatprep.subr.mxu1 %v9386_v38 }
 0x1a7   :  { %1435 = vmatpush1.msra.mxu0 %v9387_v39  ;;  %1506 = vmatpush1.msra.mxu1 %v9388_v40 }
 0x1a8   :  { %1436 = vmatprep.subr.mxu0 %v9389_v41  ;;  %1507 = vmatprep.subr.mxu1 %v9390_v42 }
 0x1a9   :  { %1437 = vmatpush1.msra.mxu0 %v9391_v43  ;;  %1470 = vmatprep.mubr.f32.mxu0 %v9219_v59 }
 0x1aa   :  { %1508 = vmatpush1.msra.mxu1 %v9392_v44  ;;  %1541 = vmatprep.mubr.f32.mxu1 %v9219_v59  ;;  %v1355_v44 = vrot.slane %v6055_v58, 6 }
 0x1ab   :  { %1567 = vmatprep.subr.mxu0 %v9393_v45  ;;  %1638 = vmatprep.subr.mxu1 %v9394_v46 }
 0x224   :  { %v1082_v47 = vpop.f32.mrf.mxu0  ;;  %v1153_v52 = vpop.f32.mrf.mxu1 }
 0x225   :  { %v1162_v48 = vrot.slane %v1082_v47, 6  ;;  %v1164_v33 = vrot.slane %v1153_v52, 6 }
 0x226   :  { %v1084_v49 = vpop.f32.mrf.mxu0  ;;  %v1155_v30 = vpop.f32.mrf.mxu1 }
 0x227   :  { %v1170_v51 = vadd.f32 %v1162_v48, %v9395_v50  ;;  %v1163_v53 = vrot.slane %v1084_v49, 6  ;;  %v1165_v31 = vrot.slane %v1155_v30, 6  ;;  %v1172_v37 = vadd.f32 %v1164_v33, %v9396_v36 }
 0x229   :  { %v4051_v54 = vmul.f32 -1.442695, %v1170_v51  ;;  %v1171_v28 = vadd.f32 %v1163_v53, %v6040_v55  ;;  %v1173_v32 = vadd.f32 %v1165_v31, %v6044_v22 }
 0x22b   :  { %4163 = vpow2.f32 %v4051_v54  ;;  %v4052_v29 = vmul.f32 -1.442695, %v1171_v28  ;;  %v4053_v34 = vmul.f32 -1.442695, %v1173_v32 }
 0x22d   :  { %4165 = vpow2.f32 %v4052_v29 }
 0x22e   :  { %4167 = vpow2.f32 %v4053_v34 }
 0x238   :  { %v4164_v35 = vpop.eup %4163 }
 0x239   :  { %v1338_v38 = vadd.f32 1.0, %v4164_v35 }
 0x23a   :  { %v4166_v39 = vpop.eup %4165 }
 0x23b   :  { %4169 = vrcp.f32 %v1338_v38  ;;  %v1344_v40 = vadd.f32 1.0, %v4166_v39  ;;  %v4168_v41 = vpop.eup %4167 }
 0x23c   :  { %4171 = vtanh.f32 %v1172_v37  ;;  %v1351_v49 = vadd.f32 1.0, %v4168_v41 }
 0x23d   :  { %4173 = vrcp.f32 %v1344_v40 }
 0x23e   :  { %4175 = vrcp.f32 %v1351_v49 }
 0x248   :  { %v4170_v42 = vpop.eup %4169 }
 0x249   :  { %v4172_v43 = vpop.eup %4171 }
 0x24a   :  { %v4174_v45 = vpop.eup %4173  ;;  %v1243_v46 = vpop.f32.mrf.mxu0  ;;  %v1358_v47 = vmul.f32 %v4172_v43, %v4170_v42 }
 0x24b   :  { %v1357_v48 = vmul.f32 %v4174_v45, %v1355_v44  ;;  %v1323_v51 = vrot.slane %v1243_v46, 4  ;;  %v1314_v28 = vpop.f32.mrf.mxu1  ;;  %v4176_v37 = vpop.eup %4175  ;;  %v6323_v45 = vld [vmem:[%s8705_s1] sm:$0xff] }
 0x24c   :  { %v1245_v52 = vpop.f32.mrf.mxu0  ;;  %v1325_v35 = vrot.slane %v1314_v28, 4  ;;  %v1011_v49 = vmul.f32 %v6323_v45, %v6066_v12  ;;  %v6345_v28 = vld [vmem:[%s8710_s6 + $0x1c8] sm:$0xff] }
 0x24d   :  { %v6313_v53 = vadd.f32 %v1358_v47, %v1357_v48  ;;  %v1331_v54 = vadd.f32 %v1323_v51, %v6050_v15  ;;  %v1324_v29 = vrot.slane %v1245_v52, 4  ;;  %v1316_v32 = vpop.f32.mrf.mxu1  ;;  %v6331_v52 = vld [vmem:[%s8710_s6 + $0x1e0] sm:$0xff] }
 0x24e   :  { %v1326_v33 = vrot.slane %v1316_v32, 4  ;;  %v1333_v41 = vadd.f32 %v1325_v35, %v6063_v16  ;;  %v6375_v32 = vld [vmem:[%s8710_s6 + $0x1b8] sm:$0xff]  ;;  %v6393_v35 = vld [vmem:[%s8710_s6 + $0x188] sm:$0xff] }
 0x24f   :  { %v4054_v30 = vmul.f32 -1.442695, %v1331_v54  ;;  %v1332_v31 = vadd.f32 %v1324_v29, %v6052_v25  ;;  %4177 = vtanh.f32 %v6313_v53  ;;  %v6337_v54 = vld [vmem:[%s8710_s6 + $0x1f0] sm:$0xff]  ;;  %v6351_v29 = vld [vmem:[%s8710_s6 + $0x1d8] sm:$0xff] }
 0x250   :  { %v1334_v34 = vadd.f32 %v1326_v33, %v6059_v24  ;;  %v6381_v33 = vld [vmem:[%s8710_s6 + $0x1a0] sm:$0xff] }
 0x251   :  { %4179 = vpow2.f32 %v4054_v30  ;;  %v4055_v58 = vmul.f32 -1.442695, %v1332_v31  ;;  %v6357_v30 = vld [vmem:[%s8710_s6 + $0x1c0] sm:$0xff]  ;;  %v6363_v31 = vld [vmem:[%s8710_s6 + $0x1d0] sm:$0xff] }
 0x252   :  { %v4056_v38 = vmul.f32 -1.442695, %v1334_v34  ;;  %v6387_v34 = vld [vmem:[%s8710_s6 + $0x1b0] sm:$0xff] }
 0x253   :  { %4181 = vpow2.f32 %v4055_v58  ;;  %v6369_v58 = vld [vmem:[%s8710_s6 + $0x1a8] sm:$0xff] }
 0x254   :  { %4183 = vpow2.f32 %v4056_v38  ;;  %v6405_v38 = vld [vmem:[%s8710_s6 + $0x180] sm:$0xff] }
 0x25c   :  { %v4178_v39 = vpop.eup %4177 }
 0x25d   :  { %v1361_v42 = vmul.f32 %v4178_v39, %v4176_v37  ;;  %v6399_v37 = vld [vmem:[%s8710_s6 + $0x198] sm:$0xff]  ;;  %v6411_v39 = vld [vmem:[%s8710_s6 + $0x190] sm:$0xff] }
 0x25e   :  { %v4180_v40 = vpop.eup %4179 }
 0x25f   :  { %v1365_v43 = vadd.f32 1.0, %v4180_v40  ;;  %v1389_v46 = vmul.f32 %v6323_v45, %v1361_v42  ;;  %v1404_v47 = vrot.slane %v1361_v42, 2  ;;  %v6417_v40 = vld [vmem:[%s8710_s6 + $0x168] sm:$0xff]  ;;  %v6429_v42 = vld [vmem:[%s8710_s6 + $0x160] sm:$0xff] }
 0x260   :  { %v4182_v44 = vpop.eup %4181  ;;  %9397 = vst [vmem:[#allocation40_spill] sm:$0xff] %v6417_v40  ;;  %9399 = vst [vmem:[#allocation42_spill] sm:$0xff] %v6429_v42 }
 0x261   :  { %4185 = vrcp.f32 %v1365_v43  ;;  %v1371_v48 = vadd.f32 1.0, %v4182_v44  ;;  %v1391_v51 = vrot.slane %v1389_v46, 2  ;;  %1471 = vmatmul.mubr.f32.vlgmr.msra.gmra.mxu0 %v1404_v47  ;;  %1542 = vmatmul.mubr.f32.vlgmr.msra.gmra.mxu1 %v1404_v47  ;;  %v6435_v43 = vld [vmem:[%s8710_s6 + $0x170] sm:$0xff]  ;;  %v4184_v44 = vpop.eup %4183 }
 0x262   :  { %4187 = vtanh.f32 %v1333_v41  ;;  %1568 = vmatpush1.msra.mxu0 %v6331_v52  ;;  %1639 = vmatpush1.msra.mxu1 %v6337_v54  ;;  %v6423_v41 = vld [vmem:[%s8710_s6 + $0x178] sm:$0xff]  ;;  %9400 = vst [vmem:[#allocation43_spill] sm:$0xff] %v6435_v43  ;;  %v9401_v47 = vld [vmem:[#allocation46_spill] sm:$0xff] }
 0x263   :  { %4189 = vrcp.f32 %v1371_v48  ;;  %v6340_v12 = vadd.f32 %v1391_v51, %v1011_v49  ;;  %1569 = vmatprep.subr.mxu0 %v6345_v28  ;;  %1640 = vmatprep.subr.mxu1 %v6351_v29  ;;  %9398 = vst [vmem:[#allocation41_spill] sm:$0xff] %v6423_v41  ;;  %v9402_v48 = vld [vmem:[#allocation47_spill] sm:$0xff]  ;;  %v1382_v51 = vrot.slane %v6104_v18, 2 }
 0x264   :  { %1570 = vmatpush1.msra.mxu0 %v6357_v30  ;;  %1641 = vmatpush1.msra.mxu1 %v6363_v31 }
 0x265   :  { %1571 = vmatprep.subr.mxu0 %v6369_v58  ;;  %1642 = vmatprep.subr.mxu1 %v6375_v32 }
 0x266   :  { %1572 = vmatpush1.msra.mxu0 %v6381_v33  ;;  %1643 = vmatpush1.msra.mxu1 %v6387_v34 }
 0x267   :  { %1573 = vmatprep.subr.mxu0 %v6393_v35  ;;  %1644 = vmatprep.subr.mxu1 %v6399_v37 }
 0x268   :  { %1574 = vmatpush1.msra.mxu0 %v6405_v38  ;;  %1645 = vmatpush1.msra.mxu1 %v6411_v39 }
 0x269   :  { %1575 = vmatprep.subr.mxu0 %v6417_v40  ;;  %1646 = vmatprep.subr.mxu1 %v6423_v41  ;;  %v1378_v41 = vadd.f32 1.0, %v4184_v44  ;;  %v9406_v40 = vld [vmem:[#allocation51_spill] sm:$0xff]  ;;  %v9411_v44 = vld [vmem:[#allocation60_spill] sm:$0xff] }
 0x26a   :  { %1576 = vmatpush1.msra.mxu0 %v6429_v42  ;;  %1647 = vmatpush1.msra.mxu1 %v6435_v43  ;;  %v9403_v42 = vld [vmem:[#allocation48_spill] sm:$0xff]  ;;  %v9404_v43 = vld [vmem:[#allocation49_spill] sm:$0xff] }
 0x26b   :  { %1577 = vmatprep.subr.mxu0 %v9324_v26  ;;  %1648 = vmatprep.subr.mxu1 %v9325_v57  ;;  %v9405_v57 = vld [vmem:[#allocation50_spill] sm:$0xff]  ;;  %4191 = vrcp.f32 %v1378_v41  ;;  %v9418_v41 = vld [vmem:[#allocation75_spill] sm:$0xff] }
 0x26c   :  { %1578 = vmatpush1.msra.mxu0 %v9326_v1  ;;  %1649 = vmatpush1.msra.mxu1 %v9327_v20 }
 0x26d   :  { %1579 = vmatprep.subr.mxu0 %v9401_v47  ;;  %1650 = vmatprep.subr.mxu1 %v9402_v48  ;;  %v9407_v47 = vld [vmem:[#allocation53_spill] sm:$0xff]  ;;  %v9417_v48 = vld [vmem:[#allocation66_spill] sm:$0xff] }
 0x26e   :  { %v4186_v46 = vpop.eup %4185  ;;  %1580 = vmatpush1.msra.mxu0 %v9403_v42  ;;  %1651 = vmatpush1.msra.mxu1 %v9404_v43  ;;  %v9408_v42 = vld [vmem:[#allocation57_spill] sm:$0xff]  ;;  %v9409_v43 = vld [vmem:[#allocation58_spill] sm:$0xff] }
 0x26f   :  { %v4188_v49 = vpop.eup %4187  ;;  %1581 = vmatprep.subr.mxu0 %v9405_v57  ;;  %1652 = vmatprep.subr.mxu1 %v9406_v40  ;;  %v9410_v40 = vld [vmem:[#allocation59_spill] sm:$0xff]  ;;  %v9426_v57 = vld [vmem:[#allocation25_spill] sm:$0xff] }
 0x270   :  { %v4190_v26 = vpop.eup %4189  ;;  %v1385_v1 = vmul.f32 %v4188_v49, %v4186_v46  ;;  %1582 = vmatpush1.msra.mxu0 %v9334_v56  ;;  %1653 = vmatpush1.msra.mxu1 %v9407_v47  ;;  %v9412_v56 = vld [vmem:[#allocation61_spill] sm:$0xff]  ;;  %v9415_v46 = vld [vmem:[#allocation64_spill] sm:$0xff]  ;;  %v9428_v47 = vld [vmem:[#allocation27_spill] sm:$0xff] }
 0x271   :  { %v1384_v20 = vmul.f32 %v4190_v26, %v1382_v51  ;;  %1583 = vmatprep.subr.mxu0 %v9336_v21  ;;  %1654 = vmatprep.subr.mxu1 %v9337_v27  ;;  %v9413_v21 = vld [vmem:[#allocation62_spill] sm:$0xff]  ;;  %v9414_v27 = vld [vmem:[#allocation63_spill] sm:$0xff] }
 0x272   :  { %1584 = vmatpush1.msra.mxu0 %v9338_v14  ;;  %1655 = vmatpush1.msra.mxu1 %v9408_v42  ;;  %v9416_v14 = vld [vmem:[#allocation65_spill] sm:$0xff]  ;;  %v9429_v42 = vld [vmem:[#allocation28_spill] sm:$0xff] }
 0x273   :  { %v6453_v18 = vadd.f32 %v1385_v1, %v1384_v20  ;;  %1585 = vmatprep.subr.mxu0 %v9409_v43  ;;  %1656 = vmatprep.subr.mxu1 %v9410_v40  ;;  %v9427_v20 = vld [vmem:[#allocation26_spill] sm:$0xff]  ;;  %v9430_v43 = vld [vmem:[#allocation29_spill] sm:$0xff] }
 0x274   :  { %1586 = vmatpush1.msra.mxu0 %v9411_v44  ;;  %1657 = vmatpush1.msra.mxu1 %v9412_v56  ;;  %v9431_v40 = vld [vmem:[#allocation30_spill] sm:$0xff]  ;;  %v9433_v44 = vld [vmem:[#allocation32_spill] sm:$0xff]  ;;  %v9434_v56 = vld [vmem:[#allocation33_spill] sm:$0xff] }
 0x275   :  { %4193 = vtanh.f32 %v6453_v18  ;;  %1587 = vmatprep.subr.mxu0 %v9413_v21  ;;  %1658 = vmatprep.subr.mxu1 %v9414_v27  ;;  %v9435_v21 = vld [vmem:[#allocation34_spill] sm:$0xff]  ;;  %v9436_v27 = vld [vmem:[#allocation35_spill] sm:$0xff] }
 0x276   :  { %1588 = vmatpush1.msra.mxu0 %v9415_v46  ;;  %1659 = vmatpush1.msra.mxu1 %v9416_v14  ;;  %v9437_v46 = vld [vmem:[#allocation36_spill] sm:$0xff]  ;;  %v9438_v14 = vld [vmem:[#allocation37_spill] sm:$0xff] }
 0x277   :  { %1589 = vmatprep.subr.mxu0 %v9417_v48  ;;  %1660 = vmatprep.subr.mxu1 %v9349_v17  ;;  %v9419_v17 = vld [vmem:[#allocation78_spill] sm:$0xff] }
 0x278   :  { %1590 = vmatpush1.msra.mxu0 %v9350_v11  ;;  %1661 = vmatpush1.msra.mxu1 %v9351_v9  ;;  %v9420_v11 = vld [vmem:[#allocation79_spill] sm:$0xff]  ;;  %v6521_v48 = vld [vmem:[%s8707_s3 + $0x148] sm:$0xff] }
 0x279   :  { %1591 = vmatprep.subr.mxu0 %v9352_v19  ;;  %1662 = vmatprep.subr.mxu1 %v9353_v13  ;;  %v9421_v13 = vld [vmem:[#allocation80_spill] sm:$0xff]  ;;  %v4192_v19 = vpop.eup %4191  ;;  %9439 = vst [vmem:[#allocation44_spill] sm:$0xff] %v6521_v48 }
 0x27a   :  { %1592 = vmatpush1.msra.mxu0 %v9354_v61  ;;  %1663 = vmatpush1.msra.mxu1 %v9355_v60  ;;  %v9422_v61 = vld [vmem:[#allocation81_spill] sm:$0xff]  ;;  %v9423_v60 = vld [vmem:[#allocation82_spill] sm:$0xff] }
 0x27b   :  { %1593 = vmatprep.subr.mxu0 %v9356_v63  ;;  %1664 = vmatprep.subr.mxu1 %v9418_v41  ;;  %v9424_v63 = vld [vmem:[#allocation83_spill] sm:$0xff] }
 0x27c   :  { %1594 = vmatpush1.msra.mxu0 %v9358_v62  ;;  %1665 = vmatpush1.msra.mxu1 %v9359_v10  ;;  %v6527_v41 = vld [vmem:[%s8707_s3 + $0x158] sm:$0xff] }
 0x27d   :  { %1595 = vmatprep.subr.mxu0 %v9419_v17  ;;  %1666 = vmatprep.subr.mxu1 %v5889_v6  ;;  %v9425_v6 = vld [vmem:[#allocation24_spill] sm:$0xff]  ;;  %9440 = vst [vmem:[#allocation45_spill] sm:$0xff] %v6527_v41 }
 0x27e   :  { %1596 = vmatpush1.msra.mxu0 %v9420_v11  ;;  %1667 = vmatpush1.msra.mxu1 %v5901_v8  ;;  %v6493_v8 = vld [vmem:[%s8705_s1 + $0x8] sm:$0xff]  ;;  %v6533_v17 = vld [vmem:[%s8707_s3 + $0x140] sm:$0xff]  ;;  %v6539_v11 = vld [vmem:[%s8707_s3 + $0x150] sm:$0xff] }
 0x27f   :  { %1597 = vmatprep.subr.mxu0 %v9421_v13  ;;  %1668 = vmatprep.subr.mxu1 %v9422_v61  ;;  %v1013_v51 = vmul.f32 %v6493_v8, %v6149_v5  ;;  %v9432_v5 = vld [vmem:[#allocation31_spill] sm:$0xff]  ;;  %9441 = vst [vmem:[#allocation52_spill] sm:$0xff] %v6533_v17  ;;  %9442 = vst [vmem:[#allocation54_spill] sm:$0xff] %v6539_v11  ;;  %v6545_v13 = vld [vmem:[%s8707_s3 + $0x128] sm:$0xff] }
 0x280   :  { %1598 = vmatpush1.msra.mxu0 %v9423_v60  ;;  %1631 = vmatprep.mubr.f32.mxu0 %v9219_v59  ;;  %9443 = vst [vmem:[#allocation55_spill] sm:$0xff] %v6545_v13  ;;  %v6551_v61 = vld [vmem:[%s8707_s3 + $0x138] sm:$0xff]  ;;  %v6563_v60 = vld [vmem:[%s8707_s3 + $0x130] sm:$0xff] }
 0x281   :  { %1669 = vmatpush1.msra.mxu1 %v9424_v63  ;;  %1702 = vmatprep.mubr.f32.mxu1 %v9219_v59  ;;  %9444 = vst [vmem:[#allocation56_spill] sm:$0xff] %v6551_v61  ;;  %9446 = vst [vmem:[#allocation68_spill] sm:$0xff] %v6563_v60  ;;  %v6575_v63 = vld [vmem:[%s8707_s3 + $0x118] sm:$0xff] }
 0x282   :  { %v4194_v62 = vpop.eup %4193  ;;  %1795 = vmatprep.subr.mxu0 %v9425_v6  ;;  %1866 = vmatprep.subr.mxu1 %v6146_v7  ;;  %9448 = vst [vmem:[#allocation70_spill] sm:$0xff] %v6575_v63 }
 0x283   :  { %v1388_v10 = vmul.f32 %v4194_v62, %v4192_v19  ;;  %v6557_v19 = vld [vmem:[%s8707_s3 + $0x120] sm:$0xff]  ;;  %v6569_v62 = vld [vmem:[%s8707_s3 + $0x108] sm:$0xff] }
 0x284   :  { %9445 = vst [vmem:[#allocation67_spill] sm:$0xff] %v6557_v19  ;;  %9447 = vst [vmem:[#allocation69_spill] sm:$0xff] %v6569_v62 }
 0x285   :  { %v1394_v9 = vmul.f32 %v6493_v8, %v1388_v10  ;;  %v1565_v49 = vrot.slane %v1388_v10, 4  ;;  %v6581_v10 = vld [vmem:[%s8707_s3 + $0x100] sm:$0xff] }
 0x286   :  { %9449 = vst [vmem:[#allocation71_spill] sm:$0xff] %v6581_v10 }
 0x287   :  { %v1396_v26 = vrot.slane %v1394_v9, 6  ;;  %1632 = vmatmul.mubr.f32.vlgmr.msra.gmra.mxu0 %v1565_v49  ;;  %1703 = vmatmul.mubr.f32.vlgmr.msra.gmra.mxu1 %v1565_v49  ;;  %v6587_v9 = vld [vmem:[%s8707_s3 + $0x110] sm:$0xff]  ;;  %v6593_v49 = vld [vmem:[%s8707_s3 + $0xe8] sm:$0xff] }
 0x288   :  { %1796 = vmatpush1.msra.mxu0 %v6155_v2  ;;  %1867 = vmatpush1.msra.mxu1 %v9426_v57  ;;  %9450 = vst [vmem:[#allocation72_spill] sm:$0xff] %v6587_v9  ;;  %9451 = vst [vmem:[#allocation73_spill] sm:$0xff] %v6593_v49 }
 0x289   :  { %v6500_v1 = vadd.f32 %v1396_v26, %v1013_v51  ;;  %1797 = vmatprep.subr.mxu0 %v9427_v20  ;;  %1868 = vmatprep.subr.mxu1 %v9428_v47  ;;  %v6599_v51 = vld [vmem:[%s8707_s3 + $0xf8] sm:$0xff]  ;;  %v6605_v26 = vld [vmem:[%s8707_s3 + $0xe0] sm:$0xff] }
 0x28a   :  { %1798 = vmatpush1.msra.mxu0 %v9429_v42  ;;  %1869 = vmatpush1.msra.mxu1 %v9430_v43  ;;  %9452 = vst [vmem:[#allocation74_spill] sm:$0xff] %v6599_v51  ;;  %9453 = vst [vmem:[#allocation76_spill] sm:$0xff] %v6605_v26 }
 0x28b   :  { %1799 = vmatprep.subr.mxu0 %v9431_v40  ;;  %1870 = vmatprep.subr.mxu1 %v9432_v5 }
 0x28c   :  { %1800 = vmatpush1.msra.mxu0 %v9433_v44  ;;  %1871 = vmatpush1.msra.mxu1 %v9434_v56 }
 0x28d   :  { %1801 = vmatprep.subr.mxu0 %v9435_v21  ;;  %1872 = vmatprep.subr.mxu1 %v9436_v27 }
 0x28e   :  { %1802 = vmatpush1.msra.mxu0 %v9437_v46  ;;  %1873 = vmatpush1.msra.mxu1 %v9438_v14 }
 0x28f   :  { %1803 = vmatprep.subr.mxu0 %v6239_v3  ;;  %1874 = vmatprep.subr.mxu1 %v6245_v0 }
 0x290   :  { %1804 = vmatpush1.msra.mxu0 %v6251_v23  ;;  %1875 = vmatpush1.msra.mxu1 %v6257_v4 }
 0x291   :  { %1805 = vmatprep.subr.mxu0 %v6521_v48  ;;  %1876 = vmatprep.subr.mxu1 %v6527_v41 }
 0x292   :  { %1806 = vmatpush1.msra.mxu0 %v6533_v17  ;;  %1877 = vmatpush1.msra.mxu1 %v6539_v11 }
 0x293   :  { %1807 = vmatprep.subr.mxu0 %v6545_v13  ;;  %1878 = vmatprep.subr.mxu1 %v6551_v61 }
 0x294   :  { %1808 = vmatpush1.msra.mxu0 %v6557_v19  ;;  %1879 = vmatpush1.msra.mxu1 %v6563_v60 }
 0x295   :  { %1809 = vmatprep.subr.mxu0 %v6569_v62  ;;  %1880 = vmatprep.subr.mxu1 %v6575_v63 }
 0x296   :  { %1810 = vmatpush1.msra.mxu0 %v6581_v10  ;;  %1881 = vmatpush1.msra.mxu1 %v6587_v9  ;;  %v6611_v9 = vld [vmem:[%s8707_s3 + $0xf0] sm:$0xff] }
 0x297   :  { %1811 = vmatprep.subr.mxu0 %v6593_v49  ;;  %1882 = vmatprep.subr.mxu1 %v6599_v51  ;;  %9454 = vst [vmem:[#allocation77_spill] sm:$0xff] %v6611_v9  ;;  %v6617_v49 = vld [vmem:[%s8707_s3 + $0xc8] sm:$0xff]  ;;  %v6623_v51 = vld [vmem:[%s8707_s3 + $0xd8] sm:$0xff] }
 0x298   :  { %1812 = vmatpush1.msra.mxu0 %v6605_v26  ;;  %1883 = vmatpush1.msra.mxu1 %v6611_v9  ;;  %9455 = vst [vmem:[#allocation5_spill] sm:$0xff] %v6617_v49  ;;  %9456 = vst [vmem:[#allocation6_spill] sm:$0xff] %v6623_v51  ;;  %v6629_v26 = vld [vmem:[%s8707_s3 + $0xc0] sm:$0xff]  ;;  %v6635_v9 = vld [vmem:[%s8707_s3 + $0xd0] sm:$0xff] }
 0x299   :  { %1813 = vmatprep.subr.mxu0 %v6617_v49  ;;  %1884 = vmatprep.subr.mxu1 %v6623_v51  ;;  %9457 = vst [vmem:[#allocation7_spill] sm:$0xff] %v6629_v26  ;;  %9458 = vst [vmem:[#allocation8_spill] sm:$0xff] %v6635_v9  ;;  %v6641_v49 = vld [vmem:[%s8707_s3 + $0xa8] sm:$0xff]  ;;  %v6647_v51 = vld [vmem:[%s8707_s3 + $0xb8] sm:$0xff] }
 0x29a   :  { %1814 = vmatpush1.msra.mxu0 %v6629_v26  ;;  %1885 = vmatpush1.msra.mxu1 %v6635_v9  ;;  %9459 = vst [vmem:[#allocation9_spill] sm:$0xff] %v6641_v49  ;;  %9460 = vst [vmem:[#allocation10_spill] sm:$0xff] %v6647_v51  ;;  %v6653_v26 = vld [vmem:[%s8707_s3 + $0xa0] sm:$0xff]  ;;  %v6659_v9 = vld [vmem:[%s8707_s3 + $0xb0] sm:$0xff] }
 0x29b   :  { %1815 = vmatprep.subr.mxu0 %v6641_v49  ;;  %1886 = vmatprep.subr.mxu1 %v6647_v51  ;;  %9461 = vst [vmem:[#allocation11_spill] sm:$0xff] %v6653_v26  ;;  %9462 = vst [vmem:[#allocation12_spill] sm:$0xff] %v6659_v9  ;;  %v6665_v49 = vld [vmem:[%s8707_s3 + $0x88] sm:$0xff]  ;;  %v6671_v51 = vld [vmem:[%s8707_s3 + $0x98] sm:$0xff] }
 0x29c   :  { %1816 = vmatpush1.msra.mxu0 %v6653_v26  ;;  %1887 = vmatpush1.msra.mxu1 %v6659_v9  ;;  %9463 = vst [vmem:[#allocation13_spill] sm:$0xff] %v6665_v49  ;;  %9464 = vst [vmem:[#allocation14_spill] sm:$0xff] %v6671_v51  ;;  %v6677_v26 = vld [vmem:[%s8707_s3 + $0x80] sm:$0xff]  ;;  %v6683_v9 = vld [vmem:[%s8707_s3 + $0x90] sm:$0xff] }
 0x29d   :  { %1817 = vmatprep.subr.mxu0 %v6665_v49  ;;  %1888 = vmatprep.subr.mxu1 %v6671_v51  ;;  %9465 = vst [vmem:[#allocation15_spill] sm:$0xff] %v6677_v26  ;;  %9466 = vst [vmem:[#allocation16_spill] sm:$0xff] %v6683_v9  ;;  %v6689_v49 = vld [vmem:[%s8707_s3 + $0x68] sm:$0xff]  ;;  %v6695_v51 = vld [vmem:[%s8707_s3 + $0x78] sm:$0xff] }
 0x29e   :  { %1818 = vmatpush1.msra.mxu0 %v6677_v26  ;;  %1889 = vmatpush1.msra.mxu1 %v6683_v9  ;;  %9467 = vst [vmem:[#allocation17_spill] sm:$0xff] %v6689_v49  ;;  %9468 = vst [vmem:[#allocation18_spill] sm:$0xff] %v6695_v51  ;;  %v6701_v26 = vld [vmem:[%s8707_s3 + $0x60] sm:$0xff]  ;;  %v6707_v9 = vld [vmem:[%s8707_s3 + $0x70] sm:$0xff] }
 0x29f   :  { %1819 = vmatprep.subr.mxu0 %v6689_v49  ;;  %1890 = vmatprep.subr.mxu1 %v6695_v51  ;;  %9469 = vst [vmem:[#allocation19_spill] sm:$0xff] %v6701_v26  ;;  %9470 = vst [vmem:[#allocation20_spill] sm:$0xff] %v6707_v9  ;;  %v6713_v49 = vld [vmem:[%s8707_s3 + $0x48] sm:$0xff]  ;;  %v6719_v51 = vld [vmem:[%s8707_s3 + $0x58] sm:$0xff] }
 0x2a0   :  { %1820 = vmatpush1.msra.mxu0 %v6701_v26  ;;  %1891 = vmatpush1.msra.mxu1 %v6707_v9  ;;  %9471 = vst [vmem:[#allocation21_spill] sm:$0xff] %v6713_v49  ;;  %9472 = vst [vmem:[#allocation22_spill] sm:$0xff] %v6719_v51  ;;  %v6725_v26 = vld [vmem:[%s8707_s3 + $0x40] sm:$0xff]  ;;  %v6731_v9 = vld [vmem:[%s8707_s3 + $0x50] sm:$0xff] }
 0x2a1   :  { %1821 = vmatprep.subr.mxu0 %v6713_v49  ;;  %1892 = vmatprep.subr.mxu1 %v6719_v51  ;;  %9473 = vst [vmem:[#allocation23_spill] sm:$0xff] %v6725_v26  ;;  %9474 = vst [vmem:[#allocation94_spill] sm:$0xff] %v6731_v9  ;;  %v6737_v49 = vld [vmem:[%s8707_s3 + $0x28] sm:$0xff]  ;;  %v6743_v51 = vld [vmem:[%s8707_s3 + $0x38] sm:$0xff] }
 0x2a2   :  { %1822 = vmatpush1.msra.mxu0 %v6725_v26  ;;  %1893 = vmatpush1.msra.mxu1 %v6731_v9  ;;  %9475 = vst [vmem:[#allocation96_spill] sm:$0xff] %v6737_v49  ;;  %9476 = vst [vmem:[#allocation46_spill] sm:$0xff] %v6743_v51  ;;  %v6749_v26 = vld [vmem:[%s8707_s3 + $0x20] sm:$0xff]  ;;  %v6755_v9 = vld [vmem:[%s8707_s3 + $0x30] sm:$0xff] }
 0x2a3   :  { %1823 = vmatprep.subr.mxu0 %v6737_v49  ;;  %1894 = vmatprep.subr.mxu1 %v6743_v51  ;;  %9477 = vst [vmem:[#allocation47_spill] sm:$0xff] %v6749_v26  ;;  %9478 = vst [vmem:[#allocation48_spill] sm:$0xff] %v6755_v9  ;;  %v6761_v49 = vld [vmem:[%s8707_s3 + $0x8] sm:$0xff]  ;;  %v6767_v51 = vld [vmem:[%s8707_s3 + $0x18] sm:$0xff] }
 0x2a4   :  { %1824 = vmatpush1.msra.mxu0 %v6749_v26  ;;  %1895 = vmatpush1.msra.mxu1 %v6755_v9  ;;  %9479 = vst [vmem:[#allocation49_spill] sm:$0xff] %v6761_v49  ;;  %9480 = vst [vmem:[#allocation50_spill] sm:$0xff] %v6767_v51  ;;  %v6773_v26 = vld [vmem:[%s8707_s3] sm:$0xff] }
 0x2a5   :  { %1825 = vmatprep.subr.mxu0 %v6761_v49  ;;  %1896 = vmatprep.subr.mxu1 %v6767_v51  ;;  %9481 = vst [vmem:[#allocation51_spill] sm:$0xff] %v6773_v26  ;;  %v6780_v49 = vld [vmem:[%s8707_s3 + $0x10] sm:$0xff]  ;;  %v6787_v51 = vld [vmem:[%s8710_s6 + $0x1e8] sm:$0xff] }
 0x2a6   :  { %1826 = vmatpush1.msra.mxu0 %v6773_v26  ;;  %1859 = vmatprep.mubr.f32.mxu0 %v9219_v59  ;;  %9482 = vst [vmem:[#allocation53_spill] sm:$0xff] %v6780_v49  ;;  %9483 = vst [vmem:[#allocation57_spill] sm:$0xff] %v6787_v51  ;;  %v6793_v26 = vld [vmem:[%s8710_s6 + $0x1f8] sm:$0xff] }
 0x2a7   :  { %1897 = vmatpush1.msra.mxu1 %v6780_v49  ;;  %1930 = vmatprep.mubr.f32.mxu1 %v9219_v59  ;;  %9484 = vst [vmem:[#allocation58_spill] sm:$0xff] %v6793_v26 }
 0x2a8   :  { %1956 = vmatprep.subr.mxu0 %v6787_v51  ;;  %2027 = vmatprep.subr.mxu1 %v6793_v26 }
 0x321   :  { %v1472_v9 = vpop.f32.mrf.mxu0  ;;  %v1543_v62 = vpop.f32.mrf.mxu1 }
 0x322   :  { %v1552_v10 = vrot.slane %v1472_v9, 4  ;;  %v1554_v41 = vrot.slane %v1543_v62, 4 }
 0x323   :  { %v1474_v63 = vpop.f32.mrf.mxu0  ;;  %v1545_v51 = vpop.f32.mrf.mxu1 }
 0x324   :  { %v1560_v49 = vadd.f32 %v1552_v10, %v9395_v50  ;;  %v1553_v60 = vrot.slane %v1474_v63, 4  ;;  %v1555_v11 = vrot.slane %v1545_v51, 4  ;;  %v1562_v9 = vadd.f32 %v1554_v41, %v9396_v36 }
 0x326   :  { %v4057_v19 = vmul.f32 -1.442695, %v1560_v49  ;;  %v1561_v61 = vadd.f32 %v1553_v60, %v6040_v55  ;;  %v1563_v17 = vadd.f32 %v1555_v11, %v6044_v22 }
 0x328   :  { %4195 = vpow2.f32 %v4057_v19  ;;  %v4058_v13 = vmul.f32 -1.442695, %v1561_v61  ;;  %v4059_v48 = vmul.f32 -1.442695, %v1563_v17 }
 0x32a   :  { %4197 = vpow2.f32 %v4058_v13  ;;  %v1745_v13 = vrot.slane %v6313_v53, 6 }
 0x32b   :  { %4199 = vpow2.f32 %v4059_v48 }
 0x335   :  { %v4196_v26 = vpop.eup %4195 }
 0x336   :  { %v1728_v4 = vadd.f32 1.0, %v4196_v26 }
 0x337   :  { %v4198_v23 = vpop.eup %4197 }
 0x338   :  { %4201 = vrcp.f32 %v1728_v4  ;;  %v1734_v63 = vadd.f32 1.0, %v4198_v23  ;;  %v4200_v60 = vpop.eup %4199 }
 0x339   :  { %4203 = vtanh.f32 %v1562_v9  ;;  %v1741_v11 = vadd.f32 1.0, %v4200_v60 }
 0x33a   :  { %4205 = vrcp.f32 %v1734_v63 }
 0x33b   :  { %4207 = vrcp.f32 %v1741_v11 }
 0x345   :  { %v4202_v19 = vpop.eup %4201 }
 0x346   :  { %v4204_v61 = vpop.eup %4203 }
 0x347   :  { %v1633_v10 = vpop.f32.mrf.mxu0  ;;  %v4206_v49 = vpop.eup %4205  ;;  %v1748_v17 = vmul.f32 %v4204_v61, %v4202_v19 }
 0x348   :  { %v1713_v62 = vrot.slane %v1633_v10, 6  ;;  %v1747_v51 = vmul.f32 %v4206_v49, %v1745_v13  ;;  %v1704_v26 = vpop.f32.mrf.mxu1  ;;  %v4208_v13 = vpop.eup %4207 }
 0x349   :  { %v1635_v22 = vpop.f32.mrf.mxu0  ;;  %v1715_v61 = vrot.slane %v1704_v26, 6 }
 0x34a   :  { %v1721_v41 = vadd.f32 %v1713_v62, %v6050_v15  ;;  %v1714_v48 = vrot.slane %v1635_v22, 6  ;;  %v6802_v4 = vadd.f32 %v1748_v17, %v1747_v51  ;;  %v1706_v63 = vpop.f32.mrf.mxu1 }
 0x34b   :  { %v1716_v60 = vrot.slane %v1706_v63, 6  ;;  %v1723_v62 = vadd.f32 %v1715_v61, %v6063_v16  ;;  %v9487_v63 = vld [vmem:[#allocation42_spill] sm:$0xff]  ;;  %v6839_v61 = vld [vmem:[%s8710_s6 + $0x158] sm:$0xff] }
 0x34c   :  { %v4060_v23 = vmul.f32 -1.442695, %v1721_v41  ;;  %v1722_v9 = vadd.f32 %v1714_v48, %v6052_v25  ;;  %4209 = vtanh.f32 %v6802_v4 }
 0x34d   :  { %v1724_v19 = vadd.f32 %v1716_v60, %v6059_v24  ;;  %v9488_v60 = vld [vmem:[#allocation43_spill] sm:$0xff] }
 0x34e   :  { %4211 = vpow2.f32 %v4060_v23  ;;  %v4061_v53 = vmul.f32 -1.442695, %v1722_v9 }
 0x34f   :  { %v4062_v10 = vmul.f32 -1.442695, %v1724_v19  ;;  %v6833_v19 = vld [vmem:[%s8710_s6 + $0x148] sm:$0xff] }
 0x350   :  { %4213 = vpow2.f32 %v4061_v53  ;;  %v9486_v53 = vld [vmem:[#allocation41_spill] sm:$0xff] }
 0x351   :  { %4215 = vpow2.f32 %v4062_v10  ;;  %v6845_v10 = vld [vmem:[%s8710_s6 + $0x140] sm:$0xff] }
 0x359   :  { %v4210_v49 = vpop.eup %4209 }
 0x35a   :  { %v1751_v11 = vmul.f32 %v4210_v49, %v4208_v13  ;;  %v6851_v49 = vld [vmem:[%s8710_s6 + $0x150] sm:$0xff] }
 0x35b   :  { %v4212_v22 = vpop.eup %4211 }
 0x35c   :  { %v1755_v17 = vadd.f32 1.0, %v4212_v22  ;;  %v1779_v41 = vmul.f32 %v6323_v45, %v1751_v11  ;;  %v1793_v48 = vrot.slane %v1751_v11, 4  ;;  %v6863_v11 = vld [vmem:[%s8710_s6 + $0x138] sm:$0xff] }
 0x35d   :  { %v4214_v51 = vpop.eup %4213  ;;  %9490 = vst [vmem:[#allocation60_spill] sm:$0xff] %v6863_v11 }
 0x35e   :  { %4217 = vrcp.f32 %v1755_v17  ;;  %v1761_v23 = vadd.f32 1.0, %v4214_v51  ;;  %v1781_v9 = vrot.slane %v1779_v41, 4  ;;  %1860 = vmatmul.mubr.f32.vlgmr.msra.gmra.mxu0 %v1793_v48  ;;  %1931 = vmatmul.mubr.f32.vlgmr.msra.gmra.mxu1 %v1793_v48  ;;  %v4216_v13 = vpop.eup %4215  ;;  %v1772_v51 = vrot.slane %v6453_v18, 2  ;;  %v6870_v41 = vld [vmem:[%s8710_s6 + $0x120] sm:$0xff]  ;;  %v6876_v48 = vld [vmem:[%s8710_s6 + $0x130] sm:$0xff]  ;;  %v6882_v18 = vld [vmem:[%s8710_s6 + $0x108] sm:$0xff] }
 0x35f   :  { %4219 = vtanh.f32 %v1723_v62  ;;  %1957 = vmatpush1.msra.mxu0 %v6331_v52  ;;  %2028 = vmatpush1.msra.mxu1 %v6337_v54  ;;  %v6857_v62 = vld [vmem:[%s8710_s6 + $0x128] sm:$0xff]  ;;  %9491 = vst [vmem:[#allocation61_spill] sm:$0xff] %v6870_v41  ;;  %9492 = vst [vmem:[#allocation62_spill] sm:$0xff] %v6882_v18 }
 0x360   :  { %4221 = vrcp.f32 %v1761_v23  ;;  %v6812_v26 = vadd.f32 %v1781_v9, %v6340_v12  ;;  %1958 = vmatprep.subr.mxu0 %v6345_v28  ;;  %2029 = vmatprep.subr.mxu1 %v6351_v29  ;;  %v9485_v12 = vld [vmem:[#allocation40_spill] sm:$0xff]  ;;  %9489 = vst [vmem:[#allocation59_spill] sm:$0xff] %v6857_v62  ;;  %v1768_v9 = vadd.f32 1.0, %v4216_v13 }
 0x361   :  { %1959 = vmatpush1.msra.mxu0 %v6357_v30  ;;  %2030 = vmatpush1.msra.mxu1 %v6363_v31  ;;  %v6894_v13 = vld [vmem:[%s8710_s6 + $0x100] sm:$0xff] }
 0x362   :  { %1960 = vmatprep.subr.mxu0 %v6369_v58  ;;  %2031 = vmatprep.subr.mxu1 %v6375_v32  ;;  %4223 = vrcp.f32 %v1768_v9  ;;  %v6950_v9 = vld [vmem:[%s8710_s6 + $0xd0] sm:$0xff] }
 0x363   :  { %1961 = vmatpush1.msra.mxu0 %v6381_v33  ;;  %2032 = vmatpush1.msra.mxu1 %v6387_v34  ;;  %9502 = vst [vmem:[#allocation82_spill] sm:$0xff] %v6950_v9 }
 0x364   :  { %1962 = vmatprep.subr.mxu0 %v6393_v35  ;;  %2033 = vmatprep.subr.mxu1 %v6399_v37 }
 0x365   :  { %1963 = vmatpush1.msra.mxu0 %v6405_v38  ;;  %2034 = vmatpush1.msra.mxu1 %v6411_v39 }
 0x366   :  { %1964 = vmatprep.subr.mxu0 %v9485_v12  ;;  %2035 = vmatprep.subr.mxu1 %v9486_v53 }
 0x367   :  { %1965 = vmatpush1.msra.mxu0 %v9487_v63  ;;  %2036 = vmatpush1.msra.mxu1 %v9488_v60 }
 0x368   :  { %1966 = vmatprep.subr.mxu0 %v6833_v19  ;;  %2037 = vmatprep.subr.mxu1 %v6839_v61 }
 0x369   :  { %1967 = vmatpush1.msra.mxu0 %v6845_v10  ;;  %2038 = vmatpush1.msra.mxu1 %v6851_v49 }
 0x36a   :  { %1968 = vmatprep.subr.mxu0 %v6857_v62  ;;  %2039 = vmatprep.subr.mxu1 %v6863_v11 }
 0x36b   :  { %v4218_v22 = vpop.eup %4217  ;;  %1969 = vmatpush1.msra.mxu0 %v6870_v41  ;;  %2040 = vmatpush1.msra.mxu1 %v6876_v48  ;;  %v6888_v41 = vld [vmem:[%s8710_s6 + $0x118] sm:$0xff] }
 0x36c   :  { %v4220_v17 = vpop.eup %4219  ;;  %1970 = vmatprep.subr.mxu0 %v6882_v18  ;;  %9493 = vst [vmem:[#allocation63_spill] sm:$0xff] %v6888_v41  ;;  %2041 = vmatprep.subr.mxu1 %v6888_v41  ;;  %v6900_v18 = vld [vmem:[%s8710_s6 + $0x110] sm:$0xff]  ;;  %v6906_v41 = vld [vmem:[%s8710_s6 + $0xe8] sm:$0xff] }
 0x36d   :  { %v4222_v23 = vpop.eup %4221  ;;  %v1775_v11 = vmul.f32 %v4220_v17, %v4218_v22  ;;  %1971 = vmatpush1.msra.mxu0 %v6894_v13  ;;  %9494 = vst [vmem:[#allocation64_spill] sm:$0xff] %v6900_v18  ;;  %2042 = vmatpush1.msra.mxu1 %v6900_v18  ;;  %9495 = vst [vmem:[#allocation65_spill] sm:$0xff] %v6906_v41  ;;  %v6912_v22 = vld [vmem:[%s8710_s6 + $0xf8] sm:$0xff] }
 0x36e   :  { %v1774_v62 = vmul.f32 %v4222_v23, %v1772_v51  ;;  %1972 = vmatprep.subr.mxu0 %v6906_v41  ;;  %9496 = vst [vmem:[#allocation66_spill] sm:$0xff] %v6912_v22  ;;  %2043 = vmatprep.subr.mxu1 %v6912_v22  ;;  %v6920_v51 = vld [vmem:[%s8710_s6 + $0xe0] sm:$0xff]  ;;  %v6926_v23 = vld [vmem:[%s8710_s6 + $0xf0] sm:$0xff] }
 0x36f   :  { %9497 = vst [vmem:[#allocation75_spill] sm:$0xff] %v6920_v51  ;;  %1973 = vmatpush1.msra.mxu0 %v6920_v51  ;;  %9498 = vst [vmem:[#allocation78_spill] sm:$0xff] %v6926_v23  ;;  %2044 = vmatpush1.msra.mxu1 %v6926_v23  ;;  %v6944_v51 = vld [vmem:[%s8710_s6 + $0xc0] sm:$0xff] }
 0x370   :  { %v6915_v17 = vadd.f32 %v1775_v11, %v1774_v62  ;;  %v6932_v62 = vld [vmem:[%s8710_s6 + $0xc8] sm:$0xff]  ;;  %v6938_v11 = vld [vmem:[%s8710_s6 + $0xd8] sm:$0xff]  ;;  %9501 = vst [vmem:[#allocation81_spill] sm:$0xff] %v6944_v51  ;;  %v7089_v23 = vld [vmem:[%s8710_s6] sm:$0xff]  ;;  %2020 = vmatprep.mubr.f32.mxu0 %v9219_v59  ;;  %2091 = vmatprep.mubr.f32.mxu1 %v9219_v59 }
 0x371   :  { %9499 = vst [vmem:[#allocation79_spill] sm:$0xff] %v6932_v62  ;;  %1974 = vmatprep.subr.mxu0 %v6932_v62  ;;  %9500 = vst [vmem:[#allocation80_spill] sm:$0xff] %v6938_v11  ;;  %2045 = vmatprep.subr.mxu1 %v6938_v11  ;;  %v6957_v11 = vld [vmem:[%s8710_s6 + $0xa8] sm:$0xff]  ;;  %v6975_v62 = vld [vmem:[%s8710_s6 + $0xb0] sm:$0xff] }
 0x372   :  { %1975 = vmatpush1.msra.mxu0 %v6944_v51  ;;  %2046 = vmatpush1.msra.mxu1 %v6950_v9  ;;  %4225 = vtanh.f32 %v6915_v17  ;;  %9503 = vst [vmem:[#allocation83_spill] sm:$0xff] %v6957_v11  ;;  %v6963_v51 = vld [vmem:[%s8710_s6 + $0xb8] sm:$0xff]  ;;  %v6969_v9 = vld [vmem:[%s8710_s6 + $0xa0] sm:$0xff]  ;;  %9506 = vst [vmem:[#allocation26_spill] sm:$0xff] %v6975_v62 }
 0x373   :  { %1976 = vmatprep.subr.mxu0 %v6957_v11  ;;  %9504 = vst [vmem:[#allocation24_spill] sm:$0xff] %v6963_v51  ;;  %2047 = vmatprep.subr.mxu1 %v6963_v51  ;;  %9505 = vst [vmem:[#allocation25_spill] sm:$0xff] %v6969_v9  ;;  %v6981_v11 = vld [vmem:[%s8710_s6 + $0x88] sm:$0xff]  ;;  %v6987_v51 = vld [vmem:[%s8710_s6 + $0x98] sm:$0xff] }
 0x374   :  { %1977 = vmatpush1.msra.mxu0 %v6969_v9  ;;  %2048 = vmatpush1.msra.mxu1 %v6975_v62  ;;  %9507 = vst [vmem:[#allocation27_spill] sm:$0xff] %v6981_v11  ;;  %9508 = vst [vmem:[#allocation28_spill] sm:$0xff] %v6987_v51  ;;  %v6993_v9 = vld [vmem:[%s8710_s6 + $0x80] sm:$0xff]  ;;  %v6999_v62 = vld [vmem:[%s8710_s6 + $0x90] sm:$0xff] }
 0x375   :  { %1978 = vmatprep.subr.mxu0 %v6981_v11  ;;  %2049 = vmatprep.subr.mxu1 %v6987_v51  ;;  %9509 = vst [vmem:[#allocation29_spill] sm:$0xff] %v6993_v9  ;;  %9510 = vst [vmem:[#allocation30_spill] sm:$0xff] %v6999_v62  ;;  %v7005_v11 = vld [vmem:[%s8710_s6 + $0x68] sm:$0xff]  ;;  %v7011_v51 = vld [vmem:[%s8710_s6 + $0x78] sm:$0xff] }
 0x376   :  { %1979 = vmatpush1.msra.mxu0 %v6993_v9  ;;  %2050 = vmatpush1.msra.mxu1 %v6999_v62  ;;  %9511 = vst [vmem:[#allocation31_spill] sm:$0xff] %v7005_v11  ;;  %9512 = vst [vmem:[#allocation32_spill] sm:$0xff] %v7011_v51  ;;  %v7017_v9 = vld [vmem:[%s8710_s6 + $0x60] sm:$0xff]  ;;  %v7023_v62 = vld [vmem:[%s8710_s6 + $0x70] sm:$0xff] }
 0x377   :  { %1980 = vmatprep.subr.mxu0 %v7005_v11  ;;  %2051 = vmatprep.subr.mxu1 %v7011_v51  ;;  %9513 = vst [vmem:[#allocation33_spill] sm:$0xff] %v7017_v9  ;;  %9514 = vst [vmem:[#allocation34_spill] sm:$0xff] %v7023_v62  ;;  %v7029_v11 = vld [vmem:[%s8710_s6 + $0x48] sm:$0xff]  ;;  %v7035_v51 = vld [vmem:[%s8710_s6 + $0x58] sm:$0xff] }
 0x378   :  { %1981 = vmatpush1.msra.mxu0 %v7017_v9  ;;  %2052 = vmatpush1.msra.mxu1 %v7023_v62  ;;  %9515 = vst [vmem:[#allocation35_spill] sm:$0xff] %v7029_v11  ;;  %9516 = vst [vmem:[#allocation36_spill] sm:$0xff] %v7035_v51  ;;  %v7041_v9 = vld [vmem:[%s8710_s6 + $0x40] sm:$0xff]  ;;  %v7047_v62 = vld [vmem:[%s8710_s6 + $0x50] sm:$0xff] }
 0x379   :  { %1982 = vmatprep.subr.mxu0 %v7029_v11  ;;  %2053 = vmatprep.subr.mxu1 %v7035_v51  ;;  %9517 = vst [vmem:[#allocation37_spill] sm:$0xff] %v7041_v9  ;;  %9518 = vst [vmem:[#allocation40_spill] sm:$0xff] %v7047_v62  ;;  %v7053_v11 = vld [vmem:[%s8710_s6 + $0x28] sm:$0xff]  ;;  %v7059_v51 = vld [vmem:[%s8710_s6 + $0x38] sm:$0xff] }
 0x37a   :  { %1983 = vmatpush1.msra.mxu0 %v7041_v9  ;;  %2054 = vmatpush1.msra.mxu1 %v7047_v62  ;;  %9519 = vst [vmem:[#allocation41_spill] sm:$0xff] %v7053_v11  ;;  %9520 = vst [vmem:[#allocation42_spill] sm:$0xff] %v7059_v51  ;;  %v7065_v9 = vld [vmem:[%s8710_s6 + $0x20] sm:$0xff]  ;;  %v7071_v62 = vld [vmem:[%s8710_s6 + $0x30] sm:$0xff] }
 0x37b   :  { %1984 = vmatprep.subr.mxu0 %v7053_v11  ;;  %2055 = vmatprep.subr.mxu1 %v7059_v51  ;;  %9521 = vst [vmem:[#allocation43_spill] sm:$0xff] %v7065_v9  ;;  %9522 = vst [vmem:[#allocation97_spill] sm:$0xff] %v7071_v62  ;;  %v7077_v11 = vld [vmem:[%s8710_s6 + $0x8] sm:$0xff]  ;;  %v7083_v51 = vld [vmem:[%s8710_s6 + $0x18] sm:$0xff] }
 0x37c   :  { %1985 = vmatpush1.msra.mxu0 %v7065_v9  ;;  %2056 = vmatpush1.msra.mxu1 %v7071_v62  ;;  %9523 = vst [vmem:[#allocation98_spill] sm:$0xff] %v7077_v11  ;;  %9524 = vst [vmem:[#allocation99_spill] sm:$0xff] %v7083_v51  ;;  %v4224_v9 = vpop.eup %4223 }
 0x37d   :  { %1986 = vmatprep.subr.mxu0 %v7077_v11  ;;  %2057 = vmatprep.subr.mxu1 %v7083_v51  ;;  %9525 = vst [vmem:[#allocation100_spill] sm:$0xff] %v7089_v23  ;;  %v7096_v11 = vld [vmem:[%s8710_s6 + $0x10] sm:$0xff] }
 0x37e   :  { %1987 = vmatpush1.msra.mxu0 %v7089_v23  ;;  %9526 = vst [vmem:[#allocation101_spill] sm:$0xff] %v7096_v11  ;;  %2058 = vmatpush1.msra.mxu1 %v7096_v11 }
 0x37f   :  { %v4226_v62 = vpop.eup %4225  ;;  %2172 = vmatprep.subr.mxu0 %v9425_v6  ;;  %2243 = vmatprep.subr.mxu1 %v6146_v7  ;;  %v9528_v7 = vld [vmem:[#allocation39_spill] sm:$0xff]  ;;  %v9529_v6 = vld [vmem:[#allocation44_spill] sm:$0xff] }
 0x380   :  { %v1778_v51 = vmul.f32 %v4226_v62, %v4224_v9  ;;  %v9550_v62 = vld [vmem:[#allocation10_spill] sm:$0xff]  ;;  %v9551_v9 = vld [vmem:[#allocation11_spill] sm:$0xff] }
 0x382   :  { %v1784_v22 = vmul.f32 %v6493_v8, %v1778_v51  ;;  %v1954_v23 = vrot.slane %v1778_v51, 2  ;;  %v9548_v51 = vld [vmem:[#allocation8_spill] sm:$0xff] }
 0x384   :  { %v1786_v41 = vrot.slane %v1784_v22, 4  ;;  %2021 = vmatmul.mubr.f32.vlgmr.msra.gmra.mxu0 %v1954_v23  ;;  %2092 = vmatmul.mubr.f32.vlgmr.msra.gmra.mxu1 %v1954_v23  ;;  %v9547_v22 = vld [vmem:[#allocation7_spill] sm:$0xff]  ;;  %v9549_v23 = vld [vmem:[#allocation9_spill] sm:$0xff] }
 0x385   :  { %2173 = vmatpush1.msra.mxu0 %v6155_v2  ;;  %2244 = vmatpush1.msra.mxu1 %v9426_v57  ;;  %v9527_v2 = vld [vmem:[#allocation38_spill] sm:$0xff]  ;;  %v9530_v57 = vld [vmem:[#allocation45_spill] sm:$0xff] }
 0x386   :  { %v7106_v18 = vadd.f32 %v1786_v41, %v6500_v1  ;;  %2174 = vmatprep.subr.mxu0 %v9427_v20  ;;  %2245 = vmatprep.subr.mxu1 %v9428_v47  ;;  %v9531_v1 = vld [vmem:[#allocation52_spill] sm:$0xff]  ;;  %v9532_v20 = vld [vmem:[#allocation54_spill] sm:$0xff]  ;;  %v9533_v47 = vld [vmem:[#allocation55_spill] sm:$0xff] }
 0x387   :  { %2175 = vmatpush1.msra.mxu0 %v9429_v42  ;;  %2246 = vmatpush1.msra.mxu1 %v9430_v43  ;;  %v9534_v42 = vld [vmem:[#allocation56_spill] sm:$0xff]  ;;  %v9535_v43 = vld [vmem:[#allocation67_spill] sm:$0xff]  ;;  %v9546_v41 = vld [vmem:[#allocation6_spill] sm:$0xff] }
 0x388   :  { %2176 = vmatprep.subr.mxu0 %v9431_v40  ;;  %2247 = vmatprep.subr.mxu1 %v9432_v5  ;;  %v9538_v40 = vld [vmem:[#allocation70_spill] sm:$0xff]  ;;  %v9539_v5 = vld [vmem:[#allocation71_spill] sm:$0xff] }
 0x389   :  { %2177 = vmatpush1.msra.mxu0 %v9433_v44  ;;  %2248 = vmatpush1.msra.mxu1 %v9434_v56  ;;  %v9540_v44 = vld [vmem:[#allocation72_spill] sm:$0xff]  ;;  %v9541_v56 = vld [vmem:[#allocation73_spill] sm:$0xff] }
 0x38a   :  { %2178 = vmatprep.subr.mxu0 %v9435_v21  ;;  %2249 = vmatprep.subr.mxu1 %v9436_v27  ;;  %v9542_v21 = vld [vmem:[#allocation74_spill] sm:$0xff]  ;;  %v9543_v27 = vld [vmem:[#allocation76_spill] sm:$0xff] }
 0x38b   :  { %2179 = vmatpush1.msra.mxu0 %v9437_v46  ;;  %2250 = vmatpush1.msra.mxu1 %v9438_v14  ;;  %v9544_v46 = vld [vmem:[#allocation77_spill] sm:$0xff] }
 0x38c   :  { %2180 = vmatprep.subr.mxu0 %v6239_v3  ;;  %2251 = vmatprep.subr.mxu1 %v6245_v0  ;;  %v9536_v3 = vld [vmem:[#allocation68_spill] sm:$0xff]  ;;  %v9537_v0 = vld [vmem:[#allocation69_spill] sm:$0xff] }
 0x38d   :  { %2181 = vmatpush1.msra.mxu0 %v9527_v2  ;;  %2252 = vmatpush1.msra.mxu1 %v9528_v7  ;;  %v9545_v14 = vld [vmem:[#allocation5_spill] sm:$0xff]  ;;  %v9552_v2 = vld [vmem:[#allocation12_spill] sm:$0xff] }
 0x38e   :  { %2182 = vmatprep.subr.mxu0 %v9529_v6  ;;  %2253 = vmatprep.subr.mxu1 %v9530_v57  ;;  %v9553_v7 = vld [vmem:[#allocation13_spill] sm:$0xff] }
 0x38f   :  { %2183 = vmatpush1.msra.mxu0 %v9531_v1  ;;  %2254 = vmatpush1.msra.mxu1 %v9532_v20 }
 0x390   :  { %2184 = vmatprep.subr.mxu0 %v9533_v47  ;;  %2255 = vmatprep.subr.mxu1 %v9534_v42 }
 0x391   :  { %2185 = vmatpush1.msra.mxu0 %v9535_v43  ;;  %2256 = vmatpush1.msra.mxu1 %v9536_v3 }
 0x392   :  { %2186 = vmatprep.subr.mxu0 %v9537_v0  ;;  %2257 = vmatprep.subr.mxu1 %v9538_v40 }
 0x393   :  { %2187 = vmatpush1.msra.mxu0 %v9539_v5  ;;  %2258 = vmatpush1.msra.mxu1 %v9540_v44  ;;  %v9575_v44 = vld [vmem:[#allocation95_spill] sm:$0xff] }
 0x394   :  { %2188 = vmatprep.subr.mxu0 %v9541_v56  ;;  %2259 = vmatprep.subr.mxu1 %v9542_v21 }
 0x395   :  { %2189 = vmatpush1.msra.mxu0 %v9543_v27  ;;  %2260 = vmatpush1.msra.mxu1 %v9544_v46  ;;  %v9554_v27 = vld [vmem:[#allocation14_spill] sm:$0xff]  ;;  %v9555_v46 = vld [vmem:[#allocation15_spill] sm:$0xff] }
 0x396   :  { %2190 = vmatprep.subr.mxu0 %v9545_v14  ;;  %2261 = vmatprep.subr.mxu1 %v9546_v41  ;;  %v9556_v14 = vld [vmem:[#allocation16_spill] sm:$0xff]  ;;  %v9557_v41 = vld [vmem:[#allocation17_spill] sm:$0xff] }
 0x397   :  { %2191 = vmatpush1.msra.mxu0 %v9547_v22  ;;  %2262 = vmatpush1.msra.mxu1 %v9548_v51  ;;  %v9558_v22 = vld [vmem:[#allocation18_spill] sm:$0xff]  ;;  %v9559_v51 = vld [vmem:[#allocation19_spill] sm:$0xff] }
 0x398   :  { %2192 = vmatprep.subr.mxu0 %v9549_v23  ;;  %2263 = vmatprep.subr.mxu1 %v9550_v62  ;;  %v9560_v23 = vld [vmem:[#allocation20_spill] sm:$0xff]  ;;  %v9561_v62 = vld [vmem:[#allocation21_spill] sm:$0xff] }
 0x399   :  { %2193 = vmatpush1.msra.mxu0 %v9551_v9  ;;  %2264 = vmatpush1.msra.mxu1 %v9552_v2  ;;  %v9562_v9 = vld [vmem:[#allocation22_spill] sm:$0xff]  ;;  %v9563_v2 = vld [vmem:[#allocation23_spill] sm:$0xff] }
 0x39a   :  { %2194 = vmatprep.subr.mxu0 %v9553_v7  ;;  %2265 = vmatprep.subr.mxu1 %v9554_v27  ;;  %v9564_v7 = vld [vmem:[#allocation94_spill] sm:$0xff]  ;;  %v9565_v27 = vld [vmem:[#allocation96_spill] sm:$0xff] }
 0x39b   :  { %2195 = vmatpush1.msra.mxu0 %v9555_v46  ;;  %2266 = vmatpush1.msra.mxu1 %v9556_v14  ;;  %v9566_v46 = vld [vmem:[#allocation46_spill] sm:$0xff]  ;;  %v9567_v14 = vld [vmem:[#allocation47_spill] sm:$0xff] }
 0x39c   :  { %2196 = vmatprep.subr.mxu0 %v9557_v41  ;;  %2267 = vmatprep.subr.mxu1 %v9558_v22  ;;  %v9568_v41 = vld [vmem:[#allocation48_spill] sm:$0xff]  ;;  %v9569_v22 = vld [vmem:[#allocation49_spill] sm:$0xff] }
 0x39d   :  { %2197 = vmatpush1.msra.mxu0 %v9559_v51  ;;  %2268 = vmatpush1.msra.mxu1 %v9560_v23  ;;  %v9570_v51 = vld [vmem:[#allocation50_spill] sm:$0xff]  ;;  %v9571_v23 = vld [vmem:[#allocation51_spill] sm:$0xff] }
 0x39e   :  { %2198 = vmatprep.subr.mxu0 %v9561_v62  ;;  %2269 = vmatprep.subr.mxu1 %v9562_v9  ;;  %v9572_v9 = vld [vmem:[#allocation53_spill] sm:$0xff] }
 0x39f   :  { %2199 = vmatpush1.msra.mxu0 %v9563_v2  ;;  %2270 = vmatpush1.msra.mxu1 %v9564_v7  ;;  %v9573_v7 = vld [vmem:[#allocation57_spill] sm:$0xff] }
 0x3a0   :  { %2200 = vmatprep.subr.mxu0 %v9565_v27  ;;  %2271 = vmatprep.subr.mxu1 %v9566_v46  ;;  %v9574_v27 = vld [vmem:[#allocation58_spill] sm:$0xff] }
 0x3a1   :  { %2201 = vmatpush1.msra.mxu0 %v9567_v14  ;;  %2272 = vmatpush1.msra.mxu1 %v9568_v41 }
 0x3a2   :  { %2202 = vmatprep.subr.mxu0 %v9569_v22  ;;  %2273 = vmatprep.subr.mxu1 %v9570_v51 }
 0x3a3   :  { %2203 = vmatpush1.msra.mxu0 %v9571_v23  ;;  %2236 = vmatprep.mubr.f32.mxu0 %v9219_v59 }
 0x3a4   :  { %2274 = vmatpush1.msra.mxu1 %v9572_v9  ;;  %2307 = vmatprep.mubr.f32.mxu1 %v9219_v59 }
 0x3a5   :  { %2318 = vmatprep.subr.mxu0 %v9573_v7  ;;  %2389 = vmatprep.subr.mxu1 %v9574_v27 }
 0x41e   :  { %v1861_v46 = vpop.f32.mrf.mxu0  ;;  %v1932_v2 = vpop.f32.mrf.mxu1 }
 0x41f   :  { %v1941_v14 = vrot.slane %v1861_v46, 2  ;;  %v1943_v7 = vrot.slane %v1932_v2, 2 }
 0x420   :  { %v1863_v41 = vpop.f32.mrf.mxu0  ;;  %v1934_v21 = vpop.f32.mrf.mxu1 }
 0x421   :  { %v1949_v22 = vadd.f32 %v1941_v14, %v9395_v50  ;;  %v1942_v62 = vrot.slane %v1863_v41, 2  ;;  %v1944_v9 = vrot.slane %v1934_v21, 2  ;;  %v1951_v46 = vadd.f32 %v1943_v7, %v9396_v36 }
 0x423   :  { %v4063_v51 = vmul.f32 -1.442695, %v1949_v22  ;;  %v1950_v23 = vadd.f32 %v1942_v62, %v6040_v55  ;;  %v1952_v5 = vadd.f32 %v1944_v9, %v9575_v44 }
 0x425   :  { %4227 = vpow2.f32 %v4063_v51  ;;  %v4064_v56 = vmul.f32 -1.442695, %v1950_v23  ;;  %v4065_v40 = vmul.f32 -1.442695, %v1952_v5 }
 0x427   :  { %4229 = vpow2.f32 %v4064_v56  ;;  %v2122_v56 = vrot.slane %v6802_v4, 6 }
 0x428   :  { %4231 = vpow2.f32 %v4065_v40 }
 0x432   :  { %v4228_v27 = vpop.eup %4227 }
 0x433   :  { %v2105_v0 = vadd.f32 1.0, %v4228_v27 }
 0x434   :  { %v4230_v3 = vpop.eup %4229 }
 0x435   :  { %4233 = vrcp.f32 %v2105_v0  ;;  %v2111_v50 = vadd.f32 1.0, %v4230_v3  ;;  %v4232_v55 = vpop.eup %4231 }
 0x436   :  { %4235 = vtanh.f32 %v1951_v46  ;;  %v2118_v21 = vadd.f32 1.0, %v4232_v55 }
 0x437   :  { %4237 = vrcp.f32 %v2111_v50 }
 0x438   :  { %4239 = vrcp.f32 %v2118_v21 }
 0x442   :  { %v4234_v14 = vpop.eup %4233 }
 0x443   :  { %v4236_v41 = vpop.eup %4235 }
 0x444   :  { %v2022_v22 = vpop.f32.mrf.mxu0  ;;  %v4238_v44 = vpop.eup %4237  ;;  %v2125_v51 = vmul.f32 %v4236_v41, %v4234_v14 }
 0x445   :  { %v2098_v5 = vadd.f32 %v2022_v22, %v6050_v15  ;;  %v2124_v23 = vmul.f32 %v4238_v44, %v2122_v56  ;;  %v2093_v3 = vpop.f32.mrf.mxu1  ;;  %v4240_v15 = vpop.eup %4239  ;;  %v9589_v44 = vld [vmem:[#allocation82_spill] sm:$0xff] }
 0x446   :  { %v2024_v36 = vpop.f32.mrf.mxu0  ;;  %v2100_v46 = vadd.f32 %v2093_v3, %v6063_v16  ;;  %v9596_v3 = vld [vmem:[#allocation29_spill] sm:$0xff] }
 0x447   :  { %v4066_v27 = vmul.f32 -1.442695, %v2098_v5  ;;  %v2099_v40 = vadd.f32 %v2024_v36, %v6052_v25  ;;  %v7179_v0 = vadd.f32 %v2125_v51, %v2124_v23  ;;  %v2095_v4 = vpop.f32.mrf.mxu1  ;;  %v9590_v5 = vld [vmem:[#allocation83_spill] sm:$0xff]  ;;  %v9591_v51 = vld [vmem:[#allocation24_spill] sm:$0xff]  ;;  %v9592_v23 = vld [vmem:[#allocation25_spill] sm:$0xff] }
 0x448   :  { %v2101_v9 = vadd.f32 %v2095_v4, %v6059_v24  ;;  %v9593_v36 = vld [vmem:[#allocation26_spill] sm:$0xff]  ;;  %v9598_v4 = vld [vmem:[#allocation31_spill] sm:$0xff] }
 0x449   :  { %4241 = vpow2.f32 %v4066_v27  ;;  %v4067_v62 = vmul.f32 -1.442695, %v2099_v40  ;;  %v9594_v27 = vld [vmem:[#allocation27_spill] sm:$0xff]  ;;  %v9595_v40 = vld [vmem:[#allocation28_spill] sm:$0xff] }
 0x44a   :  { %4243 = vtanh.f32 %v7179_v0  ;;  %v4068_v2 = vmul.f32 -1.442695, %v2101_v9  ;;  %v9599_v9 = vld [vmem:[#allocation32_spill] sm:$0xff] }
 0x44b   :  { %4245 = vpow2.f32 %v4067_v62  ;;  %v9597_v62 = vld [vmem:[#allocation30_spill] sm:$0xff] }
 0x44c   :  { %4247 = vpow2.f32 %v4068_v2  ;;  %v9600_v2 = vld [vmem:[#allocation33_spill] sm:$0xff] }
 0x456   :  { %v4242_v7 = vpop.eup %4241 }
 0x457   :  { %v4244_v50 = vpop.eup %4243  ;;  %v2132_v55 = vadd.f32 1.0, %v4242_v7  ;;  %v9602_v7 = vld [vmem:[#allocation35_spill] sm:$0xff] }
 0x458   :  { %v4246_v25 = vpop.eup %4245  ;;  %v2128_v14 = vmul.f32 %v4244_v50, %v4240_v15  ;;  %v9601_v15 = vld [vmem:[#allocation34_spill] sm:$0xff]  ;;  %v9604_v50 = vld [vmem:[#allocation37_spill] sm:$0xff] }
 0x459   :  { %4249 = vrcp.f32 %v2132_v55  ;;  %v2138_v41 = vadd.f32 1.0, %v4246_v25  ;;  %v4248_v16 = vpop.eup %4247  ;;  %v9605_v55 = vld [vmem:[#allocation40_spill] sm:$0xff]  ;;  %v9606_v25 = vld [vmem:[#allocation41_spill] sm:$0xff] }
 0x45a   :  { %4251 = vtanh.f32 %v2100_v46  ;;  %v2156_v56 = vmul.f32 %v6323_v45, %v2128_v14  ;;  %v2170_v21 = vrot.slane %v2128_v14, 6  ;;  %v9603_v46 = vld [vmem:[#allocation36_spill] sm:$0xff]  ;;  %v9607_v14 = vld [vmem:[#allocation42_spill] sm:$0xff] }
 0x45b   :  { %4253 = vrcp.f32 %v2138_v41 }
 0x45c   :  { %v2158_v22 = vrot.slane %v2156_v56, 6  ;;  %2237 = vmatmul.mubr.f32.vlgmr.msra.gmra.mxu0 %v2170_v21  ;;  %2308 = vmatmul.mubr.f32.vlgmr.msra.gmra.mxu1 %v2170_v21  ;;  %v9608_v56 = vld [vmem:[#allocation43_spill] sm:$0xff]  ;;  %v9609_v21 = vld [vmem:[#allocation97_spill] sm:$0xff] }
 0x45d   :  { %2319 = vmatpush1.msra.mxu0 %v6331_v52  ;;  %2390 = vmatpush1.msra.mxu1 %v6337_v54  ;;  %v2149_v54 = vrot.slane %v6915_v17, 2  ;;  %v9588_v17 = vld [vmem:[#allocation81_spill] sm:$0xff] }
 0x45e   :  { %v7188_v24 = vadd.f32 %v2158_v22, %v6812_v26  ;;  %2320 = vmatprep.subr.mxu0 %v6345_v28  ;;  %2391 = vmatprep.subr.mxu1 %v6351_v29  ;;  %v2145_v29 = vadd.f32 1.0, %v4248_v16  ;;  %v9583_v26 = vld [vmem:[#allocation66_spill] sm:$0xff] }
 0x45f   :  { %2321 = vmatpush1.msra.mxu0 %v6357_v30  ;;  %2392 = vmatpush1.msra.mxu1 %v6363_v31  ;;  %v9576_v30 = vld [vmem:[#allocation59_spill] sm:$0xff]  ;;  %v9577_v31 = vld [vmem:[#allocation60_spill] sm:$0xff]  ;;  %v9610_v16 = vld [vmem:[#allocation98_spill] sm:$0xff] }
 0x460   :  { %2322 = vmatprep.subr.mxu0 %v6369_v58  ;;  %2393 = vmatprep.subr.mxu1 %v6375_v32  ;;  %4255 = vrcp.f32 %v2145_v29  ;;  %v7260_v29 = vld [vmem:[%s8707_s3 + $0x1e8] sm:$0xff] }
 0x461   :  { %2323 = vmatpush1.msra.mxu0 %v6381_v33  ;;  %2394 = vmatpush1.msra.mxu1 %v6387_v34  ;;  %v9578_v33 = vld [vmem:[#allocation61_spill] sm:$0xff]  ;;  %v9579_v34 = vld [vmem:[#allocation62_spill] sm:$0xff]  ;;  %9613 = vst [vmem:[#allocation38_spill] sm:$0xff] %v7260_v29 }
 0x462   :  { %2324 = vmatprep.subr.mxu0 %v6393_v35  ;;  %2395 = vmatprep.subr.mxu1 %v6399_v37  ;;  %v9580_v35 = vld [vmem:[#allocation63_spill] sm:$0xff] }
 0x463   :  { %2325 = vmatpush1.msra.mxu0 %v6405_v38  ;;  %2396 = vmatpush1.msra.mxu1 %v6411_v39  ;;  %v9581_v38 = vld [vmem:[#allocation64_spill] sm:$0xff]  ;;  %v9582_v39 = vld [vmem:[#allocation65_spill] sm:$0xff] }
 0x464   :  { %2326 = vmatprep.subr.mxu0 %v9485_v12  ;;  %2397 = vmatprep.subr.mxu1 %v9486_v53  ;;  %v9584_v12 = vld [vmem:[#allocation75_spill] sm:$0xff]  ;;  %v9585_v53 = vld [vmem:[#allocation78_spill] sm:$0xff] }
 0x465   :  { %2327 = vmatpush1.msra.mxu0 %v9487_v63  ;;  %2398 = vmatpush1.msra.mxu1 %v9488_v60  ;;  %v9586_v63 = vld [vmem:[#allocation79_spill] sm:$0xff]  ;;  %v9587_v60 = vld [vmem:[#allocation80_spill] sm:$0xff] }
 0x466   :  { %v4250_v45 = vpop.eup %4249  ;;  %2328 = vmatprep.subr.mxu0 %v6833_v19  ;;  %2399 = vmatprep.subr.mxu1 %v6839_v61 }
 0x467   :  { %v4252_v52 = vpop.eup %4251  ;;  %2329 = vmatpush1.msra.mxu0 %v6845_v10  ;;  %2400 = vmatpush1.msra.mxu1 %v6851_v49 }
 0x468   :  { %v4254_v28 = vpop.eup %4253  ;;  %2330 = vmatprep.subr.mxu0 %v9576_v30  ;;  %2401 = vmatprep.subr.mxu1 %v9577_v31  ;;  %v2152_v58 = vmul.f32 %v4252_v52, %v4250_v45  ;;  %v9611_v45 = vld [vmem:[#allocation99_spill] sm:$0xff]  ;;  %v9612_v52 = vld [vmem:[#allocation100_spill] sm:$0xff] }
 0x469   :  { %v2151_v32 = vmul.f32 %v4254_v28, %v2149_v54  ;;  %2331 = vmatpush1.msra.mxu0 %v9578_v33  ;;  %2402 = vmatpush1.msra.mxu1 %v6876_v48 }
 0x46a   :  { %2332 = vmatprep.subr.mxu0 %v9579_v34  ;;  %2403 = vmatprep.subr.mxu1 %v9580_v35 }
 0x46b   :  { %v7217_v37 = vadd.f32 %v2152_v58, %v2151_v32  ;;  %2333 = vmatpush1.msra.mxu0 %v6894_v13  ;;  %2404 = vmatpush1.msra.mxu1 %v9581_v38  ;;  %v7266_v58 = vld [vmem:[%s8707_s3 + $0x1f8] sm:$0xff] }
 0x46c   :  { %2334 = vmatprep.subr.mxu0 %v9582_v39  ;;  %2405 = vmatprep.subr.mxu1 %v9583_v26  ;;  %9614 = vst [vmem:[#allocation39_spill] sm:$0xff] %v7266_v58 }
 0x46d   :  { %2335 = vmatpush1.msra.mxu0 %v9584_v12  ;;  %2406 = vmatpush1.msra.mxu1 %v9585_v53  ;;  %4257 = vtanh.f32 %v7217_v37  ;;  %v4256_v41 = vpop.eup %4255 }
 0x46e   :  { %2336 = vmatprep.subr.mxu0 %v9586_v63  ;;  %2407 = vmatprep.subr.mxu1 %v9587_v60 }
 0x46f   :  { %2337 = vmatpush1.msra.mxu0 %v9588_v17  ;;  %2408 = vmatpush1.msra.mxu1 %v9589_v44 }
 0x470   :  { %2338 = vmatprep.subr.mxu0 %v9590_v5  ;;  %2409 = vmatprep.subr.mxu1 %v9591_v51 }
 0x471   :  { %2339 = vmatpush1.msra.mxu0 %v9592_v23  ;;  %2410 = vmatpush1.msra.mxu1 %v9593_v36 }
 0x472   :  { %2340 = vmatprep.subr.mxu0 %v9594_v27  ;;  %2411 = vmatprep.subr.mxu1 %v9595_v40 }
 0x473   :  { %2341 = vmatpush1.msra.mxu0 %v9596_v3  ;;  %2412 = vmatpush1.msra.mxu1 %v9597_v62 }
 0x474   :  { %2342 = vmatprep.subr.mxu0 %v9598_v4  ;;  %2413 = vmatprep.subr.mxu1 %v9599_v9 }
 0x475   :  { %2343 = vmatpush1.msra.mxu0 %v9600_v2  ;;  %2414 = vmatpush1.msra.mxu1 %v9601_v15 }
 0x476   :  { %2344 = vmatprep.subr.mxu0 %v9602_v7  ;;  %2415 = vmatprep.subr.mxu1 %v9603_v46 }
 0x477   :  { %2345 = vmatpush1.msra.mxu0 %v9604_v50  ;;  %2416 = vmatpush1.msra.mxu1 %v9605_v55 }
 0x478   :  { %2346 = vmatprep.subr.mxu0 %v9606_v25  ;;  %2417 = vmatprep.subr.mxu1 %v9607_v14 }
 0x479   :  { %2347 = vmatpush1.msra.mxu0 %v9608_v56  ;;  %2418 = vmatpush1.msra.mxu1 %v9609_v21 }
 0x47a   :  { %v4258_v22 = vpop.eup %4257  ;;  %2348 = vmatprep.subr.mxu0 %v9610_v16  ;;  %2419 = vmatprep.subr.mxu1 %v9611_v45 }
 0x47b   :  { %2349 = vmatpush1.msra.mxu0 %v9612_v52  ;;  %2382 = vmatprep.mubr.f32.mxu0 %v9219_v59  ;;  %v2155_v54 = vmul.f32 %v4258_v22, %v4256_v41  ;;  %v7278_v41 = vld [vmem:[%s8707_s3 + $0x1f0] sm:$0xff]  ;;  %v7284_v22 = vld [vmem:[%s8707_s3 + $0x1c8] sm:$0xff] }
 0x47c   :  { %2420 = vmatpush1.msra.mxu1 %v7096_v11  ;;  %2453 = vmatprep.mubr.f32.mxu1 %v9219_v59  ;;  %9616 = vst [vmem:[#allocation45_spill] sm:$0xff] %v7278_v41  ;;  %9617 = vst [vmem:[#allocation52_spill] sm:$0xff] %v7284_v22  ;;  %v9676_v11 = vld [vmem:[#allocation88_spill] sm:$0xff] }
 0x47d   :  { %v2161_v28 = vmul.f32 %v6493_v8, %v2155_v54  ;;  %2383 = vmatmul.mubr.f32.vlgmr.msra.gmra.mxu0 %v2155_v54  ;;  %2454 = vmatmul.mubr.f32.vlgmr.msra.gmra.mxu1 %v2155_v54  ;;  %v7272_v8 = vld [vmem:[%s8707_s3 + $0x1e0] sm:$0xff]  ;;  %v7290_v54 = vld [vmem:[%s8707_s3 + $0x1d8] sm:$0xff] }
 0x47e   :  { %2535 = vmatprep.subr.mxu0 %v7260_v29  ;;  %2606 = vmatprep.subr.mxu1 %v7266_v58  ;;  %9615 = vst [vmem:[#allocation44_spill] sm:$0xff] %v7272_v8  ;;  %9618 = vst [vmem:[#allocation54_spill] sm:$0xff] %v7290_v54 }
 0x47f   :  { %v2163_v32 = vrot.slane %v2161_v28, 2  ;;  %2536 = vmatpush1.msra.mxu0 %v7272_v8  ;;  %2607 = vmatpush1.msra.mxu1 %v7278_v41  ;;  %v7299_v41 = vld [vmem:[%s8707_s3 + $0x1c0] sm:$0xff] }
 0x480   :  { %2537 = vmatprep.subr.mxu0 %v7284_v22  ;;  %2608 = vmatprep.subr.mxu1 %v7290_v54  ;;  %9620 = vst [vmem:[#allocation56_spill] sm:$0xff] %v7299_v41  ;;  %v7305_v22 = vld [vmem:[%s8707_s3 + $0x1d0] sm:$0xff]  ;;  %v7311_v54 = vld [vmem:[%s8707_s3 + $0x1a8] sm:$0xff] }
 0x481   :  { %v7294_v28 = vadd.f32 %v2163_v32, %v7106_v18  ;;  %2538 = vmatpush1.msra.mxu0 %v7299_v41  ;;  %9621 = vst [vmem:[#allocation67_spill] sm:$0xff] %v7305_v22  ;;  %2609 = vmatpush1.msra.mxu1 %v7305_v22  ;;  %9622 = vst [vmem:[#allocation95_spill] sm:$0xff] %v7311_v54  ;;  %v7317_v18 = vld [vmem:[%s8707_s3 + $0x1b8] sm:$0xff]  ;;  %v7323_v32 = vld [vmem:[%s8707_s3 + $0x1a0] sm:$0xff] }
 0x482   :  { %2539 = vmatprep.subr.mxu0 %v7311_v54  ;;  %9623 = vst [vmem:[#allocation59_spill] sm:$0xff] %v7317_v18  ;;  %2610 = vmatprep.subr.mxu1 %v7317_v18  ;;  %9624 = vst [vmem:[#allocation60_spill] sm:$0xff] %v7323_v32  ;;  %v7329_v22 = vld [vmem:[%s8707_s3 + $0x1b0] sm:$0xff]  ;;  %v7335_v54 = vld [vmem:[%s8707_s3 + $0x188] sm:$0xff] }
 0x483   :  { %9619 = vst [vmem:[#allocation55_spill] sm:$0xff] %v7294_v28  ;;  %2540 = vmatpush1.msra.mxu0 %v7323_v32  ;;  %9625 = vst [vmem:[#allocation61_spill] sm:$0xff] %v7329_v22  ;;  %2611 = vmatpush1.msra.mxu1 %v7329_v22  ;;  %v7341_v18 = vld [vmem:[%s8707_s3 + $0x198] sm:$0xff]  ;;  %v7347_v32 = vld [vmem:[%s8707_s3 + $0x180] sm:$0xff] }
 0x484   :  { %9626 = vst [vmem:[#allocation62_spill] sm:$0xff] %v7335_v54  ;;  %2541 = vmatprep.subr.mxu0 %v7335_v54  ;;  %9627 = vst [vmem:[#allocation63_spill] sm:$0xff] %v7341_v18  ;;  %2612 = vmatprep.subr.mxu1 %v7341_v18  ;;  %v7353_v22 = vld [vmem:[%s8707_s3 + $0x190] sm:$0xff]  ;;  %v7359_v54 = vld [vmem:[%s8707_s3 + $0x168] sm:$0xff] }
 0x485   :  { %9628 = vst [vmem:[#allocation64_spill] sm:$0xff] %v7347_v32  ;;  %2542 = vmatpush1.msra.mxu0 %v7347_v32  ;;  %9629 = vst [vmem:[#allocation65_spill] sm:$0xff] %v7353_v22  ;;  %2613 = vmatpush1.msra.mxu1 %v7353_v22  ;;  %v7365_v18 = vld [vmem:[%s8707_s3 + $0x178] sm:$0xff]  ;;  %v7371_v32 = vld [vmem:[%s8707_s3 + $0x160] sm:$0xff] }
 0x486   :  { %9630 = vst [vmem:[#allocation66_spill] sm:$0xff] %v7359_v54  ;;  %2543 = vmatprep.subr.mxu0 %v7359_v54  ;;  %9631 = vst [vmem:[#allocation75_spill] sm:$0xff] %v7365_v18  ;;  %2614 = vmatprep.subr.mxu1 %v7365_v18  ;;  %v7377_v22 = vld [vmem:[%s8707_s3 + $0x170] sm:$0xff]  ;;  %v9635_v18 = vld [vmem:[#allocation69_spill] sm:$0xff] }
 0x487   :  { %9632 = vst [vmem:[#allocation78_spill] sm:$0xff] %v7371_v32  ;;  %2544 = vmatpush1.msra.mxu0 %v7371_v32  ;;  %9633 = vst [vmem:[#allocation79_spill] sm:$0xff] %v7377_v22  ;;  %2615 = vmatpush1.msra.mxu1 %v7377_v22  ;;  %v9634_v32 = vld [vmem:[#allocation68_spill] sm:$0xff]  ;;  %v9636_v54 = vld [vmem:[#allocation70_spill] sm:$0xff] }
 0x488   :  { %2545 = vmatprep.subr.mxu0 %v9529_v6  ;;  %2616 = vmatprep.subr.mxu1 %v9530_v57  ;;  %v9637_v22 = vld [vmem:[#allocation71_spill] sm:$0xff]  ;;  %v9638_v6 = vld [vmem:[#allocation72_spill] sm:$0xff]  ;;  %v9639_v57 = vld [vmem:[#allocation73_spill] sm:$0xff] }
 0x489   :  { %2546 = vmatpush1.msra.mxu0 %v9531_v1  ;;  %2617 = vmatpush1.msra.mxu1 %v9532_v20  ;;  %v9640_v1 = vld [vmem:[#allocation74_spill] sm:$0xff]  ;;  %v9641_v20 = vld [vmem:[#allocation76_spill] sm:$0xff]  ;;  %v9675_v28 = vld [vmem:[#allocation89_spill] sm:$0xff] }
 0x48a   :  { %2547 = vmatprep.subr.mxu0 %v9533_v47  ;;  %2618 = vmatprep.subr.mxu1 %v9534_v42  ;;  %v9642_v47 = vld [vmem:[#allocation77_spill] sm:$0xff] }
 0x48b   :  { %2548 = vmatpush1.msra.mxu0 %v9535_v43  ;;  %2619 = vmatpush1.msra.mxu1 %v9634_v32  ;;  %v9643_v42 = vld [vmem:[#allocation5_spill] sm:$0xff]  ;;  %v9644_v43 = vld [vmem:[#allocation6_spill] sm:$0xff]  ;;  %v9645_v32 = vld [vmem:[#allocation7_spill] sm:$0xff] }
 0x48c   :  { %2549 = vmatprep.subr.mxu0 %v9635_v18  ;;  %2620 = vmatprep.subr.mxu1 %v9636_v54  ;;  %v9646_v18 = vld [vmem:[#allocation8_spill] sm:$0xff]  ;;  %v9647_v54 = vld [vmem:[#allocation9_spill] sm:$0xff] }
 0x48d   :  { %2550 = vmatpush1.msra.mxu0 %v9637_v22  ;;  %2621 = vmatpush1.msra.mxu1 %v9638_v6  ;;  %v9648_v22 = vld [vmem:[#allocation10_spill] sm:$0xff]  ;;  %v9649_v6 = vld [vmem:[#allocation11_spill] sm:$0xff] }
 0x48e   :  { %2551 = vmatprep.subr.mxu0 %v9639_v57  ;;  %2622 = vmatprep.subr.mxu1 %v9640_v1  ;;  %v9650_v57 = vld [vmem:[#allocation12_spill] sm:$0xff]  ;;  %v9651_v1 = vld [vmem:[#allocation13_spill] sm:$0xff] }
 0x48f   :  { %2552 = vmatpush1.msra.mxu0 %v9641_v20  ;;  %2623 = vmatpush1.msra.mxu1 %v9642_v47  ;;  %v9652_v20 = vld [vmem:[#allocation14_spill] sm:$0xff]  ;;  %v9653_v47 = vld [vmem:[#allocation15_spill] sm:$0xff] }
 0x490   :  { %2553 = vmatprep.subr.mxu0 %v9643_v42  ;;  %2624 = vmatprep.subr.mxu1 %v9644_v43  ;;  %v9654_v42 = vld [vmem:[#allocation16_spill] sm:$0xff]  ;;  %v9655_v43 = vld [vmem:[#allocation17_spill] sm:$0xff] }
 0x491   :  { %2554 = vmatpush1.msra.mxu0 %v9645_v32  ;;  %2625 = vmatpush1.msra.mxu1 %v9646_v18  ;;  %v9656_v32 = vld [vmem:[#allocation18_spill] sm:$0xff]  ;;  %v9657_v18 = vld [vmem:[#allocation19_spill] sm:$0xff] }
 0x492   :  { %2555 = vmatprep.subr.mxu0 %v9647_v54  ;;  %2626 = vmatprep.subr.mxu1 %v9648_v22  ;;  %v9658_v54 = vld [vmem:[#allocation20_spill] sm:$0xff]  ;;  %v9659_v22 = vld [vmem:[#allocation21_spill] sm:$0xff] }
 0x493   :  { %2556 = vmatpush1.msra.mxu0 %v9649_v6  ;;  %2627 = vmatpush1.msra.mxu1 %v9650_v57  ;;  %v9660_v6 = vld [vmem:[#allocation22_spill] sm:$0xff]  ;;  %v9661_v57 = vld [vmem:[#allocation23_spill] sm:$0xff] }
 0x494   :  { %2557 = vmatprep.subr.mxu0 %v9651_v1  ;;  %2628 = vmatprep.subr.mxu1 %v9652_v20  ;;  %v9662_v1 = vld [vmem:[#allocation94_spill] sm:$0xff]  ;;  %v9663_v20 = vld [vmem:[#allocation96_spill] sm:$0xff] }
 0x495   :  { %2558 = vmatpush1.msra.mxu0 %v9653_v47  ;;  %2629 = vmatpush1.msra.mxu1 %v9654_v42  ;;  %v9664_v47 = vld [vmem:[#allocation46_spill] sm:$0xff]  ;;  %v9665_v42 = vld [vmem:[#allocation47_spill] sm:$0xff] }
 0x496   :  { %2559 = vmatprep.subr.mxu0 %v9655_v43  ;;  %2630 = vmatprep.subr.mxu1 %v9656_v32  ;;  %v9666_v43 = vld [vmem:[#allocation48_spill] sm:$0xff]  ;;  %v9667_v32 = vld [vmem:[#allocation49_spill] sm:$0xff] }
 0x497   :  { %2560 = vmatpush1.msra.mxu0 %v9657_v18  ;;  %2631 = vmatpush1.msra.mxu1 %v9658_v54  ;;  %v9668_v18 = vld [vmem:[#allocation50_spill] sm:$0xff]  ;;  %v9669_v54 = vld [vmem:[#allocation51_spill] sm:$0xff] }
 0x498   :  { %2561 = vmatprep.subr.mxu0 %v9659_v22  ;;  %2632 = vmatprep.subr.mxu1 %v9660_v6  ;;  %v9670_v22 = vld [vmem:[#allocation53_spill] sm:$0xff] }
 0x499   :  { %2562 = vmatpush1.msra.mxu0 %v9661_v57  ;;  %2633 = vmatpush1.msra.mxu1 %v9662_v1  ;;  %v9671_v6 = vld [vmem:[#allocation57_spill] sm:$0xff]  ;;  %v9672_v57 = vld [vmem:[#allocation58_spill] sm:$0xff] }
 0x49a   :  { %2563 = vmatprep.subr.mxu0 %v9663_v20  ;;  %2634 = vmatprep.subr.mxu1 %v9664_v47  ;;  %v9673_v20 = vld [vmem:[#allocation86_spill] sm:$0xff] }
 0x49b   :  { %2564 = vmatpush1.msra.mxu0 %v9665_v42  ;;  %2635 = vmatpush1.msra.mxu1 %v9666_v43 }
 0x49c   :  { %2565 = vmatprep.subr.mxu0 %v9667_v32  ;;  %2636 = vmatprep.subr.mxu1 %v9668_v18  ;;  %v9674_v32 = vld [vmem:[#allocation87_spill] sm:$0xff] }
 0x49d   :  { %2566 = vmatpush1.msra.mxu0 %v9669_v54  ;;  %2599 = vmatprep.mubr.f32.mxu0 %v9219_v59 }
 0x49e   :  { %2637 = vmatpush1.msra.mxu1 %v9670_v22  ;;  %2670 = vmatprep.mubr.f32.mxu1 %v9219_v59 }
 0x49f   :  { %2696 = vmatprep.subr.mxu0 %v9671_v6  ;;  %2767 = vmatprep.subr.mxu1 %v9672_v57 }
 0x51c   :  { %v2238_v1 = vpop.f32.mrf.mxu0  ;;  %v2309_v18 = vpop.f32.mrf.mxu1 }
 0x51d   :  { %v2314_v47 = vadd.f32 %v2238_v1, %v9673_v20  ;;  %v2316_v6 = vadd.f32 %v2309_v18, %v9676_v11 }
 0x51e   :  { %v2240_v42 = vpop.f32.mrf.mxu0  ;;  %v2311_v8 = vpop.f32.mrf.mxu1 }
 0x51f   :  { %v4069_v43 = vmul.f32 -1.442695, %v2314_v47  ;;  %v2315_v41 = vadd.f32 %v2240_v42, %v9674_v32  ;;  %v2317_v22 = vadd.f32 %v2311_v8, %v9675_v28  ;;  %v9677_v28 = vld [vmem:[#allocation90_spill] sm:$0xff] }
 0x521   :  { %4259 = vpow2.f32 %v4069_v43  ;;  %v4070_v54 = vmul.f32 -1.442695, %v2315_v41  ;;  %v4071_v58 = vmul.f32 -1.442695, %v2317_v22 }
 0x523   :  { %4261 = vpow2.f32 %v4070_v54  ;;  %v2496_v54 = vrot.slane %v7179_v0, 6 }
 0x524   :  { %4263 = vpow2.f32 %v4071_v58 }
 0x52e   :  { %v4260_v29 = vpop.eup %4259 }
 0x52f   :  { %v2479_v59 = vadd.f32 1.0, %v4260_v29 }
 0x530   :  { %v4262_v57 = vpop.eup %4261 }
 0x531   :  { %4265 = vrcp.f32 %v2479_v59  ;;  %v2485_v1 = vadd.f32 1.0, %v4262_v57  ;;  %v4264_v47 = vpop.eup %4263  ;;  %v9678_v57 = vld [vmem:[#allocation91_spill] sm:$0xff] }
 0x532   :  { %4267 = vtanh.f32 %v2316_v6  ;;  %v2492_v20 = vadd.f32 1.0, %v4264_v47  ;;  %v9679_v47 = vld [vmem:[#allocation93_spill] sm:$0xff] }
 0x533   :  { %4269 = vrcp.f32 %v2485_v1 }
 0x534   :  { %4271 = vrcp.f32 %v2492_v20 }
 0x53d   :  { %v2384_v42 = vpop.f32.mrf.mxu0  ;;  %v2455_v18 = vpop.f32.mrf.mxu1 }
 0x53e   :  { %v4266_v32 = vpop.eup %4265  ;;  %v2464_v43 = vrot.slane %v2384_v42, 2 }
 0x53f   :  { %v4268_v41 = vpop.eup %4267  ;;  %v2386_v8 = vpop.f32.mrf.mxu0 }
 0x540   :  { %v4270_v22 = vpop.eup %4269  ;;  %v2472_v52 = vadd.f32 %v2464_v43, %v9677_v28  ;;  %v2465_v29 = vrot.slane %v2386_v8, 2  ;;  %v2499_v58 = vmul.f32 %v4268_v41, %v4266_v32  ;;  %v2457_v45 = vpop.f32.mrf.mxu1  ;;  %v2466_v43 = vrot.slane %v2455_v18, 2  ;;  %v9680_v41 = vld [vmem:[#allocation92_spill] sm:$0xff] }
 0x541   :  { %v2498_v11 = vmul.f32 %v4270_v22, %v2496_v54  ;;  %v2467_v0 = vrot.slane %v2457_v45, 2  ;;  %v4272_v8 = vpop.eup %4271  ;;  %v7443_v45 = vld [vmem:[%s8705_s1 + $0x8] sm:$0xff] }
 0x542   :  { %v4072_v59 = vmul.f32 -1.442695, %v2472_v52  ;;  %v2473_v6 = vadd.f32 %v2465_v29, %v9678_v57  ;;  %v2474_v52 = vadd.f32 %v2466_v43, %v9680_v41  ;;  %v7494_v43 = vld [vmem:[%s8710_s6 + $0x1b8] sm:$0xff] }
 0x543   :  { %v7435_v1 = vadd.f32 %v2499_v58, %v2498_v11  ;;  %v2475_v16 = vadd.f32 %v2467_v0, %v9679_v47  ;;  %v7488_v0 = vld [vmem:[%s8710_s6 + $0x1a8] sm:$0xff] }
 0x544   :  { %4273 = vpow2.f32 %v4072_v59  ;;  %v4073_v42 = vmul.f32 -1.442695, %v2473_v6  ;;  %v7464_v59 = vld [vmem:[%s8710_s6 + $0x1c8] sm:$0xff]  ;;  %v7470_v6 = vld [vmem:[%s8710_s6 + $0x1d8] sm:$0xff] }
 0x545   :  { %4275 = vtanh.f32 %v7435_v1  ;;  %v4074_v28 = vmul.f32 -1.442695, %v2475_v16  ;;  %v7449_v16 = vld [vmem:[%s8710_s6 + $0x1e0] sm:$0xff] }
 0x546   :  { %4277 = vpow2.f32 %v4073_v42  ;;  %v7476_v42 = vld [vmem:[%s8710_s6 + $0x1c0] sm:$0xff] }
 0x547   :  { %4279 = vpow2.f32 %v4074_v28  ;;  %v7455_v28 = vld [vmem:[%s8710_s6 + $0x1f0] sm:$0xff] }
 0x551   :  { %v4274_v32 = vpop.eup %4273 }
 0x552   :  { %v4276_v54 = vpop.eup %4275  ;;  %v2506_v22 = vadd.f32 1.0, %v4274_v32  ;;  %v7506_v32 = vld [vmem:[%s8710_s6 + $0x1b0] sm:$0xff] }
 0x553   :  { %v4278_v11 = vpop.eup %4277  ;;  %v2502_v20 = vmul.f32 %v4276_v54, %v4272_v8  ;;  %v7500_v8 = vld [vmem:[%s8710_s6 + $0x1a0] sm:$0xff]  ;;  %v7518_v54 = vld [vmem:[%s8710_s6 + $0x198] sm:$0xff] }
 0x554   :  { %4281 = vrcp.f32 %v2506_v22  ;;  %v2512_v29 = vadd.f32 1.0, %v4278_v11  ;;  %v7524_v22 = vld [vmem:[%s8710_s6 + $0x180] sm:$0xff]  ;;  %v7530_v11 = vld [vmem:[%s8710_s6 + $0x190] sm:$0xff] }
 0x555   :  { %4283 = vtanh.f32 %v2474_v52  ;;  %v2530_v18 = vmul.f32 %v7443_v45, %v2502_v20  ;;  %2600 = vmatmul.mubr.f32.vlgmr.msra.gmra.mxu0 %v2502_v20  ;;  %2671 = vmatmul.mubr.f32.vlgmr.msra.gmra.mxu1 %v2502_v20  ;;  %v7512_v52 = vld [vmem:[%s8710_s6 + $0x188] sm:$0xff]  ;;  %9681 = vst [vmem:[#allocation80_spill] sm:$0xff] %v7524_v22  ;;  %9682 = vst [vmem:[#allocation81_spill] sm:$0xff] %v7530_v11 }
 0x556   :  { %4285 = vrcp.f32 %v2512_v29  ;;  %2697 = vmatpush1.msra.mxu0 %v7449_v16  ;;  %2768 = vmatpush1.msra.mxu1 %v7455_v28  ;;  %v7536_v20 = vld [vmem:[%s8710_s6 + $0x168] sm:$0xff]  ;;  %v7542_v29 = vld [vmem:[%s8710_s6 + $0x178] sm:$0xff] }
 0x557   :  { %v7459_v58 = vadd.f32 %v2530_v18, %v7188_v24  ;;  %2698 = vmatprep.subr.mxu0 %v7464_v59  ;;  %2769 = vmatprep.subr.mxu1 %v7470_v6  ;;  %v7482_v24 = vld [vmem:[%s8710_s6 + $0x1d0] sm:$0xff]  ;;  %9683 = vst [vmem:[#allocation82_spill] sm:$0xff] %v7536_v20  ;;  %9684 = vst [vmem:[#allocation83_spill] sm:$0xff] %v7542_v29  ;;  %v7548_v18 = vld [vmem:[%s8710_s6 + $0x160] sm:$0xff] }
 0x558   :  { %2699 = vmatpush1.msra.mxu0 %v7476_v42  ;;  %2770 = vmatpush1.msra.mxu1 %v7482_v24  ;;  %9685 = vst [vmem:[#allocation24_spill] sm:$0xff] %v7548_v18 }
 0x559   :  { %2700 = vmatprep.subr.mxu0 %v7488_v0  ;;  %2771 = vmatprep.subr.mxu1 %v7494_v43 }
 0x55a   :  { %2701 = vmatpush1.msra.mxu0 %v7500_v8  ;;  %2772 = vmatpush1.msra.mxu1 %v7506_v32 }
 0x55b   :  { %2702 = vmatprep.subr.mxu0 %v7512_v52  ;;  %2773 = vmatprep.subr.mxu1 %v7518_v54 }
 0x55c   :  { %2703 = vmatpush1.msra.mxu0 %v7524_v22  ;;  %2774 = vmatpush1.msra.mxu1 %v7530_v11  ;;  %v7554_v11 = vld [vmem:[%s8710_s6 + $0x170] sm:$0xff]  ;;  %v2523_v22 = vrot.slane %v7217_v37, 2 }
 0x55d   :  { %2704 = vmatprep.subr.mxu0 %v7536_v20  ;;  %2775 = vmatprep.subr.mxu1 %v7542_v29  ;;  %9686 = vst [vmem:[#allocation25_spill] sm:$0xff] %v7554_v11  ;;  %v4280_v20 = vpop.eup %4279 }
 0x55e   :  { %2705 = vmatpush1.msra.mxu0 %v7548_v18  ;;  %2776 = vmatpush1.msra.mxu1 %v7554_v11  ;;  %v2519_v11 = vadd.f32 1.0, %v4280_v20  ;;  %v7675_v20 = vld [vmem:[%s8707_s3 + $0x120] sm:$0xff] }
 0x55f   :  { %2706 = vmatprep.subr.mxu0 %v6833_v19  ;;  %2777 = vmatprep.subr.mxu1 %v6839_v61  ;;  %9718 = vst [vmem:[#allocation31_spill] sm:$0xff] %v7675_v20 }
 0x560   :  { %2707 = vmatpush1.msra.mxu0 %v6845_v10  ;;  %2778 = vmatpush1.msra.mxu1 %v6851_v49  ;;  %4287 = vrcp.f32 %v2519_v11  ;;  %v7669_v11 = vld [vmem:[%s8707_s3 + $0x138] sm:$0xff] }
 0x561   :  { %v4282_v29 = vpop.eup %4281  ;;  %2708 = vmatprep.subr.mxu0 %v9576_v30  ;;  %2779 = vmatprep.subr.mxu1 %v9577_v31  ;;  %v9689_v31 = vld [vmem:[#allocation100_spill] sm:$0xff]  ;;  %9717 = vst [vmem:[#allocation30_spill] sm:$0xff] %v7669_v11 }
 0x562   :  { %v4284_v18 = vpop.eup %4283  ;;  %2709 = vmatpush1.msra.mxu0 %v9578_v33  ;;  %2780 = vmatpush1.msra.mxu1 %v6876_v48  ;;  %v9687_v48 = vld [vmem:[#allocation98_spill] sm:$0xff]  ;;  %v9690_v33 = vmov 0.0  }
 0x563   :  { %v4286_v19 = vpop.eup %4285  ;;  %2710 = vmatprep.subr.mxu0 %v9579_v34  ;;  %2781 = vmatprep.subr.mxu1 %v9580_v35  ;;  %v2526_v61 = vmul.f32 %v4284_v18, %v4282_v29  ;;  %v9691_v35 = vld [vmem:[#allocation101_spill] sm:$0xff]  ;;  %v7681_v29 = vld [vmem:[%s8707_s3 + $0x130] sm:$0xff] }
 0x564   :  { %v2525_v10 = vmul.f32 %v4286_v19, %v2523_v22  ;;  %2711 = vmatpush1.msra.mxu0 %v6894_v13  ;;  %2782 = vmatpush1.msra.mxu1 %v9581_v38  ;;  %v9688_v13 = vld [vmem:[#allocation99_spill] sm:$0xff]  ;;  %v9692_v38 = vld [vmem:[#allocation38_spill] sm:$0xff]  ;;  %9719 = vst [vmem:[#allocation32_spill] sm:$0xff] %v7681_v29 }
 0x565   :  { %2712 = vmatprep.subr.mxu0 %v9582_v39  ;;  %2783 = vmatprep.subr.mxu1 %v9583_v26  ;;  %v9693_v39 = vld [vmem:[#allocation39_spill] sm:$0xff]  ;;  %v7612_v26 = vld [vmem:[%s8705_s1] sm:$0xff]  ;;  %v7663_v22 = vld [vmem:[%s8707_s3 + $0x128] sm:$0xff] }
 0x566   :  { %v7572_v49 = vadd.f32 %v2526_v61, %v2525_v10  ;;  %2713 = vmatpush1.msra.mxu0 %v9584_v12  ;;  %2784 = vmatpush1.msra.mxu1 %v9585_v53  ;;  %9716 = vst [vmem:[#allocation29_spill] sm:$0xff] %v7663_v22  ;;  %v7687_v18 = vld [vmem:[%s8707_s3 + $0x108] sm:$0xff]  ;;  %v7693_v19 = vld [vmem:[%s8707_s3 + $0x118] sm:$0xff]  ;;  %v7699_v61 = vld [vmem:[%s8707_s3 + $0x100] sm:$0xff] }
 0x567   :  { %2714 = vmatprep.subr.mxu0 %v9586_v63  ;;  %2785 = vmatprep.subr.mxu1 %v9587_v60  ;;  %v9694_v63 = vld [vmem:[#allocation55_spill] sm:$0xff]  ;;  %9720 = vst [vmem:[#allocation33_spill] sm:$0xff] %v7687_v18  ;;  %9721 = vst [vmem:[#allocation34_spill] sm:$0xff] %v7693_v19 }
 0x568   :  { %2715 = vmatpush1.msra.mxu0 %v9588_v17  ;;  %2786 = vmatpush1.msra.mxu1 %v9589_v44  ;;  %4289 = vtanh.f32 %v7572_v49  ;;  %v9695_v17 = vld [vmem:[#allocation44_spill] sm:$0xff]  ;;  %v9696_v44 = vld [vmem:[#allocation45_spill] sm:$0xff]  ;;  %9722 = vst [vmem:[#allocation35_spill] sm:$0xff] %v7699_v61  ;;  %v7705_v10 = vld [vmem:[%s8707_s3 + $0x110] sm:$0xff] }
 0x569   :  { %2716 = vmatprep.subr.mxu0 %v9590_v5  ;;  %2787 = vmatprep.subr.mxu1 %v9591_v51  ;;  %v9697_v5 = vld [vmem:[#allocation52_spill] sm:$0xff]  ;;  %v9698_v51 = vld [vmem:[#allocation54_spill] sm:$0xff]  ;;  %9723 = vst [vmem:[#allocation36_spill] sm:$0xff] %v7705_v10 }
 0x56a   :  { %2717 = vmatpush1.msra.mxu0 %v9592_v23  ;;  %2788 = vmatpush1.msra.mxu1 %v9593_v36  ;;  %v9699_v23 = vld [vmem:[#allocation56_spill] sm:$0xff]  ;;  %v9700_v36 = vld [vmem:[#allocation67_spill] sm:$0xff] }
 0x56b   :  { %2718 = vmatprep.subr.mxu0 %v9594_v27  ;;  %2789 = vmatprep.subr.mxu1 %v9595_v40  ;;  %v9701_v27 = vld [vmem:[#allocation95_spill] sm:$0xff] }
 0x56c   :  { %2719 = vmatpush1.msra.mxu0 %v9596_v3  ;;  %2790 = vmatpush1.msra.mxu1 %v9597_v62  ;;  %v9702_v40 = vld [vmem:[#allocation59_spill] sm:$0xff]  ;;  %v9703_v3 = vld [vmem:[#allocation60_spill] sm:$0xff]  ;;  %v9704_v62 = vld [vmem:[#allocation61_spill] sm:$0xff] }
 0x56d   :  { %2720 = vmatprep.subr.mxu0 %v9598_v4  ;;  %2791 = vmatprep.subr.mxu1 %v9599_v9  ;;  %v4288_v30 = vpop.eup %4287  ;;  %v9705_v4 = vld [vmem:[#allocation62_spill] sm:$0xff]  ;;  %v9706_v9 = vld [vmem:[#allocation63_spill] sm:$0xff] }
 0x56e   :  { %2721 = vmatpush1.msra.mxu0 %v9600_v2  ;;  %2792 = vmatpush1.msra.mxu1 %v9601_v15  ;;  %v9707_v2 = vld [vmem:[#allocation64_spill] sm:$0xff]  ;;  %v9708_v15 = vld [vmem:[#allocation65_spill] sm:$0xff] }
 0x56f   :  { %2722 = vmatprep.subr.mxu0 %v9602_v7  ;;  %2793 = vmatprep.subr.mxu1 %v9603_v46  ;;  %v9709_v7 = vld [vmem:[#allocation66_spill] sm:$0xff]  ;;  %v9710_v46 = vld [vmem:[#allocation75_spill] sm:$0xff] }
 0x570   :  { %2723 = vmatpush1.msra.mxu0 %v9604_v50  ;;  %2794 = vmatpush1.msra.mxu1 %v9605_v55  ;;  %v9711_v50 = vld [vmem:[#allocation78_spill] sm:$0xff]  ;;  %v9712_v55 = vld [vmem:[#allocation79_spill] sm:$0xff] }
 0x571   :  { %2724 = vmatprep.subr.mxu0 %v9606_v25  ;;  %2795 = vmatprep.subr.mxu1 %v9607_v14  ;;  %v7639_v25 = vld [vmem:[%s8707_s3 + $0x148] sm:$0xff]  ;;  %v7645_v14 = vld [vmem:[%s8707_s3 + $0x158] sm:$0xff] }
 0x572   :  { %2725 = vmatpush1.msra.mxu0 %v9608_v56  ;;  %2796 = vmatpush1.msra.mxu1 %v9609_v21  ;;  %9713 = vst [vmem:[#allocation26_spill] sm:$0xff] %v7645_v14  ;;  %v7651_v56 = vld [vmem:[%s8707_s3 + $0x140] sm:$0xff]  ;;  %v7657_v21 = vld [vmem:[%s8707_s3 + $0x150] sm:$0xff] }
 0x573   :  { %2726 = vmatprep.subr.mxu0 %v9687_v48  ;;  %2797 = vmatprep.subr.mxu1 %v9688_v13  ;;  %9714 = vst [vmem:[#allocation27_spill] sm:$0xff] %v7651_v56  ;;  %9715 = vst [vmem:[#allocation28_spill] sm:$0xff] %v7657_v21  ;;  %v7711_v48 = vld [vmem:[%s8707_s3 + $0xe8] sm:$0xff]  ;;  %v7717_v13 = vld [vmem:[%s8707_s3 + $0xf8] sm:$0xff] }
 0x574   :  { %2727 = vmatpush1.msra.mxu0 %v9689_v31  ;;  %2760 = vmatprep.mubr.f32.mxu0 %v9690_v33  ;;  %9724 = vst [vmem:[#allocation37_spill] sm:$0xff] %v7711_v48  ;;  %9725 = vst [vmem:[#allocation40_spill] sm:$0xff] %v7717_v13  ;;  %v7729_v31 = vld [vmem:[%s8707_s3 + $0xf0] sm:$0xff] }
 0x575   :  { %v4290_v34 = vpop.eup %4289  ;;  %2798 = vmatpush1.msra.mxu1 %v9691_v35  ;;  %2831 = vmatprep.mubr.f32.mxu1 %v9690_v33  ;;  %9727 = vst [vmem:[#allocation42_spill] sm:$0xff] %v7729_v31  ;;  %v7741_v35 = vld [vmem:[%s8707_s3 + $0xd8] sm:$0xff] }
 0x576   :  { %v2529_v37 = vmul.f32 %v4290_v34, %v4288_v30  ;;  %2925 = vmatprep.subr.mxu0 %v9692_v38  ;;  %2996 = vmatprep.subr.mxu1 %v9693_v39  ;;  %v7723_v30 = vld [vmem:[%s8707_s3 + $0xe0] sm:$0xff]  ;;  %v7735_v34 = vld [vmem:[%s8707_s3 + $0xc8] sm:$0xff]  ;;  %9729 = vst [vmem:[#allocation97_spill] sm:$0xff] %v7741_v35 }
 0x577   :  { %9726 = vst [vmem:[#allocation41_spill] sm:$0xff] %v7723_v30  ;;  %9728 = vst [vmem:[#allocation43_spill] sm:$0xff] %v7735_v34 }
 0x578   :  { %v2532_v12 = vmul.f32 %v7612_v26, %v2529_v37  ;;  %v2694_v53 = vrot.slane %v2529_v37, 6  ;;  %v7747_v37 = vld [vmem:[%s8707_s3 + $0xc0] sm:$0xff] }
 0x579   :  { %9730 = vst [vmem:[#allocation68_spill] sm:$0xff] %v7747_v37 }
 0x57a   :  { %v7616_v60 = vadd.f32 %v2532_v12, %v9694_v63  ;;  %2761 = vmatmul.mubr.f32.vlgmr.msra.gmra.mxu0 %v2694_v53  ;;  %2832 = vmatmul.mubr.f32.vlgmr.msra.gmra.mxu1 %v2694_v53  ;;  %v7753_v12 = vld [vmem:[%s8707_s3 + $0xd0] sm:$0xff]  ;;  %v7759_v53 = vld [vmem:[%s8707_s3 + $0xa8] sm:$0xff]  ;;  %v7765_v63 = vld [vmem:[%s8707_s3 + $0xb8] sm:$0xff] }
 0x57b   :  { %2926 = vmatpush1.msra.mxu0 %v9695_v17  ;;  %2997 = vmatpush1.msra.mxu1 %v9696_v44  ;;  %9731 = vst [vmem:[#allocation69_spill] sm:$0xff] %v7753_v12  ;;  %9732 = vst [vmem:[#allocation70_spill] sm:$0xff] %v7759_v53 }
 0x57c   :  { %2927 = vmatprep.subr.mxu0 %v9697_v5  ;;  %2998 = vmatprep.subr.mxu1 %v9698_v51  ;;  %9733 = vst [vmem:[#allocation71_spill] sm:$0xff] %v7765_v63 }
 0x57d   :  { %2928 = vmatpush1.msra.mxu0 %v9699_v23  ;;  %2999 = vmatpush1.msra.mxu1 %v9700_v36 }
 0x57e   :  { %2929 = vmatprep.subr.mxu0 %v9701_v27  ;;  %3000 = vmatprep.subr.mxu1 %v9702_v40 }
 0x57f   :  { %2930 = vmatpush1.msra.mxu0 %v9703_v3  ;;  %3001 = vmatpush1.msra.mxu1 %v9704_v62 }
 0x580   :  { %2931 = vmatprep.subr.mxu0 %v9705_v4  ;;  %3002 = vmatprep.subr.mxu1 %v9706_v9 }
 0x581   :  { %2932 = vmatpush1.msra.mxu0 %v9707_v2  ;;  %3003 = vmatpush1.msra.mxu1 %v9708_v15 }
 0x582   :  { %2933 = vmatprep.subr.mxu0 %v9709_v7  ;;  %3004 = vmatprep.subr.mxu1 %v9710_v46 }
 0x583   :  { %2934 = vmatpush1.msra.mxu0 %v9711_v50  ;;  %3005 = vmatpush1.msra.mxu1 %v9712_v55 }
 0x584   :  { %2935 = vmatprep.subr.mxu0 %v7639_v25  ;;  %3006 = vmatprep.subr.mxu1 %v7645_v14 }
 0x585   :  { %2936 = vmatpush1.msra.mxu0 %v7651_v56  ;;  %3007 = vmatpush1.msra.mxu1 %v7657_v21  ;;  %v9761_v21 = vld [vmem:[#allocation88_spill] sm:$0xff] }
 0x586   :  { %2937 = vmatprep.subr.mxu0 %v7663_v22  ;;  %3008 = vmatprep.subr.mxu1 %v7669_v11 }
 0x587   :  { %2938 = vmatpush1.msra.mxu0 %v7675_v20  ;;  %3009 = vmatpush1.msra.mxu1 %v7681_v29  ;;  %v9760_v29 = vld [vmem:[#allocation89_spill] sm:$0xff] }
 0x588   :  { %2939 = vmatprep.subr.mxu0 %v7687_v18  ;;  %3010 = vmatprep.subr.mxu1 %v7693_v19 }
 0x589   :  { %2940 = vmatpush1.msra.mxu0 %v7699_v61  ;;  %3011 = vmatpush1.msra.mxu1 %v7705_v10  ;;  %v9759_v10 = vld [vmem:[#allocation87_spill] sm:$0xff] }
 0x58a   :  { %2941 = vmatprep.subr.mxu0 %v7711_v48  ;;  %3012 = vmatprep.subr.mxu1 %v7717_v13 }
 0x58b   :  { %2942 = vmatpush1.msra.mxu0 %v7723_v30  ;;  %3013 = vmatpush1.msra.mxu1 %v7729_v31 }
 0x58c   :  { %2943 = vmatprep.subr.mxu0 %v7735_v34  ;;  %3014 = vmatprep.subr.mxu1 %v7741_v35 }
 0x58d   :  { %2944 = vmatpush1.msra.mxu0 %v7747_v37  ;;  %3015 = vmatpush1.msra.mxu1 %v7753_v12  ;;  %v7771_v37 = vld [vmem:[%s8707_s3 + $0xa0] sm:$0xff]  ;;  %v7777_v12 = vld [vmem:[%s8707_s3 + $0xb0] sm:$0xff] }
 0x58e   :  { %2945 = vmatprep.subr.mxu0 %v7759_v53  ;;  %3016 = vmatprep.subr.mxu1 %v7765_v63  ;;  %9734 = vst [vmem:[#allocation72_spill] sm:$0xff] %v7771_v37  ;;  %9735 = vst [vmem:[#allocation73_spill] sm:$0xff] %v7777_v12  ;;  %v7783_v53 = vld [vmem:[%s8707_s3 + $0x88] sm:$0xff]  ;;  %v7789_v63 = vld [vmem:[%s8707_s3 + $0x98] sm:$0xff] }
 0x58f   :  { %2946 = vmatpush1.msra.mxu0 %v7771_v37  ;;  %3017 = vmatpush1.msra.mxu1 %v7777_v12  ;;  %9736 = vst [vmem:[#allocation74_spill] sm:$0xff] %v7783_v53  ;;  %9737 = vst [vmem:[#allocation76_spill] sm:$0xff] %v7789_v63  ;;  %v7795_v37 = vld [vmem:[%s8707_s3 + $0x80] sm:$0xff]  ;;  %v7801_v12 = vld [vmem:[%s8707_s3 + $0x90] sm:$0xff] }
 0x590   :  { %2947 = vmatprep.subr.mxu0 %v7783_v53  ;;  %3018 = vmatprep.subr.mxu1 %v7789_v63  ;;  %9738 = vst [vmem:[#allocation77_spill] sm:$0xff] %v7795_v37  ;;  %9739 = vst [vmem:[#allocation5_spill] sm:$0xff] %v7801_v12  ;;  %v7807_v53 = vld [vmem:[%s8707_s3 + $0x68] sm:$0xff]  ;;  %v7813_v63 = vld [vmem:[%s8707_s3 + $0x78] sm:$0xff] }
 0x591   :  { %2948 = vmatpush1.msra.mxu0 %v7795_v37  ;;  %3019 = vmatpush1.msra.mxu1 %v7801_v12  ;;  %9740 = vst [vmem:[#allocation6_spill] sm:$0xff] %v7807_v53  ;;  %9741 = vst [vmem:[#allocation7_spill] sm:$0xff] %v7813_v63  ;;  %v7819_v37 = vld [vmem:[%s8707_s3 + $0x60] sm:$0xff]  ;;  %v7825_v12 = vld [vmem:[%s8707_s3 + $0x70] sm:$0xff] }
 0x592   :  { %2949 = vmatprep.subr.mxu0 %v7807_v53  ;;  %3020 = vmatprep.subr.mxu1 %v7813_v63  ;;  %9742 = vst [vmem:[#allocation8_spill] sm:$0xff] %v7819_v37  ;;  %9743 = vst [vmem:[#allocation9_spill] sm:$0xff] %v7825_v12  ;;  %v7831_v53 = vld [vmem:[%s8707_s3 + $0x48] sm:$0xff]  ;;  %v7837_v63 = vld [vmem:[%s8707_s3 + $0x58] sm:$0xff] }
 0x593   :  { %2950 = vmatpush1.msra.mxu0 %v7819_v37  ;;  %3021 = vmatpush1.msra.mxu1 %v7825_v12  ;;  %9744 = vst [vmem:[#allocation10_spill] sm:$0xff] %v7831_v53  ;;  %9745 = vst [vmem:[#allocation11_spill] sm:$0xff] %v7837_v63  ;;  %v7843_v37 = vld [vmem:[%s8707_s3 + $0x40] sm:$0xff]  ;;  %v7849_v12 = vld [vmem:[%s8707_s3 + $0x50] sm:$0xff] }
 0x594   :  { %2951 = vmatprep.subr.mxu0 %v7831_v53  ;;  %3022 = vmatprep.subr.mxu1 %v7837_v63  ;;  %9746 = vst [vmem:[#allocation12_spill] sm:$0xff] %v7843_v37  ;;  %9747 = vst [vmem:[#allocation13_spill] sm:$0xff] %v7849_v12  ;;  %v7855_v53 = vld [vmem:[%s8707_s3 + $0x28] sm:$0xff]  ;;  %v7861_v63 = vld [vmem:[%s8707_s3 + $0x38] sm:$0xff] }
 0x595   :  { %2952 = vmatpush1.msra.mxu0 %v7843_v37  ;;  %3023 = vmatpush1.msra.mxu1 %v7849_v12  ;;  %9748 = vst [vmem:[#allocation14_spill] sm:$0xff] %v7855_v53  ;;  %9749 = vst [vmem:[#allocation15_spill] sm:$0xff] %v7861_v63  ;;  %v7867_v37 = vld [vmem:[%s8707_s3 + $0x20] sm:$0xff]  ;;  %v7873_v12 = vld [vmem:[%s8707_s3 + $0x30] sm:$0xff] }
 0x596   :  { %2953 = vmatprep.subr.mxu0 %v7855_v53  ;;  %3024 = vmatprep.subr.mxu1 %v7861_v63  ;;  %9750 = vst [vmem:[#allocation16_spill] sm:$0xff] %v7867_v37  ;;  %9751 = vst [vmem:[#allocation17_spill] sm:$0xff] %v7873_v12  ;;  %v7879_v53 = vld [vmem:[%s8707_s3 + $0x8] sm:$0xff]  ;;  %v7885_v63 = vld [vmem:[%s8707_s3 + $0x18] sm:$0xff] }
 0x597   :  { %2954 = vmatpush1.msra.mxu0 %v7867_v37  ;;  %3025 = vmatpush1.msra.mxu1 %v7873_v12  ;;  %9752 = vst [vmem:[#allocation18_spill] sm:$0xff] %v7879_v53  ;;  %9753 = vst [vmem:[#allocation19_spill] sm:$0xff] %v7885_v63  ;;  %v7891_v37 = vld [vmem:[%s8707_s3] sm:$0xff] }
 0x598   :  { %2955 = vmatprep.subr.mxu0 %v7879_v53  ;;  %3026 = vmatprep.subr.mxu1 %v7885_v63  ;;  %9754 = vst [vmem:[#allocation20_spill] sm:$0xff] %v7891_v37  ;;  %v7898_v53 = vld [vmem:[%s8707_s3 + $0x10] sm:$0xff]  ;;  %v7905_v63 = vld [vmem:[%s8710_s6 + $0x1e8] sm:$0xff] }
 0x599   :  { %2956 = vmatpush1.msra.mxu0 %v7891_v37  ;;  %2989 = vmatprep.mubr.f32.mxu0 %v9690_v33  ;;  %9755 = vst [vmem:[#allocation21_spill] sm:$0xff] %v7898_v53  ;;  %9756 = vst [vmem:[#allocation22_spill] sm:$0xff] %v7905_v63  ;;  %v7911_v37 = vld [vmem:[%s8710_s6 + $0x1f8] sm:$0xff] }
 0x59a   :  { %3027 = vmatpush1.msra.mxu1 %v7898_v53  ;;  %3060 = vmatprep.mubr.f32.mxu1 %v9690_v33  ;;  %9757 = vst [vmem:[#allocation23_spill] sm:$0xff] %v7911_v37  ;;  %v9758_v53 = vld [vmem:[#allocation86_spill] sm:$0xff] }
 0x59b   :  { %3086 = vmatprep.subr.mxu0 %v7905_v63  ;;  %3157 = vmatprep.subr.mxu1 %v7911_v37 }
 0x615   :  { %v2601_v12 = vpop.f32.mrf.mxu0  ;;  %v2672_v30 = vpop.f32.mrf.mxu1 }
 0x616   :  { %v2681_v35 = vrot.slane %v2601_v12, 6  ;;  %v2683_v11 = vrot.slane %v2672_v30, 6 }
 0x617   :  { %v2603_v34 = vpop.f32.mrf.mxu0  ;;  %v2674_v63 = vpop.f32.mrf.mxu1 }
 0x618   :  { %v2689_v31 = vadd.f32 %v2681_v35, %v9758_v53  ;;  %v2682_v13 = vrot.slane %v2603_v34, 6  ;;  %v2684_v18 = vrot.slane %v2674_v63, 6  ;;  %v2691_v12 = vadd.f32 %v2683_v11, %v9761_v21  ;;  %v9762_v11 = vld [vmem:[#allocation90_spill] sm:$0xff] }
 0x61a   :  { %v4075_v48 = vmul.f32 -1.442695, %v2689_v31  ;;  %v2690_v61 = vadd.f32 %v2682_v13, %v9759_v10  ;;  %v2692_v20 = vadd.f32 %v2684_v18, %v9760_v29 }
 0x61c   :  { %4291 = vpow2.f32 %v4075_v48  ;;  %v4076_v19 = vmul.f32 -1.442695, %v2690_v61  ;;  %v4077_v22 = vmul.f32 -1.442695, %v2692_v20 }
 0x61e   :  { %4293 = vpow2.f32 %v4076_v19  ;;  %v2874_v19 = vrot.slane %v7435_v1, 6 }
 0x61f   :  { %4295 = vpow2.f32 %v4077_v22 }
 0x629   :  { %v4292_v37 = vpop.eup %4291 }
 0x62a   :  { %v2857_v56 = vadd.f32 1.0, %v4292_v37 }
 0x62b   :  { %v4294_v14 = vpop.eup %4293 }
 0x62c   :  { %4297 = vrcp.f32 %v2857_v56  ;;  %v2863_v34 = vadd.f32 1.0, %v4294_v14  ;;  %v4296_v13 = vpop.eup %4295 }
 0x62d   :  { %4299 = vtanh.f32 %v2691_v12  ;;  %v2870_v18 = vadd.f32 1.0, %v4296_v13 }
 0x62e   :  { %4301 = vrcp.f32 %v2863_v34 }
 0x62f   :  { %4303 = vrcp.f32 %v2870_v18 }
 0x639   :  { %v4298_v48 = vpop.eup %4297 }
 0x63a   :  { %v4300_v61 = vpop.eup %4299  ;;  %v2762_v31 = vpop.f32.mrf.mxu0 }
 0x63b   :  { %v4302_v35 = vpop.eup %4301  ;;  %v2842_v30 = vrot.slane %v2762_v31, 4  ;;  %v2877_v20 = vmul.f32 %v4300_v61, %v4298_v48  ;;  %v2833_v21 = vpop.f32.mrf.mxu1 }
 0x63c   :  { %v2876_v63 = vmul.f32 %v4302_v35, %v2874_v19  ;;  %v2764_v29 = vpop.f32.mrf.mxu0  ;;  %v2844_v61 = vrot.slane %v2833_v21, 4  ;;  %v4304_v19 = vpop.eup %4303 }
 0x63d   :  { %v2850_v37 = vadd.f32 %v2842_v30, %v9762_v11  ;;  %v2843_v22 = vrot.slane %v2764_v29, 4  ;;  %v2835_v34 = vpop.f32.mrf.mxu1 }
 0x63e   :  { %v7920_v56 = vadd.f32 %v2877_v20, %v2876_v63  ;;  %v2845_v13 = vrot.slane %v2835_v34, 4  ;;  %v2852_v30 = vadd.f32 %v2844_v61, %v9680_v41  ;;  %v9765_v34 = vld [vmem:[#allocation82_spill] sm:$0xff]  ;;  %v9768_v61 = vld [vmem:[#allocation25_spill] sm:$0xff] }
 0x63f   :  { %v4078_v14 = vmul.f32 -1.442695, %v2850_v37  ;;  %v2851_v12 = vadd.f32 %v2843_v22, %v9678_v57 }
 0x640   :  { %4305 = vtanh.f32 %v7920_v56  ;;  %v2853_v48 = vadd.f32 %v2845_v13, %v9679_v47  ;;  %v9766_v13 = vld [vmem:[#allocation83_spill] sm:$0xff] }
 0x641   :  { %4307 = vpow2.f32 %v4078_v14  ;;  %v4079_v1 = vmul.f32 -1.442695, %v2851_v12 }
 0x642   :  { %v4080_v31 = vmul.f32 -1.442695, %v2853_v48  ;;  %v9767_v48 = vld [vmem:[#allocation24_spill] sm:$0xff] }
 0x643   :  { %4309 = vpow2.f32 %v4079_v1  ;;  %v9763_v1 = vld [vmem:[#allocation80_spill] sm:$0xff] }
 0x644   :  { %4311 = vpow2.f32 %v4080_v31  ;;  %v7957_v31 = vld [vmem:[%s8710_s6 + $0x158] sm:$0xff] }
 0x64d   :  { %v4306_v35 = vpop.eup %4305 }
 0x64e   :  { %v4308_v29 = vpop.eup %4307  ;;  %v2880_v18 = vmul.f32 %v4306_v35, %v4304_v19  ;;  %v7951_v19 = vld [vmem:[%s8710_s6 + $0x148] sm:$0xff] }
 0x64f   :  { %v2884_v20 = vadd.f32 1.0, %v4308_v29  ;;  %v7963_v29 = vld [vmem:[%s8710_s6 + $0x140] sm:$0xff] }
 0x650   :  { %v4310_v63 = vpop.eup %4309  ;;  %v2908_v37 = vmul.f32 %v7443_v45, %v2880_v18  ;;  %v2923_v22 = vrot.slane %v2880_v18, 2  ;;  %9769 = vst [vmem:[#allocation94_spill] sm:$0xff] %v7963_v29 }
 0x651   :  { %4313 = vrcp.f32 %v2884_v20  ;;  %v2890_v14 = vadd.f32 1.0, %v4310_v63  ;;  %v4312_v35 = vpop.eup %4311  ;;  %v7975_v20 = vld [vmem:[%s8710_s6 + $0x128] sm:$0xff]  ;;  %v7981_v63 = vld [vmem:[%s8710_s6 + $0x138] sm:$0xff] }
 0x652   :  { %4315 = vtanh.f32 %v2852_v30  ;;  %v2910_v12 = vrot.slane %v2908_v37, 2  ;;  %2990 = vmatmul.mubr.f32.vlgmr.msra.gmra.mxu0 %v2923_v22  ;;  %3061 = vmatmul.mubr.f32.vlgmr.msra.gmra.mxu1 %v2923_v22  ;;  %v7969_v30 = vld [vmem:[%s8710_s6 + $0x150] sm:$0xff]  ;;  %9771 = vst [vmem:[#allocation46_spill] sm:$0xff] %v7975_v20  ;;  %9772 = vst [vmem:[#allocation47_spill] sm:$0xff] %v7981_v63  ;;  %v2901_v22 = vrot.slane %v7572_v49, 2  ;;  %v8000_v49 = vld [vmem:[%s8710_s6 + $0x108] sm:$0xff] }
 0x653   :  { %4317 = vrcp.f32 %v2890_v14  ;;  %3087 = vmatpush1.msra.mxu0 %v7449_v16  ;;  %3158 = vmatpush1.msra.mxu1 %v7455_v28  ;;  %9770 = vst [vmem:[#allocation96_spill] sm:$0xff] %v7969_v30  ;;  %v7988_v14 = vld [vmem:[%s8710_s6 + $0x120] sm:$0xff]  ;;  %9774 = vst [vmem:[#allocation49_spill] sm:$0xff] %v8000_v49 }
 0x654   :  { %3088 = vmatprep.subr.mxu0 %v7464_v59  ;;  %3159 = vmatprep.subr.mxu1 %v7470_v6  ;;  %v7932_v21 = vadd.f32 %v2910_v12, %v7459_v58  ;;  %v9764_v58 = vld [vmem:[#allocation81_spill] sm:$0xff]  ;;  %9773 = vst [vmem:[#allocation48_spill] sm:$0xff] %v7988_v14  ;;  %v7994_v12 = vld [vmem:[%s8710_s6 + $0x130] sm:$0xff] }
 0x655   :  { %3089 = vmatpush1.msra.mxu0 %v7476_v42  ;;  %3160 = vmatpush1.msra.mxu1 %v7482_v24 }
 0x656   :  { %3090 = vmatprep.subr.mxu0 %v7488_v0  ;;  %3161 = vmatprep.subr.mxu1 %v7494_v43 }
 0x657   :  { %3091 = vmatpush1.msra.mxu0 %v7500_v8  ;;  %3162 = vmatpush1.msra.mxu1 %v7506_v32 }
 0x658   :  { %3092 = vmatprep.subr.mxu0 %v7512_v52  ;;  %3163 = vmatprep.subr.mxu1 %v7518_v54 }
 0x659   :  { %3093 = vmatpush1.msra.mxu0 %v9763_v1  ;;  %3164 = vmatpush1.msra.mxu1 %v9764_v58 }
 0x65a   :  { %3094 = vmatprep.subr.mxu0 %v9765_v34  ;;  %3165 = vmatprep.subr.mxu1 %v9766_v13 }
 0x65b   :  { %3095 = vmatpush1.msra.mxu0 %v9767_v48  ;;  %3166 = vmatpush1.msra.mxu1 %v9768_v61 }
 0x65c   :  { %3096 = vmatprep.subr.mxu0 %v7951_v19  ;;  %3167 = vmatprep.subr.mxu1 %v7957_v31 }
 0x65d   :  { %3097 = vmatpush1.msra.mxu0 %v7963_v29  ;;  %3168 = vmatpush1.msra.mxu1 %v7969_v30  ;;  %v2897_v30 = vadd.f32 1.0, %v4312_v35  ;;  %v8012_v35 = vld [vmem:[%s8710_s6 + $0x100] sm:$0xff] }
 0x65e   :  { %v4314_v18 = vpop.eup %4313  ;;  %3098 = vmatprep.subr.mxu0 %v7975_v20  ;;  %3169 = vmatprep.subr.mxu1 %v7981_v63 }
 0x65f   :  { %v4316_v37 = vpop.eup %4315  ;;  %3099 = vmatpush1.msra.mxu0 %v7988_v14  ;;  %3170 = vmatpush1.msra.mxu1 %v7994_v12  ;;  %v8006_v14 = vld [vmem:[%s8710_s6 + $0x118] sm:$0xff]  ;;  %4319 = vrcp.f32 %v2897_v30  ;;  %v8068_v30 = vld [vmem:[%s8710_s6 + $0xd0] sm:$0xff] }
 0x660   :  { %v4318_v20 = vpop.eup %4317  ;;  %3100 = vmatprep.subr.mxu0 %v8000_v49  ;;  %9775 = vst [vmem:[#allocation50_spill] sm:$0xff] %v8006_v14  ;;  %3171 = vmatprep.subr.mxu1 %v8006_v14  ;;  %v2904_v63 = vmul.f32 %v4316_v37, %v4314_v18  ;;  %v8018_v49 = vld [vmem:[%s8710_s6 + $0x110] sm:$0xff]  ;;  %v8024_v14 = vld [vmem:[%s8710_s6 + $0xe8] sm:$0xff]  ;;  %v8030_v18 = vld [vmem:[%s8710_s6 + $0xf8] sm:$0xff] }
 0x661   :  { %v2903_v29 = vmul.f32 %v4318_v20, %v2901_v22  ;;  %3101 = vmatpush1.msra.mxu0 %v8012_v35  ;;  %3172 = vmatpush1.msra.mxu1 %v8018_v49  ;;  %9776 = vst [vmem:[#allocation51_spill] sm:$0xff] %v8024_v14  ;;  %9777 = vst [vmem:[#allocation53_spill] sm:$0xff] %v8030_v18  ;;  %v8038_v37 = vld [vmem:[%s8710_s6 + $0xe0] sm:$0xff]  ;;  %v8044_v22 = vld [vmem:[%s8710_s6 + $0xf0] sm:$0xff] }
 0x662   :  { %3102 = vmatprep.subr.mxu0 %v8024_v14  ;;  %3173 = vmatprep.subr.mxu1 %v8030_v18  ;;  %9778 = vst [vmem:[#allocation57_spill] sm:$0xff] %v8038_v37  ;;  %9779 = vst [vmem:[#allocation58_spill] sm:$0xff] %v8044_v22 }
 0x663   :  { %v8033_v20 = vadd.f32 %v2904_v63, %v2903_v29  ;;  %3103 = vmatpush1.msra.mxu0 %v8038_v37  ;;  %3174 = vmatpush1.msra.mxu1 %v8044_v22  ;;  %v8050_v29 = vld [vmem:[%s8710_s6 + $0xc8] sm:$0xff]  ;;  %v8056_v63 = vld [vmem:[%s8710_s6 + $0xd8] sm:$0xff]  ;;  %v8062_v37 = vld [vmem:[%s8710_s6 + $0xc0] sm:$0xff]  ;;  %9783 = vst [vmem:[#allocation98_spill] sm:$0xff] %v8068_v30 }
 0x664   :  { %9780 = vst [vmem:[#allocation91_spill] sm:$0xff] %v8050_v29  ;;  %3104 = vmatprep.subr.mxu0 %v8050_v29  ;;  %9781 = vst [vmem:[#allocation93_spill] sm:$0xff] %v8056_v63  ;;  %3175 = vmatprep.subr.mxu1 %v8056_v63  ;;  %v8075_v63 = vld [vmem:[%s8710_s6 + $0xa8] sm:$0xff]  ;;  %v8093_v29 = vld [vmem:[%s8710_s6 + $0xb0] sm:$0xff] }
 0x665   :  { %9782 = vst [vmem:[#allocation92_spill] sm:$0xff] %v8062_v37  ;;  %3105 = vmatpush1.msra.mxu0 %v8062_v37  ;;  %3176 = vmatpush1.msra.mxu1 %v8068_v30  ;;  %4321 = vtanh.f32 %v8033_v20  ;;  %9784 = vst [vmem:[#allocation99_spill] sm:$0xff] %v8075_v63  ;;  %v8081_v37 = vld [vmem:[%s8710_s6 + $0xb8] sm:$0xff]  ;;  %v8087_v30 = vld [vmem:[%s8710_s6 + $0xa0] sm:$0xff] }
 0x666   :  { %3106 = vmatprep.subr.mxu0 %v8075_v63  ;;  %9785 = vst [vmem:[#allocation100_spill] sm:$0xff] %v8081_v37  ;;  %3177 = vmatprep.subr.mxu1 %v8081_v37  ;;  %9786 = vst [vmem:[#allocation101_spill] sm:$0xff] %v8087_v30  ;;  %v8099_v63 = vld [vmem:[%s8710_s6 + $0x88] sm:$0xff]  ;;  %v8105_v37 = vld [vmem:[%s8710_s6 + $0x98] sm:$0xff] }
 0x667   :  { %3107 = vmatpush1.msra.mxu0 %v8087_v30  ;;  %9787 = vst [vmem:[#allocation38_spill] sm:$0xff] %v8093_v29  ;;  %3178 = vmatpush1.msra.mxu1 %v8093_v29  ;;  %9788 = vst [vmem:[#allocation39_spill] sm:$0xff] %v8099_v63  ;;  %v8111_v30 = vld [vmem:[%s8710_s6 + $0x80] sm:$0xff]  ;;  %v8117_v29 = vld [vmem:[%s8710_s6 + $0x90] sm:$0xff] }
 0x668   :  { %3108 = vmatprep.subr.mxu0 %v8099_v63  ;;  %9789 = vst [vmem:[#allocation55_spill] sm:$0xff] %v8105_v37  ;;  %3179 = vmatprep.subr.mxu1 %v8105_v37  ;;  %9790 = vst [vmem:[#allocation44_spill] sm:$0xff] %v8111_v30  ;;  %v8123_v63 = vld [vmem:[%s8710_s6 + $0x68] sm:$0xff]  ;;  %v8129_v37 = vld [vmem:[%s8710_s6 + $0x78] sm:$0xff] }
 0x669   :  { %3109 = vmatpush1.msra.mxu0 %v8111_v30  ;;  %9791 = vst [vmem:[#allocation45_spill] sm:$0xff] %v8117_v29  ;;  %3180 = vmatpush1.msra.mxu1 %v8117_v29  ;;  %9792 = vst [vmem:[#allocation52_spill] sm:$0xff] %v8123_v63  ;;  %v8135_v30 = vld [vmem:[%s8710_s6 + $0x60] sm:$0xff]  ;;  %v8141_v29 = vld [vmem:[%s8710_s6 + $0x70] sm:$0xff] }
 0x66a   :  { %3110 = vmatprep.subr.mxu0 %v8123_v63  ;;  %9793 = vst [vmem:[#allocation54_spill] sm:$0xff] %v8129_v37  ;;  %3181 = vmatprep.subr.mxu1 %v8129_v37  ;;  %9794 = vst [vmem:[#allocation56_spill] sm:$0xff] %v8135_v30  ;;  %v8147_v63 = vld [vmem:[%s8710_s6 + $0x48] sm:$0xff]  ;;  %v8153_v37 = vld [vmem:[%s8710_s6 + $0x58] sm:$0xff] }
 0x66b   :  { %3111 = vmatpush1.msra.mxu0 %v8135_v30  ;;  %9795 = vst [vmem:[#allocation67_spill] sm:$0xff] %v8141_v29  ;;  %3182 = vmatpush1.msra.mxu1 %v8141_v29  ;;  %9796 = vst [vmem:[#allocation95_spill] sm:$0xff] %v8147_v63  ;;  %v8159_v30 = vld [vmem:[%s8710_s6 + $0x40] sm:$0xff]  ;;  %v8165_v29 = vld [vmem:[%s8710_s6 + $0x50] sm:$0xff] }
 0x66c   :  { %3112 = vmatprep.subr.mxu0 %v8147_v63  ;;  %9797 = vst [vmem:[#allocation59_spill] sm:$0xff] %v8153_v37  ;;  %3183 = vmatprep.subr.mxu1 %v8153_v37  ;;  %9798 = vst [vmem:[#allocation60_spill] sm:$0xff] %v8159_v30  ;;  %v8171_v63 = vld [vmem:[%s8710_s6 + $0x28] sm:$0xff]  ;;  %v8177_v37 = vld [vmem:[%s8710_s6 + $0x38] sm:$0xff] }
 0x66d   :  { %3113 = vmatpush1.msra.mxu0 %v8159_v30  ;;  %9799 = vst [vmem:[#allocation61_spill] sm:$0xff] %v8165_v29  ;;  %3184 = vmatpush1.msra.mxu1 %v8165_v29  ;;  %9800 = vst [vmem:[#allocation62_spill] sm:$0xff] %v8171_v63  ;;  %v8183_v30 = vld [vmem:[%s8710_s6 + $0x20] sm:$0xff]  ;;  %v8189_v29 = vld [vmem:[%s8710_s6 + $0x30] sm:$0xff] }
 0x66e   :  { %3114 = vmatprep.subr.mxu0 %v8171_v63  ;;  %9801 = vst [vmem:[#allocation63_spill] sm:$0xff] %v8177_v37  ;;  %3185 = vmatprep.subr.mxu1 %v8177_v37  ;;  %9802 = vst [vmem:[#allocation64_spill] sm:$0xff] %v8183_v30  ;;  %v8195_v63 = vld [vmem:[%s8710_s6 + $0x8] sm:$0xff]  ;;  %v8201_v37 = vld [vmem:[%s8710_s6 + $0x18] sm:$0xff] }
 0x66f   :  { %3115 = vmatpush1.msra.mxu0 %v8183_v30  ;;  %9803 = vst [vmem:[#allocation65_spill] sm:$0xff] %v8189_v29  ;;  %3186 = vmatpush1.msra.mxu1 %v8189_v29  ;;  %9804 = vst [vmem:[#allocation66_spill] sm:$0xff] %v8195_v63  ;;  %v4320_v30 = vpop.eup %4319  ;;  %v8207_v22 = vld [vmem:[%s8710_s6] sm:$0xff] }
 0x670   :  { %3116 = vmatprep.subr.mxu0 %v8195_v63  ;;  %9805 = vst [vmem:[#allocation75_spill] sm:$0xff] %v8201_v37  ;;  %3187 = vmatprep.subr.mxu1 %v8201_v37  ;;  %9806 = vst [vmem:[#allocation78_spill] sm:$0xff] %v8207_v22  ;;  %v8214_v63 = vld [vmem:[%s8710_s6 + $0x10] sm:$0xff] }
 0x671   :  { %3117 = vmatpush1.msra.mxu0 %v8207_v22  ;;  %3150 = vmatprep.mubr.f32.mxu0 %v9690_v33 }
 0x672   :  { %v4322_v29 = vpop.eup %4321  ;;  %3188 = vmatpush1.msra.mxu1 %v8214_v63  ;;  %3221 = vmatprep.mubr.f32.mxu1 %v9690_v33 }
 0x673   :  { %v2907_v37 = vmul.f32 %v4322_v29, %v4320_v30  ;;  %3314 = vmatprep.subr.mxu0 %v9692_v38  ;;  %3385 = vmatprep.subr.mxu1 %v9693_v39  ;;  %v9807_v38 = vld [vmem:[#allocation26_spill] sm:$0xff]  ;;  %v9808_v39 = vld [vmem:[#allocation27_spill] sm:$0xff]  ;;  %v9833_v30 = vld [vmem:[#allocation5_spill] sm:$0xff] }
 0x675   :  { %v2913_v18 = vmul.f32 %v7612_v26, %v2907_v37  ;;  %v3084_v22 = vrot.slane %v2907_v37, 4  ;;  %v9831_v37 = vld [vmem:[#allocation76_spill] sm:$0xff] }
 0x677   :  { %v2915_v14 = vrot.slane %v2913_v18, 6  ;;  %3151 = vmatmul.mubr.f32.vlgmr.msra.gmra.mxu0 %v3084_v22  ;;  %3222 = vmatmul.mubr.f32.vlgmr.msra.gmra.mxu1 %v3084_v22  ;;  %v9830_v18 = vld [vmem:[#allocation74_spill] sm:$0xff]  ;;  %v9832_v22 = vld [vmem:[#allocation77_spill] sm:$0xff] }
 0x678   :  { %3315 = vmatpush1.msra.mxu0 %v9695_v17  ;;  %3386 = vmatpush1.msra.mxu1 %v9696_v44  ;;  %v9810_v17 = vld [vmem:[#allocation29_spill] sm:$0xff]  ;;  %v9811_v44 = vld [vmem:[#allocation30_spill] sm:$0xff] }
 0x679   :  { %3316 = vmatprep.subr.mxu0 %v9697_v5  ;;  %3387 = vmatprep.subr.mxu1 %v9698_v51  ;;  %v8226_v29 = vadd.f32 %v2915_v14, %v7616_v60  ;;  %v9809_v60 = vld [vmem:[#allocation28_spill] sm:$0xff]  ;;  %v9812_v5 = vld [vmem:[#allocation31_spill] sm:$0xff]  ;;  %v9829_v14 = vld [vmem:[#allocation73_spill] sm:$0xff] }
 0x67a   :  { %3317 = vmatpush1.msra.mxu0 %v9699_v23  ;;  %3388 = vmatpush1.msra.mxu1 %v9700_v36  ;;  %v9813_v51 = vld [vmem:[#allocation32_spill] sm:$0xff]  ;;  %v9814_v23 = vld [vmem:[#allocation33_spill] sm:$0xff]  ;;  %v9815_v36 = vld [vmem:[#allocation34_spill] sm:$0xff] }
 0x67b   :  { %3318 = vmatprep.subr.mxu0 %v9701_v27  ;;  %3389 = vmatprep.subr.mxu1 %v9702_v40  ;;  %v9816_v27 = vld [vmem:[#allocation35_spill] sm:$0xff]  ;;  %v9817_v40 = vld [vmem:[#allocation36_spill] sm:$0xff] }
 0x67c   :  { %3319 = vmatpush1.msra.mxu0 %v9703_v3  ;;  %3390 = vmatpush1.msra.mxu1 %v9704_v62  ;;  %v9818_v3 = vld [vmem:[#allocation37_spill] sm:$0xff]  ;;  %v9819_v62 = vld [vmem:[#allocation40_spill] sm:$0xff] }
 0x67d   :  { %3320 = vmatprep.subr.mxu0 %v9705_v4  ;;  %3391 = vmatprep.subr.mxu1 %v9706_v9  ;;  %v9820_v4 = vld [vmem:[#allocation41_spill] sm:$0xff]  ;;  %v9821_v9 = vld [vmem:[#allocation42_spill] sm:$0xff] }
 0x67e   :  { %3321 = vmatpush1.msra.mxu0 %v9707_v2  ;;  %3392 = vmatpush1.msra.mxu1 %v9708_v15  ;;  %v9822_v2 = vld [vmem:[#allocation43_spill] sm:$0xff]  ;;  %v9823_v15 = vld [vmem:[#allocation97_spill] sm:$0xff] }
 0x67f   :  { %3322 = vmatprep.subr.mxu0 %v9709_v7  ;;  %3393 = vmatprep.subr.mxu1 %v9710_v46  ;;  %v9824_v7 = vld [vmem:[#allocation68_spill] sm:$0xff]  ;;  %v9825_v46 = vld [vmem:[#allocation69_spill] sm:$0xff] }
 0x680   :  { %3323 = vmatpush1.msra.mxu0 %v9711_v50  ;;  %3394 = vmatpush1.msra.mxu1 %v9712_v55  ;;  %v9826_v50 = vld [vmem:[#allocation70_spill] sm:$0xff]  ;;  %v9827_v55 = vld [vmem:[#allocation71_spill] sm:$0xff] }
 0x681   :  { %3324 = vmatprep.subr.mxu0 %v7639_v25  ;;  %3395 = vmatprep.subr.mxu1 %v9807_v38  ;;  %v9828_v25 = vld [vmem:[#allocation72_spill] sm:$0xff]  ;;  %v9834_v38 = vld [vmem:[#allocation6_spill] sm:$0xff] }
 0x682   :  { %3325 = vmatpush1.msra.mxu0 %v9808_v39  ;;  %3396 = vmatpush1.msra.mxu1 %v9809_v60  ;;  %v9835_v39 = vld [vmem:[#allocation7_spill] sm:$0xff]  ;;  %v9836_v60 = vld [vmem:[#allocation8_spill] sm:$0xff] }
 0x683   :  { %3326 = vmatprep.subr.mxu0 %v9810_v17  ;;  %3397 = vmatprep.subr.mxu1 %v9811_v44  ;;  %v9837_v17 = vld [vmem:[#allocation9_spill] sm:$0xff]  ;;  %v9838_v44 = vld [vmem:[#allocation10_spill] sm:$0xff] }
 0x684   :  { %3327 = vmatpush1.msra.mxu0 %v9812_v5  ;;  %3398 = vmatpush1.msra.mxu1 %v9813_v51  ;;  %v9839_v5 = vld [vmem:[#allocation11_spill] sm:$0xff]  ;;  %v9840_v51 = vld [vmem:[#allocation12_spill] sm:$0xff] }
 0x685   :  { %3328 = vmatprep.subr.mxu0 %v9814_v23  ;;  %3399 = vmatprep.subr.mxu1 %v9815_v36  ;;  %v9841_v23 = vld [vmem:[#allocation13_spill] sm:$0xff]  ;;  %v9842_v36 = vld [vmem:[#allocation14_spill] sm:$0xff] }
 0x686   :  { %3329 = vmatpush1.msra.mxu0 %v9816_v27  ;;  %3400 = vmatpush1.msra.mxu1 %v9817_v40  ;;  %v9843_v27 = vld [vmem:[#allocation15_spill] sm:$0xff]  ;;  %v9844_v40 = vld [vmem:[#allocation16_spill] sm:$0xff] }
 0x687   :  { %3330 = vmatprep.subr.mxu0 %v9818_v3  ;;  %3401 = vmatprep.subr.mxu1 %v9819_v62  ;;  %v9845_v3 = vld [vmem:[#allocation17_spill] sm:$0xff]  ;;  %v9846_v62 = vld [vmem:[#allocation18_spill] sm:$0xff] }
 0x688   :  { %3331 = vmatpush1.msra.mxu0 %v9820_v4  ;;  %3402 = vmatpush1.msra.mxu1 %v9821_v9  ;;  %v9847_v4 = vld [vmem:[#allocation19_spill] sm:$0xff]  ;;  %v9848_v9 = vld [vmem:[#allocation20_spill] sm:$0xff] }
 0x689   :  { %3332 = vmatprep.subr.mxu0 %v9822_v2  ;;  %3403 = vmatprep.subr.mxu1 %v9823_v15  ;;  %v9849_v2 = vld [vmem:[#allocation21_spill] sm:$0xff]  ;;  %v9850_v15 = vld [vmem:[#allocation22_spill] sm:$0xff] }
 0x68a   :  { %3333 = vmatpush1.msra.mxu0 %v9824_v7  ;;  %3404 = vmatpush1.msra.mxu1 %v9825_v46  ;;  %v9851_v7 = vld [vmem:[#allocation23_spill] sm:$0xff] }
 0x68b   :  { %3334 = vmatprep.subr.mxu0 %v9826_v50  ;;  %3405 = vmatprep.subr.mxu1 %v9827_v55 }
 0x68c   :  { %3335 = vmatpush1.msra.mxu0 %v9828_v25  ;;  %3406 = vmatpush1.msra.mxu1 %v9829_v14 }
 0x68d   :  { %3336 = vmatprep.subr.mxu0 %v9830_v18  ;;  %3407 = vmatprep.subr.mxu1 %v9831_v37 }
 0x68e   :  { %3337 = vmatpush1.msra.mxu0 %v9832_v22  ;;  %3408 = vmatpush1.msra.mxu1 %v9833_v30 }
 0x68f   :  { %3338 = vmatprep.subr.mxu0 %v9834_v38  ;;  %3409 = vmatprep.subr.mxu1 %v9835_v39 }
 0x690   :  { %3339 = vmatpush1.msra.mxu0 %v9836_v60  ;;  %3410 = vmatpush1.msra.mxu1 %v9837_v17  ;;  %v9852_v60 = vld [vmem:[#allocation89_spill] sm:$0xff] }
 0x691   :  { %3340 = vmatprep.subr.mxu0 %v9838_v44  ;;  %3411 = vmatprep.subr.mxu1 %v9839_v5 }
 0x692   :  { %3341 = vmatpush1.msra.mxu0 %v9840_v51  ;;  %3412 = vmatpush1.msra.mxu1 %v9841_v23  ;;  %v9853_v23 = vld [vmem:[#allocation88_spill] sm:$0xff] }
 0x693   :  { %3342 = vmatprep.subr.mxu0 %v9842_v36  ;;  %3413 = vmatprep.subr.mxu1 %v9843_v27 }
 0x694   :  { %3343 = vmatpush1.msra.mxu0 %v9844_v40  ;;  %3414 = vmatpush1.msra.mxu1 %v9845_v3 }
 0x695   :  { %3344 = vmatprep.subr.mxu0 %v9846_v62  ;;  %3415 = vmatprep.subr.mxu1 %v9847_v4 }
 0x696   :  { %3345 = vmatpush1.msra.mxu0 %v9848_v9  ;;  %3378 = vmatprep.mubr.f32.mxu0 %v9690_v33 }
 0x697   :  { %3416 = vmatpush1.msra.mxu1 %v9849_v2  ;;  %3449 = vmatprep.mubr.f32.mxu1 %v9690_v33  ;;  %v3264_v2 = vrot.slane %v7920_v56, 6 }
 0x698   :  { %3475 = vmatprep.subr.mxu0 %v9850_v15  ;;  %3546 = vmatprep.subr.mxu1 %v9851_v7 }
 0x712   :  { %v2991_v46 = vpop.f32.mrf.mxu0  ;;  %v3062_v14 = vpop.f32.mrf.mxu1 }
 0x713   :  { %v3071_v50 = vrot.slane %v2991_v46, 4  ;;  %v3073_v44 = vrot.slane %v3062_v14, 4 }
 0x714   :  { %v2993_v55 = vpop.f32.mrf.mxu0  ;;  %v3064_v38 = vpop.f32.mrf.mxu1 }
 0x715   :  { %v3079_v25 = vadd.f32 %v3071_v50, %v9758_v53  ;;  %v3072_v18 = vrot.slane %v2993_v55, 4  ;;  %v3074_v39 = vrot.slane %v3064_v38, 4  ;;  %v3081_v36 = vadd.f32 %v3073_v44, %v9853_v23 }
 0x717   :  { %v4081_v37 = vmul.f32 -1.442695, %v3079_v25  ;;  %v3080_v22 = vadd.f32 %v3072_v18, %v9759_v10  ;;  %v3082_v17 = vadd.f32 %v3074_v39, %v9852_v60 }
 0x719   :  { %4323 = vpow2.f32 %v4081_v37  ;;  %v4082_v30 = vmul.f32 -1.442695, %v3080_v22  ;;  %v4083_v5 = vmul.f32 -1.442695, %v3082_v17 }
 0x71b   :  { %4325 = vpow2.f32 %v4082_v30 }
 0x71c   :  { %4327 = vpow2.f32 %v4083_v5 }
 0x726   :  { %v4324_v51 = vpop.eup %4323 }
 0x727   :  { %v3247_v27 = vadd.f32 1.0, %v4324_v51 }
 0x728   :  { %v4326_v40 = vpop.eup %4325 }
 0x729   :  { %4329 = vrcp.f32 %v3247_v27  ;;  %v3253_v3 = vadd.f32 1.0, %v4326_v40  ;;  %v4328_v62 = vpop.eup %4327 }
 0x72a   :  { %4331 = vtanh.f32 %v3081_v36  ;;  %v3260_v46 = vadd.f32 1.0, %v4328_v62 }
 0x72b   :  { %4333 = vrcp.f32 %v3253_v3 }
 0x72c   :  { %4335 = vrcp.f32 %v3260_v46 }
 0x736   :  { %v4330_v4 = vpop.eup %4329 }
 0x737   :  { %v4332_v9 = vpop.eup %4331  ;;  %v3152_v15 = vpop.f32.mrf.mxu0 }
 0x738   :  { %v4334_v7 = vpop.eup %4333  ;;  %v3232_v50 = vrot.slane %v3152_v15, 6  ;;  %v3267_v55 = vmul.f32 %v4332_v9, %v4330_v4  ;;  %v3223_v37 = vpop.f32.mrf.mxu1 }
 0x739   :  { %v3266_v25 = vmul.f32 %v4334_v7, %v3264_v2  ;;  %v3154_v14 = vpop.f32.mrf.mxu0  ;;  %v3234_v51 = vrot.slane %v3223_v37, 6  ;;  %v4336_v36 = vpop.eup %4335  ;;  %v9874_v37 = vld [vmem:[#allocation55_spill] sm:$0xff] }
 0x73a   :  { %v3240_v18 = vadd.f32 %v3232_v50, %v9762_v11  ;;  %v3233_v22 = vrot.slane %v3154_v14, 6  ;;  %v3225_v17 = vpop.f32.mrf.mxu1  ;;  %v9872_v14 = vld [vmem:[#allocation38_spill] sm:$0xff] }
 0x73b   :  { %v8296_v30 = vadd.f32 %v3267_v55, %v3266_v25  ;;  %v3235_v44 = vrot.slane %v3225_v17, 6  ;;  %v3242_v62 = vadd.f32 %v3234_v51, %v9680_v41  ;;  %v9871_v25 = vld [vmem:[#allocation101_spill] sm:$0xff]  ;;  %v9879_v17 = vld [vmem:[#allocation56_spill] sm:$0xff]  ;;  %v9882_v51 = vld [vmem:[#allocation59_spill] sm:$0xff] }
 0x73c   :  { %v4084_v38 = vmul.f32 -1.442695, %v3240_v18  ;;  %v3241_v39 = vadd.f32 %v3233_v22, %v9678_v57  ;;  %v9873_v18 = vld [vmem:[#allocation39_spill] sm:$0xff]  ;;  %v9875_v22 = vld [vmem:[#allocation44_spill] sm:$0xff] }
 0x73d   :  { %4337 = vtanh.f32 %v8296_v30  ;;  %v3243_v5 = vadd.f32 %v3235_v44, %v9679_v47  ;;  %v9880_v44 = vld [vmem:[#allocation67_spill] sm:$0xff] }
 0x73e   :  { %4339 = vpow2.f32 %v4084_v38  ;;  %v4085_v56 = vmul.f32 -1.442695, %v3241_v39  ;;  %v9876_v38 = vld [vmem:[#allocation45_spill] sm:$0xff]  ;;  %v9877_v39 = vld [vmem:[#allocation52_spill] sm:$0xff] }
 0x73f   :  { %v4086_v27 = vmul.f32 -1.442695, %v3243_v5  ;;  %v9881_v5 = vld [vmem:[#allocation95_spill] sm:$0xff] }
 0x740   :  { %4341 = vpow2.f32 %v4085_v56  ;;  %v9878_v56 = vld [vmem:[#allocation54_spill] sm:$0xff] }
 0x741   :  { %4343 = vpow2.f32 %v4086_v27  ;;  %v9884_v27 = vld [vmem:[#allocation61_spill] sm:$0xff] }
 0x74a   :  { %v4338_v40 = vpop.eup %4337 }
 0x74b   :  { %v4340_v3 = vpop.eup %4339  ;;  %v3270_v4 = vmul.f32 %v4338_v40, %v4336_v36  ;;  %v9883_v36 = vld [vmem:[#allocation60_spill] sm:$0xff]  ;;  %v9885_v40 = vld [vmem:[#allocation62_spill] sm:$0xff] }
 0x74c   :  { %v3274_v9 = vadd.f32 1.0, %v4340_v3  ;;  %v9886_v3 = vld [vmem:[#allocation63_spill] sm:$0xff] }
 0x74d   :  { %v4342_v2 = vpop.eup %4341  ;;  %v3298_v15 = vmul.f32 %v7443_v45, %v3270_v4  ;;  %v3312_v7 = vrot.slane %v3270_v4, 4  ;;  %v9888_v4 = vld [vmem:[#allocation65_spill] sm:$0xff] }
 0x74e   :  { %4345 = vrcp.f32 %v3274_v9  ;;  %v3280_v46 = vadd.f32 1.0, %v4342_v2  ;;  %v4344_v45 = vpop.eup %4343  ;;  %v9889_v9 = vld [vmem:[#allocation66_spill] sm:$0xff]  ;;  %v9890_v2 = vld [vmem:[#allocation75_spill] sm:$0xff] }
 0x74f   :  { %4347 = vtanh.f32 %v3242_v62  ;;  %v3300_v50 = vrot.slane %v3298_v15, 4  ;;  %3379 = vmatmul.mubr.f32.vlgmr.msra.gmra.mxu0 %v3312_v7  ;;  %3450 = vmatmul.mubr.f32.vlgmr.msra.gmra.mxu1 %v3312_v7  ;;  %v9887_v62 = vld [vmem:[#allocation64_spill] sm:$0xff]  ;;  %v9891_v7 = vld [vmem:[#allocation78_spill] sm:$0xff] }
 0x750   :  { %4349 = vrcp.f32 %v3280_v46  ;;  %3476 = vmatpush1.msra.mxu0 %v7449_v16  ;;  %3547 = vmatpush1.msra.mxu1 %v7455_v28  ;;  %v9854_v16 = vld [vmem:[#allocation94_spill] sm:$0xff]  ;;  %v9855_v28 = vld [vmem:[#allocation96_spill] sm:$0xff] }
 0x751   :  { %3477 = vmatprep.subr.mxu0 %v7464_v59  ;;  %3548 = vmatprep.subr.mxu1 %v7470_v6  ;;  %v8308_v55 = vadd.f32 %v3300_v50, %v7932_v21  ;;  %v9856_v6 = vld [vmem:[#allocation46_spill] sm:$0xff] }
 0x752   :  { %3478 = vmatpush1.msra.mxu0 %v7476_v42  ;;  %3549 = vmatpush1.msra.mxu1 %v7482_v24  ;;  %v9857_v42 = vld [vmem:[#allocation47_spill] sm:$0xff] }
 0x753   :  { %3479 = vmatprep.subr.mxu0 %v7488_v0  ;;  %3550 = vmatprep.subr.mxu1 %v7494_v43  ;;  %v3291_v0 = vrot.slane %v8033_v20, 2  ;;  %v9858_v43 = vld [vmem:[#allocation48_spill] sm:$0xff] }
 0x754   :  { %3480 = vmatpush1.msra.mxu0 %v7500_v8  ;;  %3551 = vmatpush1.msra.mxu1 %v7506_v32  ;;  %v3287_v32 = vadd.f32 1.0, %v4344_v45  ;;  %v9870_v20 = vld [vmem:[#allocation100_spill] sm:$0xff] }
 0x755   :  { %3481 = vmatprep.subr.mxu0 %v7512_v52  ;;  %3552 = vmatprep.subr.mxu1 %v7518_v54  ;;  %v9859_v52 = vld [vmem:[#allocation49_spill] sm:$0xff]  ;;  %v9860_v54 = vld [vmem:[#allocation50_spill] sm:$0xff] }
 0x756   :  { %3482 = vmatpush1.msra.mxu0 %v9763_v1  ;;  %3553 = vmatpush1.msra.mxu1 %v9764_v58  ;;  %v9861_v58 = vld [vmem:[#allocation51_spill] sm:$0xff]  ;;  %4351 = vrcp.f32 %v3287_v32  ;;  %v3717_v32 = vld [vmem:[%s8712_s8 + $0xa8] sm:$0xff] }
 0x757   :  { %3483 = vmatprep.subr.mxu0 %v9765_v34  ;;  %3554 = vmatprep.subr.mxu1 %v9766_v13  ;;  %v9862_v34 = vld [vmem:[#allocation53_spill] sm:$0xff] }
 0x758   :  { %3484 = vmatpush1.msra.mxu0 %v9767_v48  ;;  %3555 = vmatpush1.msra.mxu1 %v9768_v61  ;;  %v9863_v48 = vld [vmem:[#allocation57_spill] sm:$0xff]  ;;  %v9864_v61 = vld [vmem:[#allocation58_spill] sm:$0xff] }
 0x759   :  { %3485 = vmatprep.subr.mxu0 %v7951_v19  ;;  %3556 = vmatprep.subr.mxu1 %v7957_v31  ;;  %v9865_v19 = vld [vmem:[#allocation91_spill] sm:$0xff]  ;;  %v9866_v31 = vld [vmem:[#allocation93_spill] sm:$0xff] }
 0x75a   :  { %3486 = vmatpush1.msra.mxu0 %v9854_v16  ;;  %3557 = vmatpush1.msra.mxu1 %v9855_v28 }
 0x75b   :  { %v4346_v59 = vpop.eup %4345  ;;  %3487 = vmatprep.subr.mxu0 %v9856_v6  ;;  %3558 = vmatprep.subr.mxu1 %v9857_v42  ;;  %v3725_v6 = vld [vmem:[%s8712_s8 + $0xe8] sm:$0xff]  ;;  %v3722_v42 = vld [vmem:[%s8712_s8 + $0xd0] sm:$0xff] }
 0x75c   :  { %v4348_v24 = vpop.eup %4347  ;;  %3488 = vmatpush1.msra.mxu0 %v9858_v43  ;;  %3559 = vmatpush1.msra.mxu1 %v7994_v12  ;;  %v9867_v12 = vld [vmem:[#allocation92_spill] sm:$0xff] }
 0x75d   :  { %v4350_v8 = vpop.eup %4349  ;;  %3489 = vmatprep.subr.mxu0 %v9859_v52  ;;  %3560 = vmatprep.subr.mxu1 %v9860_v54  ;;  %v3294_v21 = vmul.f32 %v4348_v24, %v4346_v59  ;;  %v3721_v24 = vld [vmem:[%s8712_s8 + $0xc8] sm:$0xff]  ;;  %v3719_v43 = vld [vmem:[%s8712_s8 + $0xb8] sm:$0xff]  ;;  %v3716_v52 = vld [vmem:[%s8712_s8 + $0xa0] sm:$0xff] }
 0x75e   :  { %v3293_v1 = vmul.f32 %v4350_v8, %v3291_v0  ;;  %3490 = vmatpush1.msra.mxu0 %v8012_v35  ;;  %3561 = vmatpush1.msra.mxu1 %v8018_v49  ;;  %v9868_v35 = vld [vmem:[#allocation98_spill] sm:$0xff]  ;;  %v9869_v49 = vld [vmem:[#allocation99_spill] sm:$0xff]  ;;  %v3720_v0 = vld [vmem:[%s8712_s8 + $0xc0] sm:$0xff] }
 0x75f   :  { %3491 = vmatprep.subr.mxu0 %v9861_v58  ;;  %3562 = vmatprep.subr.mxu1 %v9862_v34  ;;  %v3718_v8 = vld [vmem:[%s8712_s8 + $0xb0] sm:$0xff]  ;;  %v3715_v54 = vld [vmem:[%s8712_s8 + $0x98] sm:$0xff]  ;;  %v3712_v58 = vld [vmem:[%s8712_s8 + $0x80] sm:$0xff] }
 0x760   :  { %v8339_v13 = vadd.f32 %v3294_v21, %v3293_v1  ;;  %3492 = vmatpush1.msra.mxu0 %v9863_v48  ;;  %3563 = vmatpush1.msra.mxu1 %v9864_v61  ;;  %v3714_v21 = vld [vmem:[%s8712_s8 + $0x90] sm:$0xff]  ;;  %v3713_v1 = vld [vmem:[%s8712_s8 + $0x88] sm:$0xff]  ;;  %v3711_v34 = vld [vmem:[%s8712_s8 + $0x78] sm:$0xff] }
 0x761   :  { %3493 = vmatprep.subr.mxu0 %v9865_v19  ;;  %3564 = vmatprep.subr.mxu1 %v9866_v31  ;;  %v3710_v48 = vld [vmem:[%s8712_s8 + $0x70] sm:$0xff]  ;;  %v3709_v61 = vld [vmem:[%s8712_s8 + $0x68] sm:$0xff]  ;;  %v3708_v19 = vld [vmem:[%s8712_s8 + $0x60] sm:$0xff] }
 0x762   :  { %3494 = vmatpush1.msra.mxu0 %v9867_v12  ;;  %3565 = vmatpush1.msra.mxu1 %v9868_v35  ;;  %4353 = vtanh.f32 %v8339_v13  ;;  %v3707_v31 = vld [vmem:[%s8712_s8 + $0x58] sm:$0xff]  ;;  %v3706_v12 = vld [vmem:[%s8712_s8 + $0x50] sm:$0xff]  ;;  %v3705_v35 = vld [vmem:[%s8712_s8 + $0x48] sm:$0xff] }
 0x763   :  { %3495 = vmatprep.subr.mxu0 %v9869_v49  ;;  %3566 = vmatprep.subr.mxu1 %v9870_v20  ;;  %v4352_v15 = vpop.eup %4351  ;;  %v3704_v49 = vld [vmem:[%s8712_s8 + $0x40] sm:$0xff]  ;;  %v3703_v20 = vld [vmem:[%s8712_s8 + $0x38] sm:$0xff] }
 0x764   :  { %3496 = vmatpush1.msra.mxu0 %v9871_v25  ;;  %3567 = vmatpush1.msra.mxu1 %v9872_v14  ;;  %v3702_v25 = vld [vmem:[%s8712_s8 + $0x30] sm:$0xff]  ;;  %v3701_v14 = vld [vmem:[%s8712_s8 + $0x28] sm:$0xff] }
 0x765   :  { %3497 = vmatprep.subr.mxu0 %v9873_v18  ;;  %3568 = vmatprep.subr.mxu1 %v9874_v37  ;;  %v3700_v18 = vld [vmem:[%s8712_s8 + $0x20] sm:$0xff]  ;;  %v3699_v37 = vld [vmem:[%s8712_s8 + $0x18] sm:$0xff] }
 0x766   :  { %3498 = vmatpush1.msra.mxu0 %v9875_v22  ;;  %3569 = vmatpush1.msra.mxu1 %v9876_v38  ;;  %v3698_v22 = vld [vmem:[%s8712_s8 + $0x10] sm:$0xff]  ;;  %v3697_v38 = vld [vmem:[%s8712_s8 + $0x8] sm:$0xff] }
 0x767   :  { %3499 = vmatprep.subr.mxu0 %v9877_v39  ;;  %3570 = vmatprep.subr.mxu1 %v9878_v56  ;;  %v3696_v39 = vld [vmem:[%s8712_s8] sm:$0xff]  ;;  %v3759_v56 = vld [vmem:[%s8713_s9 + $0xf8] sm:$0xff] }
 0x768   :  { %3500 = vmatpush1.msra.mxu0 %v9879_v17  ;;  %3571 = vmatpush1.msra.mxu1 %v9880_v44  ;;  %v3758_v17 = vld [vmem:[%s8713_s9 + $0xf0] sm:$0xff]  ;;  %v3757_v44 = vld [vmem:[%s8713_s9 + $0xe8] sm:$0xff] }
 0x769   :  { %3501 = vmatprep.subr.mxu0 %v9881_v5  ;;  %3572 = vmatprep.subr.mxu1 %v9882_v51  ;;  %v3756_v5 = vld [vmem:[%s8713_s9 + $0xe0] sm:$0xff]  ;;  %v3755_v51 = vld [vmem:[%s8713_s9 + $0xd8] sm:$0xff] }
 0x76a   :  { %3502 = vmatpush1.msra.mxu0 %v9883_v36  ;;  %3573 = vmatpush1.msra.mxu1 %v9884_v27  ;;  %v3754_v36 = vld [vmem:[%s8713_s9 + $0xd0] sm:$0xff]  ;;  %v3753_v27 = vld [vmem:[%s8713_s9 + $0xc8] sm:$0xff] }
 0x76b   :  { %3503 = vmatprep.subr.mxu0 %v9885_v40  ;;  %3574 = vmatprep.subr.mxu1 %v9886_v3  ;;  %v3752_v40 = vld [vmem:[%s8713_s9 + $0xc0] sm:$0xff]  ;;  %v3751_v3 = vld [vmem:[%s8713_s9 + $0xb8] sm:$0xff] }
 0x76c   :  { %3504 = vmatpush1.msra.mxu0 %v9887_v62  ;;  %3575 = vmatpush1.msra.mxu1 %v9888_v4  ;;  %v3750_v62 = vld [vmem:[%s8713_s9 + $0xb0] sm:$0xff]  ;;  %v3749_v4 = vld [vmem:[%s8713_s9 + $0xa8] sm:$0xff] }
 0x76d   :  { %3505 = vmatprep.subr.mxu0 %v9889_v9  ;;  %3576 = vmatprep.subr.mxu1 %v9890_v2  ;;  %v3748_v9 = vld [vmem:[%s8713_s9 + $0xa0] sm:$0xff]  ;;  %v3747_v2 = vld [vmem:[%s8713_s9 + $0x98] sm:$0xff] }
 0x76e   :  { %3506 = vmatpush1.msra.mxu0 %v9891_v7  ;;  %3539 = vmatprep.mubr.f32.mxu0 %v9690_v33  ;;  %v3745_v7 = vld [vmem:[%s8713_s9 + $0x88] sm:$0xff] }
 0x76f   :  { %v4354_v46 = vpop.eup %4353  ;;  %3577 = vmatpush1.msra.mxu1 %v8214_v63  ;;  %3610 = vmatprep.mubr.f32.mxu1 %v9690_v33  ;;  %v3727_v63 = vld [vmem:[%s8712_s8 + $0xf8] sm:$0xff] }
 0x770   :  { %v3297_v50 = vmul.f32 %v4354_v46, %v4352_v15  ;;  %3834 = vmatprep.subr.mxu1 %v3727_v63  ;;  %3763 = vmatprep.subr.mxu0 %v3759_v56  ;;  %v3746_v15 = vld [vmem:[%s8713_s9 + $0x90] sm:$0xff]  ;;  %v3744_v46 = vld [vmem:[%s8713_s9 + $0x80] sm:$0xff]  ;;  %v3739_v63 = vld [vmem:[%s8713_s9 + $0x58] sm:$0xff] }
 0x772   :  { %v3303_v45 = vmul.f32 %v7612_v26, %v3297_v50  ;;  %v3473_v16 = vrot.slane %v3297_v50, 2  ;;  %v3726_v26 = vld [vmem:[%s8712_s8 + $0xf0] sm:$0xff]  ;;  %v3743_v50 = vld [vmem:[%s8713_s9 + $0x78] sm:$0xff] }
 0x774   :  { %v3305_v28 = vrot.slane %v3303_v45, 4  ;;  %3540 = vmatmul.mubr.f32.vlgmr.msra.gmra.mxu0 %v3473_v16  ;;  %3611 = vmatmul.mubr.f32.vlgmr.msra.gmra.mxu1 %v3473_v16  ;;  %v3742_v45 = vld [vmem:[%s8713_s9 + $0x70] sm:$0xff]  ;;  %v3741_v16 = vld [vmem:[%s8713_s9 + $0x68] sm:$0xff] }
 0x775   :  { %3898 = vmatprep.mubr.f32.mxu1 %v9690_v33  ;;  %3827 = vmatprep.mubr.f32.mxu0 %v9690_v33  ;;  %v3724_v33 = vld [vmem:[%s8712_s8 + $0xe0] sm:$0xff] }
 0x776   :  { %v8378_v59 = vadd.f32 %v3305_v28, %v8226_v29  ;;  %3835 = vmatpush1.msra.mxu1 %v3726_v26  ;;  %v3723_v29 = vld [vmem:[%s8712_s8 + $0xd8] sm:$0xff]  ;;  %3764 = vmatpush1.msra.mxu0 %v3758_v17  ;;  %v3740_v28 = vld [vmem:[%s8713_s9 + $0x60] sm:$0xff]  ;;  %v3738_v26 = vld [vmem:[%s8713_s9 + $0x50] sm:$0xff] }
 0x777   :  { %3836 = vmatprep.subr.mxu1 %v3725_v6  ;;  %3765 = vmatprep.subr.mxu0 %v3757_v44  ;;  %v3737_v6 = vld [vmem:[%s8713_s9 + $0x48] sm:$0xff] }
 0x778   :  { %3837 = vmatpush1.msra.mxu1 %v3724_v33  ;;  %3766 = vmatpush1.msra.mxu0 %v3756_v5  ;;  %v3736_v33 = vld [vmem:[%s8713_s9 + $0x40] sm:$0xff]  ;;  %v4650_v5 = vld [vmem:[%s8705_s1 + $0x8] sm:$0xff] }
 0x779   :  { %3838 = vmatprep.subr.mxu1 %v3723_v29  ;;  %3767 = vmatprep.subr.mxu0 %v3755_v51  ;;  %v3735_v29 = vld [vmem:[%s8713_s9 + $0x38] sm:$0xff] }
 0x77a   :  { %3839 = vmatpush1.msra.mxu1 %v3722_v42  ;;  %3768 = vmatpush1.msra.mxu0 %v3754_v36  ;;  %v3734_v42 = vld [vmem:[%s8713_s9 + $0x30] sm:$0xff]  ;;  %v2919_v36 = vrot.slane %v4650_v5, 2 }
 0x77b   :  { %3840 = vmatprep.subr.mxu1 %v3721_v24  ;;  %3769 = vmatprep.subr.mxu0 %v3753_v27  ;;  %v3733_v24 = vld [vmem:[%s8713_s9 + $0x28] sm:$0xff] }
 0x77c   :  { %3841 = vmatpush1.msra.mxu1 %v3720_v0  ;;  %3770 = vmatpush1.msra.mxu0 %v3752_v40  ;;  %v3732_v0 = vld [vmem:[%s8713_s9 + $0x20] sm:$0xff]  ;;  %v3308_v40 = vrot.slane %v4650_v5, 4 }
 0x77d   :  { %3842 = vmatprep.subr.mxu1 %v3719_v43  ;;  %3771 = vmatprep.subr.mxu0 %v3751_v3  ;;  %v3731_v43 = vld [vmem:[%s8713_s9 + $0x18] sm:$0xff] }
 0x77e   :  { %3843 = vmatpush1.msra.mxu1 %v3718_v8  ;;  %3772 = vmatpush1.msra.mxu0 %v3750_v62  ;;  %v3730_v8 = vld [vmem:[%s8713_s9 + $0x10] sm:$0xff] }
 0x77f   :  { %3844 = vmatprep.subr.mxu1 %v3717_v32  ;;  %3773 = vmatprep.subr.mxu0 %v3749_v4  ;;  %v3729_v32 = vld [vmem:[%s8713_s9 + $0x8] sm:$0xff]  ;;  %v3641_v4 = vrot.slane %v8296_v30, 6 }
 0x780   :  { %3845 = vmatpush1.msra.mxu1 %v3716_v52  ;;  %3774 = vmatpush1.msra.mxu0 %v3748_v9  ;;  %v3728_v52 = vld [vmem:[%s8713_s9] sm:$0xff] }
 0x781   :  { %3846 = vmatprep.subr.mxu1 %v3715_v54  ;;  %3775 = vmatprep.subr.mxu0 %v3747_v2 }
 0x782   :  { %3847 = vmatpush1.msra.mxu1 %v3714_v21  ;;  %3776 = vmatpush1.msra.mxu0 %v3746_v15 }
 0x783   :  { %3848 = vmatprep.subr.mxu1 %v3713_v1  ;;  %3777 = vmatprep.subr.mxu0 %v3745_v7  ;;  %v3685_v7 = vrot.slane %v4650_v5, 6 }
 0x784   :  { %3849 = vmatpush1.msra.mxu1 %v3712_v58  ;;  %3778 = vmatpush1.msra.mxu0 %v3744_v46 }
 0x785   :  { %3850 = vmatprep.subr.mxu1 %v3711_v34  ;;  %3779 = vmatprep.subr.mxu0 %v3743_v50 }
 0x786   :  { %3851 = vmatpush1.msra.mxu1 %v3710_v48  ;;  %3780 = vmatpush1.msra.mxu0 %v3742_v45 }
 0x787   :  { %3852 = vmatprep.subr.mxu1 %v3709_v61  ;;  %3781 = vmatprep.subr.mxu0 %v3741_v16 }
 0x788   :  { %3853 = vmatpush1.msra.mxu1 %v3708_v19  ;;  %3782 = vmatpush1.msra.mxu0 %v3740_v28 }
 0x789   :  { %3854 = vmatprep.subr.mxu1 %v3707_v31  ;;  %3783 = vmatprep.subr.mxu0 %v3739_v63 }
 0x78a   :  { %3855 = vmatpush1.msra.mxu1 %v3706_v12  ;;  %3784 = vmatpush1.msra.mxu0 %v3738_v26 }
 0x78b   :  { %3856 = vmatprep.subr.mxu1 %v3705_v35  ;;  %3785 = vmatprep.subr.mxu0 %v3737_v6 }
 0x78c   :  { %3857 = vmatpush1.msra.mxu1 %v3704_v49  ;;  %3786 = vmatpush1.msra.mxu0 %v3736_v33 }
 0x78d   :  { %3858 = vmatprep.subr.mxu1 %v3703_v20  ;;  %3787 = vmatprep.subr.mxu0 %v3735_v29  ;;  %v8578_v20 = vld [vmem:[%s8705_s1] sm:$0xff] }
 0x78e   :  { %3859 = vmatpush1.msra.mxu1 %v3702_v25  ;;  %3788 = vmatpush1.msra.mxu0 %v3734_v42  ;;  %v1400_v25 = vrot.slane %v8578_v20, 2 }
 0x78f   :  { %3860 = vmatprep.subr.mxu1 %v3701_v14  ;;  %3789 = vmatprep.subr.mxu0 %v3733_v24 }
 0x790   :  { %3861 = vmatpush1.msra.mxu1 %v3700_v18  ;;  %3790 = vmatpush1.msra.mxu0 %v3732_v0  ;;  %v1402_v18 = vadd.f32 %v8578_v20, %v1400_v25 }
 0x791   :  { %3862 = vmatprep.subr.mxu1 %v3699_v37  ;;  %3791 = vmatprep.subr.mxu0 %v3731_v43 }
 0x792   :  { %3863 = vmatpush1.msra.mxu1 %v3698_v22  ;;  %3792 = vmatpush1.msra.mxu0 %v3730_v8 }
 0x793   :  { %3864 = vmatprep.subr.mxu1 %v3697_v38  ;;  %3793 = vmatprep.subr.mxu0 %v3729_v32 }
 0x794   :  { %3865 = vmatpush1.msra.mxu1 %v3696_v39  ;;  %3794 = vmatpush1.msra.mxu0 %v3728_v52 }
 0x80f   :  { %v3380_v54 = vpop.f32.mrf.mxu0  ;;  %v3451_v1 = vpop.f32.mrf.mxu1 }
 0x810   :  { %v3460_v21 = vrot.slane %v3380_v54, 2  ;;  %v3462_v14 = vrot.slane %v3451_v1, 2 }
 0x811   :  { %v3382_v58 = vpop.f32.mrf.mxu0  ;;  %v3453_v31 = vpop.f32.mrf.mxu1 }
 0x812   :  { %v3468_v34 = vadd.f32 %v3460_v21, %v9758_v53  ;;  %v3461_v48 = vrot.slane %v3382_v58, 2  ;;  %v3463_v35 = vrot.slane %v3453_v31, 2  ;;  %v3470_v22 = vadd.f32 %v3462_v14, %v9853_v23 }
 0x814   :  { %v4087_v61 = vmul.f32 -1.442695, %v3468_v34  ;;  %v3469_v19 = vadd.f32 %v3461_v48, %v9759_v10  ;;  %v3471_v49 = vadd.f32 %v3463_v35, %v9852_v60  ;;  %v1789_v10 = vrot.slane %v8578_v20, 4 }
 0x815   :  { %v2166_v60 = vrot.slane %v8578_v20, 6 }
 0x816   :  { %4355 = vpow2.f32 %v4087_v61  ;;  %v4088_v12 = vmul.f32 -1.442695, %v3469_v19  ;;  %v4089_v53 = vmul.f32 -1.442695, %v3471_v49  ;;  %v1791_v39 = vadd.f32 %v1789_v10, %v1402_v18 }
 0x818   :  { %4357 = vpow2.f32 %v4088_v12  ;;  %v2168_v44 = vadd.f32 %v2166_v60, %v1791_v39 }
 0x819   :  { %4359 = vpow2.f32 %v4089_v53 }
 0x81a   :  { %v2534_v51 = vadd.f32 %v4650_v5, %v2168_v44  ;;  %v3951_v44 = vld [vmem:[%s8715_s11 + $0xf0] sm:$0xff] }
 0x81c   :  { %v2921_v27 = vadd.f32 %v2919_v36, %v2534_v51  ;;  %v3949_v51 = vld [vmem:[%s8715_s11 + $0xe0] sm:$0xff] }
 0x81d   :  { %v3933_v36 = vld [vmem:[%s8715_s11 + $0x60] sm:$0xff] }
 0x81e   :  { %v3310_v15 = vadd.f32 %v3308_v40, %v2921_v27  ;;  %v3948_v27 = vld [vmem:[%s8715_s11 + $0xd8] sm:$0xff] }
 0x81f   :  { %v3932_v40 = vld [vmem:[%s8715_s11 + $0x58] sm:$0xff] }
 0x820   :  { %v3687_v33 = vadd.f32 %v3685_v7, %v3310_v15  ;;  %v3944_v15 = vld [vmem:[%s8715_s11 + $0xb8] sm:$0xff] }
 0x821   :  { %v3928_v7 = vld [vmem:[%s8715_s11 + $0x38] sm:$0xff] }
 0x822   :  { %v3688_v30 = vmax.f32 %v3687_v33, 1.0  ;;  %v3939_v33 = vld [vmem:[%s8715_s11 + $0x90] sm:$0xff] }
 0x823   :  { %v4356_v37 = vpop.eup %4355 }
 0x824   :  { %v3624_v38 = vadd.f32 1.0, %v4356_v37 }
 0x825   :  { %v4358_v56 = vpop.eup %4357 }
 0x826   :  { %4361 = vrcp.f32 %v3624_v38  ;;  %v3630_v17 = vadd.f32 1.0, %v4358_v56  ;;  %v4360_v23 = vpop.eup %4359 }
 0x827   :  { %4363 = vtanh.f32 %v3470_v22  ;;  %v3637_v9 = vadd.f32 1.0, %v4360_v23  ;;  %v3947_v23 = vld [vmem:[%s8715_s11 + $0xd0] sm:$0xff] }
 0x828   :  { %4365 = vrcp.f32 %v3630_v17  ;;  %v3936_v17 = vld [vmem:[%s8715_s11 + $0x78] sm:$0xff] }
 0x829   :  { %4367 = vrcp.f32 %v3637_v9  ;;  %v3945_v9 = vld [vmem:[%s8715_s11 + $0xc0] sm:$0xff] }
 0x833   :  { %v4362_v3 = vpop.eup %4361 }
 0x834   :  { %v4364_v62 = vpop.eup %4363  ;;  %v3541_v2 = vpop.f32.mrf.mxu0 }
 0x835   :  { %v4366_v46 = vpop.eup %4365  ;;  %v3617_v50 = vadd.f32 %v3541_v2, %v9762_v11  ;;  %v3644_v45 = vmul.f32 %v4364_v62, %v4362_v3  ;;  %v3612_v29 = vpop.f32.mrf.mxu1  ;;  %v3931_v3 = vld [vmem:[%s8715_s11 + $0x50] sm:$0xff]  ;;  %v3946_v62 = vld [vmem:[%s8715_s11 + $0xc8] sm:$0xff]  ;;  %v3929_v2 = vld [vmem:[%s8715_s11 + $0x40] sm:$0xff] }
 0x836   :  { %v3643_v16 = vmul.f32 %v4366_v46, %v3641_v4  ;;  %v3543_v28 = vpop.f32.mrf.mxu0  ;;  %v4368_v43 = vpop.eup %4367  ;;  %v3619_v32 = vadd.f32 %v3612_v29, %v9680_v41  ;;  %v3668_v41 = vrot.slane %v8339_v13, 2  ;;  %v3952_v13 = vld [vmem:[%s8715_s11 + $0xf8] sm:$0xff]  ;;  %v3930_v4 = vld [vmem:[%s8715_s11 + $0x48] sm:$0xff]  ;;  %v3943_v46 = vld [vmem:[%s8715_s11 + $0xb0] sm:$0xff] }
 0x837   :  { %v4090_v63 = vmul.f32 -1.442695, %v3617_v50  ;;  %v3618_v26 = vadd.f32 %v3543_v28, %v9678_v57  ;;  %v3614_v24 = vpop.f32.mrf.mxu1  ;;  %4094 = vmatprep.subr.mxu0 %v3952_v13  ;;  %v3927_v50 = vld [vmem:[%s8715_s11 + $0x30] sm:$0xff]  ;;  %v3941_v28 = vld [vmem:[%s8715_s11 + $0xa0] sm:$0xff] }
 0x838   :  { %v3645_v6 = vadd.f32 %v3644_v45, %v3643_v16  ;;  %v3620_v0 = vadd.f32 %v3614_v24, %v9679_v47  ;;  %v3942_v45 = vld [vmem:[%s8715_s11 + $0xa8] sm:$0xff]  ;;  %v3923_v29 = vld [vmem:[%s8715_s11 + $0x10] sm:$0xff]  ;;  %v3937_v24 = vld [vmem:[%s8715_s11 + $0x80] sm:$0xff] }
 0x839   :  { %4369 = vpow2.f32 %v4090_v63  ;;  %v4091_v42 = vmul.f32 -1.442695, %v3618_v26  ;;  %v3926_v16 = vld [vmem:[%s8715_s11 + $0x28] sm:$0xff]  ;;  %v3925_v63 = vld [vmem:[%s8715_s11 + $0x20] sm:$0xff]  ;;  %v3940_v26 = vld [vmem:[%s8715_s11 + $0x98] sm:$0xff] }
 0x83a   :  { %4371 = vtanh.f32 %v3645_v6  ;;  %v4092_v11 = vmul.f32 -1.442695, %v3620_v0  ;;  %v3924_v6 = vld [vmem:[%s8715_s11 + $0x18] sm:$0xff]  ;;  %v3921_v0 = vld [vmem:[%s8715_s11] sm:$0xff] }
 0x83b   :  { %4373 = vpow2.f32 %v4091_v42  ;;  %v3938_v42 = vld [vmem:[%s8715_s11 + $0x88] sm:$0xff] }
 0x83c   :  { %4375 = vrcp.f32 %v3688_v30  ;;  %v3922_v30 = vld [vmem:[%s8715_s11 + $0x8] sm:$0xff] }
 0x83d   :  { %4377 = vpow2.f32 %v4092_v11  ;;  %v3905_v11 = vld [vmem:[%s8714_s10] sm:$0x3] }
 0x846   :  { %v4370_v8 = vpop.eup %4369 }
 0x847   :  { %v4372_v52 = vpop.eup %4371  ;;  %v3651_v57 = vadd.f32 1.0, %v4370_v8 }
 0x848   :  { %v4374_v54 = vpop.eup %4373  ;;  %v3647_v21 = vmul.f32 %v4372_v52, %v4368_v43 }
 0x849   :  { %4379 = vrcp.f32 %v3651_v57  ;;  %v3657_v1 = vadd.f32 1.0, %v4374_v54  ;;  %v4376_v48 = vpop.eup %4375  ;;  %v9893_v54 = vld [vmem:[#allocation85_spill] sm:$0xff] }
 0x84a   :  { %4381 = vtanh.f32 %v3619_v32  ;;  %v3675_v58 = vmul.f32 %v4650_v5, %v3647_v21  ;;  %v4378_v19 = vpop.eup %4377  ;;  %v3693_v38 = vrot.slane %v4376_v48, 2  ;;  %v3934_v5 = vld [vmem:[%s8715_s11 + $0x68] sm:$0xff]  ;;  %v9892_v32 = vld [vmem:[#allocation84_spill] sm:$0xff]  ;;  %v3914_v21 = vrot.slane %v3905_v11, %v9893_v54 }
 0x84b   :  { %4383 = vrcp.f32 %v3657_v1  ;;  %v3664_v49 = vadd.f32 1.0, %v4378_v19  ;;  %v3910_v52 = vrot.slane %v3905_v11, %v9892_v32 }
 0x84c   :  { %v3677_v34 = vrot.slane %v3675_v58, 6 }
 0x84d   :  { %4385 = vrcp.f32 %v3664_v49 }
 0x84e   :  { %v3679_v47 = vadd.f32 %v3677_v34, %v8308_v55 }
 0x850   :  { %v3691_v61 = vmul.f32 %v4376_v48, %v3679_v47 }
 0x852   :  { %3899 = vmatmul.mubr.f32.vlgmr.msra.gmra.mxu1 %v3691_v61 }
 0x856   :  { %v4380_v31 = vpop.eup %4379 }
 0x857   :  { %v4382_v12 = vpop.eup %4381 }
 0x858   :  { %v4384_v35 = vpop.eup %4383  ;;  %v3671_v25 = vmul.f32 %v4382_v12, %v4380_v31 }
 0x859   :  { %v3670_v14 = vmul.f32 %v4384_v35, %v3668_v41  ;;  %v4093_v41 = vld [vmem:[%s8716_s12] ss:$0 sm:$0xff] }
 0x85a   :  { %v4386_v18 = vpop.eup %4385 }
 0x85b   :  { %v3672_v53 = vadd.f32 %v3671_v25, %v3670_v14 }
 0x85d   :  { %4387 = vtanh.f32 %v3672_v53 }
 0x86a   :  { %v4388_v10 = vpop.eup %4387 }
 0x86b   :  { %v3674_v37 = vmul.f32 %v4388_v10, %v4386_v18 }
 0x86d   :  { %v3680_v22 = vmul.f32 %v8578_v20, %v3674_v37  ;;  %v3950_v20 = vld [vmem:[%s8715_s11 + $0xe8] sm:$0xff] }
 0x86f   :  { %v3682_v55 = vrot.slane %v3680_v22, 2 }
 0x871   :  { %v3684_v39 = vadd.f32 %v3682_v55, %v8378_v59  ;;  %v3935_v59 = vld [vmem:[%s8715_s11 + $0x70] sm:$0xff] }
 0x873   :  { %v3695_v60 = vmul.f32 %v3693_v38, %v3684_v39 }
 0x875   :  { %v3761_v56 = vrot.slane %v3695_v60, 6 }
 0x877   :  { %3828 = vmatmul.mubr.f32.vlgmr.msra.gmra.mxu0 %v3761_v56 }
 0x878   :  { %4095 = vmatpush3.msra.mxu0 %v3936_v17 }
 0x879   :  { %4096 = vmatprep.subr.mxu0 %v3951_v44 }
 0x87a   :  { %4097 = vmatpush3.msra.mxu0 %v3935_v59 }
 0x87b   :  { %4098 = vmatprep.subr.mxu0 %v3950_v20 }
 0x87c   :  { %4099 = vmatpush3.msra.mxu0 %v3934_v5 }
 0x87d   :  { %4100 = vmatprep.subr.mxu0 %v3949_v51 }
 0x87e   :  { %4101 = vmatpush3.msra.mxu0 %v3933_v36 }
 0x87f   :  { %4102 = vmatprep.subr.mxu0 %v3948_v27 }
 0x880   :  { %4103 = vmatpush3.msra.mxu0 %v3932_v40 }
 0x881   :  { %4104 = vmatprep.subr.mxu0 %v3947_v23 }
 0x882   :  { %4105 = vmatpush3.msra.mxu0 %v3931_v3 }
 0x883   :  { %4106 = vmatprep.subr.mxu0 %v3946_v62 }
 0x884   :  { %4107 = vmatpush3.msra.mxu0 %v3930_v4 }
 0x885   :  { %4108 = vmatprep.subr.mxu0 %v3945_v9 }
 0x886   :  { %4109 = vmatpush3.msra.mxu0 %v3929_v2 }
 0x887   :  { %4110 = vmatprep.subr.mxu0 %v3944_v15 }
 0x888   :  { %4111 = vmatpush3.msra.mxu0 %v3928_v7 }
 0x889   :  { %4112 = vmatprep.subr.mxu0 %v3943_v46 }
 0x88a   :  { %4113 = vmatpush3.msra.mxu0 %v3927_v50 }
 0x88b   :  { %4114 = vmatprep.subr.mxu0 %v3942_v45 }
 0x88c   :  { %4115 = vmatpush3.msra.mxu0 %v3926_v16 }
 0x88d   :  { %4116 = vmatprep.subr.mxu0 %v3941_v28 }
 0x88e   :  { %4117 = vmatpush3.msra.mxu0 %v3925_v63 }
 0x88f   :  { %4118 = vmatprep.subr.mxu0 %v3940_v26 }
 0x890   :  { %4119 = vmatpush3.msra.mxu0 %v3924_v6 }
 0x891   :  { %4120 = vmatprep.subr.mxu0 %v3939_v33 }
 0x892   :  { %4121 = vmatpush3.msra.mxu0 %v3923_v29 }
 0x893   :  { %4122 = vmatprep.subr.mxu0 %v3938_v42 }
 0x894   :  { %4123 = vmatpush3.msra.mxu0 %v3922_v30 }
 0x895   :  { %4124 = vmatprep.subr.mxu0 %v3937_v24 }
 0x896   :  { %4125 = vmatpush3.msra.mxu0 %v3921_v0 }
 0x912   :  { %v3900_v43 = vpop.f32.mrf.mxu1 }
 0x914   :  { %v3902_v1 = vpop.f32.mrf.mxu1 }
 0x937   :  { %v3829_v8 = vpop.f32.mrf.mxu0 }
 0x938   :  { %v3901_v57 = vadd.f32 %v3900_v43, %v3829_v8 }
 0x939   :  { %v3831_v58 = vpop.f32.mrf.mxu0 }
 0x93a   :  { %v3903_v34 = vadd.f32 %v3902_v1, %v3831_v58  ;;  %v3917_v48 = vadd.f32 %v3910_v52, %v3901_v57 }
 0x93c   :  { %v3918_v47 = vadd.f32 %v3914_v21, %v3903_v34  ;;  %v3919_v19 = vmax.f32 %v3917_v48, 0.0 }
 0x93e   :  { %v3920_v61 = vmax.f32 %v3918_v47, 0.0 }
 0x940   :  { %4024 = vmatprep.mubr.f32.mxu0 %v3920_v61 }
 0x941   :  { %4025 = vmatmul.mubr.f32.vlgmr.msra.gmra.mxu0 %v3919_v19 }
 0xa01   :  { %v4126_v31 = vpop.f32.mrf.mxu0 }
 0xa03   :  { %v4127_v12 = vpop.f32.mrf.mxu0 }
 0xa04   :  { %v4128_v35 = vadd.f32 %v4127_v12, %v4126_v31 }
 0xa06   :  { %v4027_v49 = vadd.f32 %v4128_v35, %v4093_v41 }
 0xa08   :  { %4030 = vst [vmem:[#allocation2] sm:$0x3] %v4027_v49 }
 0xa09   :  { %4662 = shalt.err (!%p4659_p4)
}
 0xa0a   :  { %4040 = dma.vmem_to_hbm [thread:$0]  %s4038_s28, 32, %s8717_s13, [#allocation3]  }
 0xa0b   :  { %4671 = dma.done.wait [#allocation3], 32  }
 0xa0c   :  { %4672 = vsyncadd [#allocation3], 4294967264 }
 0xa0d   :  { %4044 = vsyncpa [#allocation3], 1 }

</bundles_post_ra>
